<compile_context>
chip_gen: v6e
topology: v6e:2x2x1
jax: 0.10.0
libtpu: 0.0.40
codegen_flags: <defaults>
</compile_context>

<pallas_src>
import functools

import numpy as np
import jax
import jax.numpy as jnp
from jax.experimental import pallas as pl
from jax.experimental.pallas import tpu as pltpu


# ----------------------------------------------------------------------------
# Pallas kernels
# ----------------------------------------------------------------------------
def _full_spec(shape):
    """BlockSpec covering the whole array as a single block."""
    nd = len(shape)
    return pl.BlockSpec(shape, lambda *args, nd=nd: (0,) * nd)


def conv_mm_kernel(w_ref, p_ref, b_ref, o_ref):
    """(OC, K) @ (K, TM) + b, ReLU.  Output last dim = TM (lane-dense)."""
    acc = jnp.dot(w_ref[...], p_ref[...], preferred_element_type=jnp.float32)
    acc = acc + b_ref[...]                      # (OC, TM) + (OC, 1)
    o_ref[...] = jnp.maximum(acc, 0.0)


def _pick_tile(m, pref=512):
    if m >= pref:
        return pref
    if m >= 128:
        return 128
    return m


def conv_matmul_bias_relu(w_mat, patches_t, b):
    """Conv hot path after im2col: w_mat (OC,K), patches_t (K,M) -> (OC,M)."""
    OC, K = w_mat.shape
    K2, M = patches_t.shape
    assert K == K2
    TM = _pick_tile(M)
    grid = (pl.cdiv(M, TM),)
    return pl.pallas_call(
        conv_mm_kernel,
        out_shape=jax.ShapeDtypeStruct((OC, M), jnp.float32),
        grid=grid,
        in_specs=[
            pl.BlockSpec((OC, K), lambda i: (0, 0)),   # weights: constant block
            pl.BlockSpec((K, TM), lambda i: (0, i)),   # patches: streamed over M
            pl.BlockSpec((OC, 1), lambda i: (0, 0)),   # bias: constant block
        ],
        out_specs=pl.BlockSpec((OC, TM), lambda i: (0, i)),
        compiler_params=pltpu.CompilerParams(
            dimension_semantics=("parallel",)),        # megacore-shardable on v7x
    )(w_mat, patches_t, b.reshape(OC, 1))


def duel_head_kernel(x_ref, w1_ref, b1_ref, w2_ref, b2_ref, o_ref, *, n_actions):
    x = x_ref[...]
    # Fused first layer of both streams: cols [0:128) adv, [128:256) val.
    h = jnp.dot(x, w1_ref[...], preferred_element_type=jnp.float32) + b1_ref[...]
    h = jnp.where(h > 0, h, 0.01 * h)                  # leaky_relu (slope 0.01)
    # Block-diagonal second layer: cols [0:A) adv, col A = val.
    y = jnp.dot(h, w2_ref[...], preferred_element_type=jnp.float32) + b2_ref[...]
    adv = y[:, :n_actions]
    val = y[:, n_actions:]
    # PyTorch `adv.mean()` with no dim => global mean over the whole (B, A) tensor.
    o_ref[...] = val + (adv - jnp.mean(adv))


def duel_head(x_flat, kp, n_actions):
    B, K = x_flat.shape
    H2 = kp["w_h1"].shape[1]          # 256
    A1 = n_actions + 1
    kernel = functools.partial(duel_head_kernel, n_actions=n_actions)
    return pl.pallas_call(
        kernel,
        out_shape=jax.ShapeDtypeStruct((B, n_actions), jnp.float32),
        grid=(1,),                    # global adv-mean couples the batch
        in_specs=[
            _full_spec((B, K)),
            _full_spec((K, H2)), _full_spec((1, H2)),
            _full_spec((H2, A1)), _full_spec((1, A1)),
        ],
        out_specs=_full_spec((B, n_actions)),
        compiler_params=pltpu.CompilerParams(dimension_semantics=("arbitrary",)),
    )(x_flat, kp["w_h1"], kp["b_h1"], kp["w_h2"], kp["b_h2"])


# ----------------------------------------------------------------------------
# Glue: channels-first im2col producing transposed patches (K, M)
# ----------------------------------------------------------------------------
def im2col_cfirst(x_cbhw, kh, kw, stride):
    """x (C,B,H,W) -> patches_t (C*kh*kw, B*oh*ow); K order (c,dy,dx) matches
    the PyTorch OIHW weight flatten, M order is (b, y, x)."""
    C, B, H, W = x_cbhw.shape
    oh = (H - kh) // stride + 1
    ow = (W - kw) // stride + 1
    taps = []
    for dy in range(kh):
        for dx in range(kw):
            taps.append(x_cbhw[:, :,
                               dy:dy + stride * (oh - 1) + 1:stride,
                               dx:dx + stride * (ow - 1) + 1:stride])
    p = jnp.stack(taps, axis=1)                      # (C, kh*kw, B, oh, ow)
    return p.reshape(C * kh * kw, B * oh * ow), oh, ow


def conv2d_relu(x_cbhw, w_mat, b, kh, kw, stride):
    """x (C,B,H,W), w_mat (OC, C*kh*kw) -> (OC, B, oh, ow)."""
    patches_t, oh, ow = im2col_cfirst(x_cbhw, kh, kw, stride)
    y = conv_matmul_bias_relu(w_mat, patches_t, b)   # Pallas kernel, (OC, B*oh*ow)
    return y.reshape(w_mat.shape[0], x_cbhw.shape[1], oh, ow)


def duel_dqn_forward(x_nchw, kp, n_actions):
    x = jnp.transpose(x_nchw, (1, 0, 2, 3))              # NCHW -> (C,B,H,W)
    x = conv2d_relu(x, kp["w1m"], kp["b1"], 8, 8, 4)     # (32, B, 20, 20)
    x = conv2d_relu(x, kp["w2m"], kp["b2"], 4, 4, 2)     # (64, B,  9,  9)
    x = conv2d_relu(x, kp["w3m"], kp["b3"], 3, 3, 1)     # (64, B,  7,  7)
    B = x.shape[1]
    # PyTorch flattens NCHW per sample: (c, h, w) order.
    x_flat = jnp.transpose(x, (1, 0, 2, 3)).reshape(B, -1)   # (B, 3136)
    return duel_head(x_flat, kp, n_actions)              # Pallas kernel


# ----------------------------------------------------------------------------
# Parameters: PyTorch-style init + one-time kernel-layout preparation
# ----------------------------------------------------------------------------
def init_params(key, in_channels, n_actions):
    ks = jax.random.split(key, 14)

    def u(k, shape, fan_in):
        bound = 1.0 / np.sqrt(fan_in)
        return jax.random.uniform(k, shape, jnp.float32, -bound, bound)

    p = {}
    p["w1"] = u(ks[0], (32, in_channels, 8, 8), in_channels * 8 * 8)
    p["b1"] = u(ks[1], (32,), in_channels * 8 * 8)
    p["w2"] = u(ks[2], (64, 32, 4, 4), 32 * 4 * 4)
    p["b2"] = u(ks[3], (64,), 32 * 4 * 4)
    p["w3"] = u(ks[4], (64, 64, 3, 3), 64 * 3 * 3)
    p["b3"] = u(ks[5], (64,), 64 * 3 * 3)
    flat = 64 * 7 * 7
    # Linear weights stored as (in, out) for direct x @ W use.
    p["wa1"] = u(ks[6], (flat, 128), flat)
    p["ba1"] = u(ks[7], (128,), flat)
    p["wa2"] = u(ks[8], (128, n_actions), 128)
    p["ba2"] = u(ks[9], (n_actions,), 128)
    p["wv1"] = u(ks[10], (flat, 128), flat)
    p["bv1"] = u(ks[11], (128,), flat)
    p["wv2"] = u(ks[12], (128, 1), 128)
    p["bv2"] = u(ks[13], (1,), 128)
    return p


def prepare_params(p, n_actions):
    """One-time weight re-layout for the kernels (not on the forward path)."""
    A = n_actions
    q = {}
    # Conv weights as (OC, C*kh*kw) matrices, K order (c, dy, dx).
    q["w1m"] = p["w1"].reshape(p["w1"].shape[0], -1)
    q["b1"] = p["b1"]
    q["w2m"] = p["w2"].reshape(p["w2"].shape[0], -1)
    q["b2"] = p["b2"]
    q["w3m"] = p["w3"].reshape(p["w3"].shape[0], -1)
    q["b3"] = p["b3"]
    # Fused dueling head: concat first layers, block-diagonal second layer.
    q["w_h1"] = jnp.concatenate([p["wa1"], p["wv1"]], axis=1)            # (3136, 256)
    q["b_h1"] = jnp.concatenate([p["ba1"], p["bv1"]]).reshape(1, 256)
    w2 = jnp.zeros((256, A + 1), jnp.float32)
    w2 = w2.at[:128, :A].set(p["wa2"]).at[128:, A:].set(p["wv2"])        # (256, A+1)
    q["w_h2"] = w2
    q["b_h2"] = jnp.concatenate([p["ba2"], p["bv2"]]).reshape(1, A + 1)
    return q


# ----------------------------------------------------------------------------
# Pure-JAX reference (for correctness check)
# ----------------------------------------------------------------------------
def reference_forward(x_nchw, p):
    def conv(x, w, b, s):
        y = jax.lax.conv_general_dilated(
            x, w, (s, s), "VALID", dimension_numbers=("NCHW", "OIHW", "NCHW"))
        return y + b[None, :, None, None]

    x = jax.nn.relu(conv(x_nchw, p["w1"], p["b1"], 4))
    x = jax.nn.relu(conv(x, p["w2"], p["b2"], 2))
    x = jax.nn.relu(conv(x, p["w3"], p["b3"], 1))
    x = x.reshape(x.shape[0], -1)
    adv = jax.nn.leaky_relu(x @ p["wa1"] + p["ba1"], 0.01) @ p["wa2"] + p["ba2"]
    val = jax.nn.leaky_relu(x @ p["wv1"] + p["bv1"], 0.01) @ p["wv2"] + p["bv2"]
    return val + (adv - jnp.mean(adv))


# ----------------------------------------------------------------------------
if __name__ == "__main__":
    # The architecture's flatten size (64*7*7) fixes the spatial input to 84x84.
    B, C, H, W = 2, 4, 84, 84
    N_ACTIONS = 6

    key = jax.random.PRNGKey(0)
    k_x, k_p = jax.random.split(key)
    x = jax.random.normal(k_x, (B, C, H, W), dtype=jnp.float32)
    params = init_params(k_p, C, N_ACTIONS)
    kparams = prepare_params(params, N_ACTIONS)

    fwd = jax.jit(functools.partial(duel_dqn_forward, n_actions=N_ACTIONS))
    q = jax.block_until_ready(fwd(x, kparams))

    q_ref = jax.block_until_ready(reference_forward(x, params))
    np.testing.assert_allclose(np.asarray(q), np.asarray(q_ref), rtol=5e-3, atol=5e-3)

    print("KERNEL_OK")
</pallas_src>

<mosaic_0001>
module attributes {stable_mosaic.version = 11 : i64} {
  func.func @conv_mm_kernel(%arg0: i32, %arg1: memref<32x256xf32, #tpu.memory_space<vmem>>, %arg2: memref<256x512xf32, #tpu.memory_space<vmem>>, %arg3: memref<32x1xf32, #tpu.memory_space<vmem>>, %arg4: memref<32x512xf32, #tpu.memory_space<vmem>>) attributes {dimension_semantics = [#tpu.dimension_semantics<parallel>], iteration_bounds = array<i64: 2>, scalar_prefetch = 0 : i64, scratch_operands = 0 : i64, tpu.core_type = #tpu.core_type<tc>, window_params = [{pipeline_mode = #tpu.pipeline_mode<synchronous>, transform_indices = @transform_0, window_bounds = array<i64: 32, 256>}, {transform_indices = @transform_1, window_bounds = array<i64: 256, 512>}, {pipeline_mode = #tpu.pipeline_mode<synchronous>, transform_indices = @transform_2, window_bounds = array<i64: 32, 1>}, {transform_indices = @transform_3, window_bounds = array<i64: 32, 512>}]} {
    %c0 = arith.constant 0 : index
    %c0_0 = arith.constant 0 : index
    %0 = vector.load %arg1[%c0, %c0_0] : memref<32x256xf32, #tpu.memory_space<vmem>>, vector<32x256xf32>
    %c0_1 = arith.constant 0 : index
    %c0_2 = arith.constant 0 : index
    %1 = vector.load %arg2[%c0_1, %c0_2] : memref<256x512xf32, #tpu.memory_space<vmem>>, vector<256x512xf32>
    %cst = arith.constant dense<0.000000e+00> : vector<32x512xf32>
    %2 = tpu.matmul %0, %1, %cst {dimension_numbers = #tpu.dot_dimension_numbers<[1], [0], [0], [1], [0, 0, 1, 1], [], []>} : vector<32x256xf32>, vector<256x512xf32>, vector<32x512xf32> -> vector<32x512xf32>
    %c0_3 = arith.constant 0 : index
    %c0_4 = arith.constant 0 : index
    %3 = vector.load %arg3[%c0_3, %c0_4] : memref<32x1xf32, #tpu.memory_space<vmem>>, vector<32x1xf32>
    %4 = vector.broadcast %3 : vector<32x1xf32> to vector<32x512xf32>
    %5 = arith.addf %2, %4 : vector<32x512xf32>
    %cst_5 = arith.constant 0.000000e+00 : f32
    %6 = vector.broadcast %cst_5 : f32 to vector<32x512xf32>
    %7 = arith.maximumf %5, %6 : vector<32x512xf32>
    %c0_6 = arith.constant 0 : index
    %c0_7 = arith.constant 0 : index
    %8 = vector.load %arg4[%c0_6, %c0_7] : memref<32x512xf32, #tpu.memory_space<vmem>>, vector<32x512xf32>
    tpu.vector_store %arg4[%c0_6, %c0_7], %7 {strides = array<i32>} : memref<32x512xf32, #tpu.memory_space<vmem>>, vector<32x512xf32>,
    return
  }
  func.func @transform_0(%arg0: i32) -> (i32, i32) {
    %c0_i32 = arith.constant 0 : i32
    %c0_i32_0 = arith.constant 0 : i32
    %c0_i32_1 = arith.constant 0 : i32
    return %c0_i32, %c0_i32_0 : i32, i32
  }
  func.func @transform_1(%arg0: i32) -> (i32, i32) {
    %c0_i32 = arith.constant 0 : i32
    %c0_i32_0 = arith.constant 0 : i32
    return %c0_i32, %arg0 : i32, i32
  }
  func.func @transform_2(%arg0: i32) -> (i32, i32) {
    %c0_i32 = arith.constant 0 : i32
    %c0_i32_0 = arith.constant 0 : i32
    %c0_i32_1 = arith.constant 0 : i32
    return %c0_i32, %c0_i32_0 : i32, i32
  }
  func.func @transform_3(%arg0: i32) -> (i32, i32) {
    %c0_i32 = arith.constant 0 : i32
    %c0_i32_0 = arith.constant 0 : i32
    return %c0_i32, %arg0 : i32, i32
  }
}

module attributes {stable_mosaic.version = 11 : i64} {
  func.func @conv_mm_kernel(%arg0: i32, %arg1: memref<64x512xf32, #tpu.memory_space<vmem>>, %arg2: memref<512x128xf32, #tpu.memory_space<vmem>>, %arg3: memref<64x1xf32, #tpu.memory_space<vmem>>, %arg4: memref<64x128xf32, #tpu.memory_space<vmem>>) attributes {dimension_semantics = [#tpu.dimension_semantics<parallel>], iteration_bounds = array<i64: 2>, scalar_prefetch = 0 : i64, scratch_operands = 0 : i64, tpu.core_type = #tpu.core_type<tc>, window_params = [{pipeline_mode = #tpu.pipeline_mode<synchronous>, transform_indices = @transform_0, window_bounds = array<i64: 64, 512>}, {transform_indices = @transform_1, window_bounds = array<i64: 512, 128>}, {pipeline_mode = #tpu.pipeline_mode<synchronous>, transform_indices = @transform_2, window_bounds = array<i64: 64, 1>}, {transform_indices = @transform_3, window_bounds = array<i64: 64, 128>}]} {
    %c0 = arith.constant 0 : index
    %c0_0 = arith.constant 0 : index
    %0 = vector.load %arg1[%c0, %c0_0] : memref<64x512xf32, #tpu.memory_space<vmem>>, vector<64x512xf32>
    %c0_1 = arith.constant 0 : index
    %c0_2 = arith.constant 0 : index
    %1 = vector.load %arg2[%c0_1, %c0_2] : memref<512x128xf32, #tpu.memory_space<vmem>>, vector<512x128xf32>
    %cst = arith.constant dense<0.000000e+00> : vector<64x128xf32>
    %2 = tpu.matmul %0, %1, %cst {dimension_numbers = #tpu.dot_dimension_numbers<[1], [0], [0], [1], [0, 0, 1, 1], [], []>} : vector<64x512xf32>, vector<512x128xf32>, vector<64x128xf32> -> vector<64x128xf32>
    %c0_3 = arith.constant 0 : index
    %c0_4 = arith.constant 0 : index
    %3 = vector.load %arg3[%c0_3, %c0_4] : memref<64x1xf32, #tpu.memory_space<vmem>>, vector<64x1xf32>
    %4 = vector.broadcast %3 : vector<64x1xf32> to vector<64x128xf32>
    %5 = arith.addf %2, %4 : vector<64x128xf32>
    %cst_5 = arith.constant 0.000000e+00 : f32
    %6 = vector.broadcast %cst_5 : f32 to vector<64x128xf32>
    %7 = arith.maximumf %5, %6 : vector<64x128xf32>
    %c0_6 = arith.constant 0 : index
    %c0_7 = arith.constant 0 : index
    %8 = vector.load %arg4[%c0_6, %c0_7] : memref<64x128xf32, #tpu.memory_space<vmem>>, vector<64x128xf32>
    tpu.vector_store %arg4[%c0_6, %c0_7], %7 {strides = array<i32>} : memref<64x128xf32, #tpu.memory_space<vmem>>, vector<64x128xf32>,
    return
  }
  func.func @transform_0(%arg0: i32) -> (i32, i32) {
    %c0_i32 = arith.constant 0 : i32
    %c0_i32_0 = arith.constant 0 : i32
    %c0_i32_1 = arith.constant 0 : i32
    return %c0_i32, %c0_i32_0 : i32, i32
  }
  func.func @transform_1(%arg0: i32) -> (i32, i32) {
    %c0_i32 = arith.constant 0 : i32
    %c0_i32_0 = arith.constant 0 : i32
    return %c0_i32, %arg0 : i32, i32
  }
  func.func @transform_2(%arg0: i32) -> (i32, i32) {
    %c0_i32 = arith.constant 0 : i32
    %c0_i32_0 = arith.constant 0 : i32
    %c0_i32_1 = arith.constant 0 : i32
    return %c0_i32, %c0_i32_0 : i32, i32
  }
  func.func @transform_3(%arg0: i32) -> (i32, i32) {
    %c0_i32 = arith.constant 0 : i32
    %c0_i32_0 = arith.constant 0 : i32
    return %c0_i32, %arg0 : i32, i32
  }
}

module attributes {stable_mosaic.version = 11 : i64} {
  func.func @conv_mm_kernel(%arg0: i32, %arg1: memref<64x576xf32, #tpu.memory_space<vmem>>, %arg2: memref<576x98xf32, #tpu.memory_space<vmem>>, %arg3: memref<64x1xf32, #tpu.memory_space<vmem>>, %arg4: memref<64x98xf32, #tpu.memory_space<vmem>>) attributes {dimension_semantics = [#tpu.dimension_semantics<parallel>], iteration_bounds = array<i64: 1>, scalar_prefetch = 0 : i64, scratch_operands = 0 : i64, tpu.core_type = #tpu.core_type<tc>, window_params = [{pipeline_mode = #tpu.pipeline_mode<synchronous>, transform_indices = @transform_0, window_bounds = array<i64: 64, 576>}, {transform_indices = @transform_1, window_bounds = array<i64: 576, 98>}, {pipeline_mode = #tpu.pipeline_mode<synchronous>, transform_indices = @transform_2, window_bounds = array<i64: 64, 1>}, {transform_indices = @transform_3, window_bounds = array<i64: 64, 98>}]} {
    %c0 = arith.constant 0 : index
    %c0_0 = arith.constant 0 : index
    %0 = vector.load %arg1[%c0, %c0_0] : memref<64x576xf32, #tpu.memory_space<vmem>>, vector<64x576xf32>
    %c0_1 = arith.constant 0 : index
    %c0_2 = arith.constant 0 : index
    %1 = vector.load %arg2[%c0_1, %c0_2] : memref<576x98xf32, #tpu.memory_space<vmem>>, vector<576x98xf32>
    %cst = arith.constant dense<0.000000e+00> : vector<64x98xf32>
    %2 = tpu.matmul %0, %1, %cst {dimension_numbers = #tpu.dot_dimension_numbers<[1], [0], [0], [1], [0, 0, 1, 1], [], []>} : vector<64x576xf32>, vector<576x98xf32>, vector<64x98xf32> -> vector<64x98xf32>
    %c0_3 = arith.constant 0 : index
    %c0_4 = arith.constant 0 : index
    %3 = vector.load %arg3[%c0_3, %c0_4] : memref<64x1xf32, #tpu.memory_space<vmem>>, vector<64x1xf32>
    %4 = vector.broadcast %3 : vector<64x1xf32> to vector<64x98xf32>
    %5 = arith.addf %2, %4 : vector<64x98xf32>
    %cst_5 = arith.constant 0.000000e+00 : f32
    %6 = vector.broadcast %cst_5 : f32 to vector<64x98xf32>
    %7 = arith.maximumf %5, %6 : vector<64x98xf32>
    %c0_6 = arith.constant 0 : index
    %c0_7 = arith.constant 0 : index
    %8 = vector.load %arg4[%c0_6, %c0_7] : memref<64x98xf32, #tpu.memory_space<vmem>>, vector<64x98xf32>
    tpu.vector_store %arg4[%c0_6, %c0_7], %7 {strides = array<i32>} : memref<64x98xf32, #tpu.memory_space<vmem>>, vector<64x98xf32>,
    return
  }
  func.func @transform_0(%arg0: i32) -> (i32, i32) {
    %c0_i32 = arith.constant 0 : i32
    %c0_i32_0 = arith.constant 0 : i32
    %c0_i32_1 = arith.constant 0 : i32
    return %c0_i32, %c0_i32_0 : i32, i32
  }
  func.func @transform_1(%arg0: i32) -> (i32, i32) {
    %c0_i32 = arith.constant 0 : i32
    %c0_i32_0 = arith.constant 0 : i32
    return %c0_i32, %arg0 : i32, i32
  }
  func.func @transform_2(%arg0: i32) -> (i32, i32) {
    %c0_i32 = arith.constant 0 : i32
    %c0_i32_0 = arith.constant 0 : i32
    %c0_i32_1 = arith.constant 0 : i32
    return %c0_i32, %c0_i32_0 : i32, i32
  }
  func.func @transform_3(%arg0: i32) -> (i32, i32) {
    %c0_i32 = arith.constant 0 : i32
    %c0_i32_0 = arith.constant 0 : i32
    return %c0_i32, %arg0 : i32, i32
  }
}

module attributes {stable_mosaic.version = 11 : i64} {
  func.func @duel_head_kernel(%arg0: i32, %arg1: memref<2x3136xf32, #tpu.memory_space<vmem>>, %arg2: memref<3136x256xf32, #tpu.memory_space<vmem>>, %arg3: memref<1x256xf32, #tpu.memory_space<vmem>>, %arg4: memref<256x7xf32, #tpu.memory_space<vmem>>, %arg5: memref<1x7xf32, #tpu.memory_space<vmem>>, %arg6: memref<2x6xf32, #tpu.memory_space<vmem>>) attributes {dimension_semantics = [#tpu.dimension_semantics<arbitrary>], iteration_bounds = array<i64: 1>, scalar_prefetch = 0 : i64, scratch_operands = 0 : i64, tpu.core_type = #tpu.core_type<tc>, window_params = [{pipeline_mode = #tpu.pipeline_mode<synchronous>, transform_indices = @transform_0, window_bounds = array<i64: 2, 3136>}, {pipeline_mode = #tpu.pipeline_mode<synchronous>, transform_indices = @transform_1, window_bounds = array<i64: 3136, 256>}, {pipeline_mode = #tpu.pipeline_mode<synchronous>, transform_indices = @transform_2, window_bounds = array<i64: 1, 256>}, {pipeline_mode = #tpu.pipeline_mode<synchronous>, transform_indices = @transform_3, window_bounds = array<i64: 256, 7>}, {pipeline_mode = #tpu.pipeline_mode<synchronous>, transform_indices = @transform_4, window_bounds = array<i64: 1, 7>}, {pipeline_mode = #tpu.pipeline_mode<synchronous>, transform_indices = @transform_5, window_bounds = array<i64: 2, 6>}]} {
    %c0 = arith.constant 0 : index
    %c0_0 = arith.constant 0 : index
    %0 = vector.load %arg1[%c0, %c0_0] : memref<2x3136xf32, #tpu.memory_space<vmem>>, vector<2x3136xf32>
    %c0_1 = arith.constant 0 : index
    %c0_2 = arith.constant 0 : index
    %1 = vector.load %arg2[%c0_1, %c0_2] : memref<3136x256xf32, #tpu.memory_space<vmem>>, vector<3136x256xf32>
    %cst = arith.constant dense<0.000000e+00> : vector<2x256xf32>
    %2 = tpu.matmul %0, %1, %cst {dimension_numbers = #tpu.dot_dimension_numbers<[1], [0], [0], [1], [0, 0, 1, 1], [], []>} : vector<2x3136xf32>, vector<3136x256xf32>, vector<2x256xf32> -> vector<2x256xf32>
    %c0_3 = arith.constant 0 : index
    %c0_4 = arith.constant 0 : index
    %3 = vector.load %arg3[%c0_3, %c0_4] : memref<1x256xf32, #tpu.memory_space<vmem>>, vector<1x256xf32>
    %4 = vector.broadcast %3 : vector<1x256xf32> to vector<2x256xf32>
    %5 = arith.addf %2, %4 : vector<2x256xf32>
    %cst_5 = arith.constant 0.000000e+00 : f32
    %6 = vector.broadcast %cst_5 : f32 to vector<2x256xf32>
    %7 = arith.cmpf ogt, %5, %6 : vector<2x256xf32>
    %cst_6 = arith.constant 0.00999999977 : f32
    %8 = vector.broadcast %cst_6 : f32 to vector<2x256xf32>
    %9 = arith.mulf %8, %5 : vector<2x256xf32>
    %10 = arith.select %7, %5, %9 : vector<2x256xi1>, vector<2x256xf32>
    %c0_7 = arith.constant 0 : index
    %c0_8 = arith.constant 0 : index
    %11 = vector.load %arg4[%c0_7, %c0_8] : memref<256x7xf32, #tpu.memory_space<vmem>>, vector<256x7xf32>
    %cst_9 = arith.constant dense<0.000000e+00> : vector<2x7xf32>
    %12 = tpu.matmul %10, %11, %cst_9 {dimension_numbers = #tpu.dot_dimension_numbers<[1], [0], [0], [1], [0, 0, 1, 1], [], []>} : vector<2x256xf32>, vector<256x7xf32>, vector<2x7xf32> -> vector<2x7xf32>
    %c0_10 = arith.constant 0 : index
    %c0_11 = arith.constant 0 : index
    %13 = vector.load %arg5[%c0_10, %c0_11] : memref<1x7xf32, #tpu.memory_space<vmem>>, vector<1x7xf32>
    %14 = vector.broadcast %13 : vector<1x7xf32> to vector<2x7xf32>
    %15 = arith.addf %12, %14 : vector<2x7xf32>
    %16 = vector.extract_strided_slice %15 {offsets = [0, 0], sizes = [2, 6], strides = [1, 1]} : vector<2x7xf32> to vector<2x6xf32>
    %17 = vector.extract_strided_slice %15 {offsets = [0, 6], sizes = [2, 1], strides = [1, 1]} : vector<2x7xf32> to vector<2x1xf32>
    %18 = vector.shape_cast %16 : vector<2x6xf32> to vector<1x2x6xf32>
    %cst_12 = arith.constant dense<0.000000e+00> : vector<1xf32>
    %19 = vector.multi_reduction <add>, %18, %cst_12 [1, 2] : vector<1x2x6xf32> to vector<1xf32>
    %20 = vector.shape_cast %19 : vector<1xf32> to vector<1x1x1xf32>
    %21 = vector.extract %20[0, 0, 0] : f32 from vector<1x1x1xf32>
    %cst_13 = arith.constant 1.200000e+01 : f32
    %22 = arith.divf %21, %cst_13 : f32
    %23 = vector.broadcast %22 : f32 to vector<2x6xf32>
    %24 = arith.subf %16, %23 : vector<2x6xf32>
    %25 = vector.broadcast %17 : vector<2x1xf32> to vector<2x6xf32>
    %26 = arith.addf %25, %24 : vector<2x6xf32>
    %c0_14 = arith.constant 0 : index
    %c0_15 = arith.constant 0 : index
    %27 = vector.load %arg6[%c0_14, %c0_15] : memref<2x6xf32, #tpu.memory_space<vmem>>, vector<2x6xf32>
    tpu.vector_store %arg6[%c0_14, %c0_15], %26 {strides = array<i32>} : memref<2x6xf32, #tpu.memory_space<vmem>>, vector<2x6xf32>,
    return
  }
  func.func @transform_0(%arg0: i32) -> (i32, i32) {
    %c0_i32 = arith.constant 0 : i32
    %c0_i32_0 = arith.constant 0 : i32
    %c0_i32_1 = arith.constant 0 : i32
    return %c0_i32, %c0_i32_0 : i32, i32
  }
  func.func @transform_1(%arg0: i32) -> (i32, i32) {
    %c0_i32 = arith.constant 0 : i32
    %c0_i32_0 = arith.constant 0 : i32
    %c0_i32_1 = arith.constant 0 : i32
    return %c0_i32, %c0_i32_0 : i32, i32
  }
  func.func @transform_2(%arg0: i32) -> (i32, i32) {
    %c0_i32 = arith.constant 0 : i32
    %c0_i32_0 = arith.constant 0 : i32
    %c0_i32_1 = arith.constant 0 : i32
    return %c0_i32, %c0_i32_0 : i32, i32
  }
  func.func @transform_3(%arg0: i32) -> (i32, i32) {
    %c0_i32 = arith.constant 0 : i32
    %c0_i32_0 = arith.constant 0 : i32
    %c0_i32_1 = arith.constant 0 : i32
    return %c0_i32, %c0_i32_0 : i32, i32
  }
  func.func @transform_4(%arg0: i32) -> (i32, i32) {
    %c0_i32 = arith.constant 0 : i32
    %c0_i32_0 = arith.constant 0 : i32
    %c0_i32_1 = arith.constant 0 : i32
    return %c0_i32, %c0_i32_0 : i32, i32
  }
  func.func @transform_5(%arg0: i32) -> (i32, i32) {
    %c0_i32 = arith.constant 0 : i32
    %c0_i32_0 = arith.constant 0 : i32
    %c0_i32_1 = arith.constant 0 : i32
    return %c0_i32, %c0_i32_0 : i32, i32
  }
}

</mosaic_0001>

<bundles_post_ra>
// kernel: duel_dqn_forward.4
= control target key start
LH: loop header
LB: loop body
LE: loop exit
PB: predicated region body
PF: predicated region fallthrough
CT: control target
= control target key end

     0   :  { %s2535_s12 = smov 0   ;;  %s2537_s13 = smov 0   ;;  %s3990_s0 = inlined_call_operand.vmem [shape: f32[32,256], index: 0, kind: input, shape index: {}]   ;;  %s3991_s1 = inlined_call_operand.vmem [shape: f32[256,800], index: 1, kind: input, shape index: {}]   ;;  %s3992_s2 = inlined_call_operand.vmem [shape: f32[32,1], index: 2, kind: input, shape index: {}]   ;;  %s3993_s3 = inlined_call_operand.vmem [shape: f32[32,800], index: 3, kind: output, shape index: {}]  }
   0x1   :  { %s2539_s14 = smov 0  }
   0x2 LB: > { %s2551_s15 = sadd.s32 4294967295, %s2380_s14   ;;  %s2554_s16 = sadd.s32 1, %s2380_s14   ;;  %s2380_s14 = sphi %s2539_s14, %s4034_s14   ;;  %s2376_s13 = sphi %s2537_s13, %s4033_s13   ;;  %s2372_s12 = sphi %s2535_s12, %s4032_s12  }
   0x3   : > { %s38_s17 = ssub.s32 %s2380_s14, %s2554_s16  ;;  %s41_s18 = sadd.s32 1, %s2376_s13 }
   0x4   : > { %p39_p0 = scmp.eq.s32.totalorder %s38_s17, 0  ;;  %p48_p1 = scmp.ne.s32.totalorder %s2376_s13, %s2372_s12 }
   0x5   : > { %p49_p2 = scmp.eq.s32.totalorder %s2380_s14, 0  ;;  %p99_p3 = scmp.eq.s32.totalorder %s2551_s15, 1 }
   0x6   : > { %s2564_s19 = scalar_select %p39_p0, %s2376_s13, %s41_s18  }
   0x7   : > { %p50_p4 = por %p49_p2, %p48_p1  ;;  %p2566_p5 = por %p99_p3, %p48_p1 }
   0x8   : > { %p1869_p6 = scmp.ge.s32.totalorder %s2380_s14, 2 }
   0xa   : > { %127 = sbr.rel (%p1869_p6) target bundleno = 244 (0xf4), region = 24 }
   0xf   : > { %130 = sbr.rel (!%p50_p4) target bundleno = 244 (0xf4), region = 28  ;;  %s132_s21 = sand.u32 (%p50_p4), 1, %s2376_s13  }
  0x10   : > { %s1871_s22 = sshll.u32 (%p50_p4), %s2380_s14, 2  ;;  %s1870_s23 = sshll.u32 (%p50_p4), %s132_s21, 10 }
  0x11   : > { %s136_s24 = ssub.s32 (%p50_p4), 7, %s1871_s22  ;;  %s1933_s25 = sshll.u32 (%p50_p4), %s2380_s14, 5 }
  0x12   : > { %p137_p7 = scmp.lt.s32.totalorder (%p50_p4), %s136_s24, 4  ;;  %s2577_s28 = scalar_lea.vmem (%p50_p4), %s3991_s1, %s1933_s25  }
  0x13   : > { %s2581_s4 = scalar_lea.vmem (%p50_p4), [#allocation2], %s1870_s23  }
  0x14   : > { %s4036_s24 = smov (!%p137_p7, %s136_s24), 4 }
  0x15   : > { %s1872_s29 = sshll.u32 %s4036_s24, 12  ;;  %s2579_s30 = sshll.u32 %s4036_s24, 3 }
  0x16   : > { %p1876_p8 = scmp.eq.s32.totalorder %s1872_s29, 0 }
  0x17   : > { %p147_p9 = scmp.lt.u32.totalorder (!%p1876_p8), %s2579_s30, 8 }
  0x18   : > { %146 = sbr.rel (%p1876_p8) target bundleno = 244 (0xf4), region = 32 }
  0x1d   : > { %150 = sbr.rel (%p147_p9) target bundleno = 205 (0xcd), region = 36  ;;  %s2585_s5 = sand.u32 (!%p147_p9), 7, %s2579_s30  }
  0x1e   : > { %p229_p10 = scmp.eq.s32.totalorder (!%p147_p9), %s2585_s5, 0  ;;  %p1877_p11 = scmp.ne.s32.totalorder (!%p147_p9), %s2585_s5, 0 }
  0x22   : > { %232 = sbr.rel (%p1877_p11) target bundleno = 102 (0x66), region = 51  ;;  %s233_s6 = sshrl.u32 (!%p1877_p11), %s2579_s30, 3 }
  0x23   : > { %s2592_s7 = sshrl.u32 (!%p1877_p11), %s233_s6, 1 }
  0x24   : > { %p1878_p12 = scmp.le.s32.totalorder (!%p1877_p11), %s2592_s7, 0 }
  0x27   : > { %1739 = sbr.rel (%p1878_p12) target bundleno = 77 (0x4d), region = 229  ;;  %s3995_s8 = smov (!%p1878_p12), %s2581_s4 }
  0x28   : > { %s3996_s9 = smov (!%p1878_p12), %s2577_s28  ;;  %s2601_s10 = smov (!%p1878_p12), 0  }
  0x29   : > { %s2603_s11 = smov (!%p1878_p12), 0  }
  0x2c LB: >> { %v246_v0 = vld [vmem:[%s2388_s9] sm:$0xff]  ;;  %v248_v1 = vld [vmem:[%s2388_s9 + $0x8] sm:$0xff]  ;;  %v250_v2 = vld [vmem:[%s2388_s9 + $0x38] sm:$0xff]  ;;  %s374_s17 = sadd.s32 1, %s2392_s10  ;;  %s240_s11 = sadd.s32 1, %s2396_s11   ;;  %s2396_s11 = sphi %s2603_s11, %s240_s11   ;;  %s2392_s10 = sphi %s2601_s10, %s3999_s10   ;;  %s2388_s9 = sphi %s3996_s9, %s3998_s9   ;;  %s2384_s8 = sphi %s3995_s8, %s3997_s8  }
  0x2d   : >> { %247 = vst [vmem:[%s2384_s8] sm:$0xff] %v246_v0  ;;  %249 = vst [vmem:[%s2384_s8 + $0x8] sm:$0xff] %v248_v1  ;;  %v252_v3 = vld [vmem:[%s2388_s9 + $0x40] sm:$0xff]  ;;  %v254_v4 = vld [vmem:[%s2388_s9 + $0x70] sm:$0xff]  ;;  %p375_p13 = scmp.ge.s32.totalorder %s374_s17, %s2592_s7  ;;  %p239_p0 = scmp.ge.s32.totalorder %s240_s11, %s2592_s7 }
  0x2e   : >> { %251 = vst [vmem:[%s2384_s8 + $0x20] sm:$0xff] %v250_v2  ;;  %v256_v5 = vld [vmem:[%s2388_s9 + $0x78] sm:$0xff]  ;;  %253 = vst [vmem:[%s2384_s8 + $0x28] sm:$0xff] %v252_v3  ;;  %v258_v6 = vld [vmem:[%s2388_s9 + $0xa8] sm:$0xff] }
  0x2f   : >> { %255 = vst [vmem:[%s2384_s8 + $0x40] sm:$0xff] %v254_v4  ;;  %257 = vst [vmem:[%s2384_s8 + $0x48] sm:$0xff] %v256_v5  ;;  %v260_v7 = vld [vmem:[%s2388_s9 + $0xb0] sm:$0xff]  ;;  %v262_v8 = vld [vmem:[%s2388_s9 + $0xe0] sm:$0xff]  ;;  %s4038_s17 = smov (%p375_p13, %s374_s17), 0 }
  0x30   : >> { %259 = vst [vmem:[%s2384_s8 + $0x60] sm:$0xff] %v258_v6  ;;  %261 = vst [vmem:[%s2384_s8 + $0x68] sm:$0xff] %v260_v7  ;;  %v264_v9 = vld [vmem:[%s2388_s9 + $0xe8] sm:$0xff]  ;;  %v266_v10 = vld [vmem:[%s2388_s9 + $0x118] sm:$0xff]  ;;  %s1879_s18 = sshll.u32 %s4038_s17, 4  ;;  %s3999_s10 = smov %s4038_s17 }
  0x31   : >> { %263 = vst [vmem:[%s2384_s8 + $0x80] sm:$0xff] %v262_v8  ;;  %v268_v11 = vld [vmem:[%s2388_s9 + $0x120] sm:$0xff]  ;;  %265 = vst [vmem:[%s2384_s8 + $0x88] sm:$0xff] %v264_v9  ;;  %v270_v12 = vld [vmem:[%s2388_s9 + $0x150] sm:$0xff]  ;;  %s2659_s21 = scalar_lea.vmem %s2577_s28, %s1879_s18   ;;  %s2662_s22 = scalar_lea.vmem %s2581_s4, %s1879_s18 [#allocation2]  }
  0x32   : >> { %267 = vst [vmem:[%s2384_s8 + $0xa0] sm:$0xff] %v266_v10  ;;  %269 = vst [vmem:[%s2384_s8 + $0xa8] sm:$0xff] %v268_v11  ;;  %v272_v13 = vld [vmem:[%s2388_s9 + $0x158] sm:$0xff]  ;;  %v274_v14 = vld [vmem:[%s2388_s9 + $0x188] sm:$0xff] }
  0x33   : >> { %271 = vst [vmem:[%s2384_s8 + $0xc0] sm:$0xff] %v270_v12  ;;  %273 = vst [vmem:[%s2384_s8 + $0xc8] sm:$0xff] %v272_v13  ;;  %v276_v15 = vld [vmem:[%s2388_s9 + $0x190] sm:$0xff]  ;;  %v278_v16 = vld [vmem:[%s2388_s9 + $0x1c0] sm:$0xff] }
  0x34   : >> { %275 = vst [vmem:[%s2384_s8 + $0xe0] sm:$0xff] %v274_v14  ;;  %v280_v17 = vld [vmem:[%s2388_s9 + $0x1c8] sm:$0xff]  ;;  %277 = vst [vmem:[%s2384_s8 + $0xe8] sm:$0xff] %v276_v15  ;;  %v282_v18 = vld [vmem:[%s2388_s9 + $0x1f8] sm:$0xff] }
  0x35   : >> { %279 = vst [vmem:[%s2384_s8 + $0x100] sm:$0xff] %v278_v16  ;;  %281 = vst [vmem:[%s2384_s8 + $0x108] sm:$0xff] %v280_v17  ;;  %v284_v19 = vld [vmem:[%s2388_s9 + $0x200] sm:$0xff]  ;;  %v286_v20 = vld [vmem:[%s2388_s9 + $0x230] sm:$0xff] }
  0x36   : >> { %283 = vst [vmem:[%s2384_s8 + $0x120] sm:$0xff] %v282_v18  ;;  %285 = vst [vmem:[%s2384_s8 + $0x128] sm:$0xff] %v284_v19  ;;  %v288_v21 = vld [vmem:[%s2388_s9 + $0x238] sm:$0xff]  ;;  %v290_v22 = vld [vmem:[%s2388_s9 + $0x268] sm:$0xff] }
  0x37   : >> { %287 = vst [vmem:[%s2384_s8 + $0x140] sm:$0xff] %v286_v20  ;;  %v292_v23 = vld [vmem:[%s2388_s9 + $0x270] sm:$0xff]  ;;  %289 = vst [vmem:[%s2384_s8 + $0x148] sm:$0xff] %v288_v21  ;;  %v294_v24 = vld [vmem:[%s2388_s9 + $0x2a0] sm:$0xff] }
  0x38   : >> { %291 = vst [vmem:[%s2384_s8 + $0x160] sm:$0xff] %v290_v22  ;;  %293 = vst [vmem:[%s2384_s8 + $0x168] sm:$0xff] %v292_v23  ;;  %v296_v25 = vld [vmem:[%s2388_s9 + $0x2a8] sm:$0xff]  ;;  %v298_v26 = vld [vmem:[%s2388_s9 + $0x2d8] sm:$0xff] }
  0x39   : >> { %295 = vst [vmem:[%s2384_s8 + $0x180] sm:$0xff] %v294_v24  ;;  %297 = vst [vmem:[%s2384_s8 + $0x188] sm:$0xff] %v296_v25  ;;  %v300_v27 = vld [vmem:[%s2388_s9 + $0x2e0] sm:$0xff]  ;;  %v302_v28 = vld [vmem:[%s2388_s9 + $0x310] sm:$0xff] }
  0x3a   : >> { %299 = vst [vmem:[%s2384_s8 + $0x1a0] sm:$0xff] %v298_v26  ;;  %v304_v29 = vld [vmem:[%s2388_s9 + $0x318] sm:$0xff]  ;;  %301 = vst [vmem:[%s2384_s8 + $0x1a8] sm:$0xff] %v300_v27  ;;  %v306_v30 = vld [vmem:[%s2388_s9 + $0x348] sm:$0xff] }
  0x3b   : >> { %303 = vst [vmem:[%s2384_s8 + $0x1c0] sm:$0xff] %v302_v28  ;;  %305 = vst [vmem:[%s2384_s8 + $0x1c8] sm:$0xff] %v304_v29  ;;  %v308_v31 = vld [vmem:[%s2388_s9 + $0x350] sm:$0xff]  ;;  %v310_v32 = vld [vmem:[%s2388_s9 + $0x380] sm:$0xff] }
  0x3c   : >> { %307 = vst [vmem:[%s2384_s8 + $0x1e0] sm:$0xff] %v306_v30  ;;  %309 = vst [vmem:[%s2384_s8 + $0x1e8] sm:$0xff] %v308_v31  ;;  %v312_v33 = vld [vmem:[%s2388_s9 + $0x388] sm:$0xff]  ;;  %v314_v34 = vld [vmem:[%s2388_s9 + $0x3b8] sm:$0xff] }
  0x3d   : >> { %311 = vst [vmem:[%s2384_s8 + $0x200] sm:$0xff] %v310_v32  ;;  %v316_v35 = vld [vmem:[%s2388_s9 + $0x3c0] sm:$0xff]  ;;  %313 = vst [vmem:[%s2384_s8 + $0x208] sm:$0xff] %v312_v33  ;;  %v318_v36 = vld [vmem:[%s2388_s9 + $0x3f0] sm:$0xff] }
  0x3e   : >> { %315 = vst [vmem:[%s2384_s8 + $0x220] sm:$0xff] %v314_v34  ;;  %317 = vst [vmem:[%s2384_s8 + $0x228] sm:$0xff] %v316_v35  ;;  %v320_v37 = vld [vmem:[%s2388_s9 + $0x3f8] sm:$0xff]  ;;  %v322_v38 = vld [vmem:[%s2388_s9 + $0x428] sm:$0xff] }
  0x3f   : >> { %319 = vst [vmem:[%s2384_s8 + $0x240] sm:$0xff] %v318_v36  ;;  %321 = vst [vmem:[%s2384_s8 + $0x248] sm:$0xff] %v320_v37  ;;  %v324_v39 = vld [vmem:[%s2388_s9 + $0x430] sm:$0xff]  ;;  %v326_v40 = vld [vmem:[%s2388_s9 + $0x460] sm:$0xff] }
  0x40   : >> { %323 = vst [vmem:[%s2384_s8 + $0x260] sm:$0xff] %v322_v38  ;;  %v328_v41 = vld [vmem:[%s2388_s9 + $0x468] sm:$0xff]  ;;  %325 = vst [vmem:[%s2384_s8 + $0x268] sm:$0xff] %v324_v39  ;;  %v330_v42 = vld [vmem:[%s2388_s9 + $0x498] sm:$0xff] }
  0x41   : >> { %327 = vst [vmem:[%s2384_s8 + $0x280] sm:$0xff] %v326_v40  ;;  %329 = vst [vmem:[%s2384_s8 + $0x288] sm:$0xff] %v328_v41  ;;  %v332_v43 = vld [vmem:[%s2388_s9 + $0x4a0] sm:$0xff]  ;;  %v334_v44 = vld [vmem:[%s2388_s9 + $0x4d0] sm:$0xff] }
  0x42   : >> { %331 = vst [vmem:[%s2384_s8 + $0x2a0] sm:$0xff] %v330_v42  ;;  %333 = vst [vmem:[%s2384_s8 + $0x2a8] sm:$0xff] %v332_v43  ;;  %v336_v45 = vld [vmem:[%s2388_s9 + $0x4d8] sm:$0xff]  ;;  %v338_v46 = vld [vmem:[%s2388_s9 + $0x508] sm:$0xff] }
  0x43   : >> { %335 = vst [vmem:[%s2384_s8 + $0x2c0] sm:$0xff] %v334_v44  ;;  %v340_v47 = vld [vmem:[%s2388_s9 + $0x510] sm:$0xff]  ;;  %337 = vst [vmem:[%s2384_s8 + $0x2c8] sm:$0xff] %v336_v45  ;;  %v342_v48 = vld [vmem:[%s2388_s9 + $0x540] sm:$0xff] }
  0x44   : >> { %339 = vst [vmem:[%s2384_s8 + $0x2e0] sm:$0xff] %v338_v46  ;;  %341 = vst [vmem:[%s2384_s8 + $0x2e8] sm:$0xff] %v340_v47  ;;  %v344_v49 = vld [vmem:[%s2388_s9 + $0x548] sm:$0xff]  ;;  %v346_v50 = vld [vmem:[%s2388_s9 + $0x578] sm:$0xff] }
  0x45   : >> { %343 = vst [vmem:[%s2384_s8 + $0x300] sm:$0xff] %v342_v48  ;;  %345 = vst [vmem:[%s2384_s8 + $0x308] sm:$0xff] %v344_v49  ;;  %v348_v51 = vld [vmem:[%s2388_s9 + $0x580] sm:$0xff]  ;;  %v350_v52 = vld [vmem:[%s2388_s9 + $0x5b0] sm:$0xff] }
  0x46   : >> { %347 = vst [vmem:[%s2384_s8 + $0x320] sm:$0xff] %v346_v50  ;;  %v352_v53 = vld [vmem:[%s2388_s9 + $0x5b8] sm:$0xff]  ;;  %349 = vst [vmem:[%s2384_s8 + $0x328] sm:$0xff] %v348_v51  ;;  %v354_v54 = vld [vmem:[%s2388_s9 + $0x5e8] sm:$0xff] }
  0x47   : >> { %351 = vst [vmem:[%s2384_s8 + $0x340] sm:$0xff] %v350_v52  ;;  %353 = vst [vmem:[%s2384_s8 + $0x348] sm:$0xff] %v352_v53  ;;  %v356_v55 = vld [vmem:[%s2388_s9 + $0x5f0] sm:$0xff]  ;;  %v358_v56 = vld [vmem:[%s2388_s9 + $0x620] sm:$0xff] }
  0x48   : >> { %355 = vst [vmem:[%s2384_s8 + $0x360] sm:$0xff] %v354_v54  ;;  %357 = vst [vmem:[%s2384_s8 + $0x368] sm:$0xff] %v356_v55  ;;  %v360_v57 = vld [vmem:[%s2388_s9 + $0x628] sm:$0xff]  ;;  %v362_v58 = vld [vmem:[%s2388_s9 + $0x658] sm:$0xff]  ;;  %242 = sbr.rel (!%p239_p0) target bundleno = 44 (0x2c), region = 235 }
  0x49   : >> { %359 = vst [vmem:[%s2384_s8 + $0x380] sm:$0xff] %v358_v56  ;;  %v364_v59 = vld [vmem:[%s2388_s9 + $0x660] sm:$0xff]  ;;  %361 = vst [vmem:[%s2384_s8 + $0x388] sm:$0xff] %v360_v57  ;;  %v366_v60 = vld [vmem:[%s2388_s9 + $0x690] sm:$0xff] }
  0x4a   : >> { %363 = vst [vmem:[%s2384_s8 + $0x3a0] sm:$0xff] %v362_v58  ;;  %365 = vst [vmem:[%s2384_s8 + $0x3a8] sm:$0xff] %v364_v59  ;;  %v368_v61 = vld [vmem:[%s2388_s9 + $0x698] sm:$0xff]  ;;  %v370_v62 = vld [vmem:[%s2388_s9 + $0x6c8] sm:$0xff] }
  0x4b   : >> { %367 = vst [vmem:[%s2384_s8 + $0x3c0] sm:$0xff] %v366_v60  ;;  %369 = vst [vmem:[%s2384_s8 + $0x3c8] sm:$0xff] %v368_v61  ;;  %v372_v63 = vld [vmem:[%s2388_s9 + $0x6d0] sm:$0xff]  ;;  %s3998_s9 = smov %s2659_s21 }
  0x4c   : >> { %371 = vst [vmem:[%s2384_s8 + $0x3e0] sm:$0xff] %v370_v62  ;;  %373 = vst [vmem:[%s2384_s8 + $0x3e8] sm:$0xff] %v372_v63  ;;  %s3997_s8 = smov %s2662_s22 }
  0x4d PF: > { %s2768_s23 = sand.u32 1, %s233_s6   ;;  %s1934_s24 = sshll.u32 %s2592_s7, 8 }
  0x4e   : > { %s385_s25 = sshra.s32 %s1934_s24, 4  ;;  %p1884_p1 = scmp.le.s32.totalorder %s2768_s23, 0 }
  0x4f   : > { %s2772_s26 = scalar_lea.vmem %s2577_s28, %s385_s25   ;;  %s2775_s27 = scalar_lea.vmem %s2581_s4, %s385_s25 [#allocation2]  }
  0x50   : > { %1753 = sbr.rel (%p1884_p1) target bundleno = 102 (0x66), region = 240  ;;  %s4000_s29 = smov (!%p1884_p1), %s2775_s27 }
  0x51   : > { %s4001_s8 = smov (!%p1884_p1), %s2772_s26  ;;  %s2784_s9 = smov (!%p1884_p1), 0  }
  0x52   : > { %s2786_s10 = smov (!%p1884_p1), 0  }
  0x55 LB: >> { %v401_v0 = vld [vmem:[%s2404_s8] sm:$0xff]  ;;  %v403_v1 = vld [vmem:[%s2404_s8 + $0x38] sm:$0xff]  ;;  %v405_v2 = vld [vmem:[%s2404_s8 + $0x70] sm:$0xff]  ;;  %s465_s6 = sadd.s32 1, %s2408_s9  ;;  %s395_s10 = sadd.s32 1, %s2412_s10   ;;  %s2412_s10 = sphi %s2786_s10, %s395_s10   ;;  %s2408_s9 = sphi %s2784_s9, %s4004_s9   ;;  %s2404_s8 = sphi %s4001_s8, %s4003_s8   ;;  %s2400_s29 = sphi %s4000_s29, %s4002_s29  }
  0x56   : >> { %402 = vst [vmem:[%s2400_s29] sm:$0xff] %v401_v0  ;;  %404 = vst [vmem:[%s2400_s29 + $0x20] sm:$0xff] %v403_v1  ;;  %v407_v3 = vld [vmem:[%s2404_s8 + $0xa8] sm:$0xff]  ;;  %v409_v4 = vld [vmem:[%s2404_s8 + $0xe0] sm:$0xff]  ;;  %p466_p2 = scmp.ge.s32.totalorder %s465_s6, %s2768_s23  ;;  %p394_p3 = scmp.ge.s32.totalorder %s395_s10, %s2768_s23 }
  0x57   : >> { %406 = vst [vmem:[%s2400_s29 + $0x40] sm:$0xff] %v405_v2  ;;  %v411_v5 = vld [vmem:[%s2404_s8 + $0x118] sm:$0xff]  ;;  %408 = vst [vmem:[%s2400_s29 + $0x60] sm:$0xff] %v407_v3  ;;  %v413_v6 = vld [vmem:[%s2404_s8 + $0x150] sm:$0xff] }
  0x58   : >> { %410 = vst [vmem:[%s2400_s29 + $0x80] sm:$0xff] %v409_v4  ;;  %412 = vst [vmem:[%s2400_s29 + $0xa0] sm:$0xff] %v411_v5  ;;  %v415_v7 = vld [vmem:[%s2404_s8 + $0x188] sm:$0xff]  ;;  %v417_v8 = vld [vmem:[%s2404_s8 + $0x1c0] sm:$0xff]  ;;  %s4040_s6 = smov (%p466_p2, %s465_s6), 0 }
  0x59   : >> { %414 = vst [vmem:[%s2400_s29 + $0xc0] sm:$0xff] %v413_v6  ;;  %416 = vst [vmem:[%s2400_s29 + $0xe0] sm:$0xff] %v415_v7  ;;  %v419_v9 = vld [vmem:[%s2404_s8 + $0x1f8] sm:$0xff]  ;;  %v421_v10 = vld [vmem:[%s2404_s8 + $0x230] sm:$0xff]  ;;  %s1885_s7 = sshll.u32 %s4040_s6, 3  ;;  %s4004_s9 = smov %s4040_s6 }
  0x5a   : >> { %418 = vst [vmem:[%s2400_s29 + $0x100] sm:$0xff] %v417_v8  ;;  %v423_v11 = vld [vmem:[%s2404_s8 + $0x268] sm:$0xff]  ;;  %420 = vst [vmem:[%s2400_s29 + $0x120] sm:$0xff] %v419_v9  ;;  %v425_v12 = vld [vmem:[%s2404_s8 + $0x2a0] sm:$0xff]  ;;  %s2842_s11 = scalar_lea.vmem %s2772_s26, %s1885_s7   ;;  %s471_s17 = scalar_lea.vmem %s2775_s27, %s1885_s7 [#allocation2]  }
  0x5b   : >> { %422 = vst [vmem:[%s2400_s29 + $0x140] sm:$0xff] %v421_v10  ;;  %424 = vst [vmem:[%s2400_s29 + $0x160] sm:$0xff] %v423_v11  ;;  %v427_v13 = vld [vmem:[%s2404_s8 + $0x2d8] sm:$0xff]  ;;  %v429_v14 = vld [vmem:[%s2404_s8 + $0x310] sm:$0xff] }
  0x5c   : >> { %426 = vst [vmem:[%s2400_s29 + $0x180] sm:$0xff] %v425_v12  ;;  %428 = vst [vmem:[%s2400_s29 + $0x1a0] sm:$0xff] %v427_v13  ;;  %v431_v15 = vld [vmem:[%s2404_s8 + $0x348] sm:$0xff]  ;;  %v433_v16 = vld [vmem:[%s2404_s8 + $0x380] sm:$0xff] }
  0x5d   : >> { %430 = vst [vmem:[%s2400_s29 + $0x1c0] sm:$0xff] %v429_v14  ;;  %v435_v17 = vld [vmem:[%s2404_s8 + $0x3b8] sm:$0xff]  ;;  %432 = vst [vmem:[%s2400_s29 + $0x1e0] sm:$0xff] %v431_v15  ;;  %v437_v18 = vld [vmem:[%s2404_s8 + $0x3f0] sm:$0xff] }
  0x5e   : >> { %434 = vst [vmem:[%s2400_s29 + $0x200] sm:$0xff] %v433_v16  ;;  %436 = vst [vmem:[%s2400_s29 + $0x220] sm:$0xff] %v435_v17  ;;  %v439_v19 = vld [vmem:[%s2404_s8 + $0x428] sm:$0xff]  ;;  %v441_v20 = vld [vmem:[%s2404_s8 + $0x460] sm:$0xff] }
  0x5f   : >> { %438 = vst [vmem:[%s2400_s29 + $0x240] sm:$0xff] %v437_v18  ;;  %440 = vst [vmem:[%s2400_s29 + $0x260] sm:$0xff] %v439_v19  ;;  %v443_v21 = vld [vmem:[%s2404_s8 + $0x498] sm:$0xff]  ;;  %v445_v22 = vld [vmem:[%s2404_s8 + $0x4d0] sm:$0xff] }
  0x60   : >> { %442 = vst [vmem:[%s2400_s29 + $0x280] sm:$0xff] %v441_v20  ;;  %v447_v23 = vld [vmem:[%s2404_s8 + $0x508] sm:$0xff]  ;;  %444 = vst [vmem:[%s2400_s29 + $0x2a0] sm:$0xff] %v443_v21  ;;  %v449_v24 = vld [vmem:[%s2404_s8 + $0x540] sm:$0xff] }
  0x61   : >> { %446 = vst [vmem:[%s2400_s29 + $0x2c0] sm:$0xff] %v445_v22  ;;  %448 = vst [vmem:[%s2400_s29 + $0x2e0] sm:$0xff] %v447_v23  ;;  %v451_v25 = vld [vmem:[%s2404_s8 + $0x578] sm:$0xff]  ;;  %v453_v26 = vld [vmem:[%s2404_s8 + $0x5b0] sm:$0xff]  ;;  %397 = sbr.rel (!%p394_p3) target bundleno = 85 (0x55), region = 246 }
  0x62   : >> { %450 = vst [vmem:[%s2400_s29 + $0x300] sm:$0xff] %v449_v24  ;;  %452 = vst [vmem:[%s2400_s29 + $0x320] sm:$0xff] %v451_v25  ;;  %v455_v27 = vld [vmem:[%s2404_s8 + $0x5e8] sm:$0xff]  ;;  %v457_v28 = vld [vmem:[%s2404_s8 + $0x620] sm:$0xff] }
  0x63   : >> { %454 = vst [vmem:[%s2400_s29 + $0x340] sm:$0xff] %v453_v26  ;;  %v459_v29 = vld [vmem:[%s2404_s8 + $0x658] sm:$0xff]  ;;  %456 = vst [vmem:[%s2400_s29 + $0x360] sm:$0xff] %v455_v27  ;;  %v461_v30 = vld [vmem:[%s2404_s8 + $0x690] sm:$0xff] }
  0x64   : >> { %458 = vst [vmem:[%s2400_s29 + $0x380] sm:$0xff] %v457_v28  ;;  %460 = vst [vmem:[%s2400_s29 + $0x3a0] sm:$0xff] %v459_v29  ;;  %v463_v31 = vld [vmem:[%s2404_s8 + $0x6c8] sm:$0xff]  ;;  %s4003_s8 = smov %s2842_s11 }
  0x65   : >> { %462 = vst [vmem:[%s2400_s29 + $0x3c0] sm:$0xff] %v461_v30  ;;  %464 = vst [vmem:[%s2400_s29 + $0x3e0] sm:$0xff] %v463_v31  ;;  %s4002_s29 = smov %s471_s17 }
  0x66 PF: > { %474 = sbr.rel (%p229_p10) target bundleno = 205 (0xcd), region = 69  ;;  %s476_s18 = ssub.s32 (!%p229_p10), %s2579_s30, %s2585_s5 }
  0x67   : > { %s480_s21 = sshrl.u32 (!%p229_p10), %s2579_s30, 3  ;;  %s2888_s22 = scalar_lea.vmem (!%p229_p10), %s2577_s28, %s476_s18 }
  0x68   : > { %s2891_s24 = scalar_lea.vmem (!%p229_p10), %s2581_s4, %s476_s18 [#allocation2]  ;;  %s2895_s25 = sshrl.u32 (!%p229_p10), %s480_s21, 1 }
  0x69   : > { %p1887_p4 = scmp.le.s32.totalorder (!%p229_p10), %s2895_s25, 0 }
  0x6b   : > { %1767 = sbr.rel (%p1887_p4) target bundleno = 145 (0x91), region = 251  ;;  %s4005_s23 = smov (!%p1887_p4), %s2581_s4 }
  0x6c   : > { %s4006_s26 = smov (!%p1887_p4), %s2577_s28  ;;  %s2904_s27 = smov (!%p1887_p4), 0  }
  0x6d   : > { %s2906_s29 = smov (!%p1887_p4), 0  }
  0x70 LB: >> { %v493_v32 = vld [vmem:[%s2420_s26] sm:$0xff]  ;;  %v495_v33 = vld [vmem:[%s2420_s26 + $0x8] sm:$0xff]  ;;  %v497_v34 = vld [vmem:[%s2420_s26 + $0x38] sm:$0xff]  ;;  %s621_s8 = sadd.s32 1, %s2424_s27  ;;  %s487_s29 = sadd.s32 1, %s2428_s29   ;;  %s2428_s29 = sphi %s2906_s29, %s487_s29   ;;  %s2424_s27 = sphi %s2904_s27, %s4009_s27   ;;  %s2420_s26 = sphi %s4006_s26, %s4008_s26   ;;  %s2416_s23 = sphi %s4005_s23, %s4007_s23  }
  0x71   : >> { %494 = vst [vmem:[%s2416_s23] sm:$0xff] %v493_v32  ;;  %496 = vst [vmem:[%s2416_s23 + $0x8] sm:$0xff] %v495_v33  ;;  %v499_v35 = vld [vmem:[%s2420_s26 + $0x40] sm:$0xff]  ;;  %v501_v36 = vld [vmem:[%s2420_s26 + $0x70] sm:$0xff]  ;;  %p622_p6 = scmp.ge.s32.totalorder %s621_s8, %s2895_s25  ;;  %p486_p7 = scmp.ge.s32.totalorder %s487_s29, %s2895_s25 }
  0x72   : >> { %498 = vst [vmem:[%s2416_s23 + $0x20] sm:$0xff] %v497_v34  ;;  %v503_v37 = vld [vmem:[%s2420_s26 + $0x78] sm:$0xff]  ;;  %500 = vst [vmem:[%s2416_s23 + $0x28] sm:$0xff] %v499_v35  ;;  %v505_v38 = vld [vmem:[%s2420_s26 + $0xa8] sm:$0xff] }
  0x73   : >> { %502 = vst [vmem:[%s2416_s23 + $0x40] sm:$0xff] %v501_v36  ;;  %504 = vst [vmem:[%s2416_s23 + $0x48] sm:$0xff] %v503_v37  ;;  %v507_v39 = vld [vmem:[%s2420_s26 + $0xb0] sm:$0xff]  ;;  %v509_v40 = vld [vmem:[%s2420_s26 + $0xe0] sm:$0xff]  ;;  %s4042_s8 = smov (%p622_p6, %s621_s8), 0 }
  0x74   : >> { %506 = vst [vmem:[%s2416_s23 + $0x60] sm:$0xff] %v505_v38  ;;  %508 = vst [vmem:[%s2416_s23 + $0x68] sm:$0xff] %v507_v39  ;;  %v511_v41 = vld [vmem:[%s2420_s26 + $0xe8] sm:$0xff]  ;;  %v513_v42 = vld [vmem:[%s2420_s26 + $0x118] sm:$0xff]  ;;  %s1888_s9 = sshll.u32 %s4042_s8, 4  ;;  %s4009_s27 = smov %s4042_s8 }
  0x75   : >> { %510 = vst [vmem:[%s2416_s23 + $0x80] sm:$0xff] %v509_v40  ;;  %v515_v43 = vld [vmem:[%s2420_s26 + $0x120] sm:$0xff]  ;;  %512 = vst [vmem:[%s2416_s23 + $0x88] sm:$0xff] %v511_v41  ;;  %v517_v44 = vld [vmem:[%s2420_s26 + $0x150] sm:$0xff]  ;;  %s2962_s10 = scalar_lea.vmem %s2577_s28, %s1888_s9   ;;  %s2965_s6 = scalar_lea.vmem %s2581_s4, %s1888_s9 [#allocation2]  }
  0x76   : >> { %514 = vst [vmem:[%s2416_s23 + $0xa0] sm:$0xff] %v513_v42  ;;  %516 = vst [vmem:[%s2416_s23 + $0xa8] sm:$0xff] %v515_v43  ;;  %v519_v45 = vld [vmem:[%s2420_s26 + $0x158] sm:$0xff]  ;;  %v521_v46 = vld [vmem:[%s2420_s26 + $0x188] sm:$0xff] }
  0x77   : >> { %518 = vst [vmem:[%s2416_s23 + $0xc0] sm:$0xff] %v517_v44  ;;  %520 = vst [vmem:[%s2416_s23 + $0xc8] sm:$0xff] %v519_v45  ;;  %v523_v47 = vld [vmem:[%s2420_s26 + $0x190] sm:$0xff]  ;;  %v525_v48 = vld [vmem:[%s2420_s26 + $0x1c0] sm:$0xff] }
  0x78   : >> { %522 = vst [vmem:[%s2416_s23 + $0xe0] sm:$0xff] %v521_v46  ;;  %v527_v49 = vld [vmem:[%s2420_s26 + $0x1c8] sm:$0xff]  ;;  %524 = vst [vmem:[%s2416_s23 + $0xe8] sm:$0xff] %v523_v47  ;;  %v529_v50 = vld [vmem:[%s2420_s26 + $0x1f8] sm:$0xff] }
  0x79   : >> { %526 = vst [vmem:[%s2416_s23 + $0x100] sm:$0xff] %v525_v48  ;;  %528 = vst [vmem:[%s2416_s23 + $0x108] sm:$0xff] %v527_v49  ;;  %v531_v51 = vld [vmem:[%s2420_s26 + $0x200] sm:$0xff]  ;;  %v533_v52 = vld [vmem:[%s2420_s26 + $0x230] sm:$0xff] }
  0x7a   : >> { %530 = vst [vmem:[%s2416_s23 + $0x120] sm:$0xff] %v529_v50  ;;  %532 = vst [vmem:[%s2416_s23 + $0x128] sm:$0xff] %v531_v51  ;;  %v535_v53 = vld [vmem:[%s2420_s26 + $0x238] sm:$0xff]  ;;  %v537_v54 = vld [vmem:[%s2420_s26 + $0x268] sm:$0xff] }
  0x7b   : >> { %534 = vst [vmem:[%s2416_s23 + $0x140] sm:$0xff] %v533_v52  ;;  %v539_v55 = vld [vmem:[%s2420_s26 + $0x270] sm:$0xff]  ;;  %536 = vst [vmem:[%s2416_s23 + $0x148] sm:$0xff] %v535_v53  ;;  %v541_v56 = vld [vmem:[%s2420_s26 + $0x2a0] sm:$0xff] }
  0x7c   : >> { %538 = vst [vmem:[%s2416_s23 + $0x160] sm:$0xff] %v537_v54  ;;  %540 = vst [vmem:[%s2416_s23 + $0x168] sm:$0xff] %v539_v55  ;;  %v543_v57 = vld [vmem:[%s2420_s26 + $0x2a8] sm:$0xff]  ;;  %v545_v58 = vld [vmem:[%s2420_s26 + $0x2d8] sm:$0xff] }
  0x7d   : >> { %542 = vst [vmem:[%s2416_s23 + $0x180] sm:$0xff] %v541_v56  ;;  %544 = vst [vmem:[%s2416_s23 + $0x188] sm:$0xff] %v543_v57  ;;  %v547_v59 = vld [vmem:[%s2420_s26 + $0x2e0] sm:$0xff]  ;;  %v549_v60 = vld [vmem:[%s2420_s26 + $0x310] sm:$0xff] }
  0x7e   : >> { %546 = vst [vmem:[%s2416_s23 + $0x1a0] sm:$0xff] %v545_v58  ;;  %v551_v61 = vld [vmem:[%s2420_s26 + $0x318] sm:$0xff]  ;;  %548 = vst [vmem:[%s2416_s23 + $0x1a8] sm:$0xff] %v547_v59  ;;  %v553_v62 = vld [vmem:[%s2420_s26 + $0x348] sm:$0xff] }
  0x7f   : >> { %550 = vst [vmem:[%s2416_s23 + $0x1c0] sm:$0xff] %v549_v60  ;;  %552 = vst [vmem:[%s2416_s23 + $0x1c8] sm:$0xff] %v551_v61  ;;  %v555_v63 = vld [vmem:[%s2420_s26 + $0x350] sm:$0xff]  ;;  %v557_v0 = vld [vmem:[%s2420_s26 + $0x380] sm:$0xff] }
  0x80   : >> { %554 = vst [vmem:[%s2416_s23 + $0x1e0] sm:$0xff] %v553_v62  ;;  %556 = vst [vmem:[%s2416_s23 + $0x1e8] sm:$0xff] %v555_v63  ;;  %v559_v1 = vld [vmem:[%s2420_s26 + $0x388] sm:$0xff]  ;;  %v561_v2 = vld [vmem:[%s2420_s26 + $0x3b8] sm:$0xff] }
  0x81   : >> { %558 = vst [vmem:[%s2416_s23 + $0x200] sm:$0xff] %v557_v0  ;;  %v563_v3 = vld [vmem:[%s2420_s26 + $0x3c0] sm:$0xff]  ;;  %560 = vst [vmem:[%s2416_s23 + $0x208] sm:$0xff] %v559_v1  ;;  %v565_v4 = vld [vmem:[%s2420_s26 + $0x3f0] sm:$0xff] }
  0x82   : >> { %562 = vst [vmem:[%s2416_s23 + $0x220] sm:$0xff] %v561_v2  ;;  %564 = vst [vmem:[%s2416_s23 + $0x228] sm:$0xff] %v563_v3  ;;  %v567_v5 = vld [vmem:[%s2420_s26 + $0x3f8] sm:$0xff]  ;;  %v569_v6 = vld [vmem:[%s2420_s26 + $0x428] sm:$0xff] }
  0x83   : >> { %566 = vst [vmem:[%s2416_s23 + $0x240] sm:$0xff] %v565_v4  ;;  %568 = vst [vmem:[%s2416_s23 + $0x248] sm:$0xff] %v567_v5  ;;  %v571_v7 = vld [vmem:[%s2420_s26 + $0x430] sm:$0xff]  ;;  %v573_v8 = vld [vmem:[%s2420_s26 + $0x460] sm:$0xff] }
  0x84   : >> { %570 = vst [vmem:[%s2416_s23 + $0x260] sm:$0xff] %v569_v6  ;;  %v575_v9 = vld [vmem:[%s2420_s26 + $0x468] sm:$0xff]  ;;  %572 = vst [vmem:[%s2416_s23 + $0x268] sm:$0xff] %v571_v7  ;;  %v577_v10 = vld [vmem:[%s2420_s26 + $0x498] sm:$0xff] }
  0x85   : >> { %574 = vst [vmem:[%s2416_s23 + $0x280] sm:$0xff] %v573_v8  ;;  %576 = vst [vmem:[%s2416_s23 + $0x288] sm:$0xff] %v575_v9  ;;  %v579_v11 = vld [vmem:[%s2420_s26 + $0x4a0] sm:$0xff]  ;;  %v581_v12 = vld [vmem:[%s2420_s26 + $0x4d0] sm:$0xff] }
  0x86   : >> { %578 = vst [vmem:[%s2416_s23 + $0x2a0] sm:$0xff] %v577_v10  ;;  %580 = vst [vmem:[%s2416_s23 + $0x2a8] sm:$0xff] %v579_v11  ;;  %v583_v13 = vld [vmem:[%s2420_s26 + $0x4d8] sm:$0xff]  ;;  %v585_v14 = vld [vmem:[%s2420_s26 + $0x508] sm:$0xff] }
  0x87   : >> { %582 = vst [vmem:[%s2416_s23 + $0x2c0] sm:$0xff] %v581_v12  ;;  %v587_v15 = vld [vmem:[%s2420_s26 + $0x510] sm:$0xff]  ;;  %584 = vst [vmem:[%s2416_s23 + $0x2c8] sm:$0xff] %v583_v13  ;;  %v589_v16 = vld [vmem:[%s2420_s26 + $0x540] sm:$0xff] }
  0x88   : >> { %586 = vst [vmem:[%s2416_s23 + $0x2e0] sm:$0xff] %v585_v14  ;;  %588 = vst [vmem:[%s2416_s23 + $0x2e8] sm:$0xff] %v587_v15  ;;  %v591_v17 = vld [vmem:[%s2420_s26 + $0x548] sm:$0xff]  ;;  %v593_v18 = vld [vmem:[%s2420_s26 + $0x578] sm:$0xff] }
  0x89   : >> { %590 = vst [vmem:[%s2416_s23 + $0x300] sm:$0xff] %v589_v16  ;;  %592 = vst [vmem:[%s2416_s23 + $0x308] sm:$0xff] %v591_v17  ;;  %v595_v19 = vld [vmem:[%s2420_s26 + $0x580] sm:$0xff]  ;;  %v597_v20 = vld [vmem:[%s2420_s26 + $0x5b0] sm:$0xff] }
  0x8a   : >> { %594 = vst [vmem:[%s2416_s23 + $0x320] sm:$0xff] %v593_v18  ;;  %v599_v21 = vld [vmem:[%s2420_s26 + $0x5b8] sm:$0xff]  ;;  %596 = vst [vmem:[%s2416_s23 + $0x328] sm:$0xff] %v595_v19  ;;  %v601_v22 = vld [vmem:[%s2420_s26 + $0x5e8] sm:$0xff] }
  0x8b   : >> { %598 = vst [vmem:[%s2416_s23 + $0x340] sm:$0xff] %v597_v20  ;;  %600 = vst [vmem:[%s2416_s23 + $0x348] sm:$0xff] %v599_v21  ;;  %v603_v23 = vld [vmem:[%s2420_s26 + $0x5f0] sm:$0xff]  ;;  %v605_v24 = vld [vmem:[%s2420_s26 + $0x620] sm:$0xff] }
  0x8c   : >> { %602 = vst [vmem:[%s2416_s23 + $0x360] sm:$0xff] %v601_v22  ;;  %604 = vst [vmem:[%s2416_s23 + $0x368] sm:$0xff] %v603_v23  ;;  %v607_v25 = vld [vmem:[%s2420_s26 + $0x628] sm:$0xff]  ;;  %v609_v26 = vld [vmem:[%s2420_s26 + $0x658] sm:$0xff]  ;;  %489 = sbr.rel (!%p486_p7) target bundleno = 112 (0x70), region = 257 }
  0x8d   : >> { %606 = vst [vmem:[%s2416_s23 + $0x380] sm:$0xff] %v605_v24  ;;  %v611_v27 = vld [vmem:[%s2420_s26 + $0x660] sm:$0xff]  ;;  %608 = vst [vmem:[%s2416_s23 + $0x388] sm:$0xff] %v607_v25  ;;  %v613_v28 = vld [vmem:[%s2420_s26 + $0x690] sm:$0xff] }
  0x8e   : >> { %610 = vst [vmem:[%s2416_s23 + $0x3a0] sm:$0xff] %v609_v26  ;;  %612 = vst [vmem:[%s2416_s23 + $0x3a8] sm:$0xff] %v611_v27  ;;  %v615_v29 = vld [vmem:[%s2420_s26 + $0x698] sm:$0xff]  ;;  %v617_v30 = vld [vmem:[%s2420_s26 + $0x6c8] sm:$0xff] }
  0x8f   : >> { %614 = vst [vmem:[%s2416_s23 + $0x3c0] sm:$0xff] %v613_v28  ;;  %616 = vst [vmem:[%s2416_s23 + $0x3c8] sm:$0xff] %v615_v29  ;;  %v619_v31 = vld [vmem:[%s2420_s26 + $0x6d0] sm:$0xff]  ;;  %s4008_s26 = smov %s2962_s10 }
  0x90   : >> { %618 = vst [vmem:[%s2416_s23 + $0x3e0] sm:$0xff] %v617_v30  ;;  %620 = vst [vmem:[%s2416_s23 + $0x3e8] sm:$0xff] %v619_v31  ;;  %s4007_s23 = smov %s2965_s6 }
  0x91 PF: > { %s3071_s7 = sand.u32 1, %s480_s21   ;;  %s1936_s11 = sshll.u32 %s2895_s25, 8 }
  0x92   : > { %s632_s17 = sshra.s32 %s1936_s11, 4  ;;  %p1893_p8 = scmp.le.s32.totalorder %s3071_s7, 0 }
  0x93   : > { %s3075_s18 = scalar_lea.vmem %s2577_s28, %s632_s17   ;;  %s3078_s9 = scalar_lea.vmem %s2581_s4, %s632_s17 [#allocation2]  }
  0x94   : > { %1781 = sbr.rel (%p1893_p8) target bundleno = 170 (0xaa), region = 262  ;;  %s4010_s23 = smov (!%p1893_p8), %s3078_s9 }
  0x95   : > { %s4011_s26 = smov (!%p1893_p8), %s3075_s18  ;;  %s3087_s27 = smov (!%p1893_p8), 0  }
  0x96   : > { %s3089_s29 = smov (!%p1893_p8), 0  }
  0x99 LB: >> { %v648_v32 = vld [vmem:[%s2436_s26] sm:$0xff]  ;;  %v650_v33 = vld [vmem:[%s2436_s26 + $0x38] sm:$0xff]  ;;  %v652_v34 = vld [vmem:[%s2436_s26 + $0x70] sm:$0xff]  ;;  %s712_s21 = sadd.s32 1, %s2440_s27  ;;  %s642_s29 = sadd.s32 1, %s2444_s29   ;;  %s2444_s29 = sphi %s3089_s29, %s642_s29   ;;  %s2440_s27 = sphi %s3087_s27, %s4014_s27   ;;  %s2436_s26 = sphi %s4011_s26, %s4013_s26   ;;  %s2432_s23 = sphi %s4010_s23, %s4012_s23  }
  0x9a   : >> { %649 = vst [vmem:[%s2432_s23] sm:$0xff] %v648_v32  ;;  %651 = vst [vmem:[%s2432_s23 + $0x20] sm:$0xff] %v650_v33  ;;  %v654_v35 = vld [vmem:[%s2436_s26 + $0xa8] sm:$0xff]  ;;  %v656_v36 = vld [vmem:[%s2436_s26 + $0xe0] sm:$0xff]  ;;  %p713_p9 = scmp.ge.s32.totalorder %s712_s21, %s3071_s7  ;;  %p641_p10 = scmp.ge.s32.totalorder %s642_s29, %s3071_s7 }
  0x9b   : >> { %653 = vst [vmem:[%s2432_s23 + $0x40] sm:$0xff] %v652_v34  ;;  %v658_v37 = vld [vmem:[%s2436_s26 + $0x118] sm:$0xff]  ;;  %655 = vst [vmem:[%s2432_s23 + $0x60] sm:$0xff] %v654_v35  ;;  %v660_v38 = vld [vmem:[%s2436_s26 + $0x150] sm:$0xff] }
  0x9c   : >> { %657 = vst [vmem:[%s2432_s23 + $0x80] sm:$0xff] %v656_v36  ;;  %659 = vst [vmem:[%s2432_s23 + $0xa0] sm:$0xff] %v658_v37  ;;  %v662_v39 = vld [vmem:[%s2436_s26 + $0x188] sm:$0xff]  ;;  %v664_v40 = vld [vmem:[%s2436_s26 + $0x1c0] sm:$0xff]  ;;  %s4044_s21 = smov (%p713_p9, %s712_s21), 0 }
  0x9d   : >> { %661 = vst [vmem:[%s2432_s23 + $0xc0] sm:$0xff] %v660_v38  ;;  %663 = vst [vmem:[%s2432_s23 + $0xe0] sm:$0xff] %v662_v39  ;;  %v666_v41 = vld [vmem:[%s2436_s26 + $0x1f8] sm:$0xff]  ;;  %v668_v42 = vld [vmem:[%s2436_s26 + $0x230] sm:$0xff]  ;;  %s1894_s25 = sshll.u32 %s4044_s21, 3  ;;  %s4014_s27 = smov %s4044_s21 }
  0x9e   : >> { %665 = vst [vmem:[%s2432_s23 + $0x100] sm:$0xff] %v664_v40  ;;  %v670_v43 = vld [vmem:[%s2436_s26 + $0x268] sm:$0xff]  ;;  %667 = vst [vmem:[%s2432_s23 + $0x120] sm:$0xff] %v666_v41  ;;  %v672_v44 = vld [vmem:[%s2436_s26 + $0x2a0] sm:$0xff]  ;;  %s3145_s8 = scalar_lea.vmem %s3075_s18, %s1894_s25   ;;  %s718_s10 = scalar_lea.vmem %s3078_s9, %s1894_s25 [#allocation2]  }
  0x9f   : >> { %669 = vst [vmem:[%s2432_s23 + $0x140] sm:$0xff] %v668_v42  ;;  %671 = vst [vmem:[%s2432_s23 + $0x160] sm:$0xff] %v670_v43  ;;  %v674_v45 = vld [vmem:[%s2436_s26 + $0x2d8] sm:$0xff]  ;;  %v676_v46 = vld [vmem:[%s2436_s26 + $0x310] sm:$0xff] }
  0xa0   : >> { %673 = vst [vmem:[%s2432_s23 + $0x180] sm:$0xff] %v672_v44  ;;  %675 = vst [vmem:[%s2432_s23 + $0x1a0] sm:$0xff] %v674_v45  ;;  %v678_v47 = vld [vmem:[%s2436_s26 + $0x348] sm:$0xff]  ;;  %v680_v48 = vld [vmem:[%s2436_s26 + $0x380] sm:$0xff] }
  0xa1   : >> { %677 = vst [vmem:[%s2432_s23 + $0x1c0] sm:$0xff] %v676_v46  ;;  %v682_v49 = vld [vmem:[%s2436_s26 + $0x3b8] sm:$0xff]  ;;  %679 = vst [vmem:[%s2432_s23 + $0x1e0] sm:$0xff] %v678_v47  ;;  %v684_v50 = vld [vmem:[%s2436_s26 + $0x3f0] sm:$0xff] }
  0xa2   : >> { %681 = vst [vmem:[%s2432_s23 + $0x200] sm:$0xff] %v680_v48  ;;  %683 = vst [vmem:[%s2432_s23 + $0x220] sm:$0xff] %v682_v49  ;;  %v686_v51 = vld [vmem:[%s2436_s26 + $0x428] sm:$0xff]  ;;  %v688_v52 = vld [vmem:[%s2436_s26 + $0x460] sm:$0xff] }
  0xa3   : >> { %685 = vst [vmem:[%s2432_s23 + $0x240] sm:$0xff] %v684_v50  ;;  %687 = vst [vmem:[%s2432_s23 + $0x260] sm:$0xff] %v686_v51  ;;  %v690_v53 = vld [vmem:[%s2436_s26 + $0x498] sm:$0xff]  ;;  %v692_v54 = vld [vmem:[%s2436_s26 + $0x4d0] sm:$0xff] }
  0xa4   : >> { %689 = vst [vmem:[%s2432_s23 + $0x280] sm:$0xff] %v688_v52  ;;  %v694_v55 = vld [vmem:[%s2436_s26 + $0x508] sm:$0xff]  ;;  %691 = vst [vmem:[%s2432_s23 + $0x2a0] sm:$0xff] %v690_v53  ;;  %v696_v56 = vld [vmem:[%s2436_s26 + $0x540] sm:$0xff] }
  0xa5   : >> { %693 = vst [vmem:[%s2432_s23 + $0x2c0] sm:$0xff] %v692_v54  ;;  %695 = vst [vmem:[%s2432_s23 + $0x2e0] sm:$0xff] %v694_v55  ;;  %v698_v57 = vld [vmem:[%s2436_s26 + $0x578] sm:$0xff]  ;;  %v700_v58 = vld [vmem:[%s2436_s26 + $0x5b0] sm:$0xff]  ;;  %644 = sbr.rel (!%p641_p10) target bundleno = 153 (0x99), region = 268 }
  0xa6   : >> { %697 = vst [vmem:[%s2432_s23 + $0x300] sm:$0xff] %v696_v56  ;;  %699 = vst [vmem:[%s2432_s23 + $0x320] sm:$0xff] %v698_v57  ;;  %v702_v59 = vld [vmem:[%s2436_s26 + $0x5e8] sm:$0xff]  ;;  %v704_v60 = vld [vmem:[%s2436_s26 + $0x620] sm:$0xff] }
  0xa7   : >> { %701 = vst [vmem:[%s2432_s23 + $0x340] sm:$0xff] %v700_v58  ;;  %v706_v61 = vld [vmem:[%s2436_s26 + $0x658] sm:$0xff]  ;;  %703 = vst [vmem:[%s2432_s23 + $0x360] sm:$0xff] %v702_v59  ;;  %v708_v62 = vld [vmem:[%s2436_s26 + $0x690] sm:$0xff] }
  0xa8   : >> { %705 = vst [vmem:[%s2432_s23 + $0x380] sm:$0xff] %v704_v60  ;;  %707 = vst [vmem:[%s2432_s23 + $0x3a0] sm:$0xff] %v706_v61  ;;  %v710_v63 = vld [vmem:[%s2436_s26 + $0x6c8] sm:$0xff]  ;;  %s4013_s26 = smov %s3145_s8 }
  0xa9   : >> { %709 = vst [vmem:[%s2432_s23 + $0x3c0] sm:$0xff] %v708_v62  ;;  %711 = vst [vmem:[%s2432_s23 + $0x3e0] sm:$0xff] %v710_v63  ;;  %s4012_s23 = smov %s718_s10 }
  0xaa PF: > { %s2510_s6 = smov 1  }
  0xab   : > { %s719_s11 = sshll.u32 %s2510_s6, %s2585_s5 }
  0xac   : > { %s3186_s17 = sadd.s32 4294967295, %s719_s11 }
  0xad   : > { %v729_v0 = vld [vmem:[%s2888_s22] sm:%s3186_s17]  ;;  %v731_v1 = vld [vmem:[%s2888_s22 + $0x38] sm:%s3186_s17] }
  0xae   : > { %730 = vst [vmem:[%s2891_s24] sm:%s3186_s17] %v729_v0  ;;  %732 = vst [vmem:[%s2891_s24 + $0x20] sm:%s3186_s17] %v731_v1 }
  0xaf   : > { %v733_v2 = vld [vmem:[%s2888_s22 + $0x70] sm:%s3186_s17]  ;;  %v735_v3 = vld [vmem:[%s2888_s22 + $0xa8] sm:%s3186_s17] }
  0xb0   : > { %734 = vst [vmem:[%s2891_s24 + $0x40] sm:%s3186_s17] %v733_v2  ;;  %736 = vst [vmem:[%s2891_s24 + $0x60] sm:%s3186_s17] %v735_v3 }
  0xb1   : > { %v737_v4 = vld [vmem:[%s2888_s22 + $0xe0] sm:%s3186_s17]  ;;  %v739_v5 = vld [vmem:[%s2888_s22 + $0x118] sm:%s3186_s17] }
  0xb2   : > { %738 = vst [vmem:[%s2891_s24 + $0x80] sm:%s3186_s17] %v737_v4  ;;  %740 = vst [vmem:[%s2891_s24 + $0xa0] sm:%s3186_s17] %v739_v5 }
  0xb3   : > { %v741_v6 = vld [vmem:[%s2888_s22 + $0x150] sm:%s3186_s17]  ;;  %v743_v7 = vld [vmem:[%s2888_s22 + $0x188] sm:%s3186_s17] }
  0xb4   : > { %742 = vst [vmem:[%s2891_s24 + $0xc0] sm:%s3186_s17] %v741_v6  ;;  %744 = vst [vmem:[%s2891_s24 + $0xe0] sm:%s3186_s17] %v743_v7 }
  0xb5   : > { %v745_v8 = vld [vmem:[%s2888_s22 + $0x1c0] sm:%s3186_s17]  ;;  %v747_v9 = vld [vmem:[%s2888_s22 + $0x1f8] sm:%s3186_s17] }
  0xb6   : > { %746 = vst [vmem:[%s2891_s24 + $0x100] sm:%s3186_s17] %v745_v8  ;;  %748 = vst [vmem:[%s2891_s24 + $0x120] sm:%s3186_s17] %v747_v9 }
  0xb7   : > { %v749_v10 = vld [vmem:[%s2888_s22 + $0x230] sm:%s3186_s17]  ;;  %v751_v11 = vld [vmem:[%s2888_s22 + $0x268] sm:%s3186_s17] }
  0xb8   : > { %750 = vst [vmem:[%s2891_s24 + $0x140] sm:%s3186_s17] %v749_v10  ;;  %752 = vst [vmem:[%s2891_s24 + $0x160] sm:%s3186_s17] %v751_v11 }
  0xb9   : > { %v753_v12 = vld [vmem:[%s2888_s22 + $0x2a0] sm:%s3186_s17]  ;;  %v755_v13 = vld [vmem:[%s2888_s22 + $0x2d8] sm:%s3186_s17] }
  0xba   : > { %754 = vst [vmem:[%s2891_s24 + $0x180] sm:%s3186_s17] %v753_v12  ;;  %756 = vst [vmem:[%s2891_s24 + $0x1a0] sm:%s3186_s17] %v755_v13 }
  0xbb   : > { %v757_v14 = vld [vmem:[%s2888_s22 + $0x310] sm:%s3186_s17]  ;;  %v759_v15 = vld [vmem:[%s2888_s22 + $0x348] sm:%s3186_s17] }
  0xbc   : > { %758 = vst [vmem:[%s2891_s24 + $0x1c0] sm:%s3186_s17] %v757_v14  ;;  %760 = vst [vmem:[%s2891_s24 + $0x1e0] sm:%s3186_s17] %v759_v15 }
  0xbd   : > { %v761_v16 = vld [vmem:[%s2888_s22 + $0x380] sm:%s3186_s17]  ;;  %v763_v17 = vld [vmem:[%s2888_s22 + $0x3b8] sm:%s3186_s17] }
  0xbe   : > { %762 = vst [vmem:[%s2891_s24 + $0x200] sm:%s3186_s17] %v761_v16  ;;  %764 = vst [vmem:[%s2891_s24 + $0x220] sm:%s3186_s17] %v763_v17 }
  0xbf   : > { %v765_v18 = vld [vmem:[%s2888_s22 + $0x3f0] sm:%s3186_s17]  ;;  %v767_v19 = vld [vmem:[%s2888_s22 + $0x428] sm:%s3186_s17] }
  0xc0   : > { %766 = vst [vmem:[%s2891_s24 + $0x240] sm:%s3186_s17] %v765_v18  ;;  %768 = vst [vmem:[%s2891_s24 + $0x260] sm:%s3186_s17] %v767_v19 }
  0xc1   : > { %v769_v20 = vld [vmem:[%s2888_s22 + $0x460] sm:%s3186_s17]  ;;  %v771_v21 = vld [vmem:[%s2888_s22 + $0x498] sm:%s3186_s17] }
  0xc2   : > { %770 = vst [vmem:[%s2891_s24 + $0x280] sm:%s3186_s17] %v769_v20  ;;  %772 = vst [vmem:[%s2891_s24 + $0x2a0] sm:%s3186_s17] %v771_v21 }
  0xc3   : > { %v773_v22 = vld [vmem:[%s2888_s22 + $0x4d0] sm:%s3186_s17]  ;;  %v775_v23 = vld [vmem:[%s2888_s22 + $0x508] sm:%s3186_s17] }
  0xc4   : > { %774 = vst [vmem:[%s2891_s24 + $0x2c0] sm:%s3186_s17] %v773_v22  ;;  %776 = vst [vmem:[%s2891_s24 + $0x2e0] sm:%s3186_s17] %v775_v23 }
  0xc5   : > { %v777_v24 = vld [vmem:[%s2888_s22 + $0x540] sm:%s3186_s17]  ;;  %v779_v25 = vld [vmem:[%s2888_s22 + $0x578] sm:%s3186_s17] }
  0xc6   : > { %778 = vst [vmem:[%s2891_s24 + $0x300] sm:%s3186_s17] %v777_v24  ;;  %780 = vst [vmem:[%s2891_s24 + $0x320] sm:%s3186_s17] %v779_v25 }
  0xc7   : > { %v781_v26 = vld [vmem:[%s2888_s22 + $0x5b0] sm:%s3186_s17]  ;;  %v783_v27 = vld [vmem:[%s2888_s22 + $0x5e8] sm:%s3186_s17] }
  0xc8   : > { %782 = vst [vmem:[%s2891_s24 + $0x340] sm:%s3186_s17] %v781_v26  ;;  %784 = vst [vmem:[%s2891_s24 + $0x360] sm:%s3186_s17] %v783_v27 }
  0xc9   : > { %v785_v28 = vld [vmem:[%s2888_s22 + $0x620] sm:%s3186_s17]  ;;  %v787_v29 = vld [vmem:[%s2888_s22 + $0x658] sm:%s3186_s17] }
  0xca   : > { %786 = vst [vmem:[%s2891_s24 + $0x380] sm:%s3186_s17] %v785_v28  ;;  %788 = vst [vmem:[%s2891_s24 + $0x3a0] sm:%s3186_s17] %v787_v29 }
  0xcb   : > { %v789_v30 = vld [vmem:[%s2888_s22 + $0x690] sm:%s3186_s17]  ;;  %v791_v31 = vld [vmem:[%s2888_s22 + $0x6c8] sm:%s3186_s17] }
  0xcc   : > { %790 = vst [vmem:[%s2891_s24 + $0x3c0] sm:%s3186_s17] %v789_v30  ;;  %792 = vst [vmem:[%s2891_s24 + $0x3e0] sm:%s3186_s17] %v791_v31 }
  0xcd PF: > { %p1897_p11 = scmp.ge.u32.totalorder %s2579_s30, 8 }
  0xce   : > { %s2511_s5 = smov (!%p1897_p11), 1  }
  0xcf   : > { %153 = sbr.rel (%p1897_p11) target bundleno = 244 (0xf4), region = 40  ;;  %s154_s22 = sshll.u32 (!%p1897_p11), %s2511_s5, %s2579_s30 }
  0xd0   : > { %s3318_s24 = sadd.s32 (!%p1897_p11), 4294967295, %s154_s22 }
  0xd4   : > { %v164_v32 = vld [vmem:[%s2577_s28] sm:%s3318_s24]  ;;  %v166_v33 = vld [vmem:[%s2577_s28 + $0x38] sm:%s3318_s24] }
  0xd5   : > { %165 = vst [vmem:[%s2581_s4] sm:%s3318_s24] %v164_v32  ;;  %167 = vst [vmem:[%s2581_s4 + $0x20] sm:%s3318_s24] %v166_v33 }
  0xd6   : > { %v168_v34 = vld [vmem:[%s2577_s28 + $0x70] sm:%s3318_s24]  ;;  %v170_v35 = vld [vmem:[%s2577_s28 + $0xa8] sm:%s3318_s24] }
  0xd7   : > { %169 = vst [vmem:[%s2581_s4 + $0x40] sm:%s3318_s24] %v168_v34  ;;  %171 = vst [vmem:[%s2581_s4 + $0x60] sm:%s3318_s24] %v170_v35 }
  0xd8   : > { %v172_v36 = vld [vmem:[%s2577_s28 + $0xe0] sm:%s3318_s24]  ;;  %v174_v37 = vld [vmem:[%s2577_s28 + $0x118] sm:%s3318_s24] }
  0xd9   : > { %173 = vst [vmem:[%s2581_s4 + $0x80] sm:%s3318_s24] %v172_v36  ;;  %175 = vst [vmem:[%s2581_s4 + $0xa0] sm:%s3318_s24] %v174_v37 }
  0xda   : > { %v176_v38 = vld [vmem:[%s2577_s28 + $0x150] sm:%s3318_s24]  ;;  %v178_v39 = vld [vmem:[%s2577_s28 + $0x188] sm:%s3318_s24] }
  0xdb   : > { %177 = vst [vmem:[%s2581_s4 + $0xc0] sm:%s3318_s24] %v176_v38  ;;  %179 = vst [vmem:[%s2581_s4 + $0xe0] sm:%s3318_s24] %v178_v39 }
  0xdc   : > { %v180_v40 = vld [vmem:[%s2577_s28 + $0x1c0] sm:%s3318_s24]  ;;  %v182_v41 = vld [vmem:[%s2577_s28 + $0x1f8] sm:%s3318_s24] }
  0xdd   : > { %181 = vst [vmem:[%s2581_s4 + $0x100] sm:%s3318_s24] %v180_v40  ;;  %183 = vst [vmem:[%s2581_s4 + $0x120] sm:%s3318_s24] %v182_v41 }
  0xde   : > { %v184_v42 = vld [vmem:[%s2577_s28 + $0x230] sm:%s3318_s24]  ;;  %v186_v43 = vld [vmem:[%s2577_s28 + $0x268] sm:%s3318_s24] }
  0xdf   : > { %185 = vst [vmem:[%s2581_s4 + $0x140] sm:%s3318_s24] %v184_v42  ;;  %187 = vst [vmem:[%s2581_s4 + $0x160] sm:%s3318_s24] %v186_v43 }
  0xe0   : > { %v188_v44 = vld [vmem:[%s2577_s28 + $0x2a0] sm:%s3318_s24]  ;;  %v190_v45 = vld [vmem:[%s2577_s28 + $0x2d8] sm:%s3318_s24] }
  0xe1   : > { %189 = vst [vmem:[%s2581_s4 + $0x180] sm:%s3318_s24] %v188_v44  ;;  %191 = vst [vmem:[%s2581_s4 + $0x1a0] sm:%s3318_s24] %v190_v45 }
  0xe2   : > { %v192_v46 = vld [vmem:[%s2577_s28 + $0x310] sm:%s3318_s24]  ;;  %v194_v47 = vld [vmem:[%s2577_s28 + $0x348] sm:%s3318_s24] }
  0xe3   : > { %193 = vst [vmem:[%s2581_s4 + $0x1c0] sm:%s3318_s24] %v192_v46  ;;  %195 = vst [vmem:[%s2581_s4 + $0x1e0] sm:%s3318_s24] %v194_v47 }
  0xe4   : > { %v196_v48 = vld [vmem:[%s2577_s28 + $0x380] sm:%s3318_s24]  ;;  %v198_v49 = vld [vmem:[%s2577_s28 + $0x3b8] sm:%s3318_s24] }
  0xe5   : > { %197 = vst [vmem:[%s2581_s4 + $0x200] sm:%s3318_s24] %v196_v48  ;;  %199 = vst [vmem:[%s2581_s4 + $0x220] sm:%s3318_s24] %v198_v49 }
  0xe6   : > { %v200_v50 = vld [vmem:[%s2577_s28 + $0x3f0] sm:%s3318_s24]  ;;  %v202_v51 = vld [vmem:[%s2577_s28 + $0x428] sm:%s3318_s24] }
  0xe7   : > { %201 = vst [vmem:[%s2581_s4 + $0x240] sm:%s3318_s24] %v200_v50  ;;  %203 = vst [vmem:[%s2581_s4 + $0x260] sm:%s3318_s24] %v202_v51 }
  0xe8   : > { %v204_v52 = vld [vmem:[%s2577_s28 + $0x460] sm:%s3318_s24]  ;;  %v206_v53 = vld [vmem:[%s2577_s28 + $0x498] sm:%s3318_s24] }
  0xe9   : > { %205 = vst [vmem:[%s2581_s4 + $0x280] sm:%s3318_s24] %v204_v52  ;;  %207 = vst [vmem:[%s2581_s4 + $0x2a0] sm:%s3318_s24] %v206_v53 }
  0xea   : > { %v208_v54 = vld [vmem:[%s2577_s28 + $0x4d0] sm:%s3318_s24]  ;;  %v210_v55 = vld [vmem:[%s2577_s28 + $0x508] sm:%s3318_s24] }
  0xeb   : > { %209 = vst [vmem:[%s2581_s4 + $0x2c0] sm:%s3318_s24] %v208_v54  ;;  %211 = vst [vmem:[%s2581_s4 + $0x2e0] sm:%s3318_s24] %v210_v55 }
  0xec   : > { %v212_v56 = vld [vmem:[%s2577_s28 + $0x540] sm:%s3318_s24]  ;;  %v214_v57 = vld [vmem:[%s2577_s28 + $0x578] sm:%s3318_s24] }
  0xed   : > { %213 = vst [vmem:[%s2581_s4 + $0x300] sm:%s3318_s24] %v212_v56  ;;  %215 = vst [vmem:[%s2581_s4 + $0x320] sm:%s3318_s24] %v214_v57 }
  0xee   : > { %v216_v58 = vld [vmem:[%s2577_s28 + $0x5b0] sm:%s3318_s24]  ;;  %v218_v59 = vld [vmem:[%s2577_s28 + $0x5e8] sm:%s3318_s24] }
  0xef   : > { %217 = vst [vmem:[%s2581_s4 + $0x340] sm:%s3318_s24] %v216_v58  ;;  %219 = vst [vmem:[%s2581_s4 + $0x360] sm:%s3318_s24] %v218_v59 }
  0xf0   : > { %v220_v60 = vld [vmem:[%s2577_s28 + $0x620] sm:%s3318_s24]  ;;  %v222_v61 = vld [vmem:[%s2577_s28 + $0x658] sm:%s3318_s24] }
  0xf1   : > { %221 = vst [vmem:[%s2581_s4 + $0x380] sm:%s3318_s24] %v220_v60  ;;  %223 = vst [vmem:[%s2581_s4 + $0x3a0] sm:%s3318_s24] %v222_v61 }
  0xf2   : > { %v224_v62 = vld [vmem:[%s2577_s28 + $0x690] sm:%s3318_s24]  ;;  %v226_v63 = vld [vmem:[%s2577_s28 + $0x6c8] sm:%s3318_s24] }
  0xf3   : > { %225 = vst [vmem:[%s2581_s4 + $0x3c0] sm:%s3318_s24] %v224_v62  ;;  %227 = vst [vmem:[%s2581_s4 + $0x3e0] sm:%s3318_s24] %v226_v63 }
  0xf4 PF: > { %p1899_p12 = scmp.ge.s32.totalorder %s2380_s14, 1  ;;  %p795_p13 = scmp.lt.s32.totalorder %s2380_s14, 3 }
  0xf6   : > { %p796_p0 = pnand %p1899_p12, %p795_p13 }
  0xf7   : > { %s802_s30 = sand.u32 (!%p796_p0), 1, %s2372_s12  }
  0xf8   : > { %799 = sbr.rel (%p796_p0) target bundleno = 659 (0x293), region = 94  ;;  %s1900_s28 = sshll.u32 (!%p796_p0), %s802_s30, 10 }
  0xf9   : > { %s3459_s14 = scalar_lea.vmem (!%p796_p0), [#allocation2], %s1900_s28  ;;  %s1901_s23 = sshll.u32 (!%p796_p0), %s802_s30, 7 }
  0xfa   : > { %s3621_s26 = scalar_lea.vmem (!%p796_p0), [#allocation3], %s1901_s23  }
  0xfd   : > { %v835_v0 = vld [vmem:[%s3990_s0 + $0x8] sm:$0xff]  ;;  %v2512_v1 = vmov 0   ;;  %v970_v2 = vld [vmem:[%s3992_s2] sm:$0xff]  ;;  %v905_v4 = vld [vmem:[%s3459_s14 + $0x1f8] sm:$0xff]  ;;  %s1903_s12 = sshll.u32 (%p2566_p5), %s2551_s15, 2  ;;  %s1938_s30 = sshll.u32 (%p2566_p5), %s2551_s15, 5 }
  0xfe   : > { %1058 = vmatprep.mubr.f32.mxu0 %v835_v0  ;;  %1147 = vmatprep.mubr.f32.mxu1 %v835_v0  ;;  %v903_v3 = vld [vmem:[%s3459_s14 + $0x1e8] sm:$0xff]  ;;  %v902_v5 = vld [vmem:[%s3459_s14 + $0x1e0] sm:$0xff]  ;;  %v904_v6 = vld [vmem:[%s3459_s14 + $0x1f0] sm:$0xff]  ;;  %s1212_s27 = ssub.s32 (%p2566_p5), 7, %s1903_s12  ;;  %s3646_s25 = scalar_lea.vmem (%p2566_p5), %s3993_s3, %s1938_s30  }
  0xff   : > { %2228 = vset.pattern.permute.xlu0 %v2512_v1  ;;  %2229 = vset.pattern.permute.xlu1 %v2512_v1  ;;  %v899_v7 = vld [vmem:[%s3459_s14 + $0x1c8] sm:$0xff]  ;;  %v901_v8 = vld [vmem:[%s3459_s14 + $0x1d8] sm:$0xff]  ;;  %v898_v9 = vld [vmem:[%s3459_s14 + $0x1c0] sm:$0xff]  ;;  %p1213_p1 = scmp.lt.s32.totalorder (%p2566_p5), %s1212_s27, 4 }
 0x100   : > { %976 = vperm.xlu0 %2228, %v970_v2   ;;  %994 = vmatprep.subr.mxu0 %v903_v3  ;;  %v900_v10 = vld [vmem:[%s3459_s14 + $0x1d0] sm:$0xff]  ;;  %v895_v11 = vld [vmem:[%s3459_s14 + $0x1a8] sm:$0xff]  ;;  %v897_v12 = vld [vmem:[%s3459_s14 + $0x1b8] sm:$0xff] }
 0x101   : > { %1083 = vmatprep.subr.mxu1 %v905_v4  ;;  %995 = vmatpush1.msra.mxu0 %v902_v5  ;;  %v894_v13 = vld [vmem:[%s3459_s14 + $0x1a0] sm:$0xff]  ;;  %v896_v14 = vld [vmem:[%s3459_s14 + $0x1b0] sm:$0xff]  ;;  %v891_v15 = vld [vmem:[%s3459_s14 + $0x188] sm:$0xff] }
 0x102   : > { %1084 = vmatpush1.msra.mxu1 %v904_v6  ;;  %996 = vmatprep.subr.mxu0 %v899_v7  ;;  %v893_v16 = vld [vmem:[%s3459_s14 + $0x198] sm:$0xff]  ;;  %v890_v17 = vld [vmem:[%s3459_s14 + $0x180] sm:$0xff]  ;;  %v892_v18 = vld [vmem:[%s3459_s14 + $0x190] sm:$0xff] }
 0x103   : > { %1085 = vmatprep.subr.mxu1 %v901_v8  ;;  %997 = vmatpush1.msra.mxu0 %v898_v9  ;;  %v887_v19 = vld [vmem:[%s3459_s14 + $0x168] sm:$0xff]  ;;  %v889_v20 = vld [vmem:[%s3459_s14 + $0x178] sm:$0xff]  ;;  %v886_v21 = vld [vmem:[%s3459_s14 + $0x160] sm:$0xff] }
 0x104   : > { %1086 = vmatpush1.msra.mxu1 %v900_v10  ;;  %998 = vmatprep.subr.mxu0 %v895_v11  ;;  %v888_v22 = vld [vmem:[%s3459_s14 + $0x170] sm:$0xff]  ;;  %v883_v23 = vld [vmem:[%s3459_s14 + $0x148] sm:$0xff]  ;;  %v885_v24 = vld [vmem:[%s3459_s14 + $0x158] sm:$0xff] }
 0x105   : > { %1087 = vmatprep.subr.mxu1 %v897_v12  ;;  %999 = vmatpush1.msra.mxu0 %v894_v13  ;;  %v882_v25 = vld [vmem:[%s3459_s14 + $0x140] sm:$0xff]  ;;  %v884_v26 = vld [vmem:[%s3459_s14 + $0x150] sm:$0xff]  ;;  %v879_v27 = vld [vmem:[%s3459_s14 + $0x128] sm:$0xff] }
 0x106   : > { %1088 = vmatpush1.msra.mxu1 %v896_v14  ;;  %1000 = vmatprep.subr.mxu0 %v891_v15  ;;  %v881_v28 = vld [vmem:[%s3459_s14 + $0x138] sm:$0xff]  ;;  %v878_v29 = vld [vmem:[%s3459_s14 + $0x120] sm:$0xff]  ;;  %v880_v30 = vld [vmem:[%s3459_s14 + $0x130] sm:$0xff] }
 0x107   : > { %1089 = vmatprep.subr.mxu1 %v893_v16  ;;  %1001 = vmatpush1.msra.mxu0 %v890_v17  ;;  %v875_v31 = vld [vmem:[%s3459_s14 + $0x108] sm:$0xff]  ;;  %v877_v32 = vld [vmem:[%s3459_s14 + $0x118] sm:$0xff]  ;;  %v874_v33 = vld [vmem:[%s3459_s14 + $0x100] sm:$0xff] }
 0x108   : > { %1090 = vmatpush1.msra.mxu1 %v892_v18  ;;  %1002 = vmatprep.subr.mxu0 %v887_v19  ;;  %v876_v34 = vld [vmem:[%s3459_s14 + $0x110] sm:$0xff]  ;;  %v871_v35 = vld [vmem:[%s3459_s14 + $0xe8] sm:$0xff]  ;;  %v873_v36 = vld [vmem:[%s3459_s14 + $0xf8] sm:$0xff] }
 0x109   : > { %1091 = vmatprep.subr.mxu1 %v889_v20  ;;  %1003 = vmatpush1.msra.mxu0 %v886_v21  ;;  %v870_v37 = vld [vmem:[%s3459_s14 + $0xe0] sm:$0xff]  ;;  %v872_v38 = vld [vmem:[%s3459_s14 + $0xf0] sm:$0xff]  ;;  %v867_v39 = vld [vmem:[%s3459_s14 + $0xc8] sm:$0xff] }
 0x10a   : > { %1092 = vmatpush1.msra.mxu1 %v888_v22  ;;  %1004 = vmatprep.subr.mxu0 %v883_v23  ;;  %v869_v40 = vld [vmem:[%s3459_s14 + $0xd8] sm:$0xff]  ;;  %v866_v41 = vld [vmem:[%s3459_s14 + $0xc0] sm:$0xff]  ;;  %v868_v42 = vld [vmem:[%s3459_s14 + $0xd0] sm:$0xff] }
 0x10b   : > { %1093 = vmatprep.subr.mxu1 %v885_v24  ;;  %1005 = vmatpush1.msra.mxu0 %v882_v25  ;;  %v863_v43 = vld [vmem:[%s3459_s14 + $0xa8] sm:$0xff]  ;;  %v865_v44 = vld [vmem:[%s3459_s14 + $0xb8] sm:$0xff]  ;;  %v862_v45 = vld [vmem:[%s3459_s14 + $0xa0] sm:$0xff] }
 0x10c   : > { %1094 = vmatpush1.msra.mxu1 %v884_v26  ;;  %1006 = vmatprep.subr.mxu0 %v879_v27  ;;  %v864_v46 = vld [vmem:[%s3459_s14 + $0xb0] sm:$0xff]  ;;  %v859_v47 = vld [vmem:[%s3459_s14 + $0x88] sm:$0xff]  ;;  %v861_v48 = vld [vmem:[%s3459_s14 + $0x98] sm:$0xff] }
 0x10d   : > { %1095 = vmatprep.subr.mxu1 %v881_v28  ;;  %1007 = vmatpush1.msra.mxu0 %v878_v29  ;;  %v858_v49 = vld [vmem:[%s3459_s14 + $0x80] sm:$0xff]  ;;  %v860_v50 = vld [vmem:[%s3459_s14 + $0x90] sm:$0xff]  ;;  %v855_v51 = vld [vmem:[%s3459_s14 + $0x68] sm:$0xff] }
 0x10e   : > { %1096 = vmatpush1.msra.mxu1 %v880_v30  ;;  %1008 = vmatprep.subr.mxu0 %v875_v31  ;;  %v857_v52 = vld [vmem:[%s3459_s14 + $0x78] sm:$0xff]  ;;  %v854_v53 = vld [vmem:[%s3459_s14 + $0x60] sm:$0xff]  ;;  %v856_v54 = vld [vmem:[%s3459_s14 + $0x70] sm:$0xff] }
 0x10f   : > { %1097 = vmatprep.subr.mxu1 %v877_v32  ;;  %1009 = vmatpush1.msra.mxu0 %v874_v33  ;;  %v851_v55 = vld [vmem:[%s3459_s14 + $0x48] sm:$0xff]  ;;  %v853_v56 = vld [vmem:[%s3459_s14 + $0x58] sm:$0xff]  ;;  %v850_v57 = vld [vmem:[%s3459_s14 + $0x40] sm:$0xff] }
 0x110   : > { %1098 = vmatpush1.msra.mxu1 %v876_v34  ;;  %1010 = vmatprep.subr.mxu0 %v871_v35  ;;  %v852_v58 = vld [vmem:[%s3459_s14 + $0x50] sm:$0xff]  ;;  %v847_v59 = vld [vmem:[%s3459_s14 + $0x28] sm:$0xff]  ;;  %v849_v60 = vld [vmem:[%s3459_s14 + $0x38] sm:$0xff] }
 0x111   : > { %1099 = vmatprep.subr.mxu1 %v873_v36  ;;  %1011 = vmatpush1.msra.mxu0 %v870_v37  ;;  %v846_v61 = vld [vmem:[%s3459_s14 + $0x20] sm:$0xff]  ;;  %v848_v62 = vld [vmem:[%s3459_s14 + $0x30] sm:$0xff]  ;;  %v843_v63 = vld [vmem:[%s3459_s14 + $0x8] sm:$0xff] }
 0x112   : > { %1100 = vmatpush1.msra.mxu1 %v872_v38  ;;  %1012 = vmatprep.subr.mxu0 %v867_v39  ;;  %v845_v0 = vld [vmem:[%s3459_s14 + $0x18] sm:$0xff]  ;;  %v842_v1 = vld [vmem:[%s3459_s14] sm:$0xff]  ;;  %v844_v2 = vld [vmem:[%s3459_s14 + $0x10] sm:$0xff] }
 0x113   : > { %1101 = vmatprep.subr.mxu1 %v869_v40  ;;  %1013 = vmatpush1.msra.mxu0 %v866_v41  ;;  %v967_v3 = vld [vmem:[%s3459_s14 + $0x3e8] sm:$0xff]  ;;  %v969_v4 = vld [vmem:[%s3459_s14 + $0x3f8] sm:$0xff]  ;;  %v966_v5 = vld [vmem:[%s3459_s14 + $0x3e0] sm:$0xff] }
 0x114   : > { %1102 = vmatpush1.msra.mxu1 %v868_v42  ;;  %1014 = vmatprep.subr.mxu0 %v863_v43  ;;  %v968_v6 = vld [vmem:[%s3459_s14 + $0x3f0] sm:$0xff]  ;;  %v963_v7 = vld [vmem:[%s3459_s14 + $0x3c8] sm:$0xff]  ;;  %v965_v8 = vld [vmem:[%s3459_s14 + $0x3d8] sm:$0xff] }
 0x115   : > { %1103 = vmatprep.subr.mxu1 %v865_v44  ;;  %1015 = vmatpush1.msra.mxu0 %v862_v45  ;;  %v962_v9 = vld [vmem:[%s3459_s14 + $0x3c0] sm:$0xff]  ;;  %v964_v10 = vld [vmem:[%s3459_s14 + $0x3d0] sm:$0xff]  ;;  %v959_v11 = vld [vmem:[%s3459_s14 + $0x3a8] sm:$0xff] }
 0x116   : > { %1104 = vmatpush1.msra.mxu1 %v864_v46  ;;  %1016 = vmatprep.subr.mxu0 %v859_v47  ;;  %v961_v12 = vld [vmem:[%s3459_s14 + $0x3b8] sm:$0xff]  ;;  %v958_v13 = vld [vmem:[%s3459_s14 + $0x3a0] sm:$0xff]  ;;  %v960_v14 = vld [vmem:[%s3459_s14 + $0x3b0] sm:$0xff] }
 0x117   : > { %1105 = vmatprep.subr.mxu1 %v861_v48  ;;  %1017 = vmatpush1.msra.mxu0 %v858_v49  ;;  %v955_v15 = vld [vmem:[%s3459_s14 + $0x388] sm:$0xff]  ;;  %v957_v16 = vld [vmem:[%s3459_s14 + $0x398] sm:$0xff]  ;;  %v954_v17 = vld [vmem:[%s3459_s14 + $0x380] sm:$0xff] }
 0x118   : > { %1106 = vmatpush1.msra.mxu1 %v860_v50  ;;  %1018 = vmatprep.subr.mxu0 %v855_v51  ;;  %v956_v18 = vld [vmem:[%s3459_s14 + $0x390] sm:$0xff]  ;;  %v951_v19 = vld [vmem:[%s3459_s14 + $0x368] sm:$0xff]  ;;  %v953_v20 = vld [vmem:[%s3459_s14 + $0x378] sm:$0xff] }
 0x119   : > { %1107 = vmatprep.subr.mxu1 %v857_v52  ;;  %1019 = vmatpush1.msra.mxu0 %v854_v53  ;;  %v950_v21 = vld [vmem:[%s3459_s14 + $0x360] sm:$0xff]  ;;  %v952_v22 = vld [vmem:[%s3459_s14 + $0x370] sm:$0xff]  ;;  %v947_v23 = vld [vmem:[%s3459_s14 + $0x348] sm:$0xff] }
 0x11a   : > { %1108 = vmatpush1.msra.mxu1 %v856_v54  ;;  %1020 = vmatprep.subr.mxu0 %v851_v55  ;;  %v949_v24 = vld [vmem:[%s3459_s14 + $0x358] sm:$0xff]  ;;  %v946_v25 = vld [vmem:[%s3459_s14 + $0x340] sm:$0xff]  ;;  %v948_v26 = vld [vmem:[%s3459_s14 + $0x350] sm:$0xff] }
 0x11b   : > { %1109 = vmatprep.subr.mxu1 %v853_v56  ;;  %1021 = vmatpush1.msra.mxu0 %v850_v57  ;;  %v943_v27 = vld [vmem:[%s3459_s14 + $0x328] sm:$0xff]  ;;  %v945_v28 = vld [vmem:[%s3459_s14 + $0x338] sm:$0xff]  ;;  %v942_v29 = vld [vmem:[%s3459_s14 + $0x320] sm:$0xff] }
 0x11c   : > { %1110 = vmatpush1.msra.mxu1 %v852_v58  ;;  %1022 = vmatprep.subr.mxu0 %v847_v59  ;;  %v944_v30 = vld [vmem:[%s3459_s14 + $0x330] sm:$0xff]  ;;  %v939_v31 = vld [vmem:[%s3459_s14 + $0x308] sm:$0xff]  ;;  %v941_v32 = vld [vmem:[%s3459_s14 + $0x318] sm:$0xff] }
 0x11d   : > { %1111 = vmatprep.subr.mxu1 %v849_v60  ;;  %1023 = vmatpush1.msra.mxu0 %v846_v61  ;;  %v938_v33 = vld [vmem:[%s3459_s14 + $0x300] sm:$0xff]  ;;  %v940_v34 = vld [vmem:[%s3459_s14 + $0x310] sm:$0xff]  ;;  %v935_v35 = vld [vmem:[%s3459_s14 + $0x2e8] sm:$0xff] }
 0x11e   : > { %1112 = vmatpush1.msra.mxu1 %v848_v62  ;;  %1024 = vmatprep.subr.mxu0 %v843_v63  ;;  %v937_v36 = vld [vmem:[%s3459_s14 + $0x2f8] sm:$0xff]  ;;  %v934_v37 = vld [vmem:[%s3459_s14 + $0x2e0] sm:$0xff]  ;;  %v936_v38 = vld [vmem:[%s3459_s14 + $0x2f0] sm:$0xff] }
 0x11f   : > { %1113 = vmatprep.subr.mxu1 %v845_v0  ;;  %1025 = vmatpush1.msra.mxu0 %v842_v1  ;;  %v931_v39 = vld [vmem:[%s3459_s14 + $0x2c8] sm:$0xff]  ;;  %v933_v40 = vld [vmem:[%s3459_s14 + $0x2d8] sm:$0xff]  ;;  %v930_v41 = vld [vmem:[%s3459_s14 + $0x2c0] sm:$0xff] }
 0x120   : > { %1114 = vmatpush1.msra.mxu1 %v844_v2  ;;  %1026 = vmatprep.subr.mxu0 %v967_v3  ;;  %v932_v42 = vld [vmem:[%s3459_s14 + $0x2d0] sm:$0xff]  ;;  %v927_v43 = vld [vmem:[%s3459_s14 + $0x2a8] sm:$0xff]  ;;  %v929_v44 = vld [vmem:[%s3459_s14 + $0x2b8] sm:$0xff] }
 0x121   : > { %1115 = vmatprep.subr.mxu1 %v969_v4  ;;  %1027 = vmatpush2.msra.mxu0 %v966_v5  ;;  %v926_v45 = vld [vmem:[%s3459_s14 + $0x2a0] sm:$0xff]  ;;  %v928_v46 = vld [vmem:[%s3459_s14 + $0x2b0] sm:$0xff]  ;;  %v923_v47 = vld [vmem:[%s3459_s14 + $0x288] sm:$0xff] }
 0x122   : > { %1116 = vmatpush2.msra.mxu1 %v968_v6  ;;  %1028 = vmatprep.subr.mxu0 %v963_v7  ;;  %v925_v48 = vld [vmem:[%s3459_s14 + $0x298] sm:$0xff]  ;;  %v922_v49 = vld [vmem:[%s3459_s14 + $0x280] sm:$0xff]  ;;  %v924_v50 = vld [vmem:[%s3459_s14 + $0x290] sm:$0xff] }
 0x123   : > { %1117 = vmatprep.subr.mxu1 %v965_v8  ;;  %1029 = vmatpush2.msra.mxu0 %v962_v9  ;;  %v919_v51 = vld [vmem:[%s3459_s14 + $0x268] sm:$0xff]  ;;  %v921_v52 = vld [vmem:[%s3459_s14 + $0x278] sm:$0xff]  ;;  %v918_v53 = vld [vmem:[%s3459_s14 + $0x260] sm:$0xff] }
 0x124   : > { %1118 = vmatpush2.msra.mxu1 %v964_v10  ;;  %1030 = vmatprep.subr.mxu0 %v959_v11  ;;  %v920_v54 = vld [vmem:[%s3459_s14 + $0x270] sm:$0xff]  ;;  %v915_v55 = vld [vmem:[%s3459_s14 + $0x248] sm:$0xff]  ;;  %v917_v56 = vld [vmem:[%s3459_s14 + $0x258] sm:$0xff] }
 0x125   : > { %1119 = vmatprep.subr.mxu1 %v961_v12  ;;  %1031 = vmatpush2.msra.mxu0 %v958_v13  ;;  %v914_v57 = vld [vmem:[%s3459_s14 + $0x240] sm:$0xff]  ;;  %v916_v58 = vld [vmem:[%s3459_s14 + $0x250] sm:$0xff]  ;;  %v911_v59 = vld [vmem:[%s3459_s14 + $0x228] sm:$0xff] }
 0x126   : > { %1120 = vmatpush2.msra.mxu1 %v960_v14  ;;  %1032 = vmatprep.subr.mxu0 %v955_v15  ;;  %v913_v60 = vld [vmem:[%s3459_s14 + $0x238] sm:$0xff]  ;;  %v910_v61 = vld [vmem:[%s3459_s14 + $0x220] sm:$0xff]  ;;  %v912_v62 = vld [vmem:[%s3459_s14 + $0x230] sm:$0xff] }
 0x127   : > { %1121 = vmatprep.subr.mxu1 %v957_v16  ;;  %1033 = vmatpush2.msra.mxu0 %v954_v17  ;;  %v907_v63 = vld [vmem:[%s3459_s14 + $0x208] sm:$0xff]  ;;  %v909_v0 = vld [vmem:[%s3459_s14 + $0x218] sm:$0xff]  ;;  %v906_v1 = vld [vmem:[%s3459_s14 + $0x200] sm:$0xff] }
 0x128   : > { %1122 = vmatpush2.msra.mxu1 %v956_v18  ;;  %1034 = vmatprep.subr.mxu0 %v951_v19  ;;  %v908_v2 = vld [vmem:[%s3459_s14 + $0x210] sm:$0xff]  ;;  %v834_v3 = vld [vmem:[%s3990_s0] sm:$0xff]  ;;  %v837_v4 = vld [vmem:[%s3990_s0 + $0x18] sm:$0xff] }
 0x129   : > { %1123 = vmatprep.subr.mxu1 %v953_v20  ;;  %1035 = vmatpush2.msra.mxu0 %v950_v21  ;;  %v971_v5 = vld [vmem:[%s3992_s2 + $0x8] sm:$0xff]  ;;  %v972_v6 = vld [vmem:[%s3992_s2 + $0x10] sm:$0xff]  ;;  %v973_v9 = vld [vmem:[%s3992_s2 + $0x18] sm:$0xff] }
 0x12a   : > { %1124 = vmatpush2.msra.mxu1 %v952_v22  ;;  %1036 = vmatprep.subr.mxu0 %v947_v23  ;;  %v836_v7 = vld [vmem:[%s3990_s0 + $0x10] sm:$0xff]  ;;  %v839_v8 = vld [vmem:[%s3990_s0 + $0x28] sm:$0xff]  ;;  %v838_v10 = vld [vmem:[%s3990_s0 + $0x20] sm:$0xff] }
 0x12b   : > { %1125 = vmatprep.subr.mxu1 %v949_v24  ;;  %1037 = vmatpush2.msra.mxu0 %v946_v25  ;;  %v841_v11 = vld [vmem:[%s3990_s0 + $0x38] sm:$0xff]  ;;  %v840_v12 = vld [vmem:[%s3990_s0 + $0x30] sm:$0xff] }
 0x12c   : > { %1126 = vmatpush2.msra.mxu1 %v948_v26  ;;  %1038 = vmatprep.subr.mxu0 %v943_v27 }
 0x12d   : > { %1127 = vmatprep.subr.mxu1 %v945_v28  ;;  %1039 = vmatpush2.msra.mxu0 %v942_v29 }
 0x12e   : > { %1128 = vmatpush2.msra.mxu1 %v944_v30  ;;  %1040 = vmatprep.subr.mxu0 %v939_v31 }
 0x12f   : > { %1129 = vmatprep.subr.mxu1 %v941_v32  ;;  %1041 = vmatpush2.msra.mxu0 %v938_v33 }
 0x130   : > { %1130 = vmatpush2.msra.mxu1 %v940_v34  ;;  %1042 = vmatprep.subr.mxu0 %v935_v35 }
 0x131   : > { %1131 = vmatprep.subr.mxu1 %v937_v36  ;;  %1043 = vmatpush2.msra.mxu0 %v934_v37 }
 0x132   : > { %1132 = vmatpush2.msra.mxu1 %v936_v38  ;;  %1044 = vmatprep.subr.mxu0 %v931_v39 }
 0x133   : > { %1133 = vmatprep.subr.mxu1 %v933_v40  ;;  %1045 = vmatpush2.msra.mxu0 %v930_v41 }
 0x134   : > { %1134 = vmatpush2.msra.mxu1 %v932_v42  ;;  %1046 = vmatprep.subr.mxu0 %v927_v43 }
 0x135   : > { %1135 = vmatprep.subr.mxu1 %v929_v44  ;;  %1047 = vmatpush2.msra.mxu0 %v926_v45 }
 0x136   : > { %1136 = vmatpush2.msra.mxu1 %v928_v46  ;;  %1048 = vmatprep.subr.mxu0 %v923_v47 }
 0x137   : > { %1137 = vmatprep.subr.mxu1 %v925_v48  ;;  %1049 = vmatpush2.msra.mxu0 %v922_v49 }
 0x138   : > { %1138 = vmatpush2.msra.mxu1 %v924_v50  ;;  %1050 = vmatprep.subr.mxu0 %v919_v51 }
 0x139   : > { %1139 = vmatprep.subr.mxu1 %v921_v52  ;;  %1051 = vmatpush2.msra.mxu0 %v918_v53 }
 0x13a   : > { %1140 = vmatpush2.msra.mxu1 %v920_v54  ;;  %1052 = vmatprep.subr.mxu0 %v915_v55 }
 0x13b   : > { %1141 = vmatprep.subr.mxu1 %v917_v56  ;;  %1053 = vmatpush2.msra.mxu0 %v914_v57 }
 0x13c   : > { %1142 = vmatpush2.msra.mxu1 %v916_v58  ;;  %1054 = vmatprep.subr.mxu0 %v911_v59 }
 0x13d   : > { %1143 = vmatprep.subr.mxu1 %v913_v60  ;;  %1055 = vmatpush2.msra.mxu0 %v910_v61 }
 0x13e   : > { %1144 = vmatpush2.msra.mxu1 %v912_v62  ;;  %1056 = vmatprep.subr.mxu0 %v907_v63 }
 0x13f   : > { %1145 = vmatprep.subr.mxu1 %v909_v0  ;;  %1057 = vmatpush2.msra.mxu0 %v906_v1 }
 0x140   : > { %1146 = vmatpush2.msra.mxu1 %v908_v2  ;;  %1059 = vmatmul.mubr.f32.vlgmr.msra.gmra.mxu0 %v834_v3 }
 0x141   : > { %1148 = vmatmul.mubr.f32.vlgmr.msra.gmra.mxu1 %v834_v3  ;;  %1064 = vmatprep.mubr.f32.mxu0 %v837_v4 }
 0x142   : > { %1153 = vmatprep.mubr.f32.mxu1 %v837_v4  ;;  %981 = vperm.xlu0 %2228, %v971_v5  }
 0x143   : > { %986 = vperm.xlu1 %2229, %v972_v6  }
 0x144   : > { %1065 = vmatmul.mubr.f32.gmra.mxu0 %v836_v7 }
 0x145   : > { %1154 = vmatmul.mubr.f32.gmra.mxu1 %v836_v7  ;;  %1070 = vmatprep.mubr.f32.mxu0 %v839_v8 }
 0x146   : > { %1159 = vmatprep.mubr.f32.mxu1 %v839_v8 }
 0x147   : > { %991 = vperm.xlu1 %2229, %v973_v9  }
 0x148   : > { %1071 = vmatmul.mubr.f32.gmra.mxu0 %v838_v10 }
 0x149   : > { %1160 = vmatmul.mubr.f32.gmra.mxu1 %v838_v10  ;;  %1076 = vmatprep.mubr.f32.mxu0 %v841_v11 }
 0x14a   : > { %1165 = vmatprep.mubr.f32.mxu1 %v841_v11 }
 0x14c   : > { %1077 = vmatmul.mubr.f32.gmra.mxu0 %v840_v12 }
 0x14d   : > { %1166 = vmatmul.mubr.f32.gmra.mxu1 %v840_v12 }
 0x17b   : > { %v977_v13 = vpop.permute.xlu0 %976 }
 0x1bd   : > { %v982_v18 = vpop.permute.xlu0 %981 }
 0x1be   : > { %v987_v31 = vpop.permute.xlu1 %986 }
 0x1c2   : > { %v992_v48 = vpop.permute.xlu1 %991 }
 0x200   : > { %v1060_v14 = vpop.f32.mrf.mxu0 }
 0x201   : > { %v1149_v15 = vpop.f32.mrf.mxu1  ;;  %v1061_v16 = vadd.f32 %v1060_v14, %v977_v13 }
 0x202   : > { %v1150_v17 = vadd.f32 %v1149_v15, %v977_v13  ;;  %v1062_v19 = vpop.f32.mrf.mxu0 }
 0x203   : > { %v1151_v20 = vpop.f32.mrf.mxu1  ;;  %v1172_v21 = vmax.f32 %v1061_v16, 0.0  ;;  %v1063_v23 = vadd.f32 %v1062_v19, %v977_v13 }
 0x204   : > { %v1174_v22 = vmax.f32 %v1150_v17, 0.0  ;;  %v1152_v24 = vadd.f32 %v1151_v20, %v977_v13  ;;  %v1066_v25 = vpop.f32.mrf.mxu0 }
 0x205   : > { %v1155_v26 = vpop.f32.mrf.mxu1  ;;  %1188 = vst [vmem:[%s3621_s26] sm:$0xff] %v1172_v21  ;;  %v1173_v27 = vmax.f32 %v1063_v23, 0.0  ;;  %v1067_v29 = vadd.f32 %v1066_v25, %v982_v18 }
 0x206   : > { %1190 = vst [vmem:[%s3621_s26 + $0x10] sm:$0xff] %v1174_v22  ;;  %v1175_v28 = vmax.f32 %v1152_v24, 0.0  ;;  %v1156_v30 = vadd.f32 %v1155_v26, %v982_v18  ;;  %v1068_v32 = vpop.f32.mrf.mxu0 }
 0x207   : > { %v1157_v33 = vpop.f32.mrf.mxu1  ;;  %1189 = vst [vmem:[%s3621_s26 + $0x8] sm:$0xff] %v1173_v27  ;;  %v1176_v34 = vmax.f32 %v1067_v29, 0.0  ;;  %v1069_v36 = vadd.f32 %v1068_v32, %v982_v18 }
 0x208   : > { %1191 = vst [vmem:[%s3621_s26 + $0x18] sm:$0xff] %v1175_v28  ;;  %v1178_v35 = vmax.f32 %v1156_v30, 0.0  ;;  %v1158_v37 = vadd.f32 %v1157_v33, %v982_v18  ;;  %v1072_v38 = vpop.f32.mrf.mxu0 }
 0x209   : > { %v1161_v39 = vpop.f32.mrf.mxu1  ;;  %1192 = vst [vmem:[%s3621_s26 + $0x20] sm:$0xff] %v1176_v34  ;;  %v1177_v40 = vmax.f32 %v1069_v36, 0.0  ;;  %v1073_v42 = vadd.f32 %v1072_v38, %v987_v31 }
 0x20a   : > { %1194 = vst [vmem:[%s3621_s26 + $0x30] sm:$0xff] %v1178_v35  ;;  %v1179_v41 = vmax.f32 %v1158_v37, 0.0  ;;  %v1162_v43 = vadd.f32 %v1161_v39, %v987_v31  ;;  %v1074_v44 = vpop.f32.mrf.mxu0 }
 0x20b   : > { %v1163_v45 = vpop.f32.mrf.mxu1  ;;  %1193 = vst [vmem:[%s3621_s26 + $0x28] sm:$0xff] %v1177_v40  ;;  %v1180_v46 = vmax.f32 %v1073_v42, 0.0  ;;  %v1075_v49 = vadd.f32 %v1074_v44, %v987_v31 }
 0x20c   : > { %1195 = vst [vmem:[%s3621_s26 + $0x38] sm:$0xff] %v1179_v41  ;;  %v1182_v47 = vmax.f32 %v1162_v43, 0.0  ;;  %v1164_v50 = vadd.f32 %v1163_v45, %v987_v31  ;;  %v1078_v51 = vpop.f32.mrf.mxu0 }
 0x20d   : > { %v1167_v52 = vpop.f32.mrf.mxu1  ;;  %1196 = vst [vmem:[%s3621_s26 + $0x40] sm:$0xff] %v1180_v46  ;;  %v1181_v53 = vmax.f32 %v1075_v49, 0.0  ;;  %v1079_v55 = vadd.f32 %v1078_v51, %v992_v48 }
 0x20e   : > { %1198 = vst [vmem:[%s3621_s26 + $0x50] sm:$0xff] %v1182_v47  ;;  %v1183_v54 = vmax.f32 %v1164_v50, 0.0  ;;  %v1168_v56 = vadd.f32 %v1167_v52, %v992_v48  ;;  %v1080_v57 = vpop.f32.mrf.mxu0 }
 0x20f   : > { %v1169_v58 = vpop.f32.mrf.mxu1  ;;  %1197 = vst [vmem:[%s3621_s26 + $0x48] sm:$0xff] %v1181_v53  ;;  %v1184_v59 = vmax.f32 %v1079_v55, 0.0  ;;  %v1081_v61 = vadd.f32 %v1080_v57, %v992_v48 }
 0x210   : > { %1199 = vst [vmem:[%s3621_s26 + $0x58] sm:$0xff] %v1183_v54  ;;  %v1186_v60 = vmax.f32 %v1168_v56, 0.0  ;;  %v1170_v62 = vadd.f32 %v1169_v58, %v992_v48  ;;  %1210 = sbr.rel (!%p2566_p5) target bundleno = 659 (0x293), region = 102 }
 0x211   : > { %1200 = vst [vmem:[%s3621_s26 + $0x60] sm:$0xff] %v1184_v59  ;;  %v1185_v63 = vmax.f32 %v1081_v61, 0.0 }
 0x212   : > { %1202 = vst [vmem:[%s3621_s26 + $0x70] sm:$0xff] %v1186_v60  ;;  %v1187_v0 = vmax.f32 %v1170_v62, 0.0 }
 0x213   : > { %1201 = vst [vmem:[%s3621_s26 + $0x68] sm:$0xff] %v1185_v63 }
 0x214   : > { %1203 = vst [vmem:[%s3621_s26 + $0x78] sm:$0xff] %v1187_v0 }
 0x215   : > { %s4046_s27 = smov (!%p1213_p1, %s1212_s27), 4 }
 0x216   : > { %s1904_s8 = sshll.u32 %s4046_s27, 9  ;;  %s3648_s10 = sshll.u32 %s4046_s27, 3 }
 0x217   : > { %p1908_p2 = scmp.eq.s32.totalorder %s1904_s8, 0 }
 0x218   : > { %p1223_p3 = scmp.lt.u32.totalorder (!%p1908_p2), %s3648_s10, 8 }
 0x219   : > { %1222 = sbr.rel (%p1908_p2) target bundleno = 659 (0x293), region = 106 }
 0x21e   : > { %1226 = sbr.rel (%p1223_p3) target bundleno = 647 (0x287), region = 110  ;;  %s3652_s20 = sand.u32 (!%p1223_p3), 7, %s3648_s10  }
 0x21f   : > { %p1249_p5 = scmp.eq.s32.totalorder (!%p1223_p3), %s3652_s20, 0  ;;  %p1909_p4 = scmp.ne.s32.totalorder (!%p1223_p3), %s3652_s20, 0 }
 0x223   : > { %1252 = sbr.rel (%p1909_p4) target bundleno = 593 (0x251), region = 125  ;;  %s1253_s15 = sshrl.u32 (!%p1909_p4), %s3648_s10, 3 }
 0x224   : > { %s3659_s6 = sshrl.u32 (!%p1909_p4), %s1253_s15, 4 }
 0x225   : > { %p1910_p6 = scmp.le.s32.totalorder (!%p1909_p4), %s3659_s6, 0 }
 0x228   : > { %1795 = sbr.rel (%p1910_p6) target bundleno = 577 (0x241), region = 273  ;;  %s4015_s11 = smov (!%p1910_p6), %s3646_s25 }
 0x229   : > { %s4016_s17 = smov (!%p1910_p6), %s3621_s26  ;;  %s3668_s5 = smov (!%p1910_p6), 0  }
 0x22a   : > { %s3670_s22 = smov (!%p1910_p6), 0  }
 0x22d LB: >> { %v1266_v1 = vld [vmem:[%s2452_s17] sm:$0xff]  ;;  %v1268_v2 = vld [vmem:[%s2452_s17 + $0x8] sm:$0xff]  ;;  %v1270_v3 = vld [vmem:[%s2452_s17 + $0x10] sm:$0xff]  ;;  %s1394_s24 = sadd.s32 1, %s2456_s5  ;;  %s1260_s22 = sadd.s32 1, %s2460_s22   ;;  %s2460_s22 = sphi %s3670_s22, %s1260_s22   ;;  %s2456_s5 = sphi %s3668_s5, %s4020_s5   ;;  %s2452_s17 = sphi %s4016_s17, %s4019_s17   ;;  %s2448_s11 = sphi %s4015_s11, %s4018_s11  }
 0x22e   : >> { %1267 = vst [vmem:[%s2448_s11] sm:$0xff] %v1266_v1  ;;  %1269 = vst [vmem:[%s2448_s11 + $0x8] sm:$0xff] %v1268_v2  ;;  %v1272_v4 = vld [vmem:[%s2452_s17 + $0x18] sm:$0xff]  ;;  %v1274_v5 = vld [vmem:[%s2452_s17 + $0x20] sm:$0xff]  ;;  %p3711_p7 = scmp.ge.s32.totalorder %s1394_s24, %s3659_s6  ;;  %p1259_p8 = scmp.ge.s32.totalorder %s1260_s22, %s3659_s6 }
 0x22f   : >> { %1271 = vst [vmem:[%s2448_s11 + $0x10] sm:$0xff] %v1270_v3  ;;  %v1276_v6 = vld [vmem:[%s2452_s17 + $0x28] sm:$0xff]  ;;  %1273 = vst [vmem:[%s2448_s11 + $0x18] sm:$0xff] %v1272_v4  ;;  %v1278_v7 = vld [vmem:[%s2452_s17 + $0x30] sm:$0xff] }
 0x230   : >> { %1275 = vst [vmem:[%s2448_s11 + $0x20] sm:$0xff] %v1274_v5  ;;  %1277 = vst [vmem:[%s2448_s11 + $0x28] sm:$0xff] %v1276_v6  ;;  %v1304_v8 = vld [vmem:[%s2452_s17 + $0x38] sm:$0xff]  ;;  %v1306_v9 = vld [vmem:[%s2452_s17 + $0x40] sm:$0xff]  ;;  %s4048_s24 = smov (%p3711_p7, %s1394_s24), 0 }
 0x231   : >> { %1299 = vst [vmem:[%s2448_s11 + $0x38] sm:$0xff] %v1274_v5  ;;  %1301 = vst [vmem:[%s2448_s11 + $0x40] sm:$0xff] %v1276_v6  ;;  %v1308_v10 = vld [vmem:[%s2452_s17 + $0x48] sm:$0xff]  ;;  %v1310_v11 = vld [vmem:[%s2452_s17 + $0x50] sm:$0xff]  ;;  %s1911_s18 = sshll.u32 %s4048_s24, 7  ;;  %s4020_s5 = smov %s4048_s24 }
 0x232   : >> { %1279 = vst [vmem:[%s2448_s11 + $0x30] sm:$0xff] %v1278_v7  ;;  %1303 = vst [vmem:[%s2448_s11 + $0x48] sm:$0xff] %v1278_v7  ;;  %v1336_v12 = vld [vmem:[%s2452_s17 + $0x58] sm:$0xff]  ;;  %v1338_v13 = vld [vmem:[%s2452_s17 + $0x60] sm:$0xff]  ;;  %s1399_s28 = scalar_lea.vmem %s3621_s26, %s1911_s18 [#allocation3]   ;;  %s1400_s4 = scalar_lea.vmem %s3646_s25, %s1911_s18  }
 0x233   : >> { %1305 = vst [vmem:[%s2448_s11 + $0x50] sm:$0xff] %v1304_v8  ;;  %1307 = vst [vmem:[%s2448_s11 + $0x58] sm:$0xff] %v1306_v9  ;;  %v1340_v14 = vld [vmem:[%s2452_s17 + $0x68] sm:$0xff]  ;;  %v1342_v15 = vld [vmem:[%s2452_s17 + $0x70] sm:$0xff] }
 0x234   : >> { %1331 = vst [vmem:[%s2448_s11 + $0x70] sm:$0xff] %v1306_v9  ;;  %1309 = vst [vmem:[%s2448_s11 + $0x60] sm:$0xff] %v1308_v10  ;;  %v1368_v16 = vld [vmem:[%s2452_s17 + $0x78] sm:$0xff]  ;;  %v1370_v17 = vld [vmem:[%s2452_s17 + $0x80] sm:$0xff] }
 0x235   : >> { %1311 = vst [vmem:[%s2448_s11 + $0x68] sm:$0xff] %v1310_v11  ;;  %1333 = vst [vmem:[%s2448_s11 + $0x78] sm:$0xff] %v1308_v10  ;;  %v1372_v18 = vld [vmem:[%s2452_s17 + $0x88] sm:$0xff]  ;;  %v1374_v19 = vld [vmem:[%s2452_s17 + $0x90] sm:$0xff] }
 0x236   : >> { %1335 = vst [vmem:[%s2448_s11 + $0x80] sm:$0xff] %v1310_v11  ;;  %1337 = vst [vmem:[%s2448_s11 + $0x88] sm:$0xff] %v1336_v12  ;;  %v1376_v20 = vld [vmem:[%s2452_s17 + $0x98] sm:$0xff]  ;;  %v1378_v21 = vld [vmem:[%s2452_s17 + $0xa0] sm:$0xff] }
 0x237   : >> { %1339 = vst [vmem:[%s2448_s11 + $0x90] sm:$0xff] %v1338_v13  ;;  %1341 = vst [vmem:[%s2448_s11 + $0x98] sm:$0xff] %v1340_v14  ;;  %v1380_v22 = vld [vmem:[%s2452_s17 + $0xa8] sm:$0xff]  ;;  %v1382_v23 = vld [vmem:[%s2452_s17 + $0xb0] sm:$0xff] }
 0x238   : >> { %1343 = vst [vmem:[%s2448_s11 + $0xa0] sm:$0xff] %v1342_v15  ;;  %1363 = vst [vmem:[%s2448_s11 + $0xa8] sm:$0xff] %v1338_v13  ;;  %v1384_v24 = vld [vmem:[%s2452_s17 + $0xb8] sm:$0xff]  ;;  %v1386_v25 = vld [vmem:[%s2452_s17 + $0xc0] sm:$0xff] }
 0x239   : >> { %1365 = vst [vmem:[%s2448_s11 + $0xb0] sm:$0xff] %v1340_v14  ;;  %1367 = vst [vmem:[%s2448_s11 + $0xb8] sm:$0xff] %v1342_v15  ;;  %v1388_v26 = vld [vmem:[%s2452_s17 + $0xc8] sm:$0xff]  ;;  %v1390_v27 = vld [vmem:[%s2452_s17 + $0xd0] sm:$0xff] }
 0x23a   : >> { %1369 = vst [vmem:[%s2448_s11 + $0xc0] sm:$0xff] %v1368_v16  ;;  %1371 = vst [vmem:[%s2448_s11 + $0xc8] sm:$0xff] %v1370_v17  ;;  %v1392_v28 = vld [vmem:[%s2452_s17 + $0xd8] sm:$0xff]  ;;  %s4019_s17 = smov %s1399_s28 }
 0x23b   : >> { %1373 = vst [vmem:[%s2448_s11 + $0xd0] sm:$0xff] %v1372_v18  ;;  %1375 = vst [vmem:[%s2448_s11 + $0xd8] sm:$0xff] %v1374_v19 }
 0x23c   : >> { %1377 = vst [vmem:[%s2448_s11 + $0xe0] sm:$0xff] %v1376_v20  ;;  %1379 = vst [vmem:[%s2448_s11 + $0xe8] sm:$0xff] %v1378_v21  ;;  %1262 = sbr.rel (!%p1259_p8) target bundleno = 557 (0x22d), region = 279 }
 0x23d   : >> { %1381 = vst [vmem:[%s2448_s11 + $0xf0] sm:$0xff] %v1380_v22  ;;  %1383 = vst [vmem:[%s2448_s11 + $0xf8] sm:$0xff] %v1382_v23 }
 0x23e   : >> { %1385 = vst [vmem:[%s2448_s11 + $0x100] sm:$0xff] %v1384_v24  ;;  %1387 = vst [vmem:[%s2448_s11 + $0x108] sm:$0xff] %v1386_v25 }
 0x23f   : >> { %1389 = vst [vmem:[%s2448_s11 + $0x110] sm:$0xff] %v1388_v26  ;;  %1391 = vst [vmem:[%s2448_s11 + $0x118] sm:$0xff] %v1390_v27 }
 0x240   : >> { %1393 = vst [vmem:[%s2448_s11 + $0x120] sm:$0xff] %v1392_v28  ;;  %s4018_s11 = smov %s1400_s4 }
 0x241 PF: > { %s3775_s9 = sand.u32 15, %s1253_s15   ;;  %s1939_s14 = sshll.u32 %s3659_s6, 11 }
 0x242   : > { %s1405_s23 = sshra.s32 %s1939_s14, 4  ;;  %p1916_p9 = scmp.le.s32.totalorder %s3775_s9, 0 }
 0x243   : > { %s3779_s12 = scalar_lea.vmem %s3621_s26, %s1405_s23 [#allocation3]   ;;  %s3782_s30 = scalar_lea.vmem %s3646_s25, %s1405_s23  }
 0x244   : > { %1809 = sbr.rel (%p1916_p9) target bundleno = 593 (0x251), region = 284  ;;  %s4021_s27 = smov (!%p1916_p9), %s3782_s30 }
 0x245   : > { %s4022_s29 = smov (!%p1916_p9), %s3779_s12  ;;  %s3791_s21 = smov (!%p1916_p9), 0  }
 0x246   : > { %s2474_s8 = smov (!%p1916_p9), 0  }
 0x249 LB: >> { %v1421_v29 = vld [vmem:[%s2468_s29] sm:$0xff]  ;;  %s1429_s15 = sadd.s32 1, %s2472_s21  ;;  %s1415_s8 = sadd.s32 1, %s2476_s8   ;;  %s2476_s8 = sphi %s2474_s8, %s1415_s8   ;;  %s2472_s21 = sphi %s3791_s21, %s4023_s21   ;;  %s2468_s29 = sphi %s4022_s29, %s1434_s29   ;;  %s2464_s27 = sphi %s4021_s27, %s1435_s27  }
 0x24a   : >> { %v1423_v30 = vld [vmem:[%s2468_s29 + $0x20] sm:$0xff]  ;;  %1422 = vst [vmem:[%s2464_s27] sm:$0xff] %v1421_v29  ;;  %p1430_p10 = scmp.ge.s32.totalorder %s1429_s15, %s3775_s9  ;;  %p1414_p11 = scmp.ge.s32.totalorder %s1415_s8, %s3775_s9 }
 0x24b   : >> { %v1425_v31 = vld [vmem:[%s2468_s29 + $0x40] sm:$0xff]  ;;  %1424 = vst [vmem:[%s2464_s27 + $0x38] sm:$0xff] %v1423_v30 }
 0x24c   : >> { %1426 = vst [vmem:[%s2464_s27 + $0x70] sm:$0xff] %v1425_v31  ;;  %v1427_v32 = vld [vmem:[%s2468_s29 + $0x60] sm:$0xff]  ;;  %s4050_s15 = smov (%p1430_p10, %s1429_s15), 0  ;;  %1417 = sbr.rel (!%p1414_p11) target bundleno = 585 (0x249), region = 290 }
 0x24d   : >> { %1428 = vst [vmem:[%s2464_s27 + $0xa8] sm:$0xff] %v1427_v32  ;;  %s1917_s6 = sshll.u32 %s4050_s15, 3  ;;  %s4023_s21 = smov %s4050_s15 }
 0x24e   : >> { %s1434_s29 = scalar_lea.vmem %s3779_s12, %s1917_s6 [#allocation3]   ;;  %s1435_s27 = scalar_lea.vmem %s3782_s30, %s1917_s6  }
 0x251 PF: > { %1438 = sbr.rel (%p1249_p5) target bundleno = 647 (0x287), region = 143  ;;  %s1440_s11 = ssub.s32 (!%p1249_p5), %s3648_s10, %s3652_s20 }
 0x252   : > { %s1444_s17 = sshrl.u32 (!%p1249_p5), %s3648_s10, 3  ;;  %s3812_s5 = scalar_lea.vmem (!%p1249_p5), %s3621_s26, %s1440_s11 [#allocation3] }
 0x253   : > { %s3815_s22 = scalar_lea.vmem (!%p1249_p5), %s3646_s25, %s1440_s11  ;;  %s3819_s24 = sshrl.u32 (!%p1249_p5), %s1444_s17, 4 }
 0x254   : > { %p1919_p12 = scmp.le.s32.totalorder (!%p1249_p5), %s3819_s24, 0 }
 0x256   : > { %1823 = sbr.rel (%p1919_p12) target bundleno = 623 (0x26f), region = 295  ;;  %s4024_s7 = smov (!%p1919_p12), %s3646_s25 }
 0x257   : > { %s4025_s18 = smov (!%p1919_p12), %s3621_s26  ;;  %s3828_s28 = smov (!%p1919_p12), 0  }
 0x258   : > { %s3830_s4 = smov (!%p1919_p12), 0  }
 0x25b LB: >> { %v1457_v33 = vld [vmem:[%s2484_s18] sm:$0xff]  ;;  %v1459_v34 = vld [vmem:[%s2484_s18 + $0x8] sm:$0xff]  ;;  %v1461_v35 = vld [vmem:[%s2484_s18 + $0x10] sm:$0xff]  ;;  %s1585_s9 = sadd.s32 1, %s2488_s28  ;;  %s1451_s4 = sadd.s32 1, %s2492_s4   ;;  %s2492_s4 = sphi %s3830_s4, %s1451_s4   ;;  %s2488_s28 = sphi %s3828_s28, %s4029_s28   ;;  %s2484_s18 = sphi %s4025_s18, %s4028_s18   ;;  %s2480_s7 = sphi %s4024_s7, %s4027_s7  }
 0x25c   : >> { %1458 = vst [vmem:[%s2480_s7] sm:$0xff] %v1457_v33  ;;  %1460 = vst [vmem:[%s2480_s7 + $0x8] sm:$0xff] %v1459_v34  ;;  %v1463_v36 = vld [vmem:[%s2484_s18 + $0x18] sm:$0xff]  ;;  %v1465_v37 = vld [vmem:[%s2484_s18 + $0x20] sm:$0xff]  ;;  %p3871_p13 = scmp.ge.s32.totalorder %s1585_s9, %s3819_s24  ;;  %p1450_p0 = scmp.ge.s32.totalorder %s1451_s4, %s3819_s24 }
 0x25d   : >> { %1462 = vst [vmem:[%s2480_s7 + $0x10] sm:$0xff] %v1461_v35  ;;  %v1467_v38 = vld [vmem:[%s2484_s18 + $0x28] sm:$0xff]  ;;  %1464 = vst [vmem:[%s2480_s7 + $0x18] sm:$0xff] %v1463_v36  ;;  %v1469_v39 = vld [vmem:[%s2484_s18 + $0x30] sm:$0xff] }
 0x25e   : >> { %1466 = vst [vmem:[%s2480_s7 + $0x20] sm:$0xff] %v1465_v37  ;;  %1468 = vst [vmem:[%s2480_s7 + $0x28] sm:$0xff] %v1467_v38  ;;  %v1495_v40 = vld [vmem:[%s2484_s18 + $0x38] sm:$0xff]  ;;  %v1497_v41 = vld [vmem:[%s2484_s18 + $0x40] sm:$0xff]  ;;  %s4052_s9 = smov (%p3871_p13, %s1585_s9), 0 }
 0x25f   : >> { %1490 = vst [vmem:[%s2480_s7 + $0x38] sm:$0xff] %v1465_v37  ;;  %1492 = vst [vmem:[%s2480_s7 + $0x40] sm:$0xff] %v1467_v38  ;;  %v1499_v42 = vld [vmem:[%s2484_s18 + $0x48] sm:$0xff]  ;;  %v1501_v43 = vld [vmem:[%s2484_s18 + $0x50] sm:$0xff]  ;;  %s1920_s23 = sshll.u32 %s4052_s9, 7  ;;  %s4029_s28 = smov %s4052_s9 }
 0x260   : >> { %1470 = vst [vmem:[%s2480_s7 + $0x30] sm:$0xff] %v1469_v39  ;;  %1494 = vst [vmem:[%s2480_s7 + $0x48] sm:$0xff] %v1469_v39  ;;  %v1527_v44 = vld [vmem:[%s2484_s18 + $0x58] sm:$0xff]  ;;  %v1529_v45 = vld [vmem:[%s2484_s18 + $0x60] sm:$0xff]  ;;  %s1590_s12 = scalar_lea.vmem %s3621_s26, %s1920_s23 [#allocation3]   ;;  %s1591_s30 = scalar_lea.vmem %s3646_s25, %s1920_s23  }
 0x261   : >> { %1496 = vst [vmem:[%s2480_s7 + $0x50] sm:$0xff] %v1495_v40  ;;  %1498 = vst [vmem:[%s2480_s7 + $0x58] sm:$0xff] %v1497_v41  ;;  %v1531_v46 = vld [vmem:[%s2484_s18 + $0x68] sm:$0xff]  ;;  %v1533_v47 = vld [vmem:[%s2484_s18 + $0x70] sm:$0xff] }
 0x262   : >> { %1522 = vst [vmem:[%s2480_s7 + $0x70] sm:$0xff] %v1497_v41  ;;  %1500 = vst [vmem:[%s2480_s7 + $0x60] sm:$0xff] %v1499_v42  ;;  %v1559_v48 = vld [vmem:[%s2484_s18 + $0x78] sm:$0xff]  ;;  %v1561_v49 = vld [vmem:[%s2484_s18 + $0x80] sm:$0xff] }
 0x263   : >> { %1502 = vst [vmem:[%s2480_s7 + $0x68] sm:$0xff] %v1501_v43  ;;  %1524 = vst [vmem:[%s2480_s7 + $0x78] sm:$0xff] %v1499_v42  ;;  %v1563_v50 = vld [vmem:[%s2484_s18 + $0x88] sm:$0xff]  ;;  %v1565_v51 = vld [vmem:[%s2484_s18 + $0x90] sm:$0xff] }
 0x264   : >> { %1526 = vst [vmem:[%s2480_s7 + $0x80] sm:$0xff] %v1501_v43  ;;  %1528 = vst [vmem:[%s2480_s7 + $0x88] sm:$0xff] %v1527_v44  ;;  %v1567_v52 = vld [vmem:[%s2484_s18 + $0x98] sm:$0xff]  ;;  %v1569_v53 = vld [vmem:[%s2484_s18 + $0xa0] sm:$0xff] }
 0x265   : >> { %1530 = vst [vmem:[%s2480_s7 + $0x90] sm:$0xff] %v1529_v45  ;;  %1532 = vst [vmem:[%s2480_s7 + $0x98] sm:$0xff] %v1531_v46  ;;  %v1571_v54 = vld [vmem:[%s2484_s18 + $0xa8] sm:$0xff]  ;;  %v1573_v55 = vld [vmem:[%s2484_s18 + $0xb0] sm:$0xff] }
 0x266   : >> { %1534 = vst [vmem:[%s2480_s7 + $0xa0] sm:$0xff] %v1533_v47  ;;  %1554 = vst [vmem:[%s2480_s7 + $0xa8] sm:$0xff] %v1529_v45  ;;  %v1575_v56 = vld [vmem:[%s2484_s18 + $0xb8] sm:$0xff]  ;;  %v1577_v57 = vld [vmem:[%s2484_s18 + $0xc0] sm:$0xff] }
 0x267   : >> { %1556 = vst [vmem:[%s2480_s7 + $0xb0] sm:$0xff] %v1531_v46  ;;  %1558 = vst [vmem:[%s2480_s7 + $0xb8] sm:$0xff] %v1533_v47  ;;  %v1579_v58 = vld [vmem:[%s2484_s18 + $0xc8] sm:$0xff]  ;;  %v1581_v59 = vld [vmem:[%s2484_s18 + $0xd0] sm:$0xff] }
 0x268   : >> { %1560 = vst [vmem:[%s2480_s7 + $0xc0] sm:$0xff] %v1559_v48  ;;  %1562 = vst [vmem:[%s2480_s7 + $0xc8] sm:$0xff] %v1561_v49  ;;  %v1583_v60 = vld [vmem:[%s2484_s18 + $0xd8] sm:$0xff]  ;;  %s4028_s18 = smov %s1590_s12 }
 0x269   : >> { %1564 = vst [vmem:[%s2480_s7 + $0xd0] sm:$0xff] %v1563_v50  ;;  %1566 = vst [vmem:[%s2480_s7 + $0xd8] sm:$0xff] %v1565_v51 }
 0x26a   : >> { %1568 = vst [vmem:[%s2480_s7 + $0xe0] sm:$0xff] %v1567_v52  ;;  %1570 = vst [vmem:[%s2480_s7 + $0xe8] sm:$0xff] %v1569_v53  ;;  %1453 = sbr.rel (!%p1450_p0) target bundleno = 603 (0x25b), region = 301 }
 0x26b   : >> { %1572 = vst [vmem:[%s2480_s7 + $0xf0] sm:$0xff] %v1571_v54  ;;  %1574 = vst [vmem:[%s2480_s7 + $0xf8] sm:$0xff] %v1573_v55 }
 0x26c   : >> { %1576 = vst [vmem:[%s2480_s7 + $0x100] sm:$0xff] %v1575_v56  ;;  %1578 = vst [vmem:[%s2480_s7 + $0x108] sm:$0xff] %v1577_v57 }
 0x26d   : >> { %1580 = vst [vmem:[%s2480_s7 + $0x110] sm:$0xff] %v1579_v58  ;;  %1582 = vst [vmem:[%s2480_s7 + $0x118] sm:$0xff] %v1581_v59 }
 0x26e   : >> { %1584 = vst [vmem:[%s2480_s7 + $0x120] sm:$0xff] %v1583_v60  ;;  %s4027_s7 = smov %s1591_s30 }
 0x26f PF: > { %s3935_s27 = sand.u32 15, %s1444_s17   ;;  %s1941_s29 = sshll.u32 %s3819_s24, 11 }
 0x270   : > { %s1596_s21 = sshra.s32 %s1941_s29, 4  ;;  %p1925_p1 = scmp.le.s32.totalorder %s3935_s27, 0 }
 0x271   : > { %s3939_s8 = scalar_lea.vmem %s3621_s26, %s1596_s21 [#allocation3]   ;;  %s3942_s15 = scalar_lea.vmem %s3646_s25, %s1596_s21  }
 0x272   : > { %1837 = sbr.rel (%p1925_p1) target bundleno = 639 (0x27f), region = 306  ;;  %s4030_s6 = smov (!%p1925_p1), %s3942_s15 }
 0x273   : > { %s4031_s11 = smov (!%p1925_p1), %s3939_s8  ;;  %s2502_s7 = smov (!%p1925_p1), 0  }
 0x274   : > { %s2506_s18 = smov (!%p1925_p1), 0  }
 0x277 LB: >> { %v1612_v61 = vld [vmem:[%s2500_s11] sm:$0xff]  ;;  %s1620_s17 = sadd.s32 1, %s2504_s7  ;;  %s1606_s18 = sadd.s32 1, %s2508_s18   ;;  %s2508_s18 = sphi %s2506_s18, %s1606_s18   ;;  %s2504_s7 = sphi %s2502_s7, %s2503_s7   ;;  %s2500_s11 = sphi %s4031_s11, %s1625_s11   ;;  %s2496_s6 = sphi %s4030_s6, %s1626_s6  }
 0x278   : >> { %v1614_v62 = vld [vmem:[%s2500_s11 + $0x20] sm:$0xff]  ;;  %1613 = vst [vmem:[%s2496_s6] sm:$0xff] %v1612_v61  ;;  %p1621_p2 = scmp.ge.s32.totalorder %s1620_s17, %s3935_s27  ;;  %p1605_p3 = scmp.ge.s32.totalorder %s1606_s18, %s3935_s27 }
 0x279   : >> { %v1616_v63 = vld [vmem:[%s2500_s11 + $0x40] sm:$0xff]  ;;  %1615 = vst [vmem:[%s2496_s6 + $0x38] sm:$0xff] %v1614_v62 }
 0x27a   : >> { %1617 = vst [vmem:[%s2496_s6 + $0x70] sm:$0xff] %v1616_v63  ;;  %v1618_v0 = vld [vmem:[%s2500_s11 + $0x60] sm:$0xff]  ;;  %s4054_s17 = smov (%p1621_p2, %s1620_s17), 0  ;;  %1608 = sbr.rel (!%p1605_p3) target bundleno = 631 (0x277), region = 312 }
 0x27b   : >> { %1619 = vst [vmem:[%s2496_s6 + $0xa8] sm:$0xff] %v1618_v0  ;;  %s1926_s24 = sshll.u32 %s4054_s17, 3  ;;  %s2503_s7 = smov %s4054_s17  }
 0x27c   : >> { %s1625_s11 = scalar_lea.vmem %s3939_s8, %s1926_s24 [#allocation3]   ;;  %s1626_s6 = scalar_lea.vmem %s3942_s15, %s1926_s24  }
 0x27f PF: > { %s2513_s28 = smov 1  }
 0x280   : > { %s1627_s4 = sshll.u32 %s2513_s28, %s3652_s20 }
 0x281   : > { %s1928_s9 = sadd.s32 4294967295, %s1627_s4 }
 0x282   : > { %v1637_v1 = vld [vmem:[%s3812_s5] sm:%s1928_s9] }
 0x283   : > { %v1639_v2 = vld [vmem:[%s3812_s5 + $0x20] sm:%s1928_s9]  ;;  %1638 = vst [vmem:[%s3815_s22] sm:%s1928_s9] %v1637_v1 }
 0x284   : > { %1640 = vst [vmem:[%s3815_s22 + $0x38] sm:%s1928_s9] %v1639_v2  ;;  %v1641_v3 = vld [vmem:[%s3812_s5 + $0x40] sm:%s1928_s9] }
 0x285   : > { %v1643_v4 = vld [vmem:[%s3812_s5 + $0x60] sm:%s1928_s9]  ;;  %1642 = vst [vmem:[%s3815_s22 + $0x70] sm:%s1928_s9] %v1641_v3 }
 0x286   : > { %1644 = vst [vmem:[%s3815_s22 + $0xa8] sm:%s1928_s9] %v1643_v4 }
 0x287 PF: > { %p1929_p5 = scmp.ge.u32.totalorder %s3648_s10, 8 }
 0x288   : > { %s2514_s14 = smov (!%p1929_p5), 1  }
 0x289   : > { %1229 = sbr.rel (%p1929_p5) target bundleno = 659 (0x293), region = 114  ;;  %s1230_s20 = sshll.u32 (!%p1929_p5), %s2514_s14, %s3648_s10 }
 0x28a   : > { %s1930_s23 = sadd.s32 (!%p1929_p5), 4294967295, %s1230_s20 }
 0x28e   : > { %v1240_v5 = vld [vmem:[%s3621_s26] sm:%s1930_s23] }
 0x28f   : > { %v1242_v6 = vld [vmem:[%s3621_s26 + $0x20] sm:%s1930_s23]  ;;  %1241 = vst [vmem:[%s3646_s25] sm:%s1930_s23] %v1240_v5 }
 0x290   : > { %1243 = vst [vmem:[%s3646_s25 + $0x38] sm:%s1930_s23] %v1242_v6  ;;  %v1244_v7 = vld [vmem:[%s3621_s26 + $0x40] sm:%s1930_s23] }
 0x291   : > { %v1246_v8 = vld [vmem:[%s3621_s26 + $0x60] sm:%s1930_s23]  ;;  %1245 = vst [vmem:[%s3646_s25 + $0x70] sm:%s1930_s23] %v1244_v7 }
 0x292   : > { %1247 = vst [vmem:[%s3646_s25 + $0xa8] sm:%s1930_s23] %v1246_v8 }
 0x293 PF: > { %p10_p4 = scmp.ge.s32.totalorder %s2554_s16, 4   ;;  %s4032_s12 = smov %s2376_s13 }
 0x294   : > { %s4033_s13 = smov %s2564_s19  ;;  %s4034_s14 = smov %s2554_s16 }
 0x295   :  { %12 = sbr.rel (!%p10_p4) target bundleno = 2 (0x2), region = 323 }

// kernel: duel_dqn_forward.5
= control target key start
LH: loop header
LB: loop body
LE: loop exit
PB: predicated region body
PF: predicated region fallthrough
CT: control target
= control target key end

     0   :  { %s1145_s12 = smov 0   ;;  %s1147_s13 = smov 0   ;;  %s1545_s0 = inlined_call_operand.vmem [shape: f32[64,512], index: 0, kind: input, shape index: {}]   ;;  %s1546_s1 = inlined_call_operand.vmem [shape: f32[512,162], index: 1, kind: input, shape index: {}]   ;;  %s1547_s2 = inlined_call_operand.vmem [shape: f32[64,1], index: 2, kind: input, shape index: {}]   ;;  %s1548_s3 = inlined_call_operand.vmem [shape: f32[64,162], index: 3, kind: output, shape index: {}]  }
   0x1   :  { %s1149_s14 = smov 0  }
   0x2 LB: > { %s948_s15 = sadd.s32 4294967295, %s1122_s14   ;;  %s1162_s16 = sadd.s32 1, %s1122_s14   ;;  %s1122_s14 = sphi %s1149_s14, %s1552_s14   ;;  %s1118_s13 = sphi %s1147_s13, %s1551_s13   ;;  %s1114_s12 = sphi %s1145_s12, %s1550_s12  }
   0x3   : > { %s38_s17 = ssub.s32 %s1122_s14, %s1162_s16  ;;  %s41_s18 = sadd.s32 1, %s1118_s13 }
   0x4   : > { %p39_p0 = scmp.eq.s32.totalorder %s38_s17, 0  ;;  %p48_p1 = scmp.ne.s32.totalorder %s1118_s13, %s1114_s12 }
   0x5   : > { %p49_p2 = scmp.eq.s32.totalorder %s1122_s14, 0  ;;  %p99_p3 = scmp.eq.s32.totalorder %s948_s15, 1 }
   0x6   : > { %s1173_s19 = scalar_select %p39_p0, %s1118_s13, %s41_s18  }
   0x7   : > { %p50_p4 = por %p49_p2, %p48_p1  ;;  %p1175_p5 = por %p99_p3, %p48_p1 }
   0x8   : > { %p951_p6 = scmp.ge.s32.totalorder %s1122_s14, 2 }
   0xa   : > { %127 = sbr.rel (%p951_p6) target bundleno = 51 (0x33), region = 24 }
   0xf   : > { %130 = sbr.rel (!%p50_p4) target bundleno = 51 (0x33), region = 28  ;;  %s132_s21 = sand.u32 (%p50_p4), 1, %s1118_s13  }
  0x10   : > { %s953_s22 = sshll.u32 (%p50_p4), %s1122_s14, 3  ;;  %s952_s23 = sshll.u32 (%p50_p4), %s132_s21, 9 }
  0x11   : > { %s1185_s26 = scalar_lea.vmem (%p50_p4), %s1546_s1, %s953_s22  ;;  %s1190_s27 = scalar_lea.vmem (%p50_p4), [#allocation2], %s952_s23 }
  0x12   : > { %v291_v0 = vld [vmem:[%s1185_s26] sm:$0xff] (%p50_p4)  ;;  %v293_v1 = vld [vmem:[%s1185_s26 + $0x10] sm:$0xff] (%p50_p4) }
  0x13   : > { %v295_v2 = vld [vmem:[%s1185_s26 + $0x20] sm:$0xff] (%p50_p4)  ;;  %292 = vst [vmem:[%s1190_s27] sm:$0xff] (%p50_p4), %v291_v0  ;;  %294 = vst [vmem:[%s1190_s27 + $0x8] sm:$0xff] (%p50_p4), %v293_v1  ;;  %v297_v3 = vld [vmem:[%s1185_s26 + $0x30] sm:$0xff] (%p50_p4) }
  0x14   : > { %296 = vst [vmem:[%s1190_s27 + $0x10] sm:$0xff] %v295_v2  ;;  %v299_v4 = vld [vmem:[%s1185_s26 + $0x40] sm:$0xff]  ;;  %v301_v5 = vld [vmem:[%s1185_s26 + $0x50] sm:$0xff]  ;;  %298 = vst [vmem:[%s1190_s27 + $0x18] sm:$0xff] %v297_v3 }
  0x15   : > { %300 = vst [vmem:[%s1190_s27 + $0x20] sm:$0xff] %v299_v4  ;;  %302 = vst [vmem:[%s1190_s27 + $0x28] sm:$0xff] %v301_v5  ;;  %v303_v6 = vld [vmem:[%s1185_s26 + $0x60] sm:$0xff]  ;;  %v305_v7 = vld [vmem:[%s1185_s26 + $0x70] sm:$0xff] }
  0x16   : > { %v307_v8 = vld [vmem:[%s1185_s26 + $0x80] sm:$0xff]  ;;  %304 = vst [vmem:[%s1190_s27 + $0x30] sm:$0xff] %v303_v6  ;;  %306 = vst [vmem:[%s1190_s27 + $0x38] sm:$0xff] %v305_v7  ;;  %v309_v9 = vld [vmem:[%s1185_s26 + $0x90] sm:$0xff] }
  0x17   : > { %308 = vst [vmem:[%s1190_s27 + $0x40] sm:$0xff] %v307_v8  ;;  %v311_v10 = vld [vmem:[%s1185_s26 + $0xa0] sm:$0xff]  ;;  %v313_v11 = vld [vmem:[%s1185_s26 + $0xb0] sm:$0xff]  ;;  %310 = vst [vmem:[%s1190_s27 + $0x48] sm:$0xff] %v309_v9 }
  0x18   : > { %312 = vst [vmem:[%s1190_s27 + $0x50] sm:$0xff] %v311_v10  ;;  %314 = vst [vmem:[%s1190_s27 + $0x58] sm:$0xff] %v313_v11  ;;  %v315_v12 = vld [vmem:[%s1185_s26 + $0xc0] sm:$0xff]  ;;  %v317_v13 = vld [vmem:[%s1185_s26 + $0xd0] sm:$0xff] }
  0x19   : > { %v319_v14 = vld [vmem:[%s1185_s26 + $0xe0] sm:$0xff]  ;;  %316 = vst [vmem:[%s1190_s27 + $0x60] sm:$0xff] %v315_v12  ;;  %318 = vst [vmem:[%s1190_s27 + $0x68] sm:$0xff] %v317_v13  ;;  %v321_v15 = vld [vmem:[%s1185_s26 + $0xf0] sm:$0xff] }
  0x1a   : > { %320 = vst [vmem:[%s1190_s27 + $0x70] sm:$0xff] %v319_v14  ;;  %v323_v16 = vld [vmem:[%s1185_s26 + $0x100] sm:$0xff]  ;;  %v325_v17 = vld [vmem:[%s1185_s26 + $0x110] sm:$0xff]  ;;  %322 = vst [vmem:[%s1190_s27 + $0x78] sm:$0xff] %v321_v15 }
  0x1b   : > { %324 = vst [vmem:[%s1190_s27 + $0x80] sm:$0xff] %v323_v16  ;;  %326 = vst [vmem:[%s1190_s27 + $0x88] sm:$0xff] %v325_v17  ;;  %v327_v18 = vld [vmem:[%s1185_s26 + $0x120] sm:$0xff]  ;;  %v329_v19 = vld [vmem:[%s1185_s26 + $0x130] sm:$0xff] }
  0x1c   : > { %v331_v20 = vld [vmem:[%s1185_s26 + $0x140] sm:$0xff]  ;;  %328 = vst [vmem:[%s1190_s27 + $0x90] sm:$0xff] %v327_v18  ;;  %330 = vst [vmem:[%s1190_s27 + $0x98] sm:$0xff] %v329_v19  ;;  %v333_v21 = vld [vmem:[%s1185_s26 + $0x150] sm:$0xff] }
  0x1d   : > { %332 = vst [vmem:[%s1190_s27 + $0xa0] sm:$0xff] %v331_v20  ;;  %v335_v22 = vld [vmem:[%s1185_s26 + $0x160] sm:$0xff]  ;;  %v337_v23 = vld [vmem:[%s1185_s26 + $0x170] sm:$0xff]  ;;  %334 = vst [vmem:[%s1190_s27 + $0xa8] sm:$0xff] %v333_v21 }
  0x1e   : > { %336 = vst [vmem:[%s1190_s27 + $0xb0] sm:$0xff] %v335_v22  ;;  %338 = vst [vmem:[%s1190_s27 + $0xb8] sm:$0xff] %v337_v23  ;;  %v339_v24 = vld [vmem:[%s1185_s26 + $0x180] sm:$0xff]  ;;  %v341_v25 = vld [vmem:[%s1185_s26 + $0x190] sm:$0xff] }
  0x1f   : > { %v343_v26 = vld [vmem:[%s1185_s26 + $0x1a0] sm:$0xff]  ;;  %340 = vst [vmem:[%s1190_s27 + $0xc0] sm:$0xff] %v339_v24  ;;  %342 = vst [vmem:[%s1190_s27 + $0xc8] sm:$0xff] %v341_v25  ;;  %v345_v27 = vld [vmem:[%s1185_s26 + $0x1b0] sm:$0xff] }
  0x20   : > { %344 = vst [vmem:[%s1190_s27 + $0xd0] sm:$0xff] %v343_v26  ;;  %v347_v28 = vld [vmem:[%s1185_s26 + $0x1c0] sm:$0xff]  ;;  %v349_v29 = vld [vmem:[%s1185_s26 + $0x1d0] sm:$0xff]  ;;  %346 = vst [vmem:[%s1190_s27 + $0xd8] sm:$0xff] %v345_v27 }
  0x21   : > { %348 = vst [vmem:[%s1190_s27 + $0xe0] sm:$0xff] %v347_v28  ;;  %350 = vst [vmem:[%s1190_s27 + $0xe8] sm:$0xff] %v349_v29  ;;  %v351_v30 = vld [vmem:[%s1185_s26 + $0x1e0] sm:$0xff]  ;;  %v353_v31 = vld [vmem:[%s1185_s26 + $0x1f0] sm:$0xff] }
  0x22   : > { %v355_v32 = vld [vmem:[%s1185_s26 + $0x200] sm:$0xff]  ;;  %352 = vst [vmem:[%s1190_s27 + $0xf0] sm:$0xff] %v351_v30  ;;  %354 = vst [vmem:[%s1190_s27 + $0xf8] sm:$0xff] %v353_v31  ;;  %v357_v33 = vld [vmem:[%s1185_s26 + $0x210] sm:$0xff] }
  0x23   : > { %356 = vst [vmem:[%s1190_s27 + $0x100] sm:$0xff] %v355_v32  ;;  %v359_v34 = vld [vmem:[%s1185_s26 + $0x220] sm:$0xff]  ;;  %v361_v35 = vld [vmem:[%s1185_s26 + $0x230] sm:$0xff]  ;;  %358 = vst [vmem:[%s1190_s27 + $0x108] sm:$0xff] %v357_v33 }
  0x24   : > { %360 = vst [vmem:[%s1190_s27 + $0x110] sm:$0xff] %v359_v34  ;;  %362 = vst [vmem:[%s1190_s27 + $0x118] sm:$0xff] %v361_v35  ;;  %v363_v36 = vld [vmem:[%s1185_s26 + $0x240] sm:$0xff]  ;;  %v365_v37 = vld [vmem:[%s1185_s26 + $0x250] sm:$0xff] }
  0x25   : > { %v367_v38 = vld [vmem:[%s1185_s26 + $0x260] sm:$0xff]  ;;  %364 = vst [vmem:[%s1190_s27 + $0x120] sm:$0xff] %v363_v36  ;;  %366 = vst [vmem:[%s1190_s27 + $0x128] sm:$0xff] %v365_v37  ;;  %v369_v39 = vld [vmem:[%s1185_s26 + $0x270] sm:$0xff] }
  0x26   : > { %368 = vst [vmem:[%s1190_s27 + $0x130] sm:$0xff] %v367_v38  ;;  %v371_v40 = vld [vmem:[%s1185_s26 + $0x280] sm:$0xff]  ;;  %v373_v41 = vld [vmem:[%s1185_s26 + $0x290] sm:$0xff]  ;;  %370 = vst [vmem:[%s1190_s27 + $0x138] sm:$0xff] %v369_v39 }
  0x27   : > { %372 = vst [vmem:[%s1190_s27 + $0x140] sm:$0xff] %v371_v40  ;;  %374 = vst [vmem:[%s1190_s27 + $0x148] sm:$0xff] %v373_v41  ;;  %v375_v42 = vld [vmem:[%s1185_s26 + $0x2a0] sm:$0xff]  ;;  %v377_v43 = vld [vmem:[%s1185_s26 + $0x2b0] sm:$0xff] }
  0x28   : > { %v379_v44 = vld [vmem:[%s1185_s26 + $0x2c0] sm:$0xff]  ;;  %376 = vst [vmem:[%s1190_s27 + $0x150] sm:$0xff] %v375_v42  ;;  %378 = vst [vmem:[%s1190_s27 + $0x158] sm:$0xff] %v377_v43  ;;  %v381_v45 = vld [vmem:[%s1185_s26 + $0x2d0] sm:$0xff] }
  0x29   : > { %380 = vst [vmem:[%s1190_s27 + $0x160] sm:$0xff] %v379_v44  ;;  %v383_v46 = vld [vmem:[%s1185_s26 + $0x2e0] sm:$0xff]  ;;  %v385_v47 = vld [vmem:[%s1185_s26 + $0x2f0] sm:$0xff]  ;;  %382 = vst [vmem:[%s1190_s27 + $0x168] sm:$0xff] %v381_v45 }
  0x2a   : > { %384 = vst [vmem:[%s1190_s27 + $0x170] sm:$0xff] %v383_v46  ;;  %386 = vst [vmem:[%s1190_s27 + $0x178] sm:$0xff] %v385_v47  ;;  %v387_v48 = vld [vmem:[%s1185_s26 + $0x300] sm:$0xff]  ;;  %v389_v49 = vld [vmem:[%s1185_s26 + $0x310] sm:$0xff] }
  0x2b   : > { %v391_v50 = vld [vmem:[%s1185_s26 + $0x320] sm:$0xff]  ;;  %388 = vst [vmem:[%s1190_s27 + $0x180] sm:$0xff] %v387_v48  ;;  %390 = vst [vmem:[%s1190_s27 + $0x188] sm:$0xff] %v389_v49  ;;  %v393_v51 = vld [vmem:[%s1185_s26 + $0x330] sm:$0xff] }
  0x2c   : > { %392 = vst [vmem:[%s1190_s27 + $0x190] sm:$0xff] %v391_v50  ;;  %v395_v52 = vld [vmem:[%s1185_s26 + $0x340] sm:$0xff]  ;;  %v397_v53 = vld [vmem:[%s1185_s26 + $0x350] sm:$0xff]  ;;  %394 = vst [vmem:[%s1190_s27 + $0x198] sm:$0xff] %v393_v51 }
  0x2d   : > { %396 = vst [vmem:[%s1190_s27 + $0x1a0] sm:$0xff] %v395_v52  ;;  %398 = vst [vmem:[%s1190_s27 + $0x1a8] sm:$0xff] %v397_v53  ;;  %v399_v54 = vld [vmem:[%s1185_s26 + $0x360] sm:$0xff]  ;;  %v401_v55 = vld [vmem:[%s1185_s26 + $0x370] sm:$0xff] }
  0x2e   : > { %v403_v56 = vld [vmem:[%s1185_s26 + $0x380] sm:$0xff]  ;;  %400 = vst [vmem:[%s1190_s27 + $0x1b0] sm:$0xff] %v399_v54  ;;  %402 = vst [vmem:[%s1190_s27 + $0x1b8] sm:$0xff] %v401_v55  ;;  %v405_v57 = vld [vmem:[%s1185_s26 + $0x390] sm:$0xff] }
  0x2f   : > { %404 = vst [vmem:[%s1190_s27 + $0x1c0] sm:$0xff] %v403_v56  ;;  %v407_v58 = vld [vmem:[%s1185_s26 + $0x3a0] sm:$0xff]  ;;  %v409_v59 = vld [vmem:[%s1185_s26 + $0x3b0] sm:$0xff]  ;;  %406 = vst [vmem:[%s1190_s27 + $0x1c8] sm:$0xff] %v405_v57 }
  0x30   : > { %408 = vst [vmem:[%s1190_s27 + $0x1d0] sm:$0xff] %v407_v58  ;;  %410 = vst [vmem:[%s1190_s27 + $0x1d8] sm:$0xff] %v409_v59  ;;  %v411_v60 = vld [vmem:[%s1185_s26 + $0x3c0] sm:$0xff]  ;;  %v413_v61 = vld [vmem:[%s1185_s26 + $0x3d0] sm:$0xff] }
  0x31   : > { %v415_v62 = vld [vmem:[%s1185_s26 + $0x3e0] sm:$0xff]  ;;  %412 = vst [vmem:[%s1190_s27 + $0x1e0] sm:$0xff] %v411_v60  ;;  %414 = vst [vmem:[%s1190_s27 + $0x1e8] sm:$0xff] %v413_v61  ;;  %v417_v63 = vld [vmem:[%s1185_s26 + $0x3f0] sm:$0xff] }
  0x32   : > { %416 = vst [vmem:[%s1190_s27 + $0x1f0] sm:$0xff] %v415_v62  ;;  %418 = vst [vmem:[%s1190_s27 + $0x1f8] sm:$0xff] %v417_v63 }
  0x33 PF: > { %p954_p7 = scmp.ge.s32.totalorder %s1122_s14, 1  ;;  %p423_p8 = scmp.lt.s32.totalorder %s1122_s14, 3 }
  0x35   : > { %p424_p9 = pnand %p954_p7, %p423_p8 }
  0x36   : > { %s430_s28 = sand.u32 (!%p424_p9), 1, %s1114_s12  }
  0x37   : > { %427 = sbr.rel (%p424_p9) target bundleno = 335 (0x14f), region = 66  ;;  %s955_s6 = sshll.u32 (!%p424_p9), %s430_s28, 9 }
  0x38   : > { %s1328_s7 = scalar_lea.vmem (!%p424_p9), [#allocation2], %s955_s6  ;;  %s956_s8 = sshll.u32 (!%p424_p9), %s430_s28, 6 }
  0x39   : > { %s1510_s9 = scalar_lea.vmem (!%p424_p9), [#allocation3], %s956_s8 }
  0x3c   : > { %v453_v0 = vld [vmem:[%s1545_s0 + $0x8] sm:$0xff]  ;;  %v455_v1 = vld [vmem:[%s1545_s0 + $0x18] sm:$0xff]  ;;  %v1124_v2 = vmov 0   ;;  %v514_v7 = vld [vmem:[%s1328_s7 + $0xf0] sm:$0xff]  ;;  %s958_s12 = sshll.u32 (%p1175_p5), %s948_s15, 3 }
  0x3d   : > { %660 = vmatprep.mubr.f32.mxu0 %v453_v0  ;;  %765 = vmatprep.mubr.f32.mxu1 %v455_v1  ;;  %v515_v3 = vld [vmem:[%s1328_s7 + $0xf8] sm:$0xff]  ;;  %v546_v8 = vld [vmem:[%s1328_s7 + $0x1f0] sm:$0xff]  ;;  %v513_v11 = vld [vmem:[%s1328_s7 + $0xe8] sm:$0xff]  ;;  %s830_s11 = scalar_lea.vmem (%p1175_p5), %s1548_s3, %s958_s12 }
  0x3e   : > { %1098 = vset.pattern.permute.xlu0 %v1124_v2  ;;  %1099 = vset.pattern.permute.xlu1 %v1124_v2  ;;  %v547_v4 = vld [vmem:[%s1328_s7 + $0x1f8] sm:$0xff]  ;;  %v498_v9 = vld [vmem:[%s1328_s7 + $0x70] sm:$0xff]  ;;  %v545_v12 = vld [vmem:[%s1328_s7 + $0x1e8] sm:$0xff] }
  0x3f   : > { %v499_v5 = vld [vmem:[%s1328_s7 + $0x78] sm:$0xff]  ;;  %961 = vmatprep.subr.mxu0 %v515_v3  ;;  %1017 = vmatprep.subr.mxu1 %v547_v4  ;;  %v530_v10 = vld [vmem:[%s1328_s7 + $0x170] sm:$0xff]  ;;  %v497_v13 = vld [vmem:[%s1328_s7 + $0x68] sm:$0xff] }
  0x40   : > { %v531_v6 = vld [vmem:[%s1328_s7 + $0x178] sm:$0xff]  ;;  %962 = vmatpush3.msra.mxu0 %v499_v5  ;;  %v529_v14 = vld [vmem:[%s1328_s7 + $0x168] sm:$0xff]  ;;  %v512_v15 = vld [vmem:[%s1328_s7 + $0xe0] sm:$0xff] }
  0x41   : > { %1018 = vmatpush3.msra.mxu1 %v531_v6  ;;  %963 = vmatprep.subr.mxu0 %v514_v7  ;;  %v544_v16 = vld [vmem:[%s1328_s7 + $0x1e0] sm:$0xff]  ;;  %v511_v19 = vld [vmem:[%s1328_s7 + $0xd8] sm:$0xff]  ;;  %v510_v23 = vld [vmem:[%s1328_s7 + $0xd0] sm:$0xff] }
  0x42   : > { %1019 = vmatprep.subr.mxu1 %v546_v8  ;;  %964 = vmatpush3.msra.mxu0 %v498_v9  ;;  %v496_v17 = vld [vmem:[%s1328_s7 + $0x60] sm:$0xff]  ;;  %v543_v20 = vld [vmem:[%s1328_s7 + $0x1d8] sm:$0xff]  ;;  %v542_v24 = vld [vmem:[%s1328_s7 + $0x1d0] sm:$0xff] }
  0x43   : > { %1020 = vmatpush3.msra.mxu1 %v530_v10  ;;  %965 = vmatprep.subr.mxu0 %v513_v11  ;;  %v528_v18 = vld [vmem:[%s1328_s7 + $0x160] sm:$0xff]  ;;  %v495_v21 = vld [vmem:[%s1328_s7 + $0x58] sm:$0xff]  ;;  %v494_v25 = vld [vmem:[%s1328_s7 + $0x50] sm:$0xff] }
  0x44   : > { %1021 = vmatprep.subr.mxu1 %v545_v12  ;;  %966 = vmatpush3.msra.mxu0 %v497_v13  ;;  %v527_v22 = vld [vmem:[%s1328_s7 + $0x158] sm:$0xff]  ;;  %v526_v26 = vld [vmem:[%s1328_s7 + $0x150] sm:$0xff]  ;;  %v509_v27 = vld [vmem:[%s1328_s7 + $0xc8] sm:$0xff] }
  0x45   : > { %1022 = vmatpush3.msra.mxu1 %v529_v14  ;;  %967 = vmatprep.subr.mxu0 %v512_v15  ;;  %v541_v28 = vld [vmem:[%s1328_s7 + $0x1c8] sm:$0xff]  ;;  %v508_v31 = vld [vmem:[%s1328_s7 + $0xc0] sm:$0xff]  ;;  %v507_v35 = vld [vmem:[%s1328_s7 + $0xb8] sm:$0xff] }
  0x46   : > { %1023 = vmatprep.subr.mxu1 %v544_v16  ;;  %968 = vmatpush3.msra.mxu0 %v496_v17  ;;  %v493_v29 = vld [vmem:[%s1328_s7 + $0x48] sm:$0xff]  ;;  %v540_v32 = vld [vmem:[%s1328_s7 + $0x1c0] sm:$0xff]  ;;  %v539_v36 = vld [vmem:[%s1328_s7 + $0x1b8] sm:$0xff] }
  0x47   : > { %1024 = vmatpush3.msra.mxu1 %v528_v18  ;;  %969 = vmatprep.subr.mxu0 %v511_v19  ;;  %v525_v30 = vld [vmem:[%s1328_s7 + $0x148] sm:$0xff]  ;;  %v492_v33 = vld [vmem:[%s1328_s7 + $0x40] sm:$0xff]  ;;  %v491_v37 = vld [vmem:[%s1328_s7 + $0x38] sm:$0xff] }
  0x48   : > { %1025 = vmatprep.subr.mxu1 %v543_v20  ;;  %970 = vmatpush3.msra.mxu0 %v495_v21  ;;  %v524_v34 = vld [vmem:[%s1328_s7 + $0x140] sm:$0xff]  ;;  %v523_v38 = vld [vmem:[%s1328_s7 + $0x138] sm:$0xff]  ;;  %v506_v39 = vld [vmem:[%s1328_s7 + $0xb0] sm:$0xff] }
  0x49   : > { %1026 = vmatpush3.msra.mxu1 %v527_v22  ;;  %971 = vmatprep.subr.mxu0 %v510_v23  ;;  %v538_v40 = vld [vmem:[%s1328_s7 + $0x1b0] sm:$0xff]  ;;  %v505_v43 = vld [vmem:[%s1328_s7 + $0xa8] sm:$0xff]  ;;  %v504_v47 = vld [vmem:[%s1328_s7 + $0xa0] sm:$0xff] }
  0x4a   : > { %1027 = vmatprep.subr.mxu1 %v542_v24  ;;  %972 = vmatpush3.msra.mxu0 %v494_v25  ;;  %v490_v41 = vld [vmem:[%s1328_s7 + $0x30] sm:$0xff]  ;;  %v537_v44 = vld [vmem:[%s1328_s7 + $0x1a8] sm:$0xff]  ;;  %v536_v48 = vld [vmem:[%s1328_s7 + $0x1a0] sm:$0xff] }
  0x4b   : > { %1028 = vmatpush3.msra.mxu1 %v526_v26  ;;  %973 = vmatprep.subr.mxu0 %v509_v27  ;;  %v522_v42 = vld [vmem:[%s1328_s7 + $0x130] sm:$0xff]  ;;  %v489_v45 = vld [vmem:[%s1328_s7 + $0x28] sm:$0xff]  ;;  %v488_v49 = vld [vmem:[%s1328_s7 + $0x20] sm:$0xff] }
  0x4c   : > { %1029 = vmatprep.subr.mxu1 %v541_v28  ;;  %974 = vmatpush3.msra.mxu0 %v493_v29  ;;  %v521_v46 = vld [vmem:[%s1328_s7 + $0x128] sm:$0xff]  ;;  %v520_v50 = vld [vmem:[%s1328_s7 + $0x120] sm:$0xff]  ;;  %v503_v51 = vld [vmem:[%s1328_s7 + $0x98] sm:$0xff] }
  0x4d   : > { %1030 = vmatpush3.msra.mxu1 %v525_v30  ;;  %975 = vmatprep.subr.mxu0 %v508_v31  ;;  %v535_v52 = vld [vmem:[%s1328_s7 + $0x198] sm:$0xff]  ;;  %v502_v55 = vld [vmem:[%s1328_s7 + $0x90] sm:$0xff]  ;;  %v501_v59 = vld [vmem:[%s1328_s7 + $0x88] sm:$0xff] }
  0x4e   : > { %1031 = vmatprep.subr.mxu1 %v540_v32  ;;  %976 = vmatpush3.msra.mxu0 %v492_v33  ;;  %v487_v53 = vld [vmem:[%s1328_s7 + $0x18] sm:$0xff]  ;;  %v534_v56 = vld [vmem:[%s1328_s7 + $0x190] sm:$0xff]  ;;  %v533_v60 = vld [vmem:[%s1328_s7 + $0x188] sm:$0xff] }
  0x4f   : > { %1032 = vmatpush3.msra.mxu1 %v524_v34  ;;  %977 = vmatprep.subr.mxu0 %v507_v35  ;;  %v519_v54 = vld [vmem:[%s1328_s7 + $0x118] sm:$0xff]  ;;  %v486_v57 = vld [vmem:[%s1328_s7 + $0x10] sm:$0xff]  ;;  %v485_v61 = vld [vmem:[%s1328_s7 + $0x8] sm:$0xff] }
  0x50   : > { %1033 = vmatprep.subr.mxu1 %v539_v36  ;;  %978 = vmatpush3.msra.mxu0 %v491_v37  ;;  %v518_v58 = vld [vmem:[%s1328_s7 + $0x110] sm:$0xff]  ;;  %v517_v62 = vld [vmem:[%s1328_s7 + $0x108] sm:$0xff]  ;;  %v500_v63 = vld [vmem:[%s1328_s7 + $0x80] sm:$0xff] }
  0x51   : > { %1034 = vmatpush3.msra.mxu1 %v523_v38  ;;  %979 = vmatprep.subr.mxu0 %v506_v39  ;;  %v532_v0 = vld [vmem:[%s1328_s7 + $0x180] sm:$0xff]  ;;  %v454_v4 = vld [vmem:[%s1545_s0 + $0x10] sm:$0xff]  ;;  %v457_v5 = vld [vmem:[%s1545_s0 + $0x28] sm:$0xff] }
  0x52   : > { %1035 = vmatprep.subr.mxu1 %v538_v40  ;;  %980 = vmatpush3.msra.mxu0 %v490_v41  ;;  %v484_v1 = vld [vmem:[%s1328_s7] sm:$0xff]  ;;  %v459_v6 = vld [vmem:[%s1545_s0 + $0x38] sm:$0xff]  ;;  %v550_v8 = vld [vmem:[%s1547_s2 + $0x10] sm:$0xff] }
  0x53   : > { %1036 = vmatpush3.msra.mxu1 %v522_v42  ;;  %981 = vmatprep.subr.mxu0 %v505_v43  ;;  %v516_v2 = vld [vmem:[%s1328_s7 + $0x100] sm:$0xff]  ;;  %v458_v10 = vld [vmem:[%s1545_s0 + $0x30] sm:$0xff]  ;;  %v461_v11 = vld [vmem:[%s1545_s0 + $0x48] sm:$0xff] }
  0x54   : > { %1037 = vmatprep.subr.mxu1 %v537_v44  ;;  %982 = vmatpush3.msra.mxu0 %v489_v45  ;;  %v452_v3 = vld [vmem:[%s1545_s0] sm:$0xff]  ;;  %v463_v12 = vld [vmem:[%s1545_s0 + $0x58] sm:$0xff]  ;;  %v549_v13 = vld [vmem:[%s1547_s2 + $0x8] sm:$0xff] }
  0x55   : > { %1038 = vmatpush3.msra.mxu1 %v521_v46  ;;  %983 = vmatprep.subr.mxu0 %v504_v47  ;;  %v548_v7 = vld [vmem:[%s1547_s2] sm:$0xff]  ;;  %v551_v14 = vld [vmem:[%s1547_s2 + $0x18] sm:$0xff]  ;;  %v462_v16 = vld [vmem:[%s1545_s0 + $0x50] sm:$0xff] }
  0x56   : > { %1039 = vmatprep.subr.mxu1 %v536_v48  ;;  %984 = vmatpush3.msra.mxu0 %v488_v49  ;;  %v456_v9 = vld [vmem:[%s1545_s0 + $0x20] sm:$0xff]  ;;  %v465_v17 = vld [vmem:[%s1545_s0 + $0x68] sm:$0xff]  ;;  %v467_v18 = vld [vmem:[%s1545_s0 + $0x78] sm:$0xff] }
  0x57   : > { %1040 = vmatpush3.msra.mxu1 %v520_v50  ;;  %985 = vmatprep.subr.mxu0 %v503_v51  ;;  %v460_v15 = vld [vmem:[%s1545_s0 + $0x40] sm:$0xff]  ;;  %v553_v19 = vld [vmem:[%s1547_s2 + $0x28] sm:$0xff]  ;;  %v466_v22 = vld [vmem:[%s1545_s0 + $0x70] sm:$0xff] }
  0x58   : > { %1041 = vmatprep.subr.mxu1 %v535_v52  ;;  %986 = vmatpush3.msra.mxu0 %v487_v53  ;;  %v552_v20 = vld [vmem:[%s1547_s2 + $0x20] sm:$0xff]  ;;  %v469_v23 = vld [vmem:[%s1545_s0 + $0x88] sm:$0xff]  ;;  %v471_v24 = vld [vmem:[%s1545_s0 + $0x98] sm:$0xff] }
  0x59   : > { %1042 = vmatpush3.msra.mxu1 %v519_v54  ;;  %987 = vmatprep.subr.mxu0 %v502_v55  ;;  %v464_v21 = vld [vmem:[%s1545_s0 + $0x60] sm:$0xff]  ;;  %v555_v25 = vld [vmem:[%s1547_s2 + $0x38] sm:$0xff]  ;;  %v554_v26 = vld [vmem:[%s1547_s2 + $0x30] sm:$0xff] }
  0x5a   : > { %1043 = vmatprep.subr.mxu1 %v534_v56  ;;  %988 = vmatpush3.msra.mxu0 %v486_v57  ;;  %v468_v27 = vld [vmem:[%s1545_s0 + $0x80] sm:$0xff]  ;;  %v470_v28 = vld [vmem:[%s1545_s0 + $0x90] sm:$0xff]  ;;  %v473_v29 = vld [vmem:[%s1545_s0 + $0xa8] sm:$0xff] }
  0x5b   : > { %1044 = vmatpush3.msra.mxu1 %v518_v58  ;;  %989 = vmatprep.subr.mxu0 %v501_v59  ;;  %v475_v30 = vld [vmem:[%s1545_s0 + $0xb8] sm:$0xff]  ;;  %v472_v31 = vld [vmem:[%s1545_s0 + $0xa0] sm:$0xff]  ;;  %v474_v32 = vld [vmem:[%s1545_s0 + $0xb0] sm:$0xff] }
  0x5c   : > { %1045 = vmatprep.subr.mxu1 %v533_v60  ;;  %990 = vmatpush3.msra.mxu0 %v485_v61  ;;  %v477_v33 = vld [vmem:[%s1545_s0 + $0xc8] sm:$0xff]  ;;  %v479_v34 = vld [vmem:[%s1545_s0 + $0xd8] sm:$0xff]  ;;  %v476_v35 = vld [vmem:[%s1545_s0 + $0xc0] sm:$0xff] }
  0x5d   : > { %1046 = vmatpush3.msra.mxu1 %v517_v62  ;;  %991 = vmatprep.subr.mxu0 %v500_v63  ;;  %v478_v36 = vld [vmem:[%s1545_s0 + $0xd0] sm:$0xff]  ;;  %v481_v37 = vld [vmem:[%s1545_s0 + $0xe8] sm:$0xff]  ;;  %v483_v38 = vld [vmem:[%s1545_s0 + $0xf8] sm:$0xff] }
  0x5e   : > { %1047 = vmatprep.subr.mxu1 %v532_v0  ;;  %992 = vmatpush3.msra.mxu0 %v484_v1  ;;  %v480_v39 = vld [vmem:[%s1545_s0 + $0xe0] sm:$0xff]  ;;  %v482_v40 = vld [vmem:[%s1545_s0 + $0xf0] sm:$0xff] }
  0x5f   : > { %1048 = vmatpush3.msra.mxu1 %v516_v2  ;;  %661 = vmatmul.mubr.f32.vlgmr.msra.gmra.mxu0 %v452_v3 }
  0x60   : > { %766 = vmatmul.mubr.f32.vlgmr.msra.gmra.mxu1 %v454_v4  ;;  %665 = vmatprep.mubr.f32.mxu0 %v457_v5 }
  0x61   : > { %770 = vmatprep.mubr.f32.mxu1 %v459_v6  ;;  %558 = vperm.xlu0 %1098, %v548_v7  }
  0x62   : > { %568 = vperm.xlu1 %1099, %v550_v8  }
  0x63   : > { %666 = vmatmul.mubr.f32.gmra.mxu0 %v456_v9 }
  0x64   : > { %771 = vmatmul.mubr.f32.gmra.mxu1 %v458_v10  ;;  %670 = vmatprep.mubr.f32.mxu0 %v461_v11 }
  0x65   : > { %775 = vmatprep.mubr.f32.mxu1 %v463_v12  ;;  %563 = vperm.xlu0 %1098, %v549_v13  }
  0x66   : > { %573 = vperm.xlu1 %1099, %v551_v14  }
  0x67   : > { %671 = vmatmul.mubr.f32.gmra.mxu0 %v460_v15 }
  0x68   : > { %776 = vmatmul.mubr.f32.gmra.mxu1 %v462_v16  ;;  %675 = vmatprep.mubr.f32.mxu0 %v465_v17 }
  0x69   : > { %780 = vmatprep.mubr.f32.mxu1 %v467_v18  ;;  %578 = vperm.xlu0 %1098, %v552_v20  }
  0x6a   : > { %583 = vperm.xlu1 %1099, %v553_v19  }
  0x6b   : > { %676 = vmatmul.mubr.f32.gmra.mxu0 %v464_v21 }
  0x6c   : > { %781 = vmatmul.mubr.f32.gmra.mxu1 %v466_v22  ;;  %680 = vmatprep.mubr.f32.mxu0 %v469_v23 }
  0x6d   : > { %785 = vmatprep.mubr.f32.mxu1 %v471_v24  ;;  %588 = vperm.xlu0 %1098, %v554_v26  }
  0x6e   : > { %593 = vperm.xlu1 %1099, %v555_v25  }
  0x6f   : > { %681 = vmatmul.mubr.f32.gmra.mxu0 %v468_v27 }
  0x70   : > { %786 = vmatmul.mubr.f32.gmra.mxu1 %v470_v28  ;;  %685 = vmatprep.mubr.f32.mxu0 %v473_v29 }
  0x71   : > { %790 = vmatprep.mubr.f32.mxu1 %v475_v30 }
  0x73   : > { %686 = vmatmul.mubr.f32.gmra.mxu0 %v472_v31 }
  0x74   : > { %791 = vmatmul.mubr.f32.gmra.mxu1 %v474_v32  ;;  %690 = vmatprep.mubr.f32.mxu0 %v477_v33 }
  0x75   : > { %795 = vmatprep.mubr.f32.mxu1 %v479_v34 }
  0x77   : > { %691 = vmatmul.mubr.f32.gmra.mxu0 %v476_v35 }
  0x78   : > { %796 = vmatmul.mubr.f32.gmra.mxu1 %v478_v36  ;;  %695 = vmatprep.mubr.f32.mxu0 %v481_v37 }
  0x79   : > { %800 = vmatprep.mubr.f32.mxu1 %v483_v38 }
  0x7b   : > { %696 = vmatmul.mubr.f32.gmra.mxu0 %v480_v39 }
  0x7c   : > { %801 = vmatmul.mubr.f32.gmra.mxu1 %v482_v40 }
  0xdc   : > { %v559_v41 = vpop.permute.xlu0 %558 }
  0xdd   : > { %v569_v60 = vpop.permute.xlu1 %568 }
  0xe0   : > { %v564_v51 = vpop.permute.xlu0 %563 }
  0xe1   : > { %v574_v10 = vpop.permute.xlu1 %573 }
  0xe4   : > { %v579_v20 = vpop.permute.xlu0 %578 }
  0xe5   : > { %v584_v29 = vpop.permute.xlu1 %583 }
  0xe8   : > { %v589_v39 = vpop.permute.xlu0 %588 }
 0x11f   : > { %v993_v42 = vpop.f32.mrf.mxu0 }
 0x120   : > { %v1049_v43 = vpop.f32.mrf.mxu1 }
 0x121   : > { %v994_v44 = vpop.f32.mrf.mxu0 }
 0x122   : > { %v1050_v45 = vpop.f32.mrf.mxu1  ;;  %v995_v46 = vadd.f32 %v994_v44, %v993_v42 }
 0x123   : > { %v996_v47 = vpop.f32.mrf.mxu0  ;;  %v1051_v49 = vadd.f32 %v1050_v45, %v1049_v43 }
 0x124   : > { %v1052_v48 = vpop.f32.mrf.mxu1  ;;  %v663_v50 = vadd.f32 %v995_v46, %v559_v41 }
 0x125   : > { %v997_v52 = vpop.f32.mrf.mxu0 }
 0x126   : > { %v1053_v53 = vpop.f32.mrf.mxu1  ;;  %v768_v54 = vadd.f32 %v1051_v49, %v663_v50  ;;  %v998_v55 = vadd.f32 %v997_v52, %v996_v47 }
 0x127   : > { %v999_v56 = vpop.f32.mrf.mxu0  ;;  %v1054_v59 = vadd.f32 %v1053_v53, %v1052_v48 }
 0x128   : > { %v1055_v57 = vpop.f32.mrf.mxu1  ;;  %v806_v58 = vmax.f32 %v768_v54, 0.0  ;;  %v668_v61 = vadd.f32 %v998_v55, %v564_v51  ;;  %v594_v51 = vpop.permute.xlu1 %593 }
 0x129   : > { %v1000_v62 = vpop.f32.mrf.mxu0 }
 0x12a   : > { %v1056_v63 = vpop.f32.mrf.mxu1  ;;  %814 = vst [vmem:[%s1510_s9] sm:$0xff] %v806_v58  ;;  %v773_v0 = vadd.f32 %v1054_v59, %v668_v61  ;;  %v1001_v1 = vadd.f32 %v1000_v62, %v999_v56 }
 0x12b   : > { %v1002_v2 = vpop.f32.mrf.mxu0  ;;  %v1057_v6 = vadd.f32 %v1056_v63, %v1055_v57 }
 0x12c   : > { %v1058_v3 = vpop.f32.mrf.mxu1  ;;  %v807_v4 = vmax.f32 %v773_v0, 0.0  ;;  %v673_v5 = vadd.f32 %v1001_v1, %v569_v60 }
 0x12d   : > { %v1003_v7 = vpop.f32.mrf.mxu0 }
 0x12e   : > { %v1059_v8 = vpop.f32.mrf.mxu1  ;;  %815 = vst [vmem:[%s1510_s9 + $0x8] sm:$0xff] %v807_v4  ;;  %v778_v9 = vadd.f32 %v1057_v6, %v673_v5  ;;  %v1004_v11 = vadd.f32 %v1003_v7, %v1002_v2 }
 0x12f   : > { %v1005_v12 = vpop.f32.mrf.mxu0  ;;  %v1060_v16 = vadd.f32 %v1059_v8, %v1058_v3 }
 0x130   : > { %v1061_v13 = vpop.f32.mrf.mxu1  ;;  %v808_v14 = vmax.f32 %v778_v9, 0.0  ;;  %v678_v15 = vadd.f32 %v1004_v11, %v574_v10 }
 0x131   : > { %v1006_v17 = vpop.f32.mrf.mxu0  ;;  %v873_v57 = vld [vmem:[%s1510_s9] sm:$0xff] (%p1175_p5) }
 0x132   : > { %v1062_v18 = vpop.f32.mrf.mxu1  ;;  %816 = vst [vmem:[%s1510_s9 + $0x10] sm:$0xff] %v808_v14  ;;  %v783_v19 = vadd.f32 %v1060_v16, %v678_v15  ;;  %v1007_v21 = vadd.f32 %v1006_v17, %v1005_v12  ;;  %874 = vst [vmem:[%s830_s11] sm:$0xff] (%p1175_p5), %v873_v57 }
 0x133   : > { %v1008_v22 = vpop.f32.mrf.mxu0  ;;  %v1063_v26 = vadd.f32 %v1062_v18, %v1061_v13 }
 0x134   : > { %v1064_v23 = vpop.f32.mrf.mxu1  ;;  %v809_v24 = vmax.f32 %v783_v19, 0.0  ;;  %v683_v25 = vadd.f32 %v1007_v21, %v579_v20 }
 0x135   : > { %v1009_v27 = vpop.f32.mrf.mxu0  ;;  %v875_v58 = vld [vmem:[%s1510_s9 + $0x8] sm:$0xff] (%p1175_p5) }
 0x136   : > { %v1065_v28 = vpop.f32.mrf.mxu1  ;;  %817 = vst [vmem:[%s1510_s9 + $0x18] sm:$0xff] %v809_v24  ;;  %v788_v30 = vadd.f32 %v1063_v26, %v683_v25  ;;  %v1010_v31 = vadd.f32 %v1009_v27, %v1008_v22  ;;  %876 = vst [vmem:[%s830_s11 + $0x10] sm:$0xff] (%p1175_p5), %v875_v58 }
 0x137   : > { %v1011_v32 = vpop.f32.mrf.mxu0  ;;  %v1066_v36 = vadd.f32 %v1065_v28, %v1064_v23 }
 0x138   : > { %v1067_v33 = vpop.f32.mrf.mxu1  ;;  %v810_v34 = vmax.f32 %v788_v30, 0.0  ;;  %v688_v35 = vadd.f32 %v1010_v31, %v584_v29 }
 0x139   : > { %v1012_v37 = vpop.f32.mrf.mxu0  ;;  %v877_v59 = vld [vmem:[%s1510_s9 + $0x10] sm:$0xff] (%p1175_p5) }
 0x13a   : > { %v1068_v38 = vpop.f32.mrf.mxu1  ;;  %818 = vst [vmem:[%s1510_s9 + $0x20] sm:$0xff] %v810_v34  ;;  %v793_v40 = vadd.f32 %v1066_v36, %v688_v35  ;;  %v1013_v41 = vadd.f32 %v1012_v37, %v1011_v32  ;;  %878 = vst [vmem:[%s830_s11 + $0x20] sm:$0xff] (%p1175_p5), %v877_v59 }
 0x13b   : > { %v1014_v42 = vpop.f32.mrf.mxu0  ;;  %v1069_v46 = vadd.f32 %v1068_v38, %v1067_v33 }
 0x13c   : > { %v1070_v43 = vpop.f32.mrf.mxu1  ;;  %v811_v44 = vmax.f32 %v793_v40, 0.0  ;;  %v693_v45 = vadd.f32 %v1013_v41, %v589_v39 }
 0x13d   : > { %v1015_v47 = vpop.f32.mrf.mxu0  ;;  %v879_v60 = vld [vmem:[%s1510_s9 + $0x18] sm:$0xff] (%p1175_p5) }
 0x13e   : > { %v1071_v48 = vpop.f32.mrf.mxu1  ;;  %819 = vst [vmem:[%s1510_s9 + $0x28] sm:$0xff] %v811_v44  ;;  %v798_v49 = vadd.f32 %v1069_v46, %v693_v45  ;;  %v1016_v50 = vadd.f32 %v1015_v47, %v1014_v42  ;;  %880 = vst [vmem:[%s830_s11 + $0x30] sm:$0xff] (%p1175_p5), %v879_v60 }
 0x13f   : > { %v1072_v54 = vadd.f32 %v1071_v48, %v1070_v43 }
 0x140   : > { %v812_v52 = vmax.f32 %v798_v49, 0.0  ;;  %v698_v53 = vadd.f32 %v1016_v50, %v594_v51 }
 0x141   : > { %v881_v61 = vld [vmem:[%s1510_s9 + $0x20] sm:$0xff] (%p1175_p5) }
 0x142   : > { %820 = vst [vmem:[%s1510_s9 + $0x30] sm:$0xff] %v812_v52  ;;  %v803_v55 = vadd.f32 %v1072_v54, %v698_v53  ;;  %828 = sbr.rel (!%p1175_p5) target bundleno = 335 (0x14f), region = 74  ;;  %882 = vst [vmem:[%s830_s11 + $0x40] sm:$0xff] (%p1175_p5), %v881_v61 }
 0x144   : > { %v813_v56 = vmax.f32 %v803_v55, 0.0 }
 0x145   : > { %v883_v62 = vld [vmem:[%s1510_s9 + $0x28] sm:$0xff] (%p1175_p5) }
 0x146   : > { %821 = vst [vmem:[%s1510_s9 + $0x38] sm:$0xff] %v813_v56  ;;  %884 = vst [vmem:[%s830_s11 + $0x50] sm:$0xff] (%p1175_p5), %v883_v62 }
 0x149   : > { %v885_v63 = vld [vmem:[%s1510_s9 + $0x30] sm:$0xff] }
 0x14a   : > { %886 = vst [vmem:[%s830_s11 + $0x60] sm:$0xff] %v885_v63 }
 0x14d   : > { %v887_v0 = vld [vmem:[%s1510_s9 + $0x38] sm:$0xff] }
 0x14e   : > { %888 = vst [vmem:[%s830_s11 + $0x70] sm:$0xff] %v887_v0 }
 0x14f PF: > { %p10_p10 = scmp.ge.s32.totalorder %s1162_s16, 4   ;;  %s1550_s12 = smov %s1118_s13 }
 0x150   : > { %s1551_s13 = smov %s1173_s19  ;;  %s1552_s14 = smov %s1162_s16 }
 0x151   :  { %12 = sbr.rel (!%p10_p10) target bundleno = 2 (0x2), region = 143 }

// kernel: duel_dqn_forward.6
= control target key start
LH: loop header
LB: loop body
LE: loop exit
PB: predicated region body
PF: predicated region fallthrough
CT: control target
= control target key end

     0   :  { %v718_v3 = vmov 0   ;;  %vm174_vm0 = vcmask 523264   ;;  %vm522_vm1 = vcmask 801792   ;;  %s1139_s1 = inlined_call_operand.vmem [shape: f32[576,98], index: 1, kind: input, shape index: {}]   ;;  %s1140_s0 = inlined_call_operand.vmem [shape: f32[64,576], index: 0, kind: input, shape index: {}]   ;;  %s1141_s2 = inlined_call_operand.vmem [shape: f32[64,1], index: 2, kind: input, shape index: {}]   ;;  %s1142_s3 = inlined_call_operand.vmem [shape: f32[64,98], index: 3, kind: output, shape index: {}]  }
   0x1   :  { %v85_v0 = vld [vmem:[%s1139_s1 + $0xf8] sm:$0xff]  ;;  %716 = vset.pattern.permute.xlu0 %v718_v3  ;;  %717 = vset.pattern.permute.xlu1 %v718_v3  ;;  %v84_v5 = vld [vmem:[%s1139_s1 + $0xf0] sm:$0xff]  ;;  %v83_v9 = vld [vmem:[%s1139_s1 + $0xe8] sm:$0xff] }
   0x2   :  { %v117_v1 = vld [vmem:[%s1139_s1 + $0x1f8] sm:$0xff]  ;;  %543 = vmatprep.subr.mxu0 %v85_v0  ;;  %v116_v6 = vld [vmem:[%s1139_s1 + $0x1f0] sm:$0xff]  ;;  %v115_v10 = vld [vmem:[%s1139_s1 + $0x1e8] sm:$0xff] }
   0x3   :  { %v69_v2 = vld [vmem:[%s1139_s1 + $0x78] sm:$0xff]  ;;  %599 = vmatprep.subr.mxu1 %v117_v1  ;;  %v68_v7 = vld [vmem:[%s1139_s1 + $0x70] sm:$0xff]  ;;  %v67_v11 = vld [vmem:[%s1139_s1 + $0x68] sm:$0xff] }
   0x4   :  { %v101_v4 = vld [vmem:[%s1139_s1 + $0x178] sm:$0xff]  ;;  %544 = vmatpush3.msra.mxu0 %v69_v2  ;;  %v100_v8 = vld [vmem:[%s1139_s1 + $0x170] sm:$0xff]  ;;  %v99_v12 = vld [vmem:[%s1139_s1 + $0x168] sm:$0xff] }
   0x5   :  { %600 = vmatpush3.msra.mxu1 %v101_v4  ;;  %545 = vmatprep.subr.mxu0 %v84_v5  ;;  %v82_v13 = vld [vmem:[%s1139_s1 + $0xe0] sm:$0xff]  ;;  %v81_v17 = vld [vmem:[%s1139_s1 + $0xd8] sm:$0xff]  ;;  %v80_v21 = vld [vmem:[%s1139_s1 + $0xd0] sm:$0xff] }
   0x6   :  { %601 = vmatprep.subr.mxu1 %v116_v6  ;;  %546 = vmatpush3.msra.mxu0 %v68_v7  ;;  %v114_v14 = vld [vmem:[%s1139_s1 + $0x1e0] sm:$0xff]  ;;  %v113_v18 = vld [vmem:[%s1139_s1 + $0x1d8] sm:$0xff]  ;;  %v112_v22 = vld [vmem:[%s1139_s1 + $0x1d0] sm:$0xff] }
   0x7   :  { %602 = vmatpush3.msra.mxu1 %v100_v8  ;;  %547 = vmatprep.subr.mxu0 %v83_v9  ;;  %v66_v15 = vld [vmem:[%s1139_s1 + $0x60] sm:$0xff]  ;;  %v65_v19 = vld [vmem:[%s1139_s1 + $0x58] sm:$0xff]  ;;  %v64_v23 = vld [vmem:[%s1139_s1 + $0x50] sm:$0xff] }
   0x8   :  { %603 = vmatprep.subr.mxu1 %v115_v10  ;;  %v98_v16 = vld [vmem:[%s1139_s1 + $0x160] sm:$0xff]  ;;  %548 = vmatpush3.msra.mxu0 %v67_v11  ;;  %v97_v20 = vld [vmem:[%s1139_s1 + $0x158] sm:$0xff]  ;;  %v96_v24 = vld [vmem:[%s1139_s1 + $0x150] sm:$0xff] }
   0x9   :  { %604 = vmatpush3.msra.mxu1 %v99_v12  ;;  %549 = vmatprep.subr.mxu0 %v82_v13  ;;  %v79_v25 = vld [vmem:[%s1139_s1 + $0xc8] sm:$0xff]  ;;  %v78_v29 = vld [vmem:[%s1139_s1 + $0xc0] sm:$0xff]  ;;  %v77_v33 = vld [vmem:[%s1139_s1 + $0xb8] sm:$0xff] }
   0xa   :  { %605 = vmatprep.subr.mxu1 %v114_v14  ;;  %550 = vmatpush3.msra.mxu0 %v66_v15  ;;  %v111_v26 = vld [vmem:[%s1139_s1 + $0x1c8] sm:$0xff]  ;;  %v110_v30 = vld [vmem:[%s1139_s1 + $0x1c0] sm:$0xff]  ;;  %v109_v34 = vld [vmem:[%s1139_s1 + $0x1b8] sm:$0xff] }
   0xb   :  { %606 = vmatpush3.msra.mxu1 %v98_v16  ;;  %551 = vmatprep.subr.mxu0 %v81_v17  ;;  %v63_v27 = vld [vmem:[%s1139_s1 + $0x48] sm:$0xff]  ;;  %v62_v31 = vld [vmem:[%s1139_s1 + $0x40] sm:$0xff]  ;;  %v61_v35 = vld [vmem:[%s1139_s1 + $0x38] sm:$0xff] }
   0xc   :  { %607 = vmatprep.subr.mxu1 %v113_v18  ;;  %552 = vmatpush3.msra.mxu0 %v65_v19  ;;  %v95_v28 = vld [vmem:[%s1139_s1 + $0x148] sm:$0xff]  ;;  %v94_v32 = vld [vmem:[%s1139_s1 + $0x140] sm:$0xff]  ;;  %v93_v36 = vld [vmem:[%s1139_s1 + $0x138] sm:$0xff] }
   0xd   :  { %608 = vmatpush3.msra.mxu1 %v97_v20  ;;  %553 = vmatprep.subr.mxu0 %v80_v21  ;;  %v76_v37 = vld [vmem:[%s1139_s1 + $0xb0] sm:$0xff]  ;;  %v75_v41 = vld [vmem:[%s1139_s1 + $0xa8] sm:$0xff]  ;;  %v74_v45 = vld [vmem:[%s1139_s1 + $0xa0] sm:$0xff] }
   0xe   :  { %609 = vmatprep.subr.mxu1 %v112_v22  ;;  %554 = vmatpush3.msra.mxu0 %v64_v23  ;;  %v108_v38 = vld [vmem:[%s1139_s1 + $0x1b0] sm:$0xff]  ;;  %v107_v42 = vld [vmem:[%s1139_s1 + $0x1a8] sm:$0xff]  ;;  %v106_v46 = vld [vmem:[%s1139_s1 + $0x1a0] sm:$0xff] }
   0xf   :  { %610 = vmatpush3.msra.mxu1 %v96_v24  ;;  %555 = vmatprep.subr.mxu0 %v79_v25  ;;  %v60_v39 = vld [vmem:[%s1139_s1 + $0x30] sm:$0xff]  ;;  %v59_v43 = vld [vmem:[%s1139_s1 + $0x28] sm:$0xff]  ;;  %v58_v47 = vld [vmem:[%s1139_s1 + $0x20] sm:$0xff] }
  0x10   :  { %611 = vmatprep.subr.mxu1 %v111_v26  ;;  %556 = vmatpush3.msra.mxu0 %v63_v27  ;;  %v92_v40 = vld [vmem:[%s1139_s1 + $0x130] sm:$0xff]  ;;  %v91_v44 = vld [vmem:[%s1139_s1 + $0x128] sm:$0xff]  ;;  %v90_v48 = vld [vmem:[%s1139_s1 + $0x120] sm:$0xff] }
  0x11   :  { %612 = vmatpush3.msra.mxu1 %v95_v28  ;;  %557 = vmatprep.subr.mxu0 %v78_v29  ;;  %v73_v49 = vld [vmem:[%s1139_s1 + $0x98] sm:$0xff]  ;;  %v72_v53 = vld [vmem:[%s1139_s1 + $0x90] sm:$0xff]  ;;  %v71_v57 = vld [vmem:[%s1139_s1 + $0x88] sm:$0xff] }
  0x12   :  { %613 = vmatprep.subr.mxu1 %v110_v30  ;;  %558 = vmatpush3.msra.mxu0 %v62_v31  ;;  %v105_v50 = vld [vmem:[%s1139_s1 + $0x198] sm:$0xff]  ;;  %v104_v54 = vld [vmem:[%s1139_s1 + $0x190] sm:$0xff]  ;;  %v103_v58 = vld [vmem:[%s1139_s1 + $0x188] sm:$0xff] }
  0x13   :  { %614 = vmatpush3.msra.mxu1 %v94_v32  ;;  %559 = vmatprep.subr.mxu0 %v77_v33  ;;  %v57_v51 = vld [vmem:[%s1139_s1 + $0x18] sm:$0xff]  ;;  %v56_v55 = vld [vmem:[%s1139_s1 + $0x10] sm:$0xff]  ;;  %v55_v59 = vld [vmem:[%s1139_s1 + $0x8] sm:$0xff] }
  0x14   :  { %615 = vmatprep.subr.mxu1 %v109_v34  ;;  %560 = vmatpush3.msra.mxu0 %v61_v35  ;;  %v89_v52 = vld [vmem:[%s1139_s1 + $0x118] sm:$0xff]  ;;  %v88_v56 = vld [vmem:[%s1139_s1 + $0x110] sm:$0xff]  ;;  %v87_v60 = vld [vmem:[%s1139_s1 + $0x108] sm:$0xff] }
  0x15   :  { %616 = vmatpush3.msra.mxu1 %v93_v36  ;;  %561 = vmatprep.subr.mxu0 %v76_v37  ;;  %v70_v61 = vld [vmem:[%s1139_s1 + $0x80] sm:$0xff]  ;;  %v15_v0 = vld [vmem:[%s1140_s0 + $0x8] sm:$0xff]  ;;  %v17_v2 = vld [vmem:[%s1140_s0 + $0x18] sm:$0xff] }
  0x16   :  { %617 = vmatprep.subr.mxu1 %v108_v38  ;;  %562 = vmatpush3.msra.mxu0 %v60_v39  ;;  %v102_v62 = vld [vmem:[%s1139_s1 + $0x180] sm:$0xff]  ;;  %v16_v4 = vld [vmem:[%s1140_s0 + $0x10] sm:$0xff]  ;;  %v125_v5 = vld [vmem:[%s1139_s1 + $0x238] sm:$0xff] }
  0x17   :  { %618 = vmatpush3.msra.mxu1 %v92_v40  ;;  %563 = vmatprep.subr.mxu0 %v75_v41  ;;  %v54_v63 = vld [vmem:[%s1139_s1] sm:$0xff]  ;;  %v20_v6 = vld [vmem:[%s1140_s0 + $0x30] sm:$0xff]  ;;  %v19_v8 = vld [vmem:[%s1140_s0 + $0x28] sm:$0xff] }
  0x18   :  { %619 = vmatprep.subr.mxu1 %v107_v42  ;;  %564 = vmatpush3.msra.mxu0 %v59_v43  ;;  %v86_v1 = vld [vmem:[%s1139_s1 + $0x100] sm:$0xff]  ;;  %v21_v9 = vld [vmem:[%s1140_s0 + $0x38] sm:$0xff]  ;;  %v124_v10 = vld [vmem:[%s1139_s1 + $0x230] sm:$0xff] }
  0x19   :  { %620 = vmatpush3.msra.mxu1 %v91_v44  ;;  %565 = vmatprep.subr.mxu0 %v74_v45  ;;  %v14_v3 = vld [vmem:[%s1140_s0] sm:$0xff]  ;;  %v25_v11 = vld [vmem:[%s1140_s0 + $0x58] sm:$0xff]  ;;  %v27_v12 = vld [vmem:[%s1140_s0 + $0x68] sm:$0xff] }
  0x1a   :  { %621 = vmatprep.subr.mxu1 %v106_v46  ;;  %566 = vmatpush3.msra.mxu0 %v58_v47  ;;  %v22_v7 = vld [vmem:[%s1140_s0 + $0x40] sm:$0xff]  ;;  %v24_v13 = vld [vmem:[%s1140_s0 + $0x50] sm:$0xff]  ;;  %v123_v15 = vld [vmem:[%s1139_s1 + $0x228] sm:$0xff] }
  0x1b   :  { %622 = vmatpush3.msra.mxu1 %v90_v48  ;;  %567 = vmatprep.subr.mxu0 %v73_v49  ;;  %v26_v14 = vld [vmem:[%s1140_s0 + $0x60] sm:$0xff]  ;;  %v32_v17 = vld [vmem:[%s1140_s0 + $0x90] sm:$0xff]  ;;  %v29_v18 = vld [vmem:[%s1140_s0 + $0x78] sm:$0xff] }
  0x1c   :  { %623 = vmatprep.subr.mxu1 %v105_v50  ;;  %568 = vmatpush3.msra.mxu0 %v57_v51  ;;  %v30_v16 = vld [vmem:[%s1140_s0 + $0x80] sm:$0xff]  ;;  %v31_v19 = vld [vmem:[%s1140_s0 + $0x88] sm:$0xff]  ;;  %v37_v22 = vld [vmem:[%s1140_s0 + $0xb8] sm:$0xff] }
  0x1d   :  { %624 = vmatpush3.msra.mxu1 %v89_v52  ;;  %569 = vmatprep.subr.mxu0 %v72_v53  ;;  %v122_v20 = vld [vmem:[%s1139_s1 + $0x220] sm:$0xff]  ;;  %v35_v21 = vld [vmem:[%s1140_s0 + $0xa8] sm:$0xff]  ;;  %v36_v24 = vld [vmem:[%s1140_s0 + $0xb0] sm:$0xff] }
  0x1e   :  { %625 = vmatprep.subr.mxu1 %v104_v54  ;;  %570 = vmatpush3.msra.mxu0 %v56_v55  ;;  %v34_v23 = vld [vmem:[%s1140_s0 + $0xa0] sm:$0xff]  ;;  %v121_v25 = vld [vmem:[%s1139_s1 + $0x218] sm:$0xff]  ;;  %v40_v26 = vld [vmem:[%s1140_s0 + $0xd0] sm:$0xff] }
  0x1f   :  { %626 = vmatpush3.msra.mxu1 %v88_v56  ;;  %571 = vmatprep.subr.mxu0 %v71_v57  ;;  %v42_v27 = vld [vmem:[%s1140_s0 + $0xe0] sm:$0xff]  ;;  %v39_v28 = vld [vmem:[%s1140_s0 + $0xc8] sm:$0xff]  ;;  %v41_v29 = vld [vmem:[%s1140_s0 + $0xd8] sm:$0xff] }
  0x20   :  { %627 = vmatprep.subr.mxu1 %v103_v58  ;;  %572 = vmatpush3.msra.mxu0 %v55_v59  ;;  %v120_v30 = vld [vmem:[%s1139_s1 + $0x210] sm:$0xff]  ;;  %v45_v31 = vld [vmem:[%s1140_s0 + $0xf8] sm:$0xff]  ;;  %v47_v32 = vld [vmem:[%s1140_s0 + $0x108] sm:$0xff] }
  0x21   :  { %628 = vmatpush3.msra.mxu1 %v87_v60  ;;  %573 = vmatprep.subr.mxu0 %v70_v61  ;;  %v44_v33 = vld [vmem:[%s1140_s0 + $0xf0] sm:$0xff]  ;;  %v46_v34 = vld [vmem:[%s1140_s0 + $0x100] sm:$0xff]  ;;  %v119_v35 = vld [vmem:[%s1139_s1 + $0x208] sm:$0xff] }
  0x22   :  { %629 = vmatprep.subr.mxu1 %v102_v62  ;;  %574 = vmatpush3.msra.mxu0 %v54_v63  ;;  %v50_v36 = vld [vmem:[%s1140_s0 + $0x120] sm:$0xff]  ;;  %v52_v37 = vld [vmem:[%s1140_s0 + $0x130] sm:$0xff]  ;;  %v49_v38 = vld [vmem:[%s1140_s0 + $0x118] sm:$0xff] }
  0x23   :  { %263 = vmatprep.mubr.f32.mxu0 %v15_v0  ;;  %630 = vmatpush3.msra.mxu1 %v86_v1  ;;  %v51_v39 = vld [vmem:[%s1140_s0 + $0x128] sm:$0xff]  ;;  %v118_v40 = vld [vmem:[%s1139_s1 + $0x200] sm:$0xff]  ;;  %v28_v45 = vld [vmem:[%s1140_s0 + $0x70] sm:$0xff] }
  0x24   :  { %368 = vmatprep.mubr.f32.mxu1 %v17_v2  ;;  %264 = vmatmul.mubr.f32.vlgmr.msra.gmra.mxu0 %v14_v3  ;;  %v18_v41 = vld [vmem:[%s1140_s0 + $0x20] sm:$0xff]  ;;  %v23_v43 = vld [vmem:[%s1140_s0 + $0x48] sm:$0xff]  ;;  %v48_v46 = vld [vmem:[%s1140_s0 + $0x110] sm:$0xff] }
  0x25   :  { %369 = vmatmul.mubr.f32.vlgmr.msra.gmra.mxu1 %v16_v4  ;;  %671 = vmatprep.subr.mxu0 %v125_v5  ;;  %v38_v42 = vld [vmem:[%s1140_s0 + $0xc0] sm:$0xff]  ;;  %v43_v44 = vld [vmem:[%s1140_s0 + $0xe8] sm:$0xff]  ;;  %v128_v48 = vld [vmem:[%s1141_s2 + $0x10] sm:$0xff] }
  0x26   :  { %699 = vmatprep.subr.mxu1 %v125_v5  ;;  %672 = vmatpush3.msra.mxu0 %v125_v5  ;;  %v126_v47 = vld [vmem:[%s1141_s2] sm:$0xff]  ;;  %v33_v49 = vld [vmem:[%s1140_s0 + $0x98] sm:$0xff]  ;;  %v127_v51 = vld [vmem:[%s1141_s2 + $0x8] sm:$0xff] }
  0x27   :  { %707 = vmatpush3.msra.mxu1 %v125_v5  ;;  %268 = vmatprep.mubr.f32.mxu0 %v20_v6  ;;  %v53_v50 = vld [vmem:[%s1140_s0 + $0x138] sm:$0xff]  ;;  %v131_v53 = vld [vmem:[%s1141_s2 + $0x28] sm:$0xff]  ;;  %v130_v54 = vld [vmem:[%s1141_s2 + $0x20] sm:$0xff] }
  0x28   :  { %373 = vmatprep.mubr.f32.mxu1 %v22_v7  ;;  %269 = vmatmul.mubr.f32.gmra.mxu0 %v19_v8  ;;  %v129_v52 = vld [vmem:[%s1141_s2 + $0x18] sm:$0xff]  ;;  %v132_v56 = vld [vmem:[%s1141_s2 + $0x30] sm:$0xff] }
  0x29   :  { %374 = vmatmul.mubr.f32.gmra.mxu1 %v21_v9  ;;  %673 = vmatprep.subr.mxu0 %v124_v10  ;;  %v133_v55 = vld [vmem:[%s1141_s2 + $0x38] sm:$0xff] }
  0x2a   :  { %700 = vmatprep.subr.mxu1 %v124_v10  ;;  %674 = vmatpush3.msra.mxu0 %v124_v10 }
  0x2b   :  { %708 = vmatpush3.msra.mxu1 %v124_v10  ;;  %273 = vmatprep.mubr.f32.mxu0 %v25_v11 }
  0x2c   :  { %378 = vmatprep.mubr.f32.mxu1 %v27_v12  ;;  %274 = vmatmul.mubr.f32.gmra.mxu0 %v24_v13 }
  0x2d   :  { %379 = vmatmul.mubr.f32.gmra.mxu1 %v26_v14  ;;  %675 = vmatprep.subr.mxu0 %v123_v15 }
  0x2e   :  { %701 = vmatprep.subr.mxu1 %v123_v15  ;;  %676 = vmatpush3.msra.mxu0 %v123_v15 }
  0x2f   :  { %709 = vmatpush3.msra.mxu1 %v123_v15  ;;  %278 = vmatprep.mubr.f32.mxu0 %v30_v16 }
  0x30   :  { %383 = vmatprep.mubr.f32.mxu1 %v32_v17  ;;  %279 = vmatmul.mubr.f32.gmra.mxu0 %v29_v18 }
  0x31   :  { %384 = vmatmul.mubr.f32.gmra.mxu1 %v31_v19  ;;  %677 = vmatprep.subr.mxu0 %v122_v20 }
  0x32   :  { %702 = vmatprep.subr.mxu1 %v122_v20  ;;  %678 = vmatpush3.msra.mxu0 %v122_v20 }
  0x33   :  { %710 = vmatpush3.msra.mxu1 %v122_v20  ;;  %283 = vmatprep.mubr.f32.mxu0 %v35_v21 }
  0x34   :  { %388 = vmatprep.mubr.f32.mxu1 %v37_v22  ;;  %284 = vmatmul.mubr.f32.gmra.mxu0 %v34_v23 }
  0x35   :  { %389 = vmatmul.mubr.f32.gmra.mxu1 %v36_v24  ;;  %679 = vmatprep.subr.mxu0 %v121_v25 }
  0x36   :  { %703 = vmatprep.subr.mxu1 %v121_v25  ;;  %680 = vmatpush3.msra.mxu0 %v121_v25 }
  0x37   :  { %711 = vmatpush3.msra.mxu1 %v121_v25  ;;  %288 = vmatprep.mubr.f32.mxu0 %v40_v26 }
  0x38   :  { %393 = vmatprep.mubr.f32.mxu1 %v42_v27  ;;  %289 = vmatmul.mubr.f32.gmra.mxu0 %v39_v28 }
  0x39   :  { %394 = vmatmul.mubr.f32.gmra.mxu1 %v41_v29  ;;  %681 = vmatprep.subr.mxu0 %v120_v30 }
  0x3a   :  { %704 = vmatprep.subr.mxu1 %v120_v30  ;;  %682 = vmatpush3.msra.mxu0 %v120_v30 }
  0x3b   :  { %712 = vmatpush3.msra.mxu1 %v120_v30  ;;  %293 = vmatprep.mubr.f32.mxu0 %v45_v31 }
  0x3c   :  { %398 = vmatprep.mubr.f32.mxu1 %v47_v32  ;;  %294 = vmatmul.mubr.f32.gmra.mxu0 %v44_v33 }
  0x3d   :  { %399 = vmatmul.mubr.f32.gmra.mxu1 %v46_v34  ;;  %683 = vmatprep.subr.mxu0 %v119_v35 }
  0x3e   :  { %705 = vmatprep.subr.mxu1 %v119_v35  ;;  %684 = vmatpush3.msra.mxu0 %v119_v35 }
  0x3f   :  { %713 = vmatpush3.msra.mxu1 %v119_v35  ;;  %298 = vmatprep.mubr.f32.mxu0 %v50_v36 }
  0x40   :  { %403 = vmatprep.mubr.f32.mxu1 %v52_v37  ;;  %299 = vmatmul.mubr.f32.gmra.mxu0 %v49_v38 }
  0x41   :  { %404 = vmatmul.mubr.f32.gmra.mxu1 %v51_v39  ;;  %685 = vmatprep.subr.mxu0 %v118_v40 }
  0x42   :  { %706 = vmatprep.subr.mxu1 %v118_v40  ;;  %686 = vmatpush3.msra.mxu0 %v118_v40 }
  0x43   :  { %714 = vmatpush3.msra.mxu1 %v118_v40  ;;  %687 = vmatprep.mubr.msk.f32.mxu0 %vm174_vm0, %v18_v41 }
  0x44   :  { %693 = vmatprep.mubr.msk.f32.mxu1 %vm174_vm0, %v38_v42  ;;  %688 = vmatmul.mubr.msk.f32.vlgmr.msra.gmra.mxu0 %vm174_vm0, %v23_v43 }
  0x45   :  { %694 = vmatmul.mubr.msk.f32.vlgmr.msra.gmra.mxu1 %vm174_vm0, %v43_v44  ;;  %690 = vmatprep.mubr.msk.f32.mxu0 %vm174_vm0, %v28_v45 }
  0x46   :  { %696 = vmatprep.mubr.msk.f32.mxu1 %vm174_vm0, %v48_v46  ;;  %136 = vperm.xlu0 %716, %v126_v47  }
  0x47   :  { %146 = vperm.xlu1 %717, %v128_v48  }
  0x48   :  { %691 = vmatmul.mubr.msk.f32.gmra.mxu0 %vm174_vm0, %v33_v49 }
  0x49   :  { %697 = vmatmul.mubr.msk.f32.gmra.mxu1 %vm174_vm0, %v53_v50 }
  0x4a   :  { %141 = vperm.xlu0 %716, %v127_v51  }
  0x4b   :  { %151 = vperm.xlu1 %717, %v129_v52  }
  0x4e   :  { %156 = vperm.xlu0 %716, %v130_v54  }
  0x4f   :  { %161 = vperm.xlu1 %717, %v131_v53  }
  0x52   :  { %166 = vperm.xlu0 %716, %v132_v56  }
  0x53   :  { %171 = vperm.xlu1 %717, %v133_v55  }
  0xc1   :  { %v137_v10 = vpop.permute.xlu0 %136 }
  0xc2   :  { %v147_v7 = vpop.permute.xlu1 %146 }
  0xc5   :  { %v142_v18 = vpop.permute.xlu0 %141 }
  0xc6   :  { %v152_v15 = vpop.permute.xlu1 %151 }
  0xc9   :  { %v157_v28 = vpop.permute.xlu0 %156 }
  0xca   :  { %v162_v27 = vpop.permute.xlu1 %161 }
  0xcd   :  { %v167_v48 = vpop.permute.xlu0 %166 }
  0xce   :  { %v172_v47 = vpop.permute.xlu1 %171 }
  0xe4   :  { %v575_v57 = vpop.f32.mrf.mxu0 }
  0xe5   :  { %v631_v58 = vpop.f32.mrf.mxu1 }
  0xe6   :  { %v576_v59 = vpop.f32.mrf.mxu0 }
  0xe7   :  { %v632_v60 = vpop.f32.mrf.mxu1  ;;  %v577_v23 = vadd.f32 %v576_v59, %v575_v57 }
  0xe8   :  { %v578_v61 = vpop.f32.mrf.mxu0  ;;  %v633_v42 = vadd.f32 %v632_v60, %v631_v58 }
  0xe9   :  { %v634_v62 = vpop.f32.mrf.mxu1  ;;  %v266_v34 = vadd.f32 %v577_v23, %v137_v10 }
  0xea   :  { %v579_v63 = vpop.f32.mrf.mxu0 }
  0xeb   :  { %v635_v0 = vpop.f32.mrf.mxu1  ;;  %v580_v21 = vadd.f32 %v579_v63, %v578_v61  ;;  %v371_v56 = vadd.f32 %v633_v42, %v266_v34 }
  0xec   :  { %v581_v1 = vpop.f32.mrf.mxu0  ;;  %v636_v39 = vadd.f32 %v635_v0, %v634_v62 }
  0xed   :  { %v637_v2 = vpop.f32.mrf.mxu1  ;;  %v271_v32 = vadd.f32 %v580_v21, %v142_v18 }
  0xee   :  { %v582_v3 = vpop.f32.mrf.mxu0 }
  0xef   :  { %v638_v4 = vpop.f32.mrf.mxu1  ;;  %v583_v35 = vadd.f32 %v582_v3, %v581_v1  ;;  %v376_v50 = vadd.f32 %v636_v39, %v271_v32 }
  0xf0   :  { %v584_v5 = vpop.f32.mrf.mxu0  ;;  %v639_v60 = vadd.f32 %v638_v4, %v637_v2 }
  0xf1   :  { %v640_v6 = vpop.f32.mrf.mxu1  ;;  %v276_v52 = vadd.f32 %v583_v35, %v147_v7 }
  0xf2   :  { %v585_v8 = vpop.f32.mrf.mxu0 }
  0xf3   :  { %v641_v9 = vpop.f32.mrf.mxu1  ;;  %v586_v29 = vadd.f32 %v585_v8, %v584_v5 }
  0xf4   :  { %v587_v11 = vpop.f32.mrf.mxu0  ;;  %v642_v53 = vadd.f32 %v641_v9, %v640_v6 }
  0xf5   :  { %v643_v12 = vpop.f32.mrf.mxu1  ;;  %v281_v43 = vadd.f32 %v586_v29, %v152_v15 }
  0xf6   :  { %v588_v13 = vpop.f32.mrf.mxu0 }
  0xf7   :  { %v644_v14 = vpop.f32.mrf.mxu1  ;;  %v589_v24 = vadd.f32 %v588_v13, %v587_v11  ;;  %v386_v5 = vadd.f32 %v642_v53, %v281_v43  ;;  %v381_v13 = vadd.f32 %v639_v60, %v276_v52 }
  0xf8   :  { %v590_v16 = vpop.f32.mrf.mxu0  ;;  %v645_v44 = vadd.f32 %v644_v14, %v643_v12 }
  0xf9   :  { %v646_v17 = vpop.f32.mrf.mxu1  ;;  %v286_v36 = vadd.f32 %v589_v24, %v157_v28 }
  0xfa   :  { %v591_v19 = vpop.f32.mrf.mxu0 }
  0xfb   :  { %v647_v20 = vpop.f32.mrf.mxu1  ;;  %v592_v22 = vadd.f32 %v591_v19, %v590_v16  ;;  %v391_v57 = vadd.f32 %v645_v44, %v286_v36 }
  0xfc   :  { %v593_v25 = vpop.f32.mrf.mxu0  ;;  %v648_v40 = vadd.f32 %v647_v20, %v646_v17 }
  0xfd   :  { %v649_v26 = vpop.f32.mrf.mxu1  ;;  %v291_v33 = vadd.f32 %v592_v22, %v162_v27 }
  0xfe   :  { %v594_v30 = vpop.f32.mrf.mxu0 }
  0xff   :  { %v650_v31 = vpop.f32.mrf.mxu1  ;;  %v595_v41 = vadd.f32 %v594_v30, %v593_v25  ;;  %v396_v51 = vadd.f32 %v648_v40, %v291_v33 }
 0x100   :  { %v596_v37 = vpop.f32.mrf.mxu0  ;;  %v651_v63 = vadd.f32 %v650_v31, %v649_v26 }
 0x101   :  { %v652_v38 = vpop.f32.mrf.mxu1  ;;  %v296_v59 = vadd.f32 %v595_v41, %v167_v48 }
 0x102   :  { %v597_v45 = vpop.f32.mrf.mxu0 }
 0x103   :  { %v653_v46 = vpop.f32.mrf.mxu1  ;;  %v598_v49 = vadd.f32 %v597_v45, %v596_v37  ;;  %v401_v15 = vadd.f32 %v651_v63, %v296_v59 }
 0x104   :  { %v689_v54 = vpop.f32.mrf.mxu0  ;;  %v654_v0 = vadd.f32 %v653_v46, %v652_v38 }
 0x105   :  { %v695_v55 = vpop.f32.mrf.mxu1  ;;  %v301_v61 = vadd.f32 %v598_v49, %v172_v47  ;;  %v481_v62 = vadd.f32 %v689_v54, %v376_v50 }
 0x106   :  { %v501_v58 = vadd.f32 %v695_v55, %v396_v51  ;;  %v475_v1 = vpop.f32.mrf.mxu0 }
 0x107   :  { %v495_v3 = vpop.f32.mrf.mxu1  ;;  %v515_v8 = vmax.f32 %v481_v62, 0.0  ;;  %v476_v11 = vadd.f32 %v475_v1, %v371_v56  ;;  %v406_v6 = vadd.f32 %v654_v0, %v301_v61 }
 0x108   :  { %v519_v10 = vmax.f32 %v501_v58, 0.0  ;;  %v496_v12 = vadd.f32 %v495_v3, %v391_v57  ;;  %v692_v7 = vpop.f32.mrf.mxu0 }
 0x109   :  { %v698_v9 = vpop.f32.mrf.mxu1  ;;  %524 = vst.msk [vmem:[%s1142_s3 + $0x8] sm:$0xff] %vm522_vm1, %v515_v8  ;;  %v514_v2 = vmax.f32 %v476_v11, 0.0  ;;  %v491_v14 = vadd.f32 %v692_v7, %v386_v5 }
 0x10a   :  { %528 = vst.msk [vmem:[%s1142_s3 + $0x28] sm:$0xff] %vm522_vm1, %v519_v10  ;;  %v518_v4 = vmax.f32 %v496_v12, 0.0  ;;  %v511_v16 = vadd.f32 %v698_v9, %v406_v6  ;;  %v485_v17 = vpop.f32.mrf.mxu0 }
 0x10b   :  { %v505_v18 = vpop.f32.mrf.mxu1  ;;  %523 = vst.msk [vmem:[%s1142_s3] sm:$0xff] %vm522_vm1, %v514_v2  ;;  %v517_v19 = vmax.f32 %v491_v14, 0.0  ;;  %v486_v20 = vadd.f32 %v485_v17, %v381_v13 }
 0x10c   :  { %527 = vst.msk [vmem:[%s1142_s3 + $0x20] sm:$0xff] %vm522_vm1, %v518_v4  ;;  %v506_v21 = vadd.f32 %v505_v18, %v401_v15  ;;  %v521_v22 = vmax.f32 %v511_v16, 0.0 }
 0x10d   :  { %526 = vst.msk [vmem:[%s1142_s3 + $0x18] sm:$0xff] %vm522_vm1, %v517_v19  ;;  %v516_v23 = vmax.f32 %v486_v20, 0.0 }
 0x10e   :  { %v520_v24 = vmax.f32 %v506_v21, 0.0  ;;  %530 = vst.msk [vmem:[%s1142_s3 + $0x38] sm:$0xff] %vm522_vm1, %v521_v22 }
 0x10f   :  { %525 = vst.msk [vmem:[%s1142_s3 + $0x10] sm:$0xff] %vm522_vm1, %v516_v23 }
 0x110   :  { %529 = vst.msk [vmem:[%s1142_s3 + $0x30] sm:$0xff] %vm522_vm1, %v520_v24 }

// kernel: duel_dqn_forward.7
= control target key start
LH: loop header
LB: loop body
LE: loop exit
PB: predicated region body
PF: predicated region fallthrough
CT: control target
= control target key end

     0   :  { %s4648_s0 = inlined_call_operand.vmem [shape: f32[2,3136], index: 0, kind: input, shape index: {}]   ;;  %s4649_s1 = inlined_call_operand.vmem [shape: f32[3136,256], index: 1, kind: input, shape index: {}]   ;;  %s4650_s2 = inlined_call_operand.vmem [shape: f32[1,256], index: 2, kind: input, shape index: {}]   ;;  %s4651_s3 = inlined_call_operand.vmem [shape: f32[256,7], index: 3, kind: input, shape index: {}]   ;;  %s4652_s4 = inlined_call_operand.vmem [shape: f32[1,7], index: 4, kind: input, shape index: {}]   ;;  %s4653_s5 = inlined_call_operand.hbm [shape: f32[2,6], index: 5, kind: output, shape index: {}]  }
   0x1   :  { %v59_v0 = vld [vmem:[%s4649_s1 + $0xf8] sm:$0xff]  ;;  %v58_v1 = vld [vmem:[%s4649_s1 + $0xf0] sm:$0xff]  ;;  %v57_v2 = vld [vmem:[%s4649_s1 + $0xe8] sm:$0xff] }
   0x2   :  { %967 = vmatprep.subr.mxu0 %v59_v0  ;;  %v123_v3 = vld [vmem:[%s4649_s1 + $0x2f8] sm:$0xff]  ;;  %v56_v4 = vld [vmem:[%s4649_s1 + $0xe0] sm:$0xff]  ;;  %v122_v5 = vld [vmem:[%s4649_s1 + $0x2f0] sm:$0xff] }
   0x3   :  { %968 = vmatpush1.msra.mxu0 %v58_v1  ;;  %1038 = vmatprep.subr.mxu1 %v123_v3  ;;  %v55_v6 = vld [vmem:[%s4649_s1 + $0xd8] sm:$0xff]  ;;  %v121_v7 = vld [vmem:[%s4649_s1 + $0x2e8] sm:$0xff]  ;;  %v54_v8 = vld [vmem:[%s4649_s1 + $0xd0] sm:$0xff] }
   0x4   :  { %969 = vmatprep.subr.mxu0 %v57_v2  ;;  %1039 = vmatpush1.msra.mxu1 %v122_v5  ;;  %v120_v9 = vld [vmem:[%s4649_s1 + $0x2e0] sm:$0xff]  ;;  %v119_v10 = vld [vmem:[%s4649_s1 + $0x2d8] sm:$0xff]  ;;  %v53_v11 = vld [vmem:[%s4649_s1 + $0xc8] sm:$0xff] }
   0x5   :  { %970 = vmatpush1.msra.mxu0 %v56_v4  ;;  %1040 = vmatprep.subr.mxu1 %v121_v7  ;;  %v118_v12 = vld [vmem:[%s4649_s1 + $0x2d0] sm:$0xff]  ;;  %v52_v13 = vld [vmem:[%s4649_s1 + $0xc0] sm:$0xff]  ;;  %v117_v14 = vld [vmem:[%s4649_s1 + $0x2c8] sm:$0xff] }
   0x6   :  { %971 = vmatprep.subr.mxu0 %v55_v6  ;;  %1041 = vmatpush1.msra.mxu1 %v120_v9  ;;  %v51_v15 = vld [vmem:[%s4649_s1 + $0xb8] sm:$0xff]  ;;  %v116_v16 = vld [vmem:[%s4649_s1 + $0x2c0] sm:$0xff]  ;;  %v50_v17 = vld [vmem:[%s4649_s1 + $0xb0] sm:$0xff] }
   0x7   :  { %972 = vmatpush1.msra.mxu0 %v54_v8  ;;  %1042 = vmatprep.subr.mxu1 %v119_v10  ;;  %v115_v18 = vld [vmem:[%s4649_s1 + $0x2b8] sm:$0xff]  ;;  %v49_v19 = vld [vmem:[%s4649_s1 + $0xa8] sm:$0xff]  ;;  %v114_v20 = vld [vmem:[%s4649_s1 + $0x2b0] sm:$0xff] }
   0x8   :  { %973 = vmatprep.subr.mxu0 %v53_v11  ;;  %1043 = vmatpush1.msra.mxu1 %v118_v12  ;;  %v48_v21 = vld [vmem:[%s4649_s1 + $0xa0] sm:$0xff]  ;;  %v113_v22 = vld [vmem:[%s4649_s1 + $0x2a8] sm:$0xff]  ;;  %v47_v23 = vld [vmem:[%s4649_s1 + $0x98] sm:$0xff] }
   0x9   :  { %974 = vmatpush1.msra.mxu0 %v52_v13  ;;  %1044 = vmatprep.subr.mxu1 %v117_v14  ;;  %v112_v24 = vld [vmem:[%s4649_s1 + $0x2a0] sm:$0xff]  ;;  %v46_v25 = vld [vmem:[%s4649_s1 + $0x90] sm:$0xff]  ;;  %v111_v26 = vld [vmem:[%s4649_s1 + $0x298] sm:$0xff] }
   0xa   :  { %975 = vmatprep.subr.mxu0 %v51_v15  ;;  %1045 = vmatpush1.msra.mxu1 %v116_v16  ;;  %v45_v27 = vld [vmem:[%s4649_s1 + $0x88] sm:$0xff]  ;;  %v110_v28 = vld [vmem:[%s4649_s1 + $0x290] sm:$0xff]  ;;  %v44_v29 = vld [vmem:[%s4649_s1 + $0x80] sm:$0xff] }
   0xb   :  { %976 = vmatpush1.msra.mxu0 %v50_v17  ;;  %1046 = vmatprep.subr.mxu1 %v115_v18  ;;  %v109_v30 = vld [vmem:[%s4649_s1 + $0x288] sm:$0xff]  ;;  %v43_v31 = vld [vmem:[%s4649_s1 + $0x78] sm:$0xff]  ;;  %v108_v32 = vld [vmem:[%s4649_s1 + $0x280] sm:$0xff] }
   0xc   :  { %977 = vmatprep.subr.mxu0 %v49_v19  ;;  %1047 = vmatpush1.msra.mxu1 %v114_v20  ;;  %v42_v33 = vld [vmem:[%s4649_s1 + $0x70] sm:$0xff]  ;;  %v107_v34 = vld [vmem:[%s4649_s1 + $0x278] sm:$0xff]  ;;  %v41_v35 = vld [vmem:[%s4649_s1 + $0x68] sm:$0xff] }
   0xd   :  { %978 = vmatpush1.msra.mxu0 %v48_v21  ;;  %1048 = vmatprep.subr.mxu1 %v113_v22  ;;  %v106_v36 = vld [vmem:[%s4649_s1 + $0x270] sm:$0xff]  ;;  %v40_v37 = vld [vmem:[%s4649_s1 + $0x60] sm:$0xff]  ;;  %v105_v38 = vld [vmem:[%s4649_s1 + $0x268] sm:$0xff] }
   0xe   :  { %979 = vmatprep.subr.mxu0 %v47_v23  ;;  %1049 = vmatpush1.msra.mxu1 %v112_v24  ;;  %v39_v39 = vld [vmem:[%s4649_s1 + $0x58] sm:$0xff]  ;;  %v104_v40 = vld [vmem:[%s4649_s1 + $0x260] sm:$0xff]  ;;  %v38_v41 = vld [vmem:[%s4649_s1 + $0x50] sm:$0xff] }
   0xf   :  { %980 = vmatpush1.msra.mxu0 %v46_v25  ;;  %1050 = vmatprep.subr.mxu1 %v111_v26  ;;  %v103_v42 = vld [vmem:[%s4649_s1 + $0x258] sm:$0xff]  ;;  %v37_v43 = vld [vmem:[%s4649_s1 + $0x48] sm:$0xff]  ;;  %v102_v44 = vld [vmem:[%s4649_s1 + $0x250] sm:$0xff] }
  0x10   :  { %981 = vmatprep.subr.mxu0 %v45_v27  ;;  %1051 = vmatpush1.msra.mxu1 %v110_v28  ;;  %v36_v45 = vld [vmem:[%s4649_s1 + $0x40] sm:$0xff]  ;;  %v101_v46 = vld [vmem:[%s4649_s1 + $0x248] sm:$0xff]  ;;  %v35_v47 = vld [vmem:[%s4649_s1 + $0x38] sm:$0xff]  ;;  %v814_v27 = vlaneseq  ;;  %v2115_v28 = vmov 1983009808  }
  0x11   :  { %982 = vmatpush1.msra.mxu0 %v44_v29  ;;  %1052 = vmatprep.subr.mxu1 %v109_v30  ;;  %v100_v48 = vld [vmem:[%s4649_s1 + $0x240] sm:$0xff]  ;;  %v34_v49 = vld [vmem:[%s4649_s1 + $0x30] sm:$0xff]  ;;  %v99_v50 = vld [vmem:[%s4649_s1 + $0x238] sm:$0xff]  ;;  %v833_v29 = vunpack.c.l.s4 %v2115_v28 }
  0x12   :  { %983 = vmatprep.subr.mxu0 %v43_v31  ;;  %1053 = vmatpush1.msra.mxu1 %v108_v32  ;;  %v33_v51 = vld [vmem:[%s4649_s1 + $0x28] sm:$0xff]  ;;  %v98_v52 = vld [vmem:[%s4649_s1 + $0x230] sm:$0xff]  ;;  %v32_v53 = vld [vmem:[%s4649_s1 + $0x20] sm:$0xff] }
  0x13   :  { %984 = vmatpush1.msra.mxu0 %v42_v33  ;;  %1054 = vmatprep.subr.mxu1 %v107_v34  ;;  %v97_v54 = vld [vmem:[%s4649_s1 + $0x228] sm:$0xff]  ;;  %v31_v55 = vld [vmem:[%s4649_s1 + $0x18] sm:$0xff]  ;;  %v96_v56 = vld [vmem:[%s4649_s1 + $0x220] sm:$0xff] }
  0x14   :  { %985 = vmatprep.subr.mxu0 %v41_v35  ;;  %1055 = vmatpush1.msra.mxu1 %v106_v36  ;;  %v30_v57 = vld [vmem:[%s4649_s1 + $0x10] sm:$0xff]  ;;  %v95_v58 = vld [vmem:[%s4649_s1 + $0x218] sm:$0xff]  ;;  %v29_v59 = vld [vmem:[%s4649_s1 + $0x8] sm:$0xff] }
  0x15   :  { %986 = vmatpush1.msra.mxu0 %v40_v37  ;;  %1056 = vmatprep.subr.mxu1 %v105_v38  ;;  %v94_v60 = vld [vmem:[%s4649_s1 + $0x210] sm:$0xff]  ;;  %v28_v61 = vld [vmem:[%s4649_s1] sm:$0xff]  ;;  %v93_v62 = vld [vmem:[%s4649_s1 + $0x208] sm:$0xff]  ;;  %v2446_v38 = vshrl.u32 %v814_v27, 7 }
  0x16   :  { %987 = vmatprep.subr.mxu0 %v39_v39  ;;  %1057 = vmatpush1.msra.mxu1 %v104_v40  ;;  %v91_v63 = vld [vmem:[%s4649_s1 + $0x1f8] sm:$0xff]  ;;  %v92_v0 = vld [vmem:[%s4649_s1 + $0x200] sm:$0xff]  ;;  %v90_v1 = vld [vmem:[%s4649_s1 + $0x1f0] sm:$0xff]  ;;  %v834_v39 = vunpack.c.0.s8 %v833_v29 }
  0x17   :  { %988 = vmatpush1.msra.mxu0 %v38_v41  ;;  %1058 = vmatprep.subr.mxu1 %v103_v42  ;;  %v155_v2 = vld [vmem:[%s4649_s1 + $0x3f8] sm:$0xff]  ;;  %v89_v3 = vld [vmem:[%s4649_s1 + $0x1e8] sm:$0xff]  ;;  %v154_v4 = vld [vmem:[%s4649_s1 + $0x3f0] sm:$0xff] }
  0x18   :  { %989 = vmatprep.subr.mxu0 %v37_v43  ;;  %1059 = vmatpush1.msra.mxu1 %v102_v44  ;;  %v88_v5 = vld [vmem:[%s4649_s1 + $0x1e0] sm:$0xff]  ;;  %v153_v6 = vld [vmem:[%s4649_s1 + $0x3e8] sm:$0xff]  ;;  %v87_v7 = vld [vmem:[%s4649_s1 + $0x1d8] sm:$0xff] }
  0x19   :  { %990 = vmatpush1.msra.mxu0 %v36_v45  ;;  %1060 = vmatprep.subr.mxu1 %v101_v46  ;;  %v152_v8 = vld [vmem:[%s4649_s1 + $0x3e0] sm:$0xff]  ;;  %v86_v9 = vld [vmem:[%s4649_s1 + $0x1d0] sm:$0xff]  ;;  %v151_v10 = vld [vmem:[%s4649_s1 + $0x3d8] sm:$0xff] }
  0x1a   :  { %991 = vmatprep.subr.mxu0 %v35_v47  ;;  %1061 = vmatpush1.msra.mxu1 %v100_v48  ;;  %v85_v11 = vld [vmem:[%s4649_s1 + $0x1c8] sm:$0xff]  ;;  %v150_v12 = vld [vmem:[%s4649_s1 + $0x3d0] sm:$0xff]  ;;  %v84_v13 = vld [vmem:[%s4649_s1 + $0x1c0] sm:$0xff]  ;;  %v2473_v48 = vsub.s32 %v834_v39, %v2446_v38 }
  0x1b   :  { %992 = vmatpush1.msra.mxu0 %v34_v49  ;;  %1062 = vmatprep.subr.mxu1 %v99_v50  ;;  %v149_v14 = vld [vmem:[%s4649_s1 + $0x3c8] sm:$0xff]  ;;  %v83_v15 = vld [vmem:[%s4649_s1 + $0x1b8] sm:$0xff]  ;;  %v148_v16 = vld [vmem:[%s4649_s1 + $0x3c0] sm:$0xff] }
  0x1c   :  { %993 = vmatprep.subr.mxu0 %v33_v51  ;;  %1063 = vmatpush1.msra.mxu1 %v98_v52  ;;  %v82_v17 = vld [vmem:[%s4649_s1 + $0x1b0] sm:$0xff]  ;;  %v147_v18 = vld [vmem:[%s4649_s1 + $0x3b8] sm:$0xff]  ;;  %v81_v19 = vld [vmem:[%s4649_s1 + $0x1a8] sm:$0xff] }
  0x1d   :  { %994 = vmatpush1.msra.mxu0 %v32_v53  ;;  %1064 = vmatprep.subr.mxu1 %v97_v54  ;;  %v146_v20 = vld [vmem:[%s4649_s1 + $0x3b0] sm:$0xff]  ;;  %v80_v21 = vld [vmem:[%s4649_s1 + $0x1a0] sm:$0xff]  ;;  %v145_v22 = vld [vmem:[%s4649_s1 + $0x3a8] sm:$0xff] }
  0x1e   :  { %995 = vmatprep.subr.mxu0 %v31_v55  ;;  %1065 = vmatpush1.msra.mxu1 %v96_v56  ;;  %v79_v23 = vld [vmem:[%s4649_s1 + $0x198] sm:$0xff]  ;;  %v144_v24 = vld [vmem:[%s4649_s1 + $0x3a0] sm:$0xff]  ;;  %v78_v25 = vld [vmem:[%s4649_s1 + $0x190] sm:$0xff] }
  0x1f   :  { %996 = vmatpush1.msra.mxu0 %v30_v57  ;;  %1066 = vmatprep.subr.mxu1 %v95_v58  ;;  %v143_v26 = vld [vmem:[%s4649_s1 + $0x398] sm:$0xff]  ;;  %v77_v30 = vld [vmem:[%s4649_s1 + $0x188] sm:$0xff]  ;;  %v142_v31 = vld [vmem:[%s4649_s1 + $0x390] sm:$0xff] }
  0x20   :  { %997 = vmatprep.subr.mxu0 %v29_v59  ;;  %1067 = vmatpush1.msra.mxu1 %v94_v60  ;;  %v76_v32 = vld [vmem:[%s4649_s1 + $0x180] sm:$0xff]  ;;  %v141_v33 = vld [vmem:[%s4649_s1 + $0x388] sm:$0xff]  ;;  %v75_v34 = vld [vmem:[%s4649_s1 + $0x178] sm:$0xff] }
  0x21   :  { %998 = vmatpush1.msra.mxu0 %v28_v61  ;;  %1068 = vmatprep.subr.mxu1 %v93_v62  ;;  %v140_v35 = vld [vmem:[%s4649_s1 + $0x380] sm:$0xff]  ;;  %v74_v36 = vld [vmem:[%s4649_s1 + $0x170] sm:$0xff]  ;;  %v139_v37 = vld [vmem:[%s4649_s1 + $0x378] sm:$0xff] }
  0x22   :  { %999 = vmatprep.subr.mxu0 %v91_v63  ;;  %1069 = vmatpush1.msra.mxu1 %v92_v0  ;;  %v73_v40 = vld [vmem:[%s4649_s1 + $0x168] sm:$0xff]  ;;  %v138_v41 = vld [vmem:[%s4649_s1 + $0x370] sm:$0xff]  ;;  %v72_v42 = vld [vmem:[%s4649_s1 + $0x160] sm:$0xff] }
  0x23   :  { %1000 = vmatpush2.msra.mxu0 %v90_v1  ;;  %1070 = vmatprep.subr.mxu1 %v155_v2  ;;  %v137_v43 = vld [vmem:[%s4649_s1 + $0x368] sm:$0xff]  ;;  %v71_v44 = vld [vmem:[%s4649_s1 + $0x158] sm:$0xff]  ;;  %v136_v45 = vld [vmem:[%s4649_s1 + $0x360] sm:$0xff] }
  0x24   :  { %1001 = vmatprep.subr.mxu0 %v89_v3  ;;  %1071 = vmatpush2.msra.mxu1 %v154_v4  ;;  %v70_v46 = vld [vmem:[%s4649_s1 + $0x150] sm:$0xff]  ;;  %v135_v47 = vld [vmem:[%s4649_s1 + $0x358] sm:$0xff]  ;;  %v69_v49 = vld [vmem:[%s4649_s1 + $0x148] sm:$0xff] }
  0x25   :  { %1002 = vmatpush2.msra.mxu0 %v88_v5  ;;  %1072 = vmatprep.subr.mxu1 %v153_v6  ;;  %v134_v50 = vld [vmem:[%s4649_s1 + $0x350] sm:$0xff]  ;;  %v21_v51 = vld [vmem:[%s4648_s0] sm:$0xff]  ;;  %v133_v53 = vld [vmem:[%s4649_s1 + $0x348] sm:$0xff] }
  0x26   :  { %1003 = vmatprep.subr.mxu0 %v87_v7  ;;  %1073 = vmatpush2.msra.mxu1 %v152_v8  ;;  %v68_v52 = vld [vmem:[%s4649_s1 + $0x140] sm:$0xff]  ;;  %v67_v54 = vld [vmem:[%s4649_s1 + $0x138] sm:$0xff]  ;;  %v66_v56 = vld [vmem:[%s4649_s1 + $0x130] sm:$0xff]  ;;  %v838_v58 = vrot.slane %v21_v51, %v2473_v48  ;;  %v831_v59 = vcombine.high %v21_v51, %v21_v51 }
  0x27   :  { %1004 = vmatpush2.msra.mxu0 %v86_v9  ;;  %1074 = vmatprep.subr.mxu1 %v151_v10  ;;  %v132_v55 = vld [vmem:[%s4649_s1 + $0x340] sm:$0xff]  ;;  %v131_v57 = vld [vmem:[%s4649_s1 + $0x338] sm:$0xff]  ;;  %v65_v60 = vld [vmem:[%s4649_s1 + $0x128] sm:$0xff] }
  0x28   :  { %1005 = vmatprep.subr.mxu0 %v85_v11  ;;  %1075 = vmatpush2.msra.mxu1 %v150_v12  ;;  %v130_v61 = vld [vmem:[%s4649_s1 + $0x330] sm:$0xff]  ;;  %v64_v62 = vld [vmem:[%s4649_s1 + $0x120] sm:$0xff]  ;;  %v129_v63 = vld [vmem:[%s4649_s1 + $0x328] sm:$0xff]  ;;  %v846_v4 = vcombine.high %v838_v58, %v838_v58  ;;  %v845_v5 = vrot.slane %v831_v59, %v2473_v48 }
  0x29   :  { %1006 = vmatpush2.msra.mxu0 %v84_v13  ;;  %1076 = vmatprep.subr.mxu1 %v149_v14  ;;  %v63_v0 = vld [vmem:[%s4649_s1 + $0x118] sm:$0xff]  ;;  %v128_v1 = vld [vmem:[%s4649_s1 + $0x320] sm:$0xff]  ;;  %v62_v2 = vld [vmem:[%s4649_s1 + $0x110] sm:$0xff] }
  0x2a   :  { %1007 = vmatprep.subr.mxu0 %v83_v15  ;;  %1077 = vmatpush2.msra.mxu1 %v148_v16  ;;  %v127_v3 = vld [vmem:[%s4649_s1 + $0x318] sm:$0xff]  ;;  %v61_v6 = vld [vmem:[%s4649_s1 + $0x108] sm:$0xff]  ;;  %v60_v7 = vld [vmem:[%s4649_s1 + $0x100] sm:$0xff]  ;;  %v847_v12 = vcombine.high %v845_v5, %v845_v5 }
  0x2b   :  { %1008 = vmatpush2.msra.mxu0 %v82_v17  ;;  %1078 = vmatprep.subr.mxu1 %v147_v18  ;;  %v126_v8 = vld [vmem:[%s4649_s1 + $0x310] sm:$0xff]  ;;  %v125_v9 = vld [vmem:[%s4649_s1 + $0x308] sm:$0xff]  ;;  %v187_v10 = vld [vmem:[%s4649_s1 + $0x4f8] sm:$0xff] }
  0x2c   :  { %1009 = vmatprep.subr.mxu0 %v81_v19  ;;  %1079 = vmatpush2.msra.mxu1 %v146_v20  ;;  %v124_v11 = vld [vmem:[%s4649_s1 + $0x300] sm:$0xff]  ;;  %v186_v13 = vld [vmem:[%s4649_s1 + $0x4f0] sm:$0xff]  ;;  %v185_v14 = vld [vmem:[%s4649_s1 + $0x4e8] sm:$0xff] }
  0x2d   :  { %1010 = vmatpush2.msra.mxu0 %v80_v21  ;;  %1080 = vmatprep.subr.mxu1 %v145_v22  ;;  %v251_v15 = vld [vmem:[%s4649_s1 + $0x6f8] sm:$0xff]  ;;  %v184_v16 = vld [vmem:[%s4649_s1 + $0x4e0] sm:$0xff]  ;;  %v250_v17 = vld [vmem:[%s4649_s1 + $0x6f0] sm:$0xff] }
  0x2e   :  { %1011 = vmatprep.subr.mxu0 %v79_v23  ;;  %1081 = vmatpush2.msra.mxu1 %v144_v24  ;;  %v183_v18 = vld [vmem:[%s4649_s1 + $0x4d8] sm:$0xff]  ;;  %v249_v19 = vld [vmem:[%s4649_s1 + $0x6e8] sm:$0xff]  ;;  %v182_v20 = vld [vmem:[%s4649_s1 + $0x4d0] sm:$0xff] }
  0x2f   :  { %1012 = vmatpush2.msra.mxu0 %v78_v25  ;;  %1082 = vmatprep.subr.mxu1 %v143_v26  ;;  %v248_v21 = vld [vmem:[%s4649_s1 + $0x6e0] sm:$0xff]  ;;  %v181_v22 = vld [vmem:[%s4649_s1 + $0x4c8] sm:$0xff]  ;;  %v247_v23 = vld [vmem:[%s4649_s1 + $0x6d8] sm:$0xff] }
  0x30   :  { %1013 = vmatprep.subr.mxu0 %v77_v30  ;;  %1083 = vmatpush2.msra.mxu1 %v142_v31  ;;  %v180_v24 = vld [vmem:[%s4649_s1 + $0x4c0] sm:$0xff]  ;;  %v246_v25 = vld [vmem:[%s4649_s1 + $0x6d0] sm:$0xff]  ;;  %v179_v26 = vld [vmem:[%s4649_s1 + $0x4b8] sm:$0xff] }
  0x31   :  { %1014 = vmatpush2.msra.mxu0 %v76_v32  ;;  %1084 = vmatprep.subr.mxu1 %v141_v33  ;;  %v245_v27 = vld [vmem:[%s4649_s1 + $0x6c8] sm:$0xff]  ;;  %v178_v28 = vld [vmem:[%s4649_s1 + $0x4b0] sm:$0xff]  ;;  %v244_v29 = vld [vmem:[%s4649_s1 + $0x6c0] sm:$0xff] }
  0x32   :  { %1015 = vmatprep.subr.mxu0 %v75_v34  ;;  %1085 = vmatpush2.msra.mxu1 %v140_v35  ;;  %v177_v30 = vld [vmem:[%s4649_s1 + $0x4a8] sm:$0xff]  ;;  %v243_v31 = vld [vmem:[%s4649_s1 + $0x6b8] sm:$0xff]  ;;  %v176_v32 = vld [vmem:[%s4649_s1 + $0x4a0] sm:$0xff] }
  0x33   :  { %1016 = vmatpush2.msra.mxu0 %v74_v36  ;;  %1086 = vmatprep.subr.mxu1 %v139_v37  ;;  %v242_v33 = vld [vmem:[%s4649_s1 + $0x6b0] sm:$0xff]  ;;  %v175_v34 = vld [vmem:[%s4649_s1 + $0x498] sm:$0xff]  ;;  %v241_v35 = vld [vmem:[%s4649_s1 + $0x6a8] sm:$0xff] }
  0x34   :  { %1017 = vmatprep.subr.mxu0 %v73_v40  ;;  %1087 = vmatpush2.msra.mxu1 %v138_v41  ;;  %v174_v36 = vld [vmem:[%s4649_s1 + $0x490] sm:$0xff]  ;;  %v240_v37 = vld [vmem:[%s4649_s1 + $0x6a0] sm:$0xff]  ;;  %v173_v39 = vld [vmem:[%s4649_s1 + $0x488] sm:$0xff] }
  0x35   :  { %1018 = vmatpush2.msra.mxu0 %v72_v42  ;;  %1088 = vmatprep.subr.mxu1 %v137_v43  ;;  %v239_v40 = vld [vmem:[%s4649_s1 + $0x698] sm:$0xff]  ;;  %v172_v41 = vld [vmem:[%s4649_s1 + $0x480] sm:$0xff]  ;;  %v238_v42 = vld [vmem:[%s4649_s1 + $0x690] sm:$0xff] }
  0x36   :  { %1019 = vmatprep.subr.mxu0 %v71_v44  ;;  %1089 = vmatpush2.msra.mxu1 %v136_v45  ;;  %v171_v43 = vld [vmem:[%s4649_s1 + $0x478] sm:$0xff]  ;;  %v237_v44 = vld [vmem:[%s4649_s1 + $0x688] sm:$0xff]  ;;  %v170_v45 = vld [vmem:[%s4649_s1 + $0x470] sm:$0xff] }
  0x37   :  { %1020 = vmatpush2.msra.mxu0 %v70_v46  ;;  %1090 = vmatprep.subr.mxu1 %v135_v47  ;;  %v236_v46 = vld [vmem:[%s4649_s1 + $0x680] sm:$0xff]  ;;  %v169_v47 = vld [vmem:[%s4649_s1 + $0x468] sm:$0xff]  ;;  %v234_v51 = vld [vmem:[%s4649_s1 + $0x670] sm:$0xff] }
  0x38   :  { %1021 = vmatprep.subr.mxu0 %v69_v49  ;;  %1091 = vmatpush2.msra.mxu1 %v134_v50  ;;  %v235_v49 = vld [vmem:[%s4649_s1 + $0x678] sm:$0xff]  ;;  %v168_v50 = vld [vmem:[%s4649_s1 + $0x460] sm:$0xff]  ;;  %v230_v59 = vld [vmem:[%s4649_s1 + $0x650] sm:$0xff] }
  0x39   :  { %1022 = vmatpush2.msra.mxu0 %v68_v52  ;;  %1092 = vmatprep.subr.mxu1 %v133_v53  ;;  %v167_v52 = vld [vmem:[%s4649_s1 + $0x458] sm:$0xff]  ;;  %v233_v53 = vld [vmem:[%s4649_s1 + $0x668] sm:$0xff] }
  0x3a   :  { %1023 = vmatprep.subr.mxu0 %v67_v54  ;;  %1093 = vmatpush2.msra.mxu1 %v132_v55  ;;  %v166_v54 = vld [vmem:[%s4649_s1 + $0x450] sm:$0xff]  ;;  %v232_v55 = vld [vmem:[%s4649_s1 + $0x660] sm:$0xff] }
  0x3b   :  { %1024 = vmatpush2.msra.mxu0 %v66_v56  ;;  %1094 = vmatprep.subr.mxu1 %v131_v57  ;;  %v165_v56 = vld [vmem:[%s4649_s1 + $0x448] sm:$0xff]  ;;  %v231_v57 = vld [vmem:[%s4649_s1 + $0x658] sm:$0xff] }
  0x3c   :  { %1025 = vmatprep.subr.mxu0 %v65_v60  ;;  %1095 = vmatpush2.msra.mxu1 %v130_v61  ;;  %v163_v60 = vld [vmem:[%s4649_s1 + $0x438] sm:$0xff]  ;;  %v229_v61 = vld [vmem:[%s4649_s1 + $0x648] sm:$0xff] }
  0x3d   :  { %1026 = vmatpush2.msra.mxu0 %v64_v62  ;;  %1096 = vmatprep.subr.mxu1 %v129_v63  ;;  %v162_v62 = vld [vmem:[%s4649_s1 + $0x430] sm:$0xff]  ;;  %v228_v63 = vld [vmem:[%s4649_s1 + $0x640] sm:$0xff] }
  0x3e   :  { %1027 = vmatprep.subr.mxu0 %v63_v0  ;;  %1097 = vmatpush2.msra.mxu1 %v128_v1  ;;  %v161_v0 = vld [vmem:[%s4649_s1 + $0x428] sm:$0xff]  ;;  %v227_v1 = vld [vmem:[%s4649_s1 + $0x638] sm:$0xff] }
  0x3f   :  { %1028 = vmatpush2.msra.mxu0 %v62_v2  ;;  %1098 = vmatprep.subr.mxu1 %v127_v3  ;;  %v160_v2 = vld [vmem:[%s4649_s1 + $0x420] sm:$0xff]  ;;  %v226_v3 = vld [vmem:[%s4649_s1 + $0x630] sm:$0xff] }
  0x40   :  { %1029 = vmatprep.subr.mxu0 %v61_v6  ;;  %1031 = vmatprep.mubr.f32.mxu0 %v846_v4  ;;  %v159_v4 = vld [vmem:[%s4649_s1 + $0x418] sm:$0xff]  ;;  %v158_v6 = vld [vmem:[%s4649_s1 + $0x410] sm:$0xff] }
  0x41   :  { %1030 = vmatpush2.msra.mxu0 %v60_v7  ;;  %1099 = vmatpush2.msra.mxu1 %v126_v8  ;;  %v224_v7 = vld [vmem:[%s4649_s1 + $0x620] sm:$0xff]  ;;  %v157_v8 = vld [vmem:[%s4649_s1 + $0x408] sm:$0xff] }
  0x42   :  { %1032 = vmatmul.mubr.f32.vlgmr.msra.gmra.mxu0 %v838_v58  ;;  %1100 = vmatprep.subr.mxu1 %v125_v9  ;;  %v164_v58 = vld [vmem:[%s4649_s1 + $0x440] sm:$0xff]  ;;  %v223_v9 = vld [vmem:[%s4649_s1 + $0x618] sm:$0xff] }
  0x43   :  { %1109 = vmatprep.subr.mxu0 %v187_v10  ;;  %1101 = vmatpush2.msra.mxu1 %v124_v11  ;;  %v156_v10 = vld [vmem:[%s4649_s1 + $0x400] sm:$0xff]  ;;  %v222_v11 = vld [vmem:[%s4649_s1 + $0x610] sm:$0xff] }
  0x44   :  { %1102 = vmatprep.mubr.f32.mxu1 %v847_v12  ;;  %1110 = vmatpush1.msra.mxu0 %v186_v13  ;;  %v219_v12 = vld [vmem:[%s4649_s1 + $0x5f8] sm:$0xff]  ;;  %v221_v13 = vld [vmem:[%s4649_s1 + $0x608] sm:$0xff] }
  0x45   :  { %1103 = vmatmul.mubr.f32.vlgmr.msra.gmra.mxu1 %v845_v5  ;;  %1111 = vmatprep.subr.mxu0 %v185_v14  ;;  %v225_v5 = vld [vmem:[%s4649_s1 + $0x628] sm:$0xff]  ;;  %v218_v14 = vld [vmem:[%s4649_s1 + $0x5f0] sm:$0xff] }
  0x46   :  { %1180 = vmatprep.subr.mxu1 %v251_v15  ;;  %1112 = vmatpush1.msra.mxu0 %v184_v16  ;;  %v220_v15 = vld [vmem:[%s4649_s1 + $0x600] sm:$0xff]  ;;  %v217_v16 = vld [vmem:[%s4649_s1 + $0x5e8] sm:$0xff] }
  0x47   :  { %1181 = vmatpush1.msra.mxu1 %v250_v17  ;;  %1113 = vmatprep.subr.mxu0 %v183_v18  ;;  %v283_v17 = vld [vmem:[%s4649_s1 + $0x7f8] sm:$0xff]  ;;  %v216_v18 = vld [vmem:[%s4649_s1 + $0x5e0] sm:$0xff] }
  0x48   :  { %1182 = vmatprep.subr.mxu1 %v249_v19  ;;  %1114 = vmatpush1.msra.mxu0 %v182_v20  ;;  %v282_v19 = vld [vmem:[%s4649_s1 + $0x7f0] sm:$0xff]  ;;  %v215_v20 = vld [vmem:[%s4649_s1 + $0x5d8] sm:$0xff] }
  0x49   :  { %1183 = vmatpush1.msra.mxu1 %v248_v21  ;;  %1115 = vmatprep.subr.mxu0 %v181_v22  ;;  %v281_v21 = vld [vmem:[%s4649_s1 + $0x7e8] sm:$0xff]  ;;  %v214_v22 = vld [vmem:[%s4649_s1 + $0x5d0] sm:$0xff] }
  0x4a   :  { %1184 = vmatprep.subr.mxu1 %v247_v23  ;;  %1116 = vmatpush1.msra.mxu0 %v180_v24  ;;  %v280_v23 = vld [vmem:[%s4649_s1 + $0x7e0] sm:$0xff]  ;;  %v213_v24 = vld [vmem:[%s4649_s1 + $0x5c8] sm:$0xff] }
  0x4b   :  { %1185 = vmatpush1.msra.mxu1 %v246_v25  ;;  %1117 = vmatprep.subr.mxu0 %v179_v26  ;;  %v279_v25 = vld [vmem:[%s4649_s1 + $0x7d8] sm:$0xff]  ;;  %v212_v26 = vld [vmem:[%s4649_s1 + $0x5c0] sm:$0xff] }
  0x4c   :  { %1186 = vmatprep.subr.mxu1 %v245_v27  ;;  %1118 = vmatpush1.msra.mxu0 %v178_v28  ;;  %v278_v27 = vld [vmem:[%s4649_s1 + $0x7d0] sm:$0xff]  ;;  %v211_v28 = vld [vmem:[%s4649_s1 + $0x5b8] sm:$0xff] }
  0x4d   :  { %1187 = vmatpush1.msra.mxu1 %v244_v29  ;;  %1119 = vmatprep.subr.mxu0 %v177_v30  ;;  %v277_v29 = vld [vmem:[%s4649_s1 + $0x7c8] sm:$0xff]  ;;  %v210_v30 = vld [vmem:[%s4649_s1 + $0x5b0] sm:$0xff] }
  0x4e   :  { %1188 = vmatprep.subr.mxu1 %v243_v31  ;;  %1120 = vmatpush1.msra.mxu0 %v176_v32  ;;  %v276_v31 = vld [vmem:[%s4649_s1 + $0x7c0] sm:$0xff]  ;;  %v209_v32 = vld [vmem:[%s4649_s1 + $0x5a8] sm:$0xff] }
  0x4f   :  { %1189 = vmatpush1.msra.mxu1 %v242_v33  ;;  %1121 = vmatprep.subr.mxu0 %v175_v34  ;;  %v275_v33 = vld [vmem:[%s4649_s1 + $0x7b8] sm:$0xff]  ;;  %v208_v34 = vld [vmem:[%s4649_s1 + $0x5a0] sm:$0xff] }
  0x50   :  { %1190 = vmatprep.subr.mxu1 %v241_v35  ;;  %1122 = vmatpush1.msra.mxu0 %v174_v36  ;;  %v274_v35 = vld [vmem:[%s4649_s1 + $0x7b0] sm:$0xff]  ;;  %v207_v36 = vld [vmem:[%s4649_s1 + $0x598] sm:$0xff] }
  0x51   :  { %1191 = vmatpush1.msra.mxu1 %v240_v37  ;;  %1123 = vmatprep.subr.mxu0 %v173_v39  ;;  %v273_v37 = vld [vmem:[%s4649_s1 + $0x7a8] sm:$0xff]  ;;  %v206_v39 = vld [vmem:[%s4649_s1 + $0x590] sm:$0xff] }
  0x52   :  { %1192 = vmatprep.subr.mxu1 %v239_v40  ;;  %1124 = vmatpush1.msra.mxu0 %v172_v41  ;;  %v272_v40 = vld [vmem:[%s4649_s1 + $0x7a0] sm:$0xff]  ;;  %v205_v41 = vld [vmem:[%s4649_s1 + $0x588] sm:$0xff] }
  0x53   :  { %1193 = vmatpush1.msra.mxu1 %v238_v42  ;;  %1125 = vmatprep.subr.mxu0 %v171_v43  ;;  %v271_v42 = vld [vmem:[%s4649_s1 + $0x798] sm:$0xff]  ;;  %v204_v43 = vld [vmem:[%s4649_s1 + $0x580] sm:$0xff] }
  0x54   :  { %1194 = vmatprep.subr.mxu1 %v237_v44  ;;  %1126 = vmatpush1.msra.mxu0 %v170_v45  ;;  %v270_v44 = vld [vmem:[%s4649_s1 + $0x790] sm:$0xff]  ;;  %v203_v45 = vld [vmem:[%s4649_s1 + $0x578] sm:$0xff] }
  0x55   :  { %1195 = vmatpush1.msra.mxu1 %v236_v46  ;;  %1127 = vmatprep.subr.mxu0 %v169_v47  ;;  %v269_v46 = vld [vmem:[%s4649_s1 + $0x788] sm:$0xff]  ;;  %v202_v47 = vld [vmem:[%s4649_s1 + $0x570] sm:$0xff] }
  0x56   :  { %1196 = vmatprep.subr.mxu1 %v235_v49  ;;  %1128 = vmatpush1.msra.mxu0 %v168_v50  ;;  %v268_v49 = vld [vmem:[%s4649_s1 + $0x780] sm:$0xff]  ;;  %v201_v50 = vld [vmem:[%s4649_s1 + $0x568] sm:$0xff] }
  0x57   :  { %1197 = vmatpush1.msra.mxu1 %v234_v51  ;;  %1129 = vmatprep.subr.mxu0 %v167_v52  ;;  %v267_v51 = vld [vmem:[%s4649_s1 + $0x778] sm:$0xff]  ;;  %v200_v52 = vld [vmem:[%s4649_s1 + $0x560] sm:$0xff] }
  0x58   :  { %1198 = vmatprep.subr.mxu1 %v233_v53  ;;  %1130 = vmatpush1.msra.mxu0 %v166_v54  ;;  %v266_v53 = vld [vmem:[%s4649_s1 + $0x770] sm:$0xff]  ;;  %v199_v54 = vld [vmem:[%s4649_s1 + $0x558] sm:$0xff] }
  0x59   :  { %1199 = vmatpush1.msra.mxu1 %v232_v55  ;;  %1131 = vmatprep.subr.mxu0 %v165_v56  ;;  %v265_v55 = vld [vmem:[%s4649_s1 + $0x768] sm:$0xff]  ;;  %v198_v56 = vld [vmem:[%s4649_s1 + $0x550] sm:$0xff] }
  0x5a   :  { %1200 = vmatprep.subr.mxu1 %v231_v57  ;;  %1132 = vmatpush1.msra.mxu0 %v164_v58  ;;  %v264_v57 = vld [vmem:[%s4649_s1 + $0x760] sm:$0xff]  ;;  %v197_v58 = vld [vmem:[%s4649_s1 + $0x548] sm:$0xff] }
  0x5b   :  { %1201 = vmatpush1.msra.mxu1 %v230_v59  ;;  %1133 = vmatprep.subr.mxu0 %v163_v60  ;;  %v263_v59 = vld [vmem:[%s4649_s1 + $0x758] sm:$0xff]  ;;  %v196_v60 = vld [vmem:[%s4649_s1 + $0x540] sm:$0xff] }
  0x5c   :  { %1202 = vmatprep.subr.mxu1 %v229_v61  ;;  %1134 = vmatpush1.msra.mxu0 %v162_v62  ;;  %v22_v61 = vld [vmem:[%s4648_s0 + $0x8] sm:$0xff]  ;;  %v262_v62 = vld [vmem:[%s4649_s1 + $0x750] sm:$0xff] }
  0x5d   :  { %1203 = vmatpush1.msra.mxu1 %v228_v63  ;;  %1135 = vmatprep.subr.mxu0 %v161_v0  ;;  %v195_v63 = vld [vmem:[%s4649_s1 + $0x538] sm:$0xff]  ;;  %v261_v0 = vld [vmem:[%s4649_s1 + $0x748] sm:$0xff] }
  0x5e   :  { %1204 = vmatprep.subr.mxu1 %v227_v1  ;;  %1136 = vmatpush1.msra.mxu0 %v160_v2  ;;  %v194_v1 = vld [vmem:[%s4649_s1 + $0x530] sm:$0xff]  ;;  %v260_v2 = vld [vmem:[%s4649_s1 + $0x740] sm:$0xff] }
  0x5f   :  { %1205 = vmatpush1.msra.mxu1 %v226_v3  ;;  %1137 = vmatprep.subr.mxu0 %v159_v4  ;;  %v193_v3 = vld [vmem:[%s4649_s1 + $0x528] sm:$0xff]  ;;  %v848_v4 = vcombine.high %v22_v61, %v22_v61 }
  0x60   :  { %1206 = vmatprep.subr.mxu1 %v225_v5  ;;  %1138 = vmatpush1.msra.mxu0 %v158_v6  ;;  %v259_v5 = vld [vmem:[%s4649_s1 + $0x738] sm:$0xff]  ;;  %v192_v6 = vld [vmem:[%s4649_s1 + $0x520] sm:$0xff] }
  0x61   :  { %1207 = vmatpush1.msra.mxu1 %v224_v7  ;;  %1139 = vmatprep.subr.mxu0 %v157_v8  ;;  %v855_v7 = vrot.slane %v22_v61, %v2473_v48  ;;  %v258_v8 = vld [vmem:[%s4649_s1 + $0x730] sm:$0xff] }
  0x62   :  { %1208 = vmatprep.subr.mxu1 %v223_v9  ;;  %1140 = vmatpush1.msra.mxu0 %v156_v10  ;;  %v191_v9 = vld [vmem:[%s4649_s1 + $0x518] sm:$0xff]  ;;  %v257_v10 = vld [vmem:[%s4649_s1 + $0x728] sm:$0xff]  ;;  %v362_v61 = vld [vmem:[%s4649_s1 + $0xa70] sm:$0xff] }
  0x63   :  { %1209 = vmatpush1.msra.mxu1 %v222_v11  ;;  %1141 = vmatprep.subr.mxu0 %v219_v12  ;;  %v190_v11 = vld [vmem:[%s4649_s1 + $0x510] sm:$0xff]  ;;  %v256_v12 = vld [vmem:[%s4649_s1 + $0x720] sm:$0xff] }
  0x64   :  { %1210 = vmatprep.subr.mxu1 %v221_v13  ;;  %1142 = vmatpush2.msra.mxu0 %v218_v14  ;;  %v189_v13 = vld [vmem:[%s4649_s1 + $0x508] sm:$0xff]  ;;  %v862_v14 = vrot.slane %v848_v4, %v2473_v48  ;;  %v292_v4 = vld [vmem:[%s4649_s1 + $0x840] sm:$0xff] }
  0x65   :  { %1211 = vmatpush1.msra.mxu1 %v220_v15  ;;  %1143 = vmatprep.subr.mxu0 %v217_v16  ;;  %v255_v15 = vld [vmem:[%s4649_s1 + $0x718] sm:$0xff]  ;;  %v188_v16 = vld [vmem:[%s4649_s1 + $0x500] sm:$0xff] }
  0x66   :  { %1212 = vmatprep.subr.mxu1 %v283_v17  ;;  %1144 = vmatpush2.msra.mxu0 %v216_v18  ;;  %v863_v17 = vcombine.high %v855_v7, %v855_v7  ;;  %v254_v18 = vld [vmem:[%s4649_s1 + $0x710] sm:$0xff] }
  0x67   :  { %1213 = vmatpush2.msra.mxu1 %v282_v19  ;;  %1145 = vmatprep.subr.mxu0 %v215_v20  ;;  %v253_v19 = vld [vmem:[%s4649_s1 + $0x708] sm:$0xff]  ;;  %v315_v20 = vld [vmem:[%s4649_s1 + $0x8f8] sm:$0xff] }
  0x68   :  { %1214 = vmatprep.subr.mxu1 %v281_v21  ;;  %1146 = vmatpush2.msra.mxu0 %v214_v22  ;;  %v252_v21 = vld [vmem:[%s4649_s1 + $0x700] sm:$0xff]  ;;  %v864_v22 = vcombine.high %v862_v14, %v862_v14 }
  0x69   :  { %1215 = vmatpush2.msra.mxu1 %v280_v23  ;;  %1147 = vmatprep.subr.mxu0 %v213_v24  ;;  %v314_v23 = vld [vmem:[%s4649_s1 + $0x8f0] sm:$0xff]  ;;  %v313_v24 = vld [vmem:[%s4649_s1 + $0x8e8] sm:$0xff] }
  0x6a   :  { %1216 = vmatprep.subr.mxu1 %v279_v25  ;;  %1148 = vmatpush2.msra.mxu0 %v212_v26  ;;  %v379_v25 = vld [vmem:[%s4649_s1 + $0xaf8] sm:$0xff]  ;;  %v312_v26 = vld [vmem:[%s4649_s1 + $0x8e0] sm:$0xff] }
  0x6b   :  { %1217 = vmatpush2.msra.mxu1 %v278_v27  ;;  %1149 = vmatprep.subr.mxu0 %v211_v28  ;;  %v378_v27 = vld [vmem:[%s4649_s1 + $0xaf0] sm:$0xff]  ;;  %v311_v28 = vld [vmem:[%s4649_s1 + $0x8d8] sm:$0xff] }
  0x6c   :  { %1218 = vmatprep.subr.mxu1 %v277_v29  ;;  %1150 = vmatpush2.msra.mxu0 %v210_v30  ;;  %v377_v29 = vld [vmem:[%s4649_s1 + $0xae8] sm:$0xff]  ;;  %v310_v30 = vld [vmem:[%s4649_s1 + $0x8d0] sm:$0xff] }
  0x6d   :  { %1219 = vmatpush2.msra.mxu1 %v276_v31  ;;  %1151 = vmatprep.subr.mxu0 %v209_v32  ;;  %v376_v31 = vld [vmem:[%s4649_s1 + $0xae0] sm:$0xff]  ;;  %v309_v32 = vld [vmem:[%s4649_s1 + $0x8c8] sm:$0xff] }
  0x6e   :  { %1220 = vmatprep.subr.mxu1 %v275_v33  ;;  %1152 = vmatpush2.msra.mxu0 %v208_v34  ;;  %v375_v33 = vld [vmem:[%s4649_s1 + $0xad8] sm:$0xff]  ;;  %v308_v34 = vld [vmem:[%s4649_s1 + $0x8c0] sm:$0xff] }
  0x6f   :  { %1221 = vmatpush2.msra.mxu1 %v274_v35  ;;  %1153 = vmatprep.subr.mxu0 %v207_v36  ;;  %v374_v35 = vld [vmem:[%s4649_s1 + $0xad0] sm:$0xff]  ;;  %v307_v36 = vld [vmem:[%s4649_s1 + $0x8b8] sm:$0xff] }
  0x70   :  { %1222 = vmatprep.subr.mxu1 %v273_v37  ;;  %1154 = vmatpush2.msra.mxu0 %v206_v39  ;;  %v373_v37 = vld [vmem:[%s4649_s1 + $0xac8] sm:$0xff]  ;;  %v306_v39 = vld [vmem:[%s4649_s1 + $0x8b0] sm:$0xff] }
  0x71   :  { %1223 = vmatpush2.msra.mxu1 %v272_v40  ;;  %1155 = vmatprep.subr.mxu0 %v205_v41  ;;  %v372_v40 = vld [vmem:[%s4649_s1 + $0xac0] sm:$0xff]  ;;  %v305_v41 = vld [vmem:[%s4649_s1 + $0x8a8] sm:$0xff] }
  0x72   :  { %1224 = vmatprep.subr.mxu1 %v271_v42  ;;  %1156 = vmatpush2.msra.mxu0 %v204_v43  ;;  %v371_v42 = vld [vmem:[%s4649_s1 + $0xab8] sm:$0xff]  ;;  %v304_v43 = vld [vmem:[%s4649_s1 + $0x8a0] sm:$0xff] }
  0x73   :  { %1225 = vmatpush2.msra.mxu1 %v270_v44  ;;  %1157 = vmatprep.subr.mxu0 %v203_v45  ;;  %v370_v44 = vld [vmem:[%s4649_s1 + $0xab0] sm:$0xff]  ;;  %v303_v45 = vld [vmem:[%s4649_s1 + $0x898] sm:$0xff] }
  0x74   :  { %1226 = vmatprep.subr.mxu1 %v269_v46  ;;  %1158 = vmatpush2.msra.mxu0 %v202_v47  ;;  %v369_v46 = vld [vmem:[%s4649_s1 + $0xaa8] sm:$0xff]  ;;  %v302_v47 = vld [vmem:[%s4649_s1 + $0x890] sm:$0xff] }
  0x75   :  { %1227 = vmatpush2.msra.mxu1 %v268_v49  ;;  %1159 = vmatprep.subr.mxu0 %v201_v50  ;;  %v368_v49 = vld [vmem:[%s4649_s1 + $0xaa0] sm:$0xff]  ;;  %v301_v50 = vld [vmem:[%s4649_s1 + $0x888] sm:$0xff] }
  0x76   :  { %1228 = vmatprep.subr.mxu1 %v267_v51  ;;  %1160 = vmatpush2.msra.mxu0 %v200_v52  ;;  %v367_v51 = vld [vmem:[%s4649_s1 + $0xa98] sm:$0xff]  ;;  %v300_v52 = vld [vmem:[%s4649_s1 + $0x880] sm:$0xff] }
  0x77   :  { %1229 = vmatpush2.msra.mxu1 %v266_v53  ;;  %1161 = vmatprep.subr.mxu0 %v199_v54  ;;  %v366_v53 = vld [vmem:[%s4649_s1 + $0xa90] sm:$0xff]  ;;  %v299_v54 = vld [vmem:[%s4649_s1 + $0x878] sm:$0xff] }
  0x78   :  { %1230 = vmatprep.subr.mxu1 %v265_v55  ;;  %1162 = vmatpush2.msra.mxu0 %v198_v56  ;;  %v365_v55 = vld [vmem:[%s4649_s1 + $0xa88] sm:$0xff]  ;;  %v298_v56 = vld [vmem:[%s4649_s1 + $0x870] sm:$0xff] }
  0x79   :  { %1231 = vmatpush2.msra.mxu1 %v264_v57  ;;  %1163 = vmatprep.subr.mxu0 %v197_v58  ;;  %v364_v57 = vld [vmem:[%s4649_s1 + $0xa80] sm:$0xff]  ;;  %v297_v58 = vld [vmem:[%s4649_s1 + $0x868] sm:$0xff] }
  0x7a   :  { %1232 = vmatprep.subr.mxu1 %v263_v59  ;;  %1164 = vmatpush2.msra.mxu0 %v196_v60  ;;  %v363_v59 = vld [vmem:[%s4649_s1 + $0xa78] sm:$0xff]  ;;  %v296_v60 = vld [vmem:[%s4649_s1 + $0x860] sm:$0xff] }
  0x7b   :  { %1233 = vmatpush2.msra.mxu1 %v262_v62  ;;  %1165 = vmatprep.subr.mxu0 %v195_v63  ;;  %v295_v62 = vld [vmem:[%s4649_s1 + $0x858] sm:$0xff]  ;;  %v361_v63 = vld [vmem:[%s4649_s1 + $0xa68] sm:$0xff] }
  0x7c   :  { %1234 = vmatprep.subr.mxu1 %v261_v0  ;;  %1166 = vmatpush2.msra.mxu0 %v194_v1  ;;  %v294_v0 = vld [vmem:[%s4649_s1 + $0x850] sm:$0xff]  ;;  %v360_v1 = vld [vmem:[%s4649_s1 + $0xa60] sm:$0xff] }
  0x7d   :  { %1235 = vmatpush2.msra.mxu1 %v260_v2  ;;  %1167 = vmatprep.subr.mxu0 %v193_v3  ;;  %v293_v2 = vld [vmem:[%s4649_s1 + $0x848] sm:$0xff]  ;;  %v359_v3 = vld [vmem:[%s4649_s1 + $0xa58] sm:$0xff] }
  0x7e   :  { %1236 = vmatprep.subr.mxu1 %v259_v5  ;;  %1168 = vmatpush2.msra.mxu0 %v192_v6  ;;  %v358_v5 = vld [vmem:[%s4649_s1 + $0xa50] sm:$0xff]  ;;  %v291_v6 = vld [vmem:[%s4649_s1 + $0x838] sm:$0xff] }
  0x7f   :  { %1237 = vmatpush2.msra.mxu1 %v258_v8  ;;  %1169 = vmatprep.subr.mxu0 %v191_v9  ;;  %v290_v8 = vld [vmem:[%s4649_s1 + $0x830] sm:$0xff]  ;;  %v356_v9 = vld [vmem:[%s4649_s1 + $0xa40] sm:$0xff] }
  0x80   :  { %1238 = vmatprep.subr.mxu1 %v257_v10  ;;  %1170 = vmatpush2.msra.mxu0 %v190_v11  ;;  %v289_v10 = vld [vmem:[%s4649_s1 + $0x828] sm:$0xff]  ;;  %v355_v11 = vld [vmem:[%s4649_s1 + $0xa38] sm:$0xff] }
  0x81   :  { %1239 = vmatpush2.msra.mxu1 %v256_v12  ;;  %1171 = vmatprep.subr.mxu0 %v189_v13  ;;  %v288_v12 = vld [vmem:[%s4649_s1 + $0x820] sm:$0xff]  ;;  %v354_v13 = vld [vmem:[%s4649_s1 + $0xa30] sm:$0xff] }
  0x82   :  { %1240 = vmatprep.subr.mxu1 %v255_v15  ;;  %1172 = vmatpush2.msra.mxu0 %v188_v16  ;;  %v353_v15 = vld [vmem:[%s4649_s1 + $0xa28] sm:$0xff]  ;;  %v286_v16 = vld [vmem:[%s4649_s1 + $0x810] sm:$0xff] }
  0x83   :  { %1173 = vmatprep.mubr.f32.mxu0 %v863_v17  ;;  %1241 = vmatpush2.msra.mxu1 %v254_v18  ;;  %v352_v17 = vld [vmem:[%s4649_s1 + $0xa20] sm:$0xff]  ;;  %v285_v18 = vld [vmem:[%s4649_s1 + $0x808] sm:$0xff] }
  0x84   :  { %1174 = vmatmul.mubr.f32.vlgmr.msra.gmra.mxu0 %v855_v7  ;;  %1242 = vmatprep.subr.mxu1 %v253_v19  ;;  %v357_v7 = vld [vmem:[%s4649_s1 + $0xa48] sm:$0xff]  ;;  %v351_v19 = vld [vmem:[%s4649_s1 + $0xa18] sm:$0xff] }
  0x85   :  { %1251 = vmatprep.subr.mxu0 %v315_v20  ;;  %1243 = vmatpush2.msra.mxu1 %v252_v21  ;;  %v284_v20 = vld [vmem:[%s4649_s1 + $0x800] sm:$0xff]  ;;  %v350_v21 = vld [vmem:[%s4649_s1 + $0xa10] sm:$0xff] }
  0x86   :  { %1244 = vmatprep.mubr.f32.mxu1 %v864_v22  ;;  %1252 = vmatpush1.msra.mxu0 %v314_v23  ;;  %v347_v22 = vld [vmem:[%s4649_s1 + $0x9f8] sm:$0xff]  ;;  %v349_v23 = vld [vmem:[%s4649_s1 + $0xa08] sm:$0xff] }
  0x87   :  { %1245 = vmatmul.mubr.f32.vlgmr.msra.gmra.mxu1 %v862_v14  ;;  %1253 = vmatprep.subr.mxu0 %v313_v24  ;;  %v287_v14 = vld [vmem:[%s4649_s1 + $0x818] sm:$0xff]  ;;  %v346_v24 = vld [vmem:[%s4649_s1 + $0x9f0] sm:$0xff] }
  0x88   :  { %1322 = vmatprep.subr.mxu1 %v379_v25  ;;  %1254 = vmatpush1.msra.mxu0 %v312_v26  ;;  %v348_v25 = vld [vmem:[%s4649_s1 + $0xa00] sm:$0xff]  ;;  %v345_v26 = vld [vmem:[%s4649_s1 + $0x9e8] sm:$0xff] }
  0x89   :  { %1323 = vmatpush1.msra.mxu1 %v378_v27  ;;  %1255 = vmatprep.subr.mxu0 %v311_v28  ;;  %v411_v27 = vld [vmem:[%s4649_s1 + $0xbf8] sm:$0xff]  ;;  %v344_v28 = vld [vmem:[%s4649_s1 + $0x9e0] sm:$0xff] }
  0x8a   :  { %1324 = vmatprep.subr.mxu1 %v377_v29  ;;  %1256 = vmatpush1.msra.mxu0 %v310_v30  ;;  %v410_v29 = vld [vmem:[%s4649_s1 + $0xbf0] sm:$0xff]  ;;  %v343_v30 = vld [vmem:[%s4649_s1 + $0x9d8] sm:$0xff] }
  0x8b   :  { %1325 = vmatpush1.msra.mxu1 %v376_v31  ;;  %1257 = vmatprep.subr.mxu0 %v309_v32  ;;  %v409_v31 = vld [vmem:[%s4649_s1 + $0xbe8] sm:$0xff]  ;;  %v342_v32 = vld [vmem:[%s4649_s1 + $0x9d0] sm:$0xff] }
  0x8c   :  { %1326 = vmatprep.subr.mxu1 %v375_v33  ;;  %1258 = vmatpush1.msra.mxu0 %v308_v34  ;;  %v408_v33 = vld [vmem:[%s4649_s1 + $0xbe0] sm:$0xff]  ;;  %v341_v34 = vld [vmem:[%s4649_s1 + $0x9c8] sm:$0xff] }
  0x8d   :  { %1327 = vmatpush1.msra.mxu1 %v374_v35  ;;  %1259 = vmatprep.subr.mxu0 %v307_v36  ;;  %v407_v35 = vld [vmem:[%s4649_s1 + $0xbd8] sm:$0xff]  ;;  %v340_v36 = vld [vmem:[%s4649_s1 + $0x9c0] sm:$0xff] }
  0x8e   :  { %1328 = vmatprep.subr.mxu1 %v373_v37  ;;  %1260 = vmatpush1.msra.mxu0 %v306_v39  ;;  %v406_v37 = vld [vmem:[%s4649_s1 + $0xbd0] sm:$0xff]  ;;  %v339_v39 = vld [vmem:[%s4649_s1 + $0x9b8] sm:$0xff] }
  0x8f   :  { %1329 = vmatpush1.msra.mxu1 %v372_v40  ;;  %1261 = vmatprep.subr.mxu0 %v305_v41  ;;  %v405_v40 = vld [vmem:[%s4649_s1 + $0xbc8] sm:$0xff]  ;;  %v338_v41 = vld [vmem:[%s4649_s1 + $0x9b0] sm:$0xff] }
  0x90   :  { %1330 = vmatprep.subr.mxu1 %v371_v42  ;;  %1262 = vmatpush1.msra.mxu0 %v304_v43  ;;  %v404_v42 = vld [vmem:[%s4649_s1 + $0xbc0] sm:$0xff]  ;;  %v337_v43 = vld [vmem:[%s4649_s1 + $0x9a8] sm:$0xff] }
  0x91   :  { %1331 = vmatpush1.msra.mxu1 %v370_v44  ;;  %1263 = vmatprep.subr.mxu0 %v303_v45  ;;  %v403_v44 = vld [vmem:[%s4649_s1 + $0xbb8] sm:$0xff]  ;;  %v336_v45 = vld [vmem:[%s4649_s1 + $0x9a0] sm:$0xff] }
  0x92   :  { %1332 = vmatprep.subr.mxu1 %v369_v46  ;;  %1264 = vmatpush1.msra.mxu0 %v302_v47  ;;  %v402_v46 = vld [vmem:[%s4649_s1 + $0xbb0] sm:$0xff]  ;;  %v335_v47 = vld [vmem:[%s4649_s1 + $0x998] sm:$0xff] }
  0x93   :  { %1333 = vmatpush1.msra.mxu1 %v368_v49  ;;  %1265 = vmatprep.subr.mxu0 %v301_v50  ;;  %v401_v49 = vld [vmem:[%s4649_s1 + $0xba8] sm:$0xff]  ;;  %v334_v50 = vld [vmem:[%s4649_s1 + $0x990] sm:$0xff] }
  0x94   :  { %1334 = vmatprep.subr.mxu1 %v367_v51  ;;  %1266 = vmatpush1.msra.mxu0 %v300_v52  ;;  %v400_v51 = vld [vmem:[%s4649_s1 + $0xba0] sm:$0xff]  ;;  %v333_v52 = vld [vmem:[%s4649_s1 + $0x988] sm:$0xff] }
  0x95   :  { %1335 = vmatpush1.msra.mxu1 %v366_v53  ;;  %1267 = vmatprep.subr.mxu0 %v299_v54  ;;  %v399_v53 = vld [vmem:[%s4649_s1 + $0xb98] sm:$0xff]  ;;  %v332_v54 = vld [vmem:[%s4649_s1 + $0x980] sm:$0xff] }
  0x96   :  { %1336 = vmatprep.subr.mxu1 %v365_v55  ;;  %1268 = vmatpush1.msra.mxu0 %v298_v56  ;;  %v398_v55 = vld [vmem:[%s4649_s1 + $0xb90] sm:$0xff]  ;;  %v331_v56 = vld [vmem:[%s4649_s1 + $0x978] sm:$0xff] }
  0x97   :  { %1337 = vmatpush1.msra.mxu1 %v364_v57  ;;  %1269 = vmatprep.subr.mxu0 %v297_v58  ;;  %v397_v57 = vld [vmem:[%s4649_s1 + $0xb88] sm:$0xff]  ;;  %v330_v58 = vld [vmem:[%s4649_s1 + $0x970] sm:$0xff] }
  0x98   :  { %1338 = vmatprep.subr.mxu1 %v363_v59  ;;  %1270 = vmatpush1.msra.mxu0 %v296_v60  ;;  %v396_v59 = vld [vmem:[%s4649_s1 + $0xb80] sm:$0xff]  ;;  %v329_v60 = vld [vmem:[%s4649_s1 + $0x968] sm:$0xff] }
  0x99   :  { %1339 = vmatpush1.msra.mxu1 %v362_v61  ;;  %1271 = vmatprep.subr.mxu0 %v295_v62  ;;  %v395_v61 = vld [vmem:[%s4649_s1 + $0xb78] sm:$0xff]  ;;  %v328_v62 = vld [vmem:[%s4649_s1 + $0x960] sm:$0xff] }
  0x9a   :  { %1340 = vmatprep.subr.mxu1 %v361_v63  ;;  %1272 = vmatpush1.msra.mxu0 %v294_v0  ;;  %v394_v63 = vld [vmem:[%s4649_s1 + $0xb70] sm:$0xff]  ;;  %v327_v0 = vld [vmem:[%s4649_s1 + $0x958] sm:$0xff] }
  0x9b   :  { %1341 = vmatpush1.msra.mxu1 %v360_v1  ;;  %1273 = vmatprep.subr.mxu0 %v293_v2  ;;  %v393_v1 = vld [vmem:[%s4649_s1 + $0xb68] sm:$0xff]  ;;  %v326_v2 = vld [vmem:[%s4649_s1 + $0x950] sm:$0xff] }
  0x9c   :  { %1342 = vmatprep.subr.mxu1 %v359_v3  ;;  %1274 = vmatpush1.msra.mxu0 %v292_v4  ;;  %v392_v3 = vld [vmem:[%s4649_s1 + $0xb60] sm:$0xff]  ;;  %v325_v4 = vld [vmem:[%s4649_s1 + $0x948] sm:$0xff] }
  0x9d   :  { %1343 = vmatpush1.msra.mxu1 %v358_v5  ;;  %1275 = vmatprep.subr.mxu0 %v291_v6  ;;  %v391_v5 = vld [vmem:[%s4649_s1 + $0xb58] sm:$0xff]  ;;  %v324_v6 = vld [vmem:[%s4649_s1 + $0x940] sm:$0xff] }
  0x9e   :  { %1344 = vmatprep.subr.mxu1 %v357_v7  ;;  %1276 = vmatpush1.msra.mxu0 %v290_v8  ;;  %v23_v7 = vld [vmem:[%s4648_s0 + $0x10] sm:$0xff] }
  0x9f   :  { %1345 = vmatpush1.msra.mxu1 %v356_v9  ;;  %1277 = vmatprep.subr.mxu0 %v289_v10  ;;  %v390_v8 = vld [vmem:[%s4649_s1 + $0xb50] sm:$0xff]  ;;  %v323_v9 = vld [vmem:[%s4649_s1 + $0x938] sm:$0xff]  ;;  %v389_v10 = vld [vmem:[%s4649_s1 + $0xb48] sm:$0xff] }
  0xa0   :  { %1346 = vmatprep.subr.mxu1 %v355_v11  ;;  %1278 = vmatpush1.msra.mxu0 %v288_v12  ;;  %v322_v11 = vld [vmem:[%s4649_s1 + $0x930] sm:$0xff]  ;;  %v388_v12 = vld [vmem:[%s4649_s1 + $0xb40] sm:$0xff] }
  0xa1   :  { %1347 = vmatpush1.msra.mxu1 %v354_v13  ;;  %1279 = vmatprep.subr.mxu0 %v287_v14  ;;  %v321_v13 = vld [vmem:[%s4649_s1 + $0x928] sm:$0xff]  ;;  %v865_v14 = vcombine.high %v23_v7, %v23_v7 }
  0xa2   :  { %1348 = vmatprep.subr.mxu1 %v353_v15  ;;  %1280 = vmatpush1.msra.mxu0 %v286_v16  ;;  %v387_v15 = vld [vmem:[%s4649_s1 + $0xb38] sm:$0xff]  ;;  %v320_v16 = vld [vmem:[%s4649_s1 + $0x920] sm:$0xff] }
  0xa3   :  { %1349 = vmatpush1.msra.mxu1 %v352_v17  ;;  %1281 = vmatprep.subr.mxu0 %v285_v18  ;;  %v872_v17 = vrot.slane %v23_v7, %v2473_v48  ;;  %v386_v18 = vld [vmem:[%s4649_s1 + $0xb30] sm:$0xff] }
  0xa4   :  { %1350 = vmatprep.subr.mxu1 %v351_v19  ;;  %1282 = vmatpush1.msra.mxu0 %v284_v20  ;;  %v319_v19 = vld [vmem:[%s4649_s1 + $0x918] sm:$0xff]  ;;  %v385_v20 = vld [vmem:[%s4649_s1 + $0xb28] sm:$0xff]  ;;  %v490_v7 = vld [vmem:[%s4649_s1 + $0xe70] sm:$0xff] }
  0xa5   :  { %1351 = vmatpush1.msra.mxu1 %v350_v21  ;;  %1283 = vmatprep.subr.mxu0 %v347_v22  ;;  %v318_v21 = vld [vmem:[%s4649_s1 + $0x910] sm:$0xff]  ;;  %v384_v22 = vld [vmem:[%s4649_s1 + $0xb20] sm:$0xff] }
  0xa6   :  { %1352 = vmatprep.subr.mxu1 %v349_v23  ;;  %1284 = vmatpush2.msra.mxu0 %v346_v24  ;;  %v317_v23 = vld [vmem:[%s4649_s1 + $0x908] sm:$0xff]  ;;  %v879_v24 = vrot.slane %v865_v14, %v2473_v48  ;;  %v420_v14 = vld [vmem:[%s4649_s1 + $0xc40] sm:$0xff] }
  0xa7   :  { %1353 = vmatpush1.msra.mxu1 %v348_v25  ;;  %1285 = vmatprep.subr.mxu0 %v345_v26  ;;  %v383_v25 = vld [vmem:[%s4649_s1 + $0xb18] sm:$0xff]  ;;  %v316_v26 = vld [vmem:[%s4649_s1 + $0x900] sm:$0xff] }
  0xa8   :  { %1354 = vmatprep.subr.mxu1 %v411_v27  ;;  %1286 = vmatpush2.msra.mxu0 %v344_v28  ;;  %v880_v27 = vcombine.high %v872_v17, %v872_v17  ;;  %v382_v28 = vld [vmem:[%s4649_s1 + $0xb10] sm:$0xff] }
  0xa9   :  { %1355 = vmatpush2.msra.mxu1 %v410_v29  ;;  %1287 = vmatprep.subr.mxu0 %v343_v30  ;;  %v381_v29 = vld [vmem:[%s4649_s1 + $0xb08] sm:$0xff]  ;;  %v443_v30 = vld [vmem:[%s4649_s1 + $0xcf8] sm:$0xff] }
  0xaa   :  { %1356 = vmatprep.subr.mxu1 %v409_v31  ;;  %1288 = vmatpush2.msra.mxu0 %v342_v32  ;;  %v380_v31 = vld [vmem:[%s4649_s1 + $0xb00] sm:$0xff]  ;;  %v881_v32 = vcombine.high %v879_v24, %v879_v24 }
  0xab   :  { %1357 = vmatpush2.msra.mxu1 %v408_v33  ;;  %1289 = vmatprep.subr.mxu0 %v341_v34  ;;  %v442_v33 = vld [vmem:[%s4649_s1 + $0xcf0] sm:$0xff]  ;;  %v441_v34 = vld [vmem:[%s4649_s1 + $0xce8] sm:$0xff] }
  0xac   :  { %1358 = vmatprep.subr.mxu1 %v407_v35  ;;  %1290 = vmatpush2.msra.mxu0 %v340_v36  ;;  %v507_v35 = vld [vmem:[%s4649_s1 + $0xef8] sm:$0xff]  ;;  %v440_v36 = vld [vmem:[%s4649_s1 + $0xce0] sm:$0xff] }
  0xad   :  { %1359 = vmatpush2.msra.mxu1 %v406_v37  ;;  %1291 = vmatprep.subr.mxu0 %v339_v39  ;;  %v506_v37 = vld [vmem:[%s4649_s1 + $0xef0] sm:$0xff]  ;;  %v439_v39 = vld [vmem:[%s4649_s1 + $0xcd8] sm:$0xff] }
  0xae   :  { %1360 = vmatprep.subr.mxu1 %v405_v40  ;;  %1292 = vmatpush2.msra.mxu0 %v338_v41  ;;  %v505_v40 = vld [vmem:[%s4649_s1 + $0xee8] sm:$0xff]  ;;  %v438_v41 = vld [vmem:[%s4649_s1 + $0xcd0] sm:$0xff] }
  0xaf   :  { %1361 = vmatpush2.msra.mxu1 %v404_v42  ;;  %1293 = vmatprep.subr.mxu0 %v337_v43  ;;  %v504_v42 = vld [vmem:[%s4649_s1 + $0xee0] sm:$0xff]  ;;  %v437_v43 = vld [vmem:[%s4649_s1 + $0xcc8] sm:$0xff] }
  0xb0   :  { %1362 = vmatprep.subr.mxu1 %v403_v44  ;;  %1294 = vmatpush2.msra.mxu0 %v336_v45  ;;  %v503_v44 = vld [vmem:[%s4649_s1 + $0xed8] sm:$0xff]  ;;  %v436_v45 = vld [vmem:[%s4649_s1 + $0xcc0] sm:$0xff] }
  0xb1   :  { %1363 = vmatpush2.msra.mxu1 %v402_v46  ;;  %1295 = vmatprep.subr.mxu0 %v335_v47  ;;  %v502_v46 = vld [vmem:[%s4649_s1 + $0xed0] sm:$0xff]  ;;  %v435_v47 = vld [vmem:[%s4649_s1 + $0xcb8] sm:$0xff] }
  0xb2   :  { %1364 = vmatprep.subr.mxu1 %v401_v49  ;;  %1296 = vmatpush2.msra.mxu0 %v334_v50  ;;  %v501_v49 = vld [vmem:[%s4649_s1 + $0xec8] sm:$0xff]  ;;  %v434_v50 = vld [vmem:[%s4649_s1 + $0xcb0] sm:$0xff] }
  0xb3   :  { %1365 = vmatpush2.msra.mxu1 %v400_v51  ;;  %1297 = vmatprep.subr.mxu0 %v333_v52  ;;  %v500_v51 = vld [vmem:[%s4649_s1 + $0xec0] sm:$0xff]  ;;  %v433_v52 = vld [vmem:[%s4649_s1 + $0xca8] sm:$0xff] }
  0xb4   :  { %1366 = vmatprep.subr.mxu1 %v399_v53  ;;  %1298 = vmatpush2.msra.mxu0 %v332_v54  ;;  %v499_v53 = vld [vmem:[%s4649_s1 + $0xeb8] sm:$0xff]  ;;  %v432_v54 = vld [vmem:[%s4649_s1 + $0xca0] sm:$0xff] }
  0xb5   :  { %1367 = vmatpush2.msra.mxu1 %v398_v55  ;;  %1299 = vmatprep.subr.mxu0 %v331_v56  ;;  %v498_v55 = vld [vmem:[%s4649_s1 + $0xeb0] sm:$0xff]  ;;  %v431_v56 = vld [vmem:[%s4649_s1 + $0xc98] sm:$0xff] }
  0xb6   :  { %1368 = vmatprep.subr.mxu1 %v397_v57  ;;  %1300 = vmatpush2.msra.mxu0 %v330_v58  ;;  %v497_v57 = vld [vmem:[%s4649_s1 + $0xea8] sm:$0xff]  ;;  %v430_v58 = vld [vmem:[%s4649_s1 + $0xc90] sm:$0xff] }
  0xb7   :  { %1369 = vmatpush2.msra.mxu1 %v396_v59  ;;  %1301 = vmatprep.subr.mxu0 %v329_v60  ;;  %v496_v59 = vld [vmem:[%s4649_s1 + $0xea0] sm:$0xff]  ;;  %v429_v60 = vld [vmem:[%s4649_s1 + $0xc88] sm:$0xff] }
  0xb8   :  { %1370 = vmatprep.subr.mxu1 %v395_v61  ;;  %1302 = vmatpush2.msra.mxu0 %v328_v62  ;;  %v495_v61 = vld [vmem:[%s4649_s1 + $0xe98] sm:$0xff]  ;;  %v428_v62 = vld [vmem:[%s4649_s1 + $0xc80] sm:$0xff] }
  0xb9   :  { %1371 = vmatpush2.msra.mxu1 %v394_v63  ;;  %1303 = vmatprep.subr.mxu0 %v327_v0  ;;  %v494_v63 = vld [vmem:[%s4649_s1 + $0xe90] sm:$0xff]  ;;  %v427_v0 = vld [vmem:[%s4649_s1 + $0xc78] sm:$0xff] }
  0xba   :  { %1372 = vmatprep.subr.mxu1 %v393_v1  ;;  %1304 = vmatpush2.msra.mxu0 %v326_v2  ;;  %v493_v1 = vld [vmem:[%s4649_s1 + $0xe88] sm:$0xff]  ;;  %v426_v2 = vld [vmem:[%s4649_s1 + $0xc70] sm:$0xff] }
  0xbb   :  { %1373 = vmatpush2.msra.mxu1 %v392_v3  ;;  %1305 = vmatprep.subr.mxu0 %v325_v4  ;;  %v492_v3 = vld [vmem:[%s4649_s1 + $0xe80] sm:$0xff]  ;;  %v425_v4 = vld [vmem:[%s4649_s1 + $0xc68] sm:$0xff] }
  0xbc   :  { %1374 = vmatprep.subr.mxu1 %v391_v5  ;;  %1306 = vmatpush2.msra.mxu0 %v324_v6  ;;  %v491_v5 = vld [vmem:[%s4649_s1 + $0xe78] sm:$0xff]  ;;  %v424_v6 = vld [vmem:[%s4649_s1 + $0xc60] sm:$0xff] }
  0xbd   :  { %1375 = vmatpush2.msra.mxu1 %v390_v8  ;;  %1307 = vmatprep.subr.mxu0 %v323_v9  ;;  %v423_v8 = vld [vmem:[%s4649_s1 + $0xc58] sm:$0xff]  ;;  %v489_v9 = vld [vmem:[%s4649_s1 + $0xe68] sm:$0xff] }
  0xbe   :  { %1376 = vmatprep.subr.mxu1 %v389_v10  ;;  %1308 = vmatpush2.msra.mxu0 %v322_v11  ;;  %v422_v10 = vld [vmem:[%s4649_s1 + $0xc50] sm:$0xff]  ;;  %v488_v11 = vld [vmem:[%s4649_s1 + $0xe60] sm:$0xff] }
  0xbf   :  { %1377 = vmatpush2.msra.mxu1 %v388_v12  ;;  %1309 = vmatprep.subr.mxu0 %v321_v13  ;;  %v421_v12 = vld [vmem:[%s4649_s1 + $0xc48] sm:$0xff]  ;;  %v487_v13 = vld [vmem:[%s4649_s1 + $0xe58] sm:$0xff] }
  0xc0   :  { %1378 = vmatprep.subr.mxu1 %v387_v15  ;;  %1310 = vmatpush2.msra.mxu0 %v320_v16  ;;  %v486_v15 = vld [vmem:[%s4649_s1 + $0xe50] sm:$0xff]  ;;  %v419_v16 = vld [vmem:[%s4649_s1 + $0xc38] sm:$0xff] }
  0xc1   :  { %1379 = vmatpush2.msra.mxu1 %v386_v18  ;;  %1311 = vmatprep.subr.mxu0 %v319_v19  ;;  %v418_v18 = vld [vmem:[%s4649_s1 + $0xc30] sm:$0xff]  ;;  %v484_v19 = vld [vmem:[%s4649_s1 + $0xe40] sm:$0xff] }
  0xc2   :  { %1380 = vmatprep.subr.mxu1 %v385_v20  ;;  %1312 = vmatpush2.msra.mxu0 %v318_v21  ;;  %v417_v20 = vld [vmem:[%s4649_s1 + $0xc28] sm:$0xff]  ;;  %v483_v21 = vld [vmem:[%s4649_s1 + $0xe38] sm:$0xff] }
  0xc3   :  { %1381 = vmatpush2.msra.mxu1 %v384_v22  ;;  %1313 = vmatprep.subr.mxu0 %v317_v23  ;;  %v416_v22 = vld [vmem:[%s4649_s1 + $0xc20] sm:$0xff]  ;;  %v482_v23 = vld [vmem:[%s4649_s1 + $0xe30] sm:$0xff] }
  0xc4   :  { %1382 = vmatprep.subr.mxu1 %v383_v25  ;;  %1314 = vmatpush2.msra.mxu0 %v316_v26  ;;  %v481_v25 = vld [vmem:[%s4649_s1 + $0xe28] sm:$0xff]  ;;  %v414_v26 = vld [vmem:[%s4649_s1 + $0xc10] sm:$0xff] }
  0xc5   :  { %1315 = vmatprep.mubr.f32.mxu0 %v880_v27  ;;  %1383 = vmatpush2.msra.mxu1 %v382_v28  ;;  %v480_v27 = vld [vmem:[%s4649_s1 + $0xe20] sm:$0xff]  ;;  %v413_v28 = vld [vmem:[%s4649_s1 + $0xc08] sm:$0xff] }
  0xc6   :  { %1316 = vmatmul.mubr.f32.vlgmr.msra.gmra.mxu0 %v872_v17  ;;  %1384 = vmatprep.subr.mxu1 %v381_v29  ;;  %v485_v17 = vld [vmem:[%s4649_s1 + $0xe48] sm:$0xff]  ;;  %v479_v29 = vld [vmem:[%s4649_s1 + $0xe18] sm:$0xff] }
  0xc7   :  { %1393 = vmatprep.subr.mxu0 %v443_v30  ;;  %1385 = vmatpush2.msra.mxu1 %v380_v31  ;;  %v412_v30 = vld [vmem:[%s4649_s1 + $0xc00] sm:$0xff]  ;;  %v478_v31 = vld [vmem:[%s4649_s1 + $0xe10] sm:$0xff] }
  0xc8   :  { %1386 = vmatprep.mubr.f32.mxu1 %v881_v32  ;;  %1394 = vmatpush1.msra.mxu0 %v442_v33  ;;  %v475_v32 = vld [vmem:[%s4649_s1 + $0xdf8] sm:$0xff]  ;;  %v477_v33 = vld [vmem:[%s4649_s1 + $0xe08] sm:$0xff] }
  0xc9   :  { %1387 = vmatmul.mubr.f32.vlgmr.msra.gmra.mxu1 %v879_v24  ;;  %1395 = vmatprep.subr.mxu0 %v441_v34  ;;  %v415_v24 = vld [vmem:[%s4649_s1 + $0xc18] sm:$0xff]  ;;  %v474_v34 = vld [vmem:[%s4649_s1 + $0xdf0] sm:$0xff] }
  0xca   :  { %1464 = vmatprep.subr.mxu1 %v507_v35  ;;  %1396 = vmatpush1.msra.mxu0 %v440_v36  ;;  %v476_v35 = vld [vmem:[%s4649_s1 + $0xe00] sm:$0xff]  ;;  %v473_v36 = vld [vmem:[%s4649_s1 + $0xde8] sm:$0xff] }
  0xcb   :  { %1465 = vmatpush1.msra.mxu1 %v506_v37  ;;  %1397 = vmatprep.subr.mxu0 %v439_v39  ;;  %v539_v37 = vld [vmem:[%s4649_s1 + $0xff8] sm:$0xff]  ;;  %v472_v39 = vld [vmem:[%s4649_s1 + $0xde0] sm:$0xff] }
  0xcc   :  { %1466 = vmatprep.subr.mxu1 %v505_v40  ;;  %1398 = vmatpush1.msra.mxu0 %v438_v41  ;;  %v538_v40 = vld [vmem:[%s4649_s1 + $0xff0] sm:$0xff]  ;;  %v471_v41 = vld [vmem:[%s4649_s1 + $0xdd8] sm:$0xff] }
  0xcd   :  { %1467 = vmatpush1.msra.mxu1 %v504_v42  ;;  %1399 = vmatprep.subr.mxu0 %v437_v43  ;;  %v537_v42 = vld [vmem:[%s4649_s1 + $0xfe8] sm:$0xff]  ;;  %v470_v43 = vld [vmem:[%s4649_s1 + $0xdd0] sm:$0xff] }
  0xce   :  { %1468 = vmatprep.subr.mxu1 %v503_v44  ;;  %1400 = vmatpush1.msra.mxu0 %v436_v45  ;;  %v536_v44 = vld [vmem:[%s4649_s1 + $0xfe0] sm:$0xff]  ;;  %v469_v45 = vld [vmem:[%s4649_s1 + $0xdc8] sm:$0xff] }
  0xcf   :  { %1469 = vmatpush1.msra.mxu1 %v502_v46  ;;  %1401 = vmatprep.subr.mxu0 %v435_v47  ;;  %v535_v46 = vld [vmem:[%s4649_s1 + $0xfd8] sm:$0xff]  ;;  %v468_v47 = vld [vmem:[%s4649_s1 + $0xdc0] sm:$0xff] }
  0xd0   :  { %1470 = vmatprep.subr.mxu1 %v501_v49  ;;  %1402 = vmatpush1.msra.mxu0 %v434_v50  ;;  %v534_v49 = vld [vmem:[%s4649_s1 + $0xfd0] sm:$0xff]  ;;  %v467_v50 = vld [vmem:[%s4649_s1 + $0xdb8] sm:$0xff] }
  0xd1   :  { %1471 = vmatpush1.msra.mxu1 %v500_v51  ;;  %1403 = vmatprep.subr.mxu0 %v433_v52  ;;  %v533_v51 = vld [vmem:[%s4649_s1 + $0xfc8] sm:$0xff]  ;;  %v466_v52 = vld [vmem:[%s4649_s1 + $0xdb0] sm:$0xff] }
  0xd2   :  { %1472 = vmatprep.subr.mxu1 %v499_v53  ;;  %1404 = vmatpush1.msra.mxu0 %v432_v54  ;;  %v532_v53 = vld [vmem:[%s4649_s1 + $0xfc0] sm:$0xff]  ;;  %v465_v54 = vld [vmem:[%s4649_s1 + $0xda8] sm:$0xff] }
  0xd3   :  { %1473 = vmatpush1.msra.mxu1 %v498_v55  ;;  %1405 = vmatprep.subr.mxu0 %v431_v56  ;;  %v531_v55 = vld [vmem:[%s4649_s1 + $0xfb8] sm:$0xff]  ;;  %v464_v56 = vld [vmem:[%s4649_s1 + $0xda0] sm:$0xff] }
  0xd4   :  { %1474 = vmatprep.subr.mxu1 %v497_v57  ;;  %1406 = vmatpush1.msra.mxu0 %v430_v58  ;;  %v530_v57 = vld [vmem:[%s4649_s1 + $0xfb0] sm:$0xff]  ;;  %v463_v58 = vld [vmem:[%s4649_s1 + $0xd98] sm:$0xff] }
  0xd5   :  { %1475 = vmatpush1.msra.mxu1 %v496_v59  ;;  %1407 = vmatprep.subr.mxu0 %v429_v60  ;;  %v529_v59 = vld [vmem:[%s4649_s1 + $0xfa8] sm:$0xff]  ;;  %v462_v60 = vld [vmem:[%s4649_s1 + $0xd90] sm:$0xff] }
  0xd6   :  { %1476 = vmatprep.subr.mxu1 %v495_v61  ;;  %1408 = vmatpush1.msra.mxu0 %v428_v62 }
  0xd7   :  { %1477 = vmatpush1.msra.mxu1 %v494_v63  ;;  %1409 = vmatprep.subr.mxu0 %v427_v0 }
  0xd8   :  { %1478 = vmatprep.subr.mxu1 %v493_v1  ;;  %1410 = vmatpush1.msra.mxu0 %v426_v2 }
  0xd9   :  { %1479 = vmatpush1.msra.mxu1 %v492_v3  ;;  %1411 = vmatprep.subr.mxu0 %v425_v4 }
  0xda   :  { %1480 = vmatprep.subr.mxu1 %v491_v5  ;;  %1412 = vmatpush1.msra.mxu0 %v424_v6 }
  0xdb   :  { %1481 = vmatpush1.msra.mxu1 %v490_v7  ;;  %1413 = vmatprep.subr.mxu0 %v423_v8 }
  0xdc   :  { %1482 = vmatprep.subr.mxu1 %v489_v9  ;;  %1414 = vmatpush1.msra.mxu0 %v422_v10 }
  0xdd   :  { %1483 = vmatpush1.msra.mxu1 %v488_v11  ;;  %1415 = vmatprep.subr.mxu0 %v421_v12 }
  0xde   :  { %1484 = vmatprep.subr.mxu1 %v487_v13  ;;  %1416 = vmatpush1.msra.mxu0 %v420_v14 }
  0xdf   :  { %1485 = vmatpush1.msra.mxu1 %v486_v15  ;;  %1417 = vmatprep.subr.mxu0 %v419_v16 }
  0xe0   :  { %1486 = vmatprep.subr.mxu1 %v485_v17  ;;  %1418 = vmatpush1.msra.mxu0 %v418_v18 }
  0xe1   :  { %1487 = vmatpush1.msra.mxu1 %v484_v19  ;;  %1419 = vmatprep.subr.mxu0 %v417_v20 }
  0xe2   :  { %1488 = vmatprep.subr.mxu1 %v483_v21  ;;  %1420 = vmatpush1.msra.mxu0 %v416_v22 }
  0xe3   :  { %1489 = vmatpush1.msra.mxu1 %v482_v23  ;;  %1421 = vmatprep.subr.mxu0 %v415_v24 }
  0xe4   :  { %1490 = vmatprep.subr.mxu1 %v481_v25  ;;  %1422 = vmatpush1.msra.mxu0 %v414_v26 }
  0xe5   :  { %1491 = vmatpush1.msra.mxu1 %v480_v27  ;;  %1423 = vmatprep.subr.mxu0 %v413_v28 }
  0xe6   :  { %1492 = vmatprep.subr.mxu1 %v479_v29  ;;  %1424 = vmatpush1.msra.mxu0 %v412_v30 }
  0xe7   :  { %1493 = vmatpush1.msra.mxu1 %v478_v31  ;;  %1425 = vmatprep.subr.mxu0 %v475_v32 }
  0xe8   :  { %1494 = vmatprep.subr.mxu1 %v477_v33  ;;  %1426 = vmatpush2.msra.mxu0 %v474_v34 }
  0xe9   :  { %1495 = vmatpush1.msra.mxu1 %v476_v35  ;;  %1427 = vmatprep.subr.mxu0 %v473_v36 }
  0xea   :  { %1496 = vmatprep.subr.mxu1 %v539_v37  ;;  %1428 = vmatpush2.msra.mxu0 %v472_v39 }
  0xeb   :  { %1497 = vmatpush2.msra.mxu1 %v538_v40  ;;  %1429 = vmatprep.subr.mxu0 %v471_v41 }
  0xec   :  { %1498 = vmatprep.subr.mxu1 %v537_v42  ;;  %1430 = vmatpush2.msra.mxu0 %v470_v43 }
  0xed   :  { %1499 = vmatpush2.msra.mxu1 %v536_v44  ;;  %1431 = vmatprep.subr.mxu0 %v469_v45 }
  0xee   :  { %1500 = vmatprep.subr.mxu1 %v535_v46  ;;  %1432 = vmatpush2.msra.mxu0 %v468_v47 }
  0xef   :  { %1501 = vmatpush2.msra.mxu1 %v534_v49  ;;  %1433 = vmatprep.subr.mxu0 %v467_v50 }
  0xf0   :  { %1502 = vmatprep.subr.mxu1 %v533_v51  ;;  %1434 = vmatpush2.msra.mxu0 %v466_v52 }
  0xf1   :  { %1503 = vmatpush2.msra.mxu1 %v532_v53  ;;  %1435 = vmatprep.subr.mxu0 %v465_v54 }
  0xf2   :  { %10 = vsyncpa [#allocation3], 0  ;;  %1504 = vmatprep.subr.mxu1 %v531_v55  ;;  %1436 = vmatpush2.msra.mxu0 %v464_v56  ;;  %v528_v61 = vld [vmem:[%s4649_s1 + $0xfa0] sm:$0xff]  ;;  %v461_v62 = vld [vmem:[%s4649_s1 + $0xd88] sm:$0xff]  ;;  %vm964_vm0 = vcmask 523264   ;;  %vm2005_vm3 = vcmask 41984  }
  0xf3   :  { %1505 = vmatpush2.msra.mxu1 %v530_v57  ;;  %1437 = vmatprep.subr.mxu0 %v463_v58  ;;  %v527_v63 = vld [vmem:[%s4649_s1 + $0xf98] sm:$0xff]  ;;  %v460_v0 = vld [vmem:[%s4649_s1 + $0xd80] sm:$0xff]  ;;  %v526_v1 = vld [vmem:[%s4649_s1 + $0xf90] sm:$0xff] }
  0xf4   :  { %1506 = vmatprep.subr.mxu1 %v529_v59  ;;  %1438 = vmatpush2.msra.mxu0 %v462_v60  ;;  %v459_v2 = vld [vmem:[%s4649_s1 + $0xd78] sm:$0xff]  ;;  %v525_v3 = vld [vmem:[%s4649_s1 + $0xf88] sm:$0xff]  ;;  %v458_v4 = vld [vmem:[%s4649_s1 + $0xd70] sm:$0xff] }
  0xf5   :  { %1507 = vmatpush2.msra.mxu1 %v528_v61  ;;  %1439 = vmatprep.subr.mxu0 %v461_v62  ;;  %v524_v5 = vld [vmem:[%s4649_s1 + $0xf80] sm:$0xff]  ;;  %v457_v6 = vld [vmem:[%s4649_s1 + $0xd68] sm:$0xff]  ;;  %v523_v7 = vld [vmem:[%s4649_s1 + $0xf78] sm:$0xff] }
  0xf6   :  { %1508 = vmatprep.subr.mxu1 %v527_v63  ;;  %1440 = vmatpush2.msra.mxu0 %v460_v0  ;;  %v456_v8 = vld [vmem:[%s4649_s1 + $0xd60] sm:$0xff]  ;;  %v522_v9 = vld [vmem:[%s4649_s1 + $0xf70] sm:$0xff]  ;;  %v455_v10 = vld [vmem:[%s4649_s1 + $0xd58] sm:$0xff] }
  0xf7   :  { %1509 = vmatpush2.msra.mxu1 %v526_v1  ;;  %1441 = vmatprep.subr.mxu0 %v459_v2  ;;  %v521_v11 = vld [vmem:[%s4649_s1 + $0xf68] sm:$0xff]  ;;  %v454_v12 = vld [vmem:[%s4649_s1 + $0xd50] sm:$0xff]  ;;  %v520_v13 = vld [vmem:[%s4649_s1 + $0xf60] sm:$0xff] }
  0xf8   :  { %1510 = vmatprep.subr.mxu1 %v525_v3  ;;  %1442 = vmatpush2.msra.mxu0 %v458_v4  ;;  %v453_v14 = vld [vmem:[%s4649_s1 + $0xd48] sm:$0xff]  ;;  %v519_v15 = vld [vmem:[%s4649_s1 + $0xf58] sm:$0xff]  ;;  %v452_v16 = vld [vmem:[%s4649_s1 + $0xd40] sm:$0xff] }
  0xf9   :  { %1511 = vmatpush2.msra.mxu1 %v524_v5  ;;  %1443 = vmatprep.subr.mxu0 %v457_v6  ;;  %v24_v17 = vld [vmem:[%s4648_s0 + $0x18] sm:$0xff]  ;;  %v518_v18 = vld [vmem:[%s4649_s1 + $0xf50] sm:$0xff]  ;;  %v517_v20 = vld [vmem:[%s4649_s1 + $0xf48] sm:$0xff] }
  0xfa   :  { %1512 = vmatprep.subr.mxu1 %v523_v7  ;;  %1444 = vmatpush2.msra.mxu0 %v456_v8  ;;  %v451_v19 = vld [vmem:[%s4649_s1 + $0xd38] sm:$0xff]  ;;  %v450_v21 = vld [vmem:[%s4649_s1 + $0xd30] sm:$0xff]  ;;  %v516_v22 = vld [vmem:[%s4649_s1 + $0xf40] sm:$0xff]  ;;  %v882_v24 = vcombine.high %v24_v17, %v24_v17  ;;  %v889_v27 = vrot.slane %v24_v17, %v2473_v48 }
  0xfb   :  { %1513 = vmatpush2.msra.mxu1 %v522_v9  ;;  %1445 = vmatprep.subr.mxu0 %v455_v10  ;;  %v449_v23 = vld [vmem:[%s4649_s1 + $0xd28] sm:$0xff]  ;;  %v515_v25 = vld [vmem:[%s4649_s1 + $0xf38] sm:$0xff]  ;;  %v448_v26 = vld [vmem:[%s4649_s1 + $0xd20] sm:$0xff] }
  0xfc   :  { %1514 = vmatprep.subr.mxu1 %v521_v11  ;;  %1446 = vmatpush2.msra.mxu0 %v454_v12  ;;  %v514_v28 = vld [vmem:[%s4649_s1 + $0xf30] sm:$0xff]  ;;  %v447_v29 = vld [vmem:[%s4649_s1 + $0xd18] sm:$0xff]  ;;  %v513_v30 = vld [vmem:[%s4649_s1 + $0xf28] sm:$0xff]  ;;  %v896_v34 = vrot.slane %v882_v24, %v2473_v48  ;;  %v897_v37 = vcombine.high %v889_v27, %v889_v27 }
  0xfd   :  { %1515 = vmatpush2.msra.mxu1 %v520_v13  ;;  %1447 = vmatprep.subr.mxu0 %v453_v14  ;;  %v446_v31 = vld [vmem:[%s4649_s1 + $0xd10] sm:$0xff]  ;;  %v512_v32 = vld [vmem:[%s4649_s1 + $0xf20] sm:$0xff]  ;;  %v445_v33 = vld [vmem:[%s4649_s1 + $0xd08] sm:$0xff] }
  0xfe   :  { %1516 = vmatprep.subr.mxu1 %v519_v15  ;;  %1448 = vmatpush2.msra.mxu0 %v452_v16  ;;  %v511_v35 = vld [vmem:[%s4649_s1 + $0xf18] sm:$0xff]  ;;  %v444_v36 = vld [vmem:[%s4649_s1 + $0xd00] sm:$0xff]  ;;  %v510_v39 = vld [vmem:[%s4649_s1 + $0xf10] sm:$0xff]  ;;  %v898_v43 = vcombine.high %v896_v34, %v896_v34 }
  0xff   :  { %1517 = vmatpush2.msra.mxu1 %v518_v18  ;;  %1449 = vmatprep.subr.mxu0 %v451_v19  ;;  %v509_v40 = vld [vmem:[%s4649_s1 + $0xf08] sm:$0xff]  ;;  %v571_v41 = vld [vmem:[%s4649_s1 + $0x10f8] sm:$0xff]  ;;  %v508_v42 = vld [vmem:[%s4649_s1 + $0xf00] sm:$0xff] }
 0x100   :  { %1518 = vmatprep.subr.mxu1 %v517_v20  ;;  %1450 = vmatpush2.msra.mxu0 %v450_v21  ;;  %v570_v44 = vld [vmem:[%s4649_s1 + $0x10f0] sm:$0xff]  ;;  %v569_v45 = vld [vmem:[%s4649_s1 + $0x10e8] sm:$0xff]  ;;  %v635_v46 = vld [vmem:[%s4649_s1 + $0x12f8] sm:$0xff] }
 0x101   :  { %1519 = vmatpush2.msra.mxu1 %v516_v22  ;;  %1451 = vmatprep.subr.mxu0 %v449_v23  ;;  %v568_v47 = vld [vmem:[%s4649_s1 + $0x10e0] sm:$0xff]  ;;  %v634_v49 = vld [vmem:[%s4649_s1 + $0x12f0] sm:$0xff]  ;;  %v567_v50 = vld [vmem:[%s4649_s1 + $0x10d8] sm:$0xff] }
 0x102   :  { %1520 = vmatprep.subr.mxu1 %v515_v25  ;;  %1452 = vmatpush2.msra.mxu0 %v448_v26  ;;  %v633_v51 = vld [vmem:[%s4649_s1 + $0x12e8] sm:$0xff]  ;;  %v566_v52 = vld [vmem:[%s4649_s1 + $0x10d0] sm:$0xff]  ;;  %v632_v53 = vld [vmem:[%s4649_s1 + $0x12e0] sm:$0xff] }
 0x103   :  { %1521 = vmatpush2.msra.mxu1 %v514_v28  ;;  %1453 = vmatprep.subr.mxu0 %v447_v29  ;;  %v565_v54 = vld [vmem:[%s4649_s1 + $0x10c8] sm:$0xff]  ;;  %v631_v55 = vld [vmem:[%s4649_s1 + $0x12d8] sm:$0xff]  ;;  %v564_v56 = vld [vmem:[%s4649_s1 + $0x10c0] sm:$0xff] }
 0x104   :  { %1522 = vmatprep.subr.mxu1 %v513_v30  ;;  %1454 = vmatpush2.msra.mxu0 %v446_v31  ;;  %v630_v57 = vld [vmem:[%s4649_s1 + $0x12d0] sm:$0xff]  ;;  %v563_v58 = vld [vmem:[%s4649_s1 + $0x10b8] sm:$0xff]  ;;  %v629_v59 = vld [vmem:[%s4649_s1 + $0x12c8] sm:$0xff] }
 0x105   :  { %1523 = vmatpush2.msra.mxu1 %v512_v32  ;;  %1455 = vmatprep.subr.mxu0 %v445_v33  ;;  %v562_v60 = vld [vmem:[%s4649_s1 + $0x10b0] sm:$0xff]  ;;  %v628_v61 = vld [vmem:[%s4649_s1 + $0x12c0] sm:$0xff]  ;;  %v561_v62 = vld [vmem:[%s4649_s1 + $0x10a8] sm:$0xff] }
 0x106   :  { %1524 = vmatprep.subr.mxu1 %v511_v35  ;;  %1456 = vmatpush2.msra.mxu0 %v444_v36  ;;  %v627_v63 = vld [vmem:[%s4649_s1 + $0x12b8] sm:$0xff]  ;;  %v560_v0 = vld [vmem:[%s4649_s1 + $0x10a0] sm:$0xff]  ;;  %v626_v1 = vld [vmem:[%s4649_s1 + $0x12b0] sm:$0xff] }
 0x107   :  { %1457 = vmatprep.mubr.f32.mxu0 %v897_v37  ;;  %1525 = vmatpush2.msra.mxu1 %v510_v39  ;;  %v559_v2 = vld [vmem:[%s4649_s1 + $0x1098] sm:$0xff]  ;;  %v625_v3 = vld [vmem:[%s4649_s1 + $0x12a8] sm:$0xff]  ;;  %v558_v4 = vld [vmem:[%s4649_s1 + $0x1090] sm:$0xff] }
 0x108   :  { %1458 = vmatmul.mubr.f32.vlgmr.msra.gmra.mxu0 %v889_v27  ;;  %1526 = vmatprep.subr.mxu1 %v509_v40  ;;  %v624_v5 = vld [vmem:[%s4649_s1 + $0x12a0] sm:$0xff]  ;;  %v557_v6 = vld [vmem:[%s4649_s1 + $0x1088] sm:$0xff]  ;;  %v623_v7 = vld [vmem:[%s4649_s1 + $0x1298] sm:$0xff] }
 0x109   :  { %1535 = vmatprep.subr.mxu0 %v571_v41  ;;  %1527 = vmatpush2.msra.mxu1 %v508_v42  ;;  %v556_v8 = vld [vmem:[%s4649_s1 + $0x1080] sm:$0xff]  ;;  %v622_v9 = vld [vmem:[%s4649_s1 + $0x1290] sm:$0xff]  ;;  %v555_v10 = vld [vmem:[%s4649_s1 + $0x1078] sm:$0xff] }
 0x10a   :  { %1528 = vmatprep.mubr.f32.mxu1 %v898_v43  ;;  %1536 = vmatpush1.msra.mxu0 %v570_v44  ;;  %v621_v11 = vld [vmem:[%s4649_s1 + $0x1288] sm:$0xff]  ;;  %v554_v12 = vld [vmem:[%s4649_s1 + $0x1070] sm:$0xff]  ;;  %v620_v13 = vld [vmem:[%s4649_s1 + $0x1280] sm:$0xff] }
 0x10b   :  { %1529 = vmatmul.mubr.f32.vlgmr.msra.gmra.mxu1 %v896_v34  ;;  %1537 = vmatprep.subr.mxu0 %v569_v45  ;;  %v553_v14 = vld [vmem:[%s4649_s1 + $0x1068] sm:$0xff]  ;;  %v619_v15 = vld [vmem:[%s4649_s1 + $0x1278] sm:$0xff]  ;;  %v552_v16 = vld [vmem:[%s4649_s1 + $0x1060] sm:$0xff] }
 0x10c   :  { %1606 = vmatprep.subr.mxu1 %v635_v46  ;;  %1538 = vmatpush1.msra.mxu0 %v568_v47  ;;  %v618_v17 = vld [vmem:[%s4649_s1 + $0x1270] sm:$0xff]  ;;  %v551_v18 = vld [vmem:[%s4649_s1 + $0x1058] sm:$0xff]  ;;  %v617_v19 = vld [vmem:[%s4649_s1 + $0x1268] sm:$0xff] }
 0x10d   :  { %1607 = vmatpush1.msra.mxu1 %v634_v49  ;;  %1539 = vmatprep.subr.mxu0 %v567_v50  ;;  %v550_v20 = vld [vmem:[%s4649_s1 + $0x1050] sm:$0xff]  ;;  %v616_v21 = vld [vmem:[%s4649_s1 + $0x1260] sm:$0xff]  ;;  %v549_v22 = vld [vmem:[%s4649_s1 + $0x1048] sm:$0xff] }
 0x10e   :  { %1608 = vmatprep.subr.mxu1 %v633_v51  ;;  %1540 = vmatpush1.msra.mxu0 %v566_v52  ;;  %v615_v23 = vld [vmem:[%s4649_s1 + $0x1258] sm:$0xff]  ;;  %v548_v24 = vld [vmem:[%s4649_s1 + $0x1040] sm:$0xff]  ;;  %v614_v25 = vld [vmem:[%s4649_s1 + $0x1250] sm:$0xff] }
 0x10f   :  { %1609 = vmatpush1.msra.mxu1 %v632_v53  ;;  %1541 = vmatprep.subr.mxu0 %v565_v54  ;;  %v547_v26 = vld [vmem:[%s4649_s1 + $0x1038] sm:$0xff]  ;;  %v613_v27 = vld [vmem:[%s4649_s1 + $0x1248] sm:$0xff]  ;;  %v546_v28 = vld [vmem:[%s4649_s1 + $0x1030] sm:$0xff] }
 0x110   :  { %1610 = vmatprep.subr.mxu1 %v631_v55  ;;  %1542 = vmatpush1.msra.mxu0 %v564_v56  ;;  %v612_v29 = vld [vmem:[%s4649_s1 + $0x1240] sm:$0xff]  ;;  %v545_v30 = vld [vmem:[%s4649_s1 + $0x1028] sm:$0xff]  ;;  %v611_v31 = vld [vmem:[%s4649_s1 + $0x1238] sm:$0xff] }
 0x111   :  { %1611 = vmatpush1.msra.mxu1 %v630_v57  ;;  %1543 = vmatprep.subr.mxu0 %v563_v58  ;;  %v544_v32 = vld [vmem:[%s4649_s1 + $0x1020] sm:$0xff]  ;;  %v610_v33 = vld [vmem:[%s4649_s1 + $0x1230] sm:$0xff]  ;;  %v543_v34 = vld [vmem:[%s4649_s1 + $0x1018] sm:$0xff] }
 0x112   :  { %1612 = vmatprep.subr.mxu1 %v629_v59  ;;  %1544 = vmatpush1.msra.mxu0 %v562_v60  ;;  %v609_v35 = vld [vmem:[%s4649_s1 + $0x1228] sm:$0xff]  ;;  %v542_v36 = vld [vmem:[%s4649_s1 + $0x1010] sm:$0xff]  ;;  %v608_v37 = vld [vmem:[%s4649_s1 + $0x1220] sm:$0xff] }
 0x113   :  { %1613 = vmatpush1.msra.mxu1 %v628_v61  ;;  %1545 = vmatprep.subr.mxu0 %v561_v62  ;;  %v541_v39 = vld [vmem:[%s4649_s1 + $0x1008] sm:$0xff]  ;;  %v607_v40 = vld [vmem:[%s4649_s1 + $0x1218] sm:$0xff]  ;;  %v540_v41 = vld [vmem:[%s4649_s1 + $0x1000] sm:$0xff] }
 0x114   :  { %1614 = vmatprep.subr.mxu1 %v627_v63  ;;  %1546 = vmatpush1.msra.mxu0 %v560_v0  ;;  %v606_v42 = vld [vmem:[%s4649_s1 + $0x1210] sm:$0xff]  ;;  %v603_v43 = vld [vmem:[%s4649_s1 + $0x11f8] sm:$0xff]  ;;  %v605_v44 = vld [vmem:[%s4649_s1 + $0x1208] sm:$0xff] }
 0x115   :  { %1615 = vmatpush1.msra.mxu1 %v626_v1  ;;  %1547 = vmatprep.subr.mxu0 %v559_v2  ;;  %v602_v45 = vld [vmem:[%s4649_s1 + $0x11f0] sm:$0xff]  ;;  %v604_v46 = vld [vmem:[%s4649_s1 + $0x1200] sm:$0xff]  ;;  %v601_v47 = vld [vmem:[%s4649_s1 + $0x11e8] sm:$0xff] }
 0x116   :  { %1616 = vmatprep.subr.mxu1 %v625_v3  ;;  %1548 = vmatpush1.msra.mxu0 %v558_v4  ;;  %v667_v49 = vld [vmem:[%s4649_s1 + $0x13f8] sm:$0xff]  ;;  %v600_v50 = vld [vmem:[%s4649_s1 + $0x11e0] sm:$0xff]  ;;  %v666_v51 = vld [vmem:[%s4649_s1 + $0x13f0] sm:$0xff] }
 0x117   :  { %1617 = vmatpush1.msra.mxu1 %v624_v5  ;;  %1549 = vmatprep.subr.mxu0 %v557_v6  ;;  %v599_v52 = vld [vmem:[%s4649_s1 + $0x11d8] sm:$0xff]  ;;  %v665_v53 = vld [vmem:[%s4649_s1 + $0x13e8] sm:$0xff]  ;;  %v598_v54 = vld [vmem:[%s4649_s1 + $0x11d0] sm:$0xff] }
 0x118   :  { %1618 = vmatprep.subr.mxu1 %v623_v7  ;;  %1550 = vmatpush1.msra.mxu0 %v556_v8  ;;  %v664_v55 = vld [vmem:[%s4649_s1 + $0x13e0] sm:$0xff]  ;;  %v597_v56 = vld [vmem:[%s4649_s1 + $0x11c8] sm:$0xff]  ;;  %v663_v57 = vld [vmem:[%s4649_s1 + $0x13d8] sm:$0xff] }
 0x119   :  { %1619 = vmatpush1.msra.mxu1 %v622_v9  ;;  %1551 = vmatprep.subr.mxu0 %v555_v10  ;;  %v596_v58 = vld [vmem:[%s4649_s1 + $0x11c0] sm:$0xff]  ;;  %v662_v59 = vld [vmem:[%s4649_s1 + $0x13d0] sm:$0xff]  ;;  %v595_v60 = vld [vmem:[%s4649_s1 + $0x11b8] sm:$0xff] }
 0x11a   :  { %1620 = vmatprep.subr.mxu1 %v621_v11  ;;  %1552 = vmatpush1.msra.mxu0 %v554_v12  ;;  %v661_v61 = vld [vmem:[%s4649_s1 + $0x13c8] sm:$0xff]  ;;  %v594_v62 = vld [vmem:[%s4649_s1 + $0x11b0] sm:$0xff]  ;;  %v660_v63 = vld [vmem:[%s4649_s1 + $0x13c0] sm:$0xff] }
 0x11b   :  { %1621 = vmatpush1.msra.mxu1 %v620_v13  ;;  %1553 = vmatprep.subr.mxu0 %v553_v14  ;;  %v593_v0 = vld [vmem:[%s4649_s1 + $0x11a8] sm:$0xff]  ;;  %v659_v1 = vld [vmem:[%s4649_s1 + $0x13b8] sm:$0xff]  ;;  %v592_v2 = vld [vmem:[%s4649_s1 + $0x11a0] sm:$0xff] }
 0x11c   :  { %1622 = vmatprep.subr.mxu1 %v619_v15  ;;  %1554 = vmatpush1.msra.mxu0 %v552_v16  ;;  %v658_v3 = vld [vmem:[%s4649_s1 + $0x13b0] sm:$0xff]  ;;  %v591_v4 = vld [vmem:[%s4649_s1 + $0x1198] sm:$0xff]  ;;  %v657_v5 = vld [vmem:[%s4649_s1 + $0x13a8] sm:$0xff] }
 0x11d   :  { %1623 = vmatpush1.msra.mxu1 %v618_v17  ;;  %1555 = vmatprep.subr.mxu0 %v551_v18  ;;  %v590_v6 = vld [vmem:[%s4649_s1 + $0x1190] sm:$0xff]  ;;  %v656_v7 = vld [vmem:[%s4649_s1 + $0x13a0] sm:$0xff]  ;;  %v589_v8 = vld [vmem:[%s4649_s1 + $0x1188] sm:$0xff] }
 0x11e   :  { %1624 = vmatprep.subr.mxu1 %v617_v19  ;;  %1556 = vmatpush1.msra.mxu0 %v550_v20  ;;  %v655_v9 = vld [vmem:[%s4649_s1 + $0x1398] sm:$0xff]  ;;  %v588_v10 = vld [vmem:[%s4649_s1 + $0x1180] sm:$0xff]  ;;  %v654_v11 = vld [vmem:[%s4649_s1 + $0x1390] sm:$0xff] }
 0x11f   :  { %1625 = vmatpush1.msra.mxu1 %v616_v21  ;;  %1557 = vmatprep.subr.mxu0 %v549_v22  ;;  %v587_v12 = vld [vmem:[%s4649_s1 + $0x1178] sm:$0xff]  ;;  %v653_v13 = vld [vmem:[%s4649_s1 + $0x1388] sm:$0xff]  ;;  %v586_v14 = vld [vmem:[%s4649_s1 + $0x1170] sm:$0xff] }
 0x120   :  { %1626 = vmatprep.subr.mxu1 %v615_v23  ;;  %1558 = vmatpush1.msra.mxu0 %v548_v24  ;;  %v652_v15 = vld [vmem:[%s4649_s1 + $0x1380] sm:$0xff]  ;;  %v585_v16 = vld [vmem:[%s4649_s1 + $0x1168] sm:$0xff]  ;;  %v651_v17 = vld [vmem:[%s4649_s1 + $0x1378] sm:$0xff] }
 0x121   :  { %1627 = vmatpush1.msra.mxu1 %v614_v25  ;;  %1559 = vmatprep.subr.mxu0 %v547_v26  ;;  %v584_v18 = vld [vmem:[%s4649_s1 + $0x1160] sm:$0xff]  ;;  %v650_v19 = vld [vmem:[%s4649_s1 + $0x1370] sm:$0xff]  ;;  %v583_v20 = vld [vmem:[%s4649_s1 + $0x1158] sm:$0xff] }
 0x122   :  { %1628 = vmatprep.subr.mxu1 %v613_v27  ;;  %1560 = vmatpush1.msra.mxu0 %v546_v28  ;;  %v649_v21 = vld [vmem:[%s4649_s1 + $0x1368] sm:$0xff]  ;;  %v582_v22 = vld [vmem:[%s4649_s1 + $0x1150] sm:$0xff]  ;;  %v648_v23 = vld [vmem:[%s4649_s1 + $0x1360] sm:$0xff] }
 0x123   :  { %1629 = vmatpush1.msra.mxu1 %v612_v29  ;;  %1561 = vmatprep.subr.mxu0 %v545_v30  ;;  %v581_v24 = vld [vmem:[%s4649_s1 + $0x1148] sm:$0xff]  ;;  %v647_v25 = vld [vmem:[%s4649_s1 + $0x1358] sm:$0xff]  ;;  %v580_v26 = vld [vmem:[%s4649_s1 + $0x1140] sm:$0xff] }
 0x124   :  { %1630 = vmatprep.subr.mxu1 %v611_v31  ;;  %1562 = vmatpush1.msra.mxu0 %v544_v32  ;;  %v25_v27 = vld [vmem:[%s4648_s0 + $0x20] sm:$0xff]  ;;  %v646_v28 = vld [vmem:[%s4649_s1 + $0x1350] sm:$0xff]  ;;  %v579_v29 = vld [vmem:[%s4649_s1 + $0x1138] sm:$0xff] }
 0x125   :  { %1631 = vmatpush1.msra.mxu1 %v610_v33  ;;  %1563 = vmatprep.subr.mxu0 %v543_v34  ;;  %v645_v30 = vld [vmem:[%s4649_s1 + $0x1348] sm:$0xff]  ;;  %v578_v31 = vld [vmem:[%s4649_s1 + $0x1130] sm:$0xff]  ;;  %v644_v32 = vld [vmem:[%s4649_s1 + $0x1340] sm:$0xff]  ;;  %v899_v34 = vcombine.high %v25_v27, %v25_v27 }
 0x126   :  { %1632 = vmatprep.subr.mxu1 %v609_v35  ;;  %1564 = vmatpush1.msra.mxu0 %v542_v36  ;;  %v577_v33 = vld [vmem:[%s4649_s1 + $0x1128] sm:$0xff]  ;;  %v643_v35 = vld [vmem:[%s4649_s1 + $0x1338] sm:$0xff]  ;;  %v576_v36 = vld [vmem:[%s4649_s1 + $0x1120] sm:$0xff] }
 0x127   :  { %1633 = vmatpush1.msra.mxu1 %v608_v37  ;;  %1565 = vmatprep.subr.mxu0 %v541_v39  ;;  %v906_v37 = vrot.slane %v25_v27, %v2473_v48  ;;  %v642_v39 = vld [vmem:[%s4649_s1 + $0x1330] sm:$0xff] }
 0x128   :  { %1634 = vmatprep.subr.mxu1 %v607_v40  ;;  %1566 = vmatpush1.msra.mxu0 %v540_v41  ;;  %v575_v40 = vld [vmem:[%s4649_s1 + $0x1118] sm:$0xff]  ;;  %v641_v41 = vld [vmem:[%s4649_s1 + $0x1328] sm:$0xff]  ;;  %v746_v27 = vld [vmem:[%s4649_s1 + $0x1670] sm:$0xff] }
 0x129   :  { %1635 = vmatpush1.msra.mxu1 %v606_v42  ;;  %1567 = vmatprep.subr.mxu0 %v603_v43  ;;  %v574_v42 = vld [vmem:[%s4649_s1 + $0x1110] sm:$0xff]  ;;  %v640_v43 = vld [vmem:[%s4649_s1 + $0x1320] sm:$0xff] }
 0x12a   :  { %1636 = vmatprep.subr.mxu1 %v605_v44  ;;  %1568 = vmatpush2.msra.mxu0 %v602_v45  ;;  %v573_v44 = vld [vmem:[%s4649_s1 + $0x1108] sm:$0xff]  ;;  %v913_v45 = vrot.slane %v899_v34, %v2473_v48  ;;  %v676_v34 = vld [vmem:[%s4649_s1 + $0x1440] sm:$0xff] }
 0x12b   :  { %1637 = vmatpush1.msra.mxu1 %v604_v46  ;;  %1569 = vmatprep.subr.mxu0 %v601_v47  ;;  %v639_v46 = vld [vmem:[%s4649_s1 + $0x1318] sm:$0xff]  ;;  %v572_v47 = vld [vmem:[%s4649_s1 + $0x1100] sm:$0xff] }
 0x12c   :  { %1638 = vmatprep.subr.mxu1 %v667_v49  ;;  %1570 = vmatpush2.msra.mxu0 %v600_v50  ;;  %v914_v49 = vcombine.high %v906_v37, %v906_v37  ;;  %v638_v50 = vld [vmem:[%s4649_s1 + $0x1310] sm:$0xff] }
 0x12d   :  { %1639 = vmatpush2.msra.mxu1 %v666_v51  ;;  %1571 = vmatprep.subr.mxu0 %v599_v52  ;;  %v637_v51 = vld [vmem:[%s4649_s1 + $0x1308] sm:$0xff]  ;;  %v699_v52 = vld [vmem:[%s4649_s1 + $0x14f8] sm:$0xff] }
 0x12e   :  { %1640 = vmatprep.subr.mxu1 %v665_v53  ;;  %1572 = vmatpush2.msra.mxu0 %v598_v54  ;;  %v636_v53 = vld [vmem:[%s4649_s1 + $0x1300] sm:$0xff]  ;;  %v915_v54 = vcombine.high %v913_v45, %v913_v45 }
 0x12f   :  { %1641 = vmatpush2.msra.mxu1 %v664_v55  ;;  %1573 = vmatprep.subr.mxu0 %v597_v56  ;;  %v698_v55 = vld [vmem:[%s4649_s1 + $0x14f0] sm:$0xff]  ;;  %v697_v56 = vld [vmem:[%s4649_s1 + $0x14e8] sm:$0xff] }
 0x130   :  { %1642 = vmatprep.subr.mxu1 %v663_v57  ;;  %1574 = vmatpush2.msra.mxu0 %v596_v58  ;;  %v763_v57 = vld [vmem:[%s4649_s1 + $0x16f8] sm:$0xff]  ;;  %v696_v58 = vld [vmem:[%s4649_s1 + $0x14e0] sm:$0xff] }
 0x131   :  { %1643 = vmatpush2.msra.mxu1 %v662_v59  ;;  %1575 = vmatprep.subr.mxu0 %v595_v60  ;;  %v762_v59 = vld [vmem:[%s4649_s1 + $0x16f0] sm:$0xff]  ;;  %v695_v60 = vld [vmem:[%s4649_s1 + $0x14d8] sm:$0xff] }
 0x132   :  { %1644 = vmatprep.subr.mxu1 %v661_v61  ;;  %1576 = vmatpush2.msra.mxu0 %v594_v62  ;;  %v761_v61 = vld [vmem:[%s4649_s1 + $0x16e8] sm:$0xff]  ;;  %v694_v62 = vld [vmem:[%s4649_s1 + $0x14d0] sm:$0xff] }
 0x133   :  { %1645 = vmatpush2.msra.mxu1 %v660_v63  ;;  %1577 = vmatprep.subr.mxu0 %v593_v0  ;;  %v760_v63 = vld [vmem:[%s4649_s1 + $0x16e0] sm:$0xff]  ;;  %v693_v0 = vld [vmem:[%s4649_s1 + $0x14c8] sm:$0xff] }
 0x134   :  { %1646 = vmatprep.subr.mxu1 %v659_v1  ;;  %1578 = vmatpush2.msra.mxu0 %v592_v2  ;;  %v759_v1 = vld [vmem:[%s4649_s1 + $0x16d8] sm:$0xff]  ;;  %v692_v2 = vld [vmem:[%s4649_s1 + $0x14c0] sm:$0xff] }
 0x135   :  { %1647 = vmatpush2.msra.mxu1 %v658_v3  ;;  %1579 = vmatprep.subr.mxu0 %v591_v4  ;;  %v758_v3 = vld [vmem:[%s4649_s1 + $0x16d0] sm:$0xff]  ;;  %v691_v4 = vld [vmem:[%s4649_s1 + $0x14b8] sm:$0xff] }
 0x136   :  { %1648 = vmatprep.subr.mxu1 %v657_v5  ;;  %1580 = vmatpush2.msra.mxu0 %v590_v6  ;;  %v757_v5 = vld [vmem:[%s4649_s1 + $0x16c8] sm:$0xff]  ;;  %v690_v6 = vld [vmem:[%s4649_s1 + $0x14b0] sm:$0xff] }
 0x137   :  { %1649 = vmatpush2.msra.mxu1 %v656_v7  ;;  %1581 = vmatprep.subr.mxu0 %v589_v8  ;;  %v756_v7 = vld [vmem:[%s4649_s1 + $0x16c0] sm:$0xff]  ;;  %v689_v8 = vld [vmem:[%s4649_s1 + $0x14a8] sm:$0xff] }
 0x138   :  { %1650 = vmatprep.subr.mxu1 %v655_v9  ;;  %1582 = vmatpush2.msra.mxu0 %v588_v10  ;;  %v755_v9 = vld [vmem:[%s4649_s1 + $0x16b8] sm:$0xff]  ;;  %v688_v10 = vld [vmem:[%s4649_s1 + $0x14a0] sm:$0xff] }
 0x139   :  { %1651 = vmatpush2.msra.mxu1 %v654_v11  ;;  %1583 = vmatprep.subr.mxu0 %v587_v12  ;;  %v754_v11 = vld [vmem:[%s4649_s1 + $0x16b0] sm:$0xff]  ;;  %v687_v12 = vld [vmem:[%s4649_s1 + $0x1498] sm:$0xff] }
 0x13a   :  { %1652 = vmatprep.subr.mxu1 %v653_v13  ;;  %1584 = vmatpush2.msra.mxu0 %v586_v14  ;;  %v753_v13 = vld [vmem:[%s4649_s1 + $0x16a8] sm:$0xff]  ;;  %v686_v14 = vld [vmem:[%s4649_s1 + $0x1490] sm:$0xff] }
 0x13b   :  { %1653 = vmatpush2.msra.mxu1 %v652_v15  ;;  %1585 = vmatprep.subr.mxu0 %v585_v16  ;;  %v752_v15 = vld [vmem:[%s4649_s1 + $0x16a0] sm:$0xff]  ;;  %v685_v16 = vld [vmem:[%s4649_s1 + $0x1488] sm:$0xff] }
 0x13c   :  { %1654 = vmatprep.subr.mxu1 %v651_v17  ;;  %1586 = vmatpush2.msra.mxu0 %v584_v18  ;;  %v751_v17 = vld [vmem:[%s4649_s1 + $0x1698] sm:$0xff]  ;;  %v684_v18 = vld [vmem:[%s4649_s1 + $0x1480] sm:$0xff] }
 0x13d   :  { %1655 = vmatpush2.msra.mxu1 %v650_v19  ;;  %1587 = vmatprep.subr.mxu0 %v583_v20  ;;  %v750_v19 = vld [vmem:[%s4649_s1 + $0x1690] sm:$0xff]  ;;  %v683_v20 = vld [vmem:[%s4649_s1 + $0x1478] sm:$0xff] }
 0x13e   :  { %1656 = vmatprep.subr.mxu1 %v649_v21  ;;  %1588 = vmatpush2.msra.mxu0 %v582_v22  ;;  %v749_v21 = vld [vmem:[%s4649_s1 + $0x1688] sm:$0xff]  ;;  %v682_v22 = vld [vmem:[%s4649_s1 + $0x1470] sm:$0xff] }
 0x13f   :  { %1657 = vmatpush2.msra.mxu1 %v648_v23  ;;  %1589 = vmatprep.subr.mxu0 %v581_v24  ;;  %v748_v23 = vld [vmem:[%s4649_s1 + $0x1680] sm:$0xff]  ;;  %v681_v24 = vld [vmem:[%s4649_s1 + $0x1468] sm:$0xff] }
 0x140   :  { %1658 = vmatprep.subr.mxu1 %v647_v25  ;;  %1590 = vmatpush2.msra.mxu0 %v580_v26  ;;  %v747_v25 = vld [vmem:[%s4649_s1 + $0x1678] sm:$0xff]  ;;  %v680_v26 = vld [vmem:[%s4649_s1 + $0x1460] sm:$0xff] }
 0x141   :  { %1659 = vmatpush2.msra.mxu1 %v646_v28  ;;  %1591 = vmatprep.subr.mxu0 %v579_v29  ;;  %v679_v28 = vld [vmem:[%s4649_s1 + $0x1458] sm:$0xff]  ;;  %v745_v29 = vld [vmem:[%s4649_s1 + $0x1668] sm:$0xff] }
 0x142   :  { %1660 = vmatprep.subr.mxu1 %v645_v30  ;;  %1592 = vmatpush2.msra.mxu0 %v578_v31  ;;  %v678_v30 = vld [vmem:[%s4649_s1 + $0x1450] sm:$0xff]  ;;  %v744_v31 = vld [vmem:[%s4649_s1 + $0x1660] sm:$0xff] }
 0x143   :  { %1661 = vmatpush2.msra.mxu1 %v644_v32  ;;  %1593 = vmatprep.subr.mxu0 %v577_v33  ;;  %v677_v32 = vld [vmem:[%s4649_s1 + $0x1448] sm:$0xff]  ;;  %v743_v33 = vld [vmem:[%s4649_s1 + $0x1658] sm:$0xff] }
 0x144   :  { %1662 = vmatprep.subr.mxu1 %v643_v35  ;;  %1594 = vmatpush2.msra.mxu0 %v576_v36  ;;  %v742_v35 = vld [vmem:[%s4649_s1 + $0x1650] sm:$0xff]  ;;  %v675_v36 = vld [vmem:[%s4649_s1 + $0x1438] sm:$0xff] }
 0x145   :  { %1663 = vmatpush2.msra.mxu1 %v642_v39  ;;  %1595 = vmatprep.subr.mxu0 %v575_v40  ;;  %v674_v39 = vld [vmem:[%s4649_s1 + $0x1430] sm:$0xff]  ;;  %v740_v40 = vld [vmem:[%s4649_s1 + $0x1640] sm:$0xff] }
 0x146   :  { %1664 = vmatprep.subr.mxu1 %v641_v41  ;;  %1596 = vmatpush2.msra.mxu0 %v574_v42  ;;  %v673_v41 = vld [vmem:[%s4649_s1 + $0x1428] sm:$0xff]  ;;  %v739_v42 = vld [vmem:[%s4649_s1 + $0x1638] sm:$0xff] }
 0x147   :  { %1665 = vmatpush2.msra.mxu1 %v640_v43  ;;  %1597 = vmatprep.subr.mxu0 %v573_v44  ;;  %v672_v43 = vld [vmem:[%s4649_s1 + $0x1420] sm:$0xff]  ;;  %v738_v44 = vld [vmem:[%s4649_s1 + $0x1630] sm:$0xff] }
 0x148   :  { %1666 = vmatprep.subr.mxu1 %v639_v46  ;;  %1598 = vmatpush2.msra.mxu0 %v572_v47  ;;  %v737_v46 = vld [vmem:[%s4649_s1 + $0x1628] sm:$0xff]  ;;  %v670_v47 = vld [vmem:[%s4649_s1 + $0x1410] sm:$0xff] }
 0x149   :  { %1599 = vmatprep.mubr.f32.mxu0 %v914_v49  ;;  %1667 = vmatpush2.msra.mxu1 %v638_v50  ;;  %v736_v49 = vld [vmem:[%s4649_s1 + $0x1620] sm:$0xff]  ;;  %v669_v50 = vld [vmem:[%s4649_s1 + $0x1408] sm:$0xff] }
 0x14a   :  { %1600 = vmatmul.mubr.f32.vlgmr.msra.gmra.mxu0 %v906_v37  ;;  %1668 = vmatprep.subr.mxu1 %v637_v51  ;;  %v741_v37 = vld [vmem:[%s4649_s1 + $0x1648] sm:$0xff]  ;;  %v735_v51 = vld [vmem:[%s4649_s1 + $0x1618] sm:$0xff] }
 0x14b   :  { %1677 = vmatprep.subr.mxu0 %v699_v52  ;;  %1669 = vmatpush2.msra.mxu1 %v636_v53  ;;  %v668_v52 = vld [vmem:[%s4649_s1 + $0x1400] sm:$0xff]  ;;  %v734_v53 = vld [vmem:[%s4649_s1 + $0x1610] sm:$0xff] }
 0x14c   :  { %1670 = vmatprep.mubr.f32.mxu1 %v915_v54  ;;  %1678 = vmatpush1.msra.mxu0 %v698_v55  ;;  %v731_v54 = vld [vmem:[%s4649_s1 + $0x15f8] sm:$0xff]  ;;  %v733_v55 = vld [vmem:[%s4649_s1 + $0x1608] sm:$0xff] }
 0x14d   :  { %1671 = vmatmul.mubr.f32.vlgmr.msra.gmra.mxu1 %v913_v45  ;;  %1679 = vmatprep.subr.mxu0 %v697_v56  ;;  %v671_v45 = vld [vmem:[%s4649_s1 + $0x1418] sm:$0xff]  ;;  %v730_v56 = vld [vmem:[%s4649_s1 + $0x15f0] sm:$0xff] }
 0x14e   :  { %1748 = vmatprep.subr.mxu1 %v763_v57  ;;  %1680 = vmatpush1.msra.mxu0 %v696_v58  ;;  %v732_v57 = vld [vmem:[%s4649_s1 + $0x1600] sm:$0xff]  ;;  %v729_v58 = vld [vmem:[%s4649_s1 + $0x15e8] sm:$0xff] }
 0x14f   :  { %1749 = vmatpush1.msra.mxu1 %v762_v59  ;;  %1681 = vmatprep.subr.mxu0 %v695_v60  ;;  %v795_v59 = vld [vmem:[%s4649_s1 + $0x17f8] sm:$0xff]  ;;  %v728_v60 = vld [vmem:[%s4649_s1 + $0x15e0] sm:$0xff] }
 0x150   :  { %1750 = vmatprep.subr.mxu1 %v761_v61  ;;  %1682 = vmatpush1.msra.mxu0 %v694_v62  ;;  %v794_v61 = vld [vmem:[%s4649_s1 + $0x17f0] sm:$0xff]  ;;  %v727_v62 = vld [vmem:[%s4649_s1 + $0x15d8] sm:$0xff] }
 0x151   :  { %1751 = vmatpush1.msra.mxu1 %v760_v63  ;;  %1683 = vmatprep.subr.mxu0 %v693_v0  ;;  %v793_v63 = vld [vmem:[%s4649_s1 + $0x17e8] sm:$0xff]  ;;  %v726_v0 = vld [vmem:[%s4649_s1 + $0x15d0] sm:$0xff] }
 0x152   :  { %1752 = vmatprep.subr.mxu1 %v759_v1  ;;  %1684 = vmatpush1.msra.mxu0 %v692_v2  ;;  %v792_v1 = vld [vmem:[%s4649_s1 + $0x17e0] sm:$0xff]  ;;  %v725_v2 = vld [vmem:[%s4649_s1 + $0x15c8] sm:$0xff] }
 0x153   :  { %1753 = vmatpush1.msra.mxu1 %v758_v3  ;;  %1685 = vmatprep.subr.mxu0 %v691_v4  ;;  %v791_v3 = vld [vmem:[%s4649_s1 + $0x17d8] sm:$0xff]  ;;  %v724_v4 = vld [vmem:[%s4649_s1 + $0x15c0] sm:$0xff] }
 0x154   :  { %1754 = vmatprep.subr.mxu1 %v757_v5  ;;  %1686 = vmatpush1.msra.mxu0 %v690_v6  ;;  %v790_v5 = vld [vmem:[%s4649_s1 + $0x17d0] sm:$0xff]  ;;  %v723_v6 = vld [vmem:[%s4649_s1 + $0x15b8] sm:$0xff] }
 0x155   :  { %1755 = vmatpush1.msra.mxu1 %v756_v7  ;;  %1687 = vmatprep.subr.mxu0 %v689_v8  ;;  %v789_v7 = vld [vmem:[%s4649_s1 + $0x17c8] sm:$0xff]  ;;  %v722_v8 = vld [vmem:[%s4649_s1 + $0x15b0] sm:$0xff] }
 0x156   :  { %1756 = vmatprep.subr.mxu1 %v755_v9  ;;  %1688 = vmatpush1.msra.mxu0 %v688_v10  ;;  %v788_v9 = vld [vmem:[%s4649_s1 + $0x17c0] sm:$0xff]  ;;  %v721_v10 = vld [vmem:[%s4649_s1 + $0x15a8] sm:$0xff] }
 0x157   :  { %1757 = vmatpush1.msra.mxu1 %v754_v11  ;;  %1689 = vmatprep.subr.mxu0 %v687_v12  ;;  %v787_v11 = vld [vmem:[%s4649_s1 + $0x17b8] sm:$0xff]  ;;  %v720_v12 = vld [vmem:[%s4649_s1 + $0x15a0] sm:$0xff] }
 0x158   :  { %1758 = vmatprep.subr.mxu1 %v753_v13  ;;  %1690 = vmatpush1.msra.mxu0 %v686_v14  ;;  %v786_v13 = vld [vmem:[%s4649_s1 + $0x17b0] sm:$0xff]  ;;  %v719_v14 = vld [vmem:[%s4649_s1 + $0x1598] sm:$0xff] }
 0x159   :  { %1759 = vmatpush1.msra.mxu1 %v752_v15  ;;  %1691 = vmatprep.subr.mxu0 %v685_v16  ;;  %v785_v15 = vld [vmem:[%s4649_s1 + $0x17a8] sm:$0xff]  ;;  %v718_v16 = vld [vmem:[%s4649_s1 + $0x1590] sm:$0xff] }
 0x15a   :  { %1760 = vmatprep.subr.mxu1 %v751_v17  ;;  %1692 = vmatpush1.msra.mxu0 %v684_v18  ;;  %v784_v17 = vld [vmem:[%s4649_s1 + $0x17a0] sm:$0xff]  ;;  %v717_v18 = vld [vmem:[%s4649_s1 + $0x1588] sm:$0xff] }
 0x15b   :  { %1761 = vmatpush1.msra.mxu1 %v750_v19  ;;  %1693 = vmatprep.subr.mxu0 %v683_v20  ;;  %v783_v19 = vld [vmem:[%s4649_s1 + $0x1798] sm:$0xff]  ;;  %v716_v20 = vld [vmem:[%s4649_s1 + $0x1580] sm:$0xff] }
 0x15c   :  { %1762 = vmatprep.subr.mxu1 %v749_v21  ;;  %1694 = vmatpush1.msra.mxu0 %v682_v22  ;;  %v782_v21 = vld [vmem:[%s4649_s1 + $0x1790] sm:$0xff]  ;;  %v715_v22 = vld [vmem:[%s4649_s1 + $0x1578] sm:$0xff] }
 0x15d   :  { %1763 = vmatpush1.msra.mxu1 %v748_v23  ;;  %1695 = vmatprep.subr.mxu0 %v681_v24  ;;  %v781_v23 = vld [vmem:[%s4649_s1 + $0x1788] sm:$0xff]  ;;  %v714_v24 = vld [vmem:[%s4649_s1 + $0x1570] sm:$0xff] }
 0x15e   :  { %1764 = vmatprep.subr.mxu1 %v747_v25  ;;  %1696 = vmatpush1.msra.mxu0 %v680_v26  ;;  %v780_v25 = vld [vmem:[%s4649_s1 + $0x1780] sm:$0xff]  ;;  %v713_v26 = vld [vmem:[%s4649_s1 + $0x1568] sm:$0xff] }
 0x15f   :  { %1765 = vmatpush1.msra.mxu1 %v746_v27  ;;  %1697 = vmatprep.subr.mxu0 %v679_v28  ;;  %v779_v27 = vld [vmem:[%s4649_s1 + $0x1778] sm:$0xff]  ;;  %v712_v28 = vld [vmem:[%s4649_s1 + $0x1560] sm:$0xff] }
 0x160   :  { %1766 = vmatprep.subr.mxu1 %v745_v29  ;;  %1698 = vmatpush1.msra.mxu0 %v678_v30  ;;  %v778_v29 = vld [vmem:[%s4649_s1 + $0x1770] sm:$0xff]  ;;  %v711_v30 = vld [vmem:[%s4649_s1 + $0x1558] sm:$0xff] }
 0x161   :  { %1767 = vmatpush1.msra.mxu1 %v744_v31  ;;  %1699 = vmatprep.subr.mxu0 %v677_v32  ;;  %v777_v31 = vld [vmem:[%s4649_s1 + $0x1768] sm:$0xff]  ;;  %v710_v32 = vld [vmem:[%s4649_s1 + $0x1550] sm:$0xff] }
 0x162   :  { %1768 = vmatprep.subr.mxu1 %v743_v33  ;;  %1700 = vmatpush1.msra.mxu0 %v676_v34  ;;  %v776_v33 = vld [vmem:[%s4649_s1 + $0x1760] sm:$0xff]  ;;  %v709_v34 = vld [vmem:[%s4649_s1 + $0x1548] sm:$0xff] }
 0x163   :  { %1769 = vmatpush1.msra.mxu1 %v742_v35  ;;  %1701 = vmatprep.subr.mxu0 %v675_v36  ;;  %v775_v35 = vld [vmem:[%s4649_s1 + $0x1758] sm:$0xff]  ;;  %v708_v36 = vld [vmem:[%s4649_s1 + $0x1540] sm:$0xff] }
 0x164   :  { %1770 = vmatprep.subr.mxu1 %v741_v37  ;;  %1702 = vmatpush1.msra.mxu0 %v674_v39  ;;  %v26_v37 = vld [vmem:[%s4648_s0 + $0x28] sm:$0xff]  ;;  %v774_v39 = vld [vmem:[%s4649_s1 + $0x1750] sm:$0xff] }
 0x165   :  { %1771 = vmatpush1.msra.mxu1 %v740_v40  ;;  %1703 = vmatprep.subr.mxu0 %v673_v41  ;;  %v707_v40 = vld [vmem:[%s4649_s1 + $0x1538] sm:$0xff]  ;;  %v773_v41 = vld [vmem:[%s4649_s1 + $0x1748] sm:$0xff] }
 0x166   :  { %1772 = vmatprep.subr.mxu1 %v739_v42  ;;  %1704 = vmatpush1.msra.mxu0 %v672_v43  ;;  %v706_v42 = vld [vmem:[%s4649_s1 + $0x1530] sm:$0xff]  ;;  %v772_v43 = vld [vmem:[%s4649_s1 + $0x1740] sm:$0xff] }
 0x167   :  { %1773 = vmatpush1.msra.mxu1 %v738_v44  ;;  %1705 = vmatprep.subr.mxu0 %v671_v45  ;;  %v705_v44 = vld [vmem:[%s4649_s1 + $0x1528] sm:$0xff]  ;;  %v916_v45 = vcombine.high %v26_v37, %v26_v37 }
 0x168   :  { %1774 = vmatprep.subr.mxu1 %v737_v46  ;;  %1706 = vmatpush1.msra.mxu0 %v670_v47  ;;  %v771_v46 = vld [vmem:[%s4649_s1 + $0x1738] sm:$0xff]  ;;  %v704_v47 = vld [vmem:[%s4649_s1 + $0x1520] sm:$0xff] }
 0x169   :  { %1775 = vmatpush1.msra.mxu1 %v736_v49  ;;  %1707 = vmatprep.subr.mxu0 %v669_v50  ;;  %v923_v49 = vrot.slane %v26_v37, %v2473_v48  ;;  %v770_v50 = vld [vmem:[%s4649_s1 + $0x1730] sm:$0xff]  ;;  %v1917_v37 = vld [vmem:[%s4651_s3 + $0xa8] sm:$0xff] }
 0x16a   :  { %1776 = vmatprep.subr.mxu1 %v735_v51  ;;  %1708 = vmatpush1.msra.mxu0 %v668_v52  ;;  %v703_v51 = vld [vmem:[%s4649_s1 + $0x1518] sm:$0xff]  ;;  %v769_v52 = vld [vmem:[%s4649_s1 + $0x1728] sm:$0xff] }
 0x16b   :  { %1777 = vmatpush1.msra.mxu1 %v734_v53  ;;  %1709 = vmatprep.subr.mxu0 %v731_v54  ;;  %v702_v53 = vld [vmem:[%s4649_s1 + $0x1510] sm:$0xff]  ;;  %v768_v54 = vld [vmem:[%s4649_s1 + $0x1720] sm:$0xff] }
 0x16c   :  { %1778 = vmatprep.subr.mxu1 %v733_v55  ;;  %1710 = vmatpush2.msra.mxu0 %v730_v56  ;;  %v701_v55 = vld [vmem:[%s4649_s1 + $0x1508] sm:$0xff]  ;;  %v930_v56 = vrot.slane %v916_v45, %v2473_v48  ;;  %v1898_v45 = vld [vmem:[%s4651_s3 + $0x10] sm:$0xff] }
 0x16d   :  { %1779 = vmatpush1.msra.mxu1 %v732_v57  ;;  %1711 = vmatprep.subr.mxu0 %v729_v58  ;;  %v767_v57 = vld [vmem:[%s4649_s1 + $0x1718] sm:$0xff]  ;;  %v700_v58 = vld [vmem:[%s4649_s1 + $0x1500] sm:$0xff]  ;;  %v765_v48 = vld [vmem:[%s4649_s1 + $0x1708] sm:$0xff] }
 0x16e   :  { %1780 = vmatprep.subr.mxu1 %v795_v59  ;;  %1712 = vmatpush2.msra.mxu0 %v728_v60  ;;  %v931_v59 = vcombine.high %v923_v49, %v923_v49  ;;  %v766_v60 = vld [vmem:[%s4649_s1 + $0x1710] sm:$0xff] }
 0x16f   :  { %1781 = vmatpush2.msra.mxu1 %v794_v61  ;;  %1713 = vmatprep.subr.mxu0 %v727_v62  ;;  %v811_v61 = vld [vmem:[%s4649_s1 + $0x1878] sm:$0xff]  ;;  %v764_v62 = vld [vmem:[%s4649_s1 + $0x1700] sm:$0xff] }
 0x170   :  { %1782 = vmatprep.subr.mxu1 %v793_v63  ;;  %1714 = vmatpush2.msra.mxu0 %v726_v0  ;;  %v932_v63 = vcombine.high %v930_v56, %v930_v56  ;;  %v810_v0 = vld [vmem:[%s4649_s1 + $0x1870] sm:$0xff] }
 0x171   :  { %1783 = vmatpush2.msra.mxu1 %v792_v1  ;;  %1715 = vmatprep.subr.mxu0 %v725_v2  ;;  %v809_v1 = vld [vmem:[%s4649_s1 + $0x1868] sm:$0xff]  ;;  %v808_v2 = vld [vmem:[%s4649_s1 + $0x1860] sm:$0xff] }
 0x172   :  { %1784 = vmatprep.subr.mxu1 %v791_v3  ;;  %1716 = vmatpush2.msra.mxu0 %v724_v4  ;;  %v807_v3 = vld [vmem:[%s4649_s1 + $0x1858] sm:$0xff]  ;;  %v806_v4 = vld [vmem:[%s4649_s1 + $0x1850] sm:$0xff] }
 0x173   :  { %1785 = vmatpush2.msra.mxu1 %v790_v5  ;;  %1717 = vmatprep.subr.mxu0 %v723_v6  ;;  %v805_v5 = vld [vmem:[%s4649_s1 + $0x1848] sm:$0xff]  ;;  %v2116_v6 = vmov 0.0  }
 0x174   :  { %1786 = vmatprep.subr.mxu1 %v789_v7  ;;  %1718 = vmatpush2.msra.mxu0 %v722_v8  ;;  %v1927_v7 = vld [vmem:[%s4651_s3 + $0xf8] sm:$0xff] }
 0x175   :  { %1787 = vmatpush2.msra.mxu1 %v788_v9  ;;  %1719 = vmatprep.subr.mxu0 %v721_v10  ;;  %v1911_v8 = vld [vmem:[%s4651_s3 + $0x78] sm:$0xff]  ;;  %v1926_v9 = vld [vmem:[%s4651_s3 + $0xf0] sm:$0xff]  ;;  %v804_v10 = vld [vmem:[%s4649_s1 + $0x1840] sm:$0xff] }
 0x176   :  { %1788 = vmatprep.subr.mxu1 %v787_v11  ;;  %1720 = vmatpush2.msra.mxu0 %v720_v12  ;;  %v1910_v11 = vld [vmem:[%s4651_s3 + $0x70] sm:$0xff]  ;;  %v803_v12 = vld [vmem:[%s4649_s1 + $0x1838] sm:$0xff] }
 0x177   :  { %1789 = vmatpush2.msra.mxu1 %v786_v13  ;;  %1721 = vmatprep.subr.mxu0 %v719_v14  ;;  %v1925_v13 = vld [vmem:[%s4651_s3 + $0xe8] sm:$0xff]  ;;  %v802_v14 = vld [vmem:[%s4649_s1 + $0x1830] sm:$0xff] }
 0x178   :  { %1790 = vmatprep.subr.mxu1 %v785_v15  ;;  %1722 = vmatpush2.msra.mxu0 %v718_v16  ;;  %v1909_v15 = vld [vmem:[%s4651_s3 + $0x68] sm:$0xff] }
 0x179   :  { %1791 = vmatpush2.msra.mxu1 %v784_v17  ;;  %1723 = vmatprep.subr.mxu0 %v717_v18  ;;  %v801_v16 = vld [vmem:[%s4649_s1 + $0x1828] sm:$0xff]  ;;  %v1924_v17 = vld [vmem:[%s4651_s3 + $0xe0] sm:$0xff] }
 0x17a   :  { %1792 = vmatprep.subr.mxu1 %v783_v19  ;;  %1724 = vmatpush2.msra.mxu0 %v716_v20  ;;  %v800_v18 = vld [vmem:[%s4649_s1 + $0x1820] sm:$0xff]  ;;  %v799_v19 = vld [vmem:[%s4649_s1 + $0x1818] sm:$0xff]  ;;  %v798_v20 = vld [vmem:[%s4649_s1 + $0x1810] sm:$0xff] }
 0x17b   :  { %1793 = vmatpush2.msra.mxu1 %v782_v21  ;;  %1725 = vmatprep.subr.mxu0 %v715_v22  ;;  %v797_v21 = vld [vmem:[%s4649_s1 + $0x1808] sm:$0xff]  ;;  %v796_v22 = vld [vmem:[%s4649_s1 + $0x1800] sm:$0xff] }
 0x17c   :  { %1794 = vmatprep.subr.mxu1 %v781_v23  ;;  %1726 = vmatpush2.msra.mxu0 %v714_v24  ;;  %v2042_v23 = vld.sshfl [vmem:[%s4648_s0 + $0x30] sm:$0x3 pattern:$0x76325410]  ;;  %v1908_v24 = vld [vmem:[%s4651_s3 + $0x60] sm:$0xff] }
 0x17d   :  { %1795 = vmatpush2.msra.mxu1 %v780_v25  ;;  %1727 = vmatprep.subr.mxu0 %v713_v26  ;;  %v1923_v25 = vld [vmem:[%s4651_s3 + $0xd8] sm:$0xff] }
 0x17e   :  { %1796 = vmatprep.subr.mxu1 %v779_v27  ;;  %1728 = vmatpush2.msra.mxu0 %v712_v28  ;;  %v1907_v26 = vld [vmem:[%s4651_s3 + $0x58] sm:$0xff]  ;;  %v1922_v27 = vld [vmem:[%s4651_s3 + $0xd0] sm:$0xff] }
 0x17f   :  { %1797 = vmatpush2.msra.mxu1 %v778_v29  ;;  %1729 = vmatprep.subr.mxu0 %v711_v30  ;;  %v1906_v28 = vld [vmem:[%s4651_s3 + $0x50] sm:$0xff]  ;;  %v1921_v29 = vld [vmem:[%s4651_s3 + $0xc8] sm:$0xff] }
 0x180   :  { %1798 = vmatprep.subr.mxu1 %v777_v31  ;;  %1730 = vmatpush2.msra.mxu0 %v710_v32  ;;  %v1905_v30 = vld [vmem:[%s4651_s3 + $0x48] sm:$0xff]  ;;  %v1920_v31 = vld [vmem:[%s4651_s3 + $0xc0] sm:$0xff] }
 0x181   :  { %1799 = vmatpush2.msra.mxu1 %v776_v33  ;;  %1731 = vmatprep.subr.mxu0 %v709_v34  ;;  %v1904_v32 = vld [vmem:[%s4651_s3 + $0x40] sm:$0xff]  ;;  %v1919_v33 = vld [vmem:[%s4651_s3 + $0xb8] sm:$0xff] }
 0x182   :  { %1800 = vmatprep.subr.mxu1 %v775_v35  ;;  %1732 = vmatpush2.msra.mxu0 %v708_v36  ;;  %v1903_v34 = vld [vmem:[%s4651_s3 + $0x38] sm:$0xff]  ;;  %v1918_v35 = vld [vmem:[%s4651_s3 + $0xb0] sm:$0xff] }
 0x183   :  { %1801 = vmatpush2.msra.mxu1 %v774_v39  ;;  %1733 = vmatprep.subr.mxu0 %v707_v40  ;;  %v1902_v36 = vld [vmem:[%s4651_s3 + $0x30] sm:$0xff]  ;;  %v1901_v39 = vld [vmem:[%s4651_s3 + $0x28] sm:$0xff]  ;;  %v1916_v40 = vld [vmem:[%s4651_s3 + $0xa0] sm:$0xff] }
 0x184   :  { %1802 = vmatprep.subr.mxu1 %v773_v41  ;;  %1734 = vmatpush2.msra.mxu0 %v706_v42  ;;  %v1900_v41 = vld [vmem:[%s4651_s3 + $0x20] sm:$0xff]  ;;  %v1915_v42 = vld [vmem:[%s4651_s3 + $0x98] sm:$0xff] }
 0x185   :  { %1803 = vmatpush2.msra.mxu1 %v772_v43  ;;  %1735 = vmatprep.subr.mxu0 %v705_v44  ;;  %v1899_v43 = vld [vmem:[%s4651_s3 + $0x18] sm:$0xff]  ;;  %v1914_v44 = vld [vmem:[%s4651_s3 + $0x90] sm:$0xff] }
 0x186   :  { %1804 = vmatprep.subr.mxu1 %v771_v46  ;;  %1736 = vmatpush2.msra.mxu0 %v704_v47  ;;  %v1913_v46 = vld [vmem:[%s4651_s3 + $0x88] sm:$0xff] }
 0x187   :  { %1805 = vmatpush2.msra.mxu1 %v770_v50  ;;  %1737 = vmatprep.subr.mxu0 %v703_v51  ;;  %v1897_v47 = vld [vmem:[%s4651_s3 + $0x8] sm:$0xff]  ;;  %v1896_v50 = vld [vmem:[%s4651_s3] sm:$0xff]  ;;  %v816_v51 = vsub.s32 0, %v2446_v38 }
 0x188   :  { %1806 = vmatprep.subr.mxu1 %v769_v52  ;;  %1738 = vmatpush2.msra.mxu0 %v702_v53  ;;  %v812_v52 = vld [vmem:[%s4650_s2] sm:$0x3]  ;;  %v820_v53 = vsub.s32 1, %v2446_v38 }
 0x189   :  { %1807 = vmatpush2.msra.mxu1 %v768_v54  ;;  %1739 = vmatprep.subr.mxu0 %v701_v55  ;;  %v1033_v54 = vpop.f32.mrf.mxu0  ;;  %v817_v55 = vrot.slane %v812_v52, %v816_v51 }
 0x18a   :  { %1808 = vmatprep.subr.mxu1 %v767_v57  ;;  %1740 = vmatpush2.msra.mxu0 %v700_v58  ;;  %v1104_v58 = vpop.f32.mrf.mxu1 }
 0x18b   :  { %1741 = vmatprep.mubr.f32.mxu0 %v931_v59  ;;  %1809 = vmatpush2.msra.mxu1 %v766_v60  ;;  %v1035_v57 = vpop.f32.mrf.mxu0  ;;  %v1034_v59 = vadd.f32 %v1033_v54, %v817_v55 }
 0x18c   :  { %1742 = vmatmul.mubr.f32.vlgmr.msra.gmra.mxu0 %v923_v49  ;;  %1810 = vmatprep.subr.mxu1 %v765_v48  ;;  %v1912_v49 = vld [vmem:[%s4651_s3 + $0x80] sm:$0xff] }
 0x18d   :  { %1835 = vmatprep.subr.mxu0 %v811_v61  ;;  %1811 = vmatpush2.msra.mxu1 %v764_v62  ;;  %v1175_v60 = vpop.f32.mrf.mxu0  ;;  %v1106_v61 = vpop.f32.mrf.mxu1  ;;  %v1105_v62 = vadd.f32 %v1104_v58, %v1034_v59 }
 0x18e   :  { %1812 = vmatprep.mubr.f32.mxu1 %v932_v63  ;;  %1836 = vmatpush1.msra.mxu0 %v810_v0 }
 0x18f   :  { %1813 = vmatmul.mubr.f32.vlgmr.msra.gmra.mxu1 %v930_v56  ;;  %1837 = vmatprep.subr.mxu0 %v809_v1  ;;  %v821_v56 = vrot.slane %v812_v52, %v820_v53  ;;  %v1177_v63 = vpop.f32.mrf.mxu0  ;;  %v1246_v0 = vpop.f32.mrf.mxu1 }
 0x190   :  { %1838 = vmatpush1.msra.mxu0 %v808_v2  ;;  %1883 = vmatprep.mubr.f32.mxu0 %v2116_v6  ;;  %v1176_v2 = vadd.f32 %v1175_v60, %v1105_v62 }
 0x191   :  { %1839 = vmatprep.subr.mxu0 %v807_v3  ;;  %2045 = vmatprep.subr.mxu1 %v1927_v7  ;;  %v1036_v48 = vadd.f32 %v1035_v57, %v821_v56  ;;  %v1317_v3 = vpop.f32.mrf.mxu0 }
 0x192   :  { %1840 = vmatpush1.msra.mxu0 %v806_v4  ;;  %2046 = vmatpush3.msra.mxu1 %v1911_v8  ;;  %v1247_v6 = vadd.f32 %v1246_v0, %v1176_v2 }
 0x193   :  { %1841 = vmatprep.subr.mxu0 %v805_v5  ;;  %2047 = vmatprep.subr.mxu1 %v1926_v9  ;;  %v1107_v1 = vadd.f32 %v1106_v61, %v1036_v48  ;;  %v1248_v5 = vpop.f32.mrf.mxu1  ;;  %v1319_v7 = vpop.f32.mrf.mxu0 }
 0x194   :  { %1842 = vmatpush1.msra.mxu0 %v804_v10  ;;  %2048 = vmatpush3.msra.mxu1 %v1910_v11  ;;  %v1318_v9 = vadd.f32 %v1317_v3, %v1247_v6 }
 0x195   :  { %1843 = vmatprep.subr.mxu0 %v803_v12  ;;  %2049 = vmatprep.subr.mxu1 %v1925_v13  ;;  %v1178_v4 = vadd.f32 %v1177_v63, %v1107_v1  ;;  %v1388_v38 = vpop.f32.mrf.mxu1 }
 0x196   :  { %1844 = vmatpush1.msra.mxu0 %v802_v14  ;;  %2050 = vmatpush3.msra.mxu1 %v1909_v15  ;;  %v1389_v13 = vadd.f32 %v1388_v38, %v1318_v9 }
 0x197   :  { %1845 = vmatprep.subr.mxu0 %v801_v16  ;;  %2051 = vmatprep.subr.mxu1 %v1924_v17  ;;  %v1249_v8 = vadd.f32 %v1248_v5, %v1178_v4  ;;  %v1390_v12 = vpop.f32.mrf.mxu1 }
 0x198   :  { %1846 = vmatpush1.msra.mxu0 %v800_v18  ;;  %2052 = vmatpush3.msra.mxu1 %v1908_v24 }
 0x199   :  { %1847 = vmatprep.subr.mxu0 %v799_v19  ;;  %2053 = vmatprep.subr.mxu1 %v1923_v25  ;;  %v1320_v11 = vadd.f32 %v1319_v7, %v1249_v8 }
 0x19a   :  { %1848 = vmatpush1.msra.mxu0 %v798_v20  ;;  %2054 = vmatpush3.msra.mxu1 %v1907_v26 }
 0x19b   :  { %1849 = vmatprep.subr.mxu0 %v797_v21  ;;  %2055 = vmatprep.subr.mxu1 %v1922_v27  ;;  %v1391_v16 = vadd.f32 %v1390_v12, %v1320_v11 }
 0x19c   :  { %1850 = vmatpush1.msra.mxu0 %v796_v22  ;;  %2056 = vmatpush3.msra.mxu1 %v1906_v28 }
 0x19d   :  { %2043 = vmatmul.mubr.msk.f32.vlgmr.msra.gmra.mxu0 %vm964_vm0, %v2042_v23  ;;  %2057 = vmatprep.subr.mxu1 %v1921_v29 }
 0x19e   :  { %2058 = vmatpush3.msra.mxu1 %v1905_v30 }
 0x19f   :  { %2059 = vmatprep.subr.mxu1 %v1920_v31 }
 0x1a0   :  { %2060 = vmatpush3.msra.mxu1 %v1904_v32 }
 0x1a1   :  { %2061 = vmatprep.subr.mxu1 %v1919_v33 }
 0x1a2   :  { %2062 = vmatpush3.msra.mxu1 %v1903_v34 }
 0x1a3   :  { %2063 = vmatprep.subr.mxu1 %v1918_v35 }
 0x1a4   :  { %2064 = vmatpush3.msra.mxu1 %v1902_v36 }
 0x1a5   :  { %2065 = vmatprep.subr.mxu1 %v1917_v37 }
 0x1a6   :  { %2066 = vmatpush3.msra.mxu1 %v1901_v39 }
 0x1a7   :  { %2067 = vmatprep.subr.mxu1 %v1916_v40 }
 0x1a8   :  { %2068 = vmatpush3.msra.mxu1 %v1900_v41 }
 0x1a9   :  { %2069 = vmatprep.subr.mxu1 %v1915_v42 }
 0x1aa   :  { %2070 = vmatpush3.msra.mxu1 %v1899_v43 }
 0x1ab   :  { %2071 = vmatprep.subr.mxu1 %v1914_v44 }
 0x1ac   :  { %2072 = vmatpush3.msra.mxu1 %v1898_v45 }
 0x1ad   :  { %2073 = vmatprep.subr.mxu1 %v1913_v46 }
 0x1ae   :  { %2074 = vmatpush3.msra.mxu1 %v1897_v47  ;;  %v2117_v47 = vmov 6  }
 0x1af   :  { %2075 = vmatprep.subr.mxu1 %v1912_v49  ;;  %2086 = vset.pattern.permute.xlu0 %v2117_v47 }
 0x1b0   :  { %2076 = vmatpush3.msra.mxu1 %v1896_v50  ;;  %v2044_v50 = vld [vmem:[%s4652_s4] ss:$0 sm:$0xff]  ;;  %s2118_s4 = smov [#allocation2]  }
 0x1b1   :  { %s2034_s14 = sshll.u32 %s2118_s4, 4  ;;  %s2035_s14 = int_to_ptr.vmem [resolvable:$true] %s2034_s14 }
 0x1b2   :  { %s2093_s15 = scalar_lea.vmem %s2035_s14, 32  ;;  %p2098_p1 = scmp.lt.s32.totalorder %s2035_s14, %s2035_s14 }
 0x1b3   :  { %p2094_p0 = scmp.ne.s32.totalorder %s2035_s14, %s2093_s15  ;;  %p2099_p2 = scmp.lt.s32.totalorder %s2093_s15, %s2093_s15 }
 0x1b5   :  { %p2100_p3 = por %p2099_p2, %p2098_p1 }
 0x1b7   :  { %p2101_p4 = pnand %p2100_p3, %p2094_p0 }
 0x1c8   :  { %v1459_v10 = vpop.f32.mrf.mxu0 }
 0x1c9   :  { %v1460_v17 = vadd.f32 %v1459_v10, %v1389_v13 }
 0x1ca   :  { %v1461_v14 = vpop.f32.mrf.mxu0 }
 0x1cb   :  { %v1530_v15 = vpop.f32.mrf.mxu1  ;;  %v1462_v19 = vadd.f32 %v1461_v14, %v1391_v16 }
 0x1cc   :  { %v1531_v21 = vadd.f32 %v1530_v15, %v1460_v17 }
 0x1cd   :  { %v1532_v20 = vpop.f32.mrf.mxu1 }
 0x1ce   :  { %v1533_v24 = vadd.f32 %v1532_v20, %v1462_v19 }
 0x20a   :  { %v1601_v18 = vpop.f32.mrf.mxu0 }
 0x20b   :  { %v1602_v25 = vadd.f32 %v1601_v18, %v1531_v21 }
 0x20c   :  { %v1603_v22 = vpop.f32.mrf.mxu0 }
 0x20d   :  { %v1672_v23 = vpop.f32.mrf.mxu1  ;;  %v1604_v27 = vadd.f32 %v1603_v22, %v1533_v24 }
 0x20e   :  { %v1673_v29 = vadd.f32 %v1672_v23, %v1602_v25 }
 0x20f   :  { %v1674_v28 = vpop.f32.mrf.mxu1 }
 0x210   :  { %v1675_v32 = vadd.f32 %v1674_v28, %v1604_v27 }
 0x24c   :  { %v1743_v26 = vpop.f32.mrf.mxu0 }
 0x24d   :  { %v1744_v33 = vadd.f32 %v1743_v26, %v1673_v29 }
 0x24e   :  { %v1745_v30 = vpop.f32.mrf.mxu0 }
 0x24f   :  { %v1814_v31 = vpop.f32.mrf.mxu1  ;;  %v1746_v34 = vadd.f32 %v1745_v30, %v1675_v32 }
 0x250   :  { %v1815_v36 = vadd.f32 %v1814_v31, %v1744_v33 }
 0x251   :  { %v1816_v35 = vpop.f32.mrf.mxu1 }
 0x252   :  { %v1817_v39 = vadd.f32 %v1816_v35, %v1746_v34 }
 0x25d   :  { %v1885_v37 = vpop.f32.mrf.mxu0 }
 0x25e   :  { %v1886_v40 = vadd.f32 %v1885_v37, %v1815_v36 }
 0x25f   :  { %v1887_v41 = vpop.f32.mrf.mxu0 }
 0x260   :  { %v1888_v42 = vadd.f32 %v1887_v41, %v1817_v39  ;;  %v1892_v43 = vmul.f32 0.01, %v1886_v40  ;;  %vm1890_vm1 = vcmp.gt.f32.partialorder %v1886_v40, 0.0 }
 0x262   :  { %v1893_v44 = vmul.f32 0.01, %v1888_v42  ;;  %vm1891_vm2 = vcmp.gt.f32.partialorder %v1888_v42, 0.0  ;;  %v1894_v46 = vsel %vm1890_vm1, %v1886_v40, %v1892_v43 }
 0x264   :  { %v1895_v45 = vsel %vm1891_vm2, %v1888_v42, %v1893_v44 }
 0x265   :  { %1999 = vmatprep.mubr.f32.mxu1 %v1895_v45 }
 0x266   :  { %2000 = vmatmul.mubr.f32.vlgmr.msra.gmra.mxu1 %v1894_v46 }
 0x326   :  { %v2077_v49 = vpop.f32.mrf.mxu1 }
 0x328   :  { %v2078_v51 = vpop.f32.mrf.mxu1 }
 0x329   :  { %v2079_v52 = vadd.f32 %v2078_v51, %v2077_v49 }
 0x32b   :  { %v2002_v53 = vadd.f32 %v2079_v52, %v2044_v50 }
 0x32d   :  { %v2006_v54 = vsel %vm2005_vm3, %v2002_v53, 0.0 }
 0x32e   :  { %2007 = vadd.xlane.f32.xlu0 %v2006_v54 }
 0x344   :  { %2023 = vperm.xlu0 %2086, %v2002_v53  }
 0x3b7   :  { %v2008_v55 = vpop.xlane.xlu0 %2007 }
 0x3b8   :  { %v2009_v56 = vrot.slane %v2008_v55, 4 }
 0x3ba   :  { %v2010_v57 = vadd.f32 %v2009_v56, %v2008_v55 }
 0x3bc   :  { %v2011_v58 = vrot.slane %v2010_v57, 2 }
 0x3be   :  { %v2012_v59 = vadd.f32 %v2011_v58, %v2010_v57 }
 0x3bf   :  { %v2024_v63 = vpop.permute.xlu0 %2023 }
 0x3c0   :  { %v2013_v60 = vrot.slane %v2012_v59, 1 }
 0x3c2   :  { %v2014_v48 = vadd.f32 %v2013_v60, %v2012_v59 }
 0x3c4   :  { %2080 = vpush %v2014_v48 }
 0x3f5   :  { %s2081_s12 = spop %2080 }
 0x3f6   :  { %s2018_s13 = smul.f32 0.083333336, %s2081_s12 }
 0x3f8   :  { %v2019_v61 = vstv %s2018_s13 }
 0x3f9   :  { %v2020_v62 = vsub.f32 %v2002_v53, %v2019_v61 }
 0x3fb   :  { %v2026_v0 = vadd.f32 %v2024_v63, %v2020_v62 }
 0x3fd   :  { %2027 = vst.msk [vmem:[#allocation2] sm:$0x3] %vm2005_vm3, %v2026_v0 }
 0x3fe   :  { %2104 = shalt.err (!%p2101_p4)
}
 0x3ff   :  { %2037 = dma.vmem_to_hbm [thread:$0]  %s2035_s14, 32, %s4653_s5, [#allocation3]  }
 0x400   :  { %2113 = dma.done.wait [#allocation3], 32  }
 0x401   :  { %2114 = vsyncadd [#allocation3], 4294967264 }
 0x402   :  { %2041 = vsyncpa [#allocation3], 1 }

</bundles_post_ra>
